<compile_context>
chip_gen: v6e
topology: v6e:2x2x1
jax: 0.10.0
libtpu: 0.0.40
codegen_flags: <defaults>
</compile_context>

<pallas_src>
import functools

import jax
import jax.numpy as jnp
from jax import lax
from jax.experimental import pallas as pl
from jax.experimental.pallas import tpu as pltpu

EPS = 1e-5                       # BatchNorm2d default eps
_VMEM_LIMIT = 48 * 1024 * 1024   # generous scoped-VMEM limit, still < v7x's 64 MiB


# ------------------------------ tile helpers -------------------------------

def _pick_m_tile(M, cap=512):
    """Largest row tile <= cap dividing M (avoids pad/slice copies); else pad."""
    for c in (512, 256, 128, 64, 32, 16, 8):
        if c <= cap and M % c == 0:
            return c, M
    Mp = ((M + 127) // 128) * 128
    return 128, Mp


def _pick_k_tile(K):
    if K % 256 == 0 and K > 256:
        return 256
    if K % 128 == 0 and K > 128:
        return 128
    return K          # full-K block (allowed: equals full array dim)


def _pick_n_tile(N):
    if N % 256 == 0 and N > 256:
        return 256
    if N % 128 == 0 and N > 128:
        return 128
    return N          # full-N block


# ----------------------------- Pallas kernels ------------------------------

def _mm_bias_kernel(a_ref, b_ref, bias_ref, o_ref, acc_ref, *, activation):
    """One (tm,tn) output tile; K accumulated over grid axis 2 into VMEM scratch."""
    k = pl.program_id(2)

    @pl.when(k == 0)
    def _():
        acc_ref[...] = jnp.zeros_like(acc_ref)

    acc_ref[...] += jnp.dot(a_ref[...], b_ref[...],
                            preferred_element_type=jnp.float32)

    @pl.when(k == pl.num_programs(2) - 1)
    def _():
        y = acc_ref[...] + bias_ref[...]
        if activation == "relu":
            y = jnp.maximum(y, 0.0)
        elif activation == "tanh":
            y = jnp.tanh(y)
        o_ref[...] = y.astype(o_ref.dtype)


def _mm_bias_stats_kernel(a_ref, b_ref, bias_ref, o_ref, s_ref, acc_ref):
    """Matmul + bias with a fused per-channel [sum; sumsq] reduction epilogue.

    Grid order is (N-tiles, M-tiles, K-tiles); the stats output block (2, tn)
    only depends on the N-tile index, so it stays resident across M and K and
    is accumulated once per output tile on the last K step.
    """
    i = pl.program_id(1)
    k = pl.program_id(2)

    @pl.when(k == 0)
    def _():
        acc_ref[...] = jnp.zeros_like(acc_ref)

    @pl.when(jnp.logical_and(i == 0, k == 0))
    def _():
        s_ref[...] = jnp.zeros_like(s_ref)

    acc_ref[...] += jnp.dot(a_ref[...], b_ref[...],
                            preferred_element_type=jnp.float32)

    @pl.when(k == pl.num_programs(2) - 1)
    def _():
        y = acc_ref[...] + bias_ref[...]
        o_ref[...] = y.astype(o_ref.dtype)
        s_ref[...] += jnp.concatenate(
            [jnp.sum(y, axis=0, keepdims=True),
             jnp.sum(y * y, axis=0, keepdims=True)], axis=0)


def _bn_apply_kernel(x_ref, scale_ref, shift_ref, o_ref, *, relu):
    y = x_ref[...] * scale_ref[...] + shift_ref[...]
    if relu:
        y = jnp.maximum(y, 0.0)
    o_ref[...] = y


def _bn_apply_res_kernel(x_ref, scale_ref, shift_ref, res_ref, o_ref, *, relu):
    y = x_ref[...] * scale_ref[...] + shift_ref[...]
    if relu:
        y = jnp.maximum(y, 0.0)
    o_ref[...] = y + res_ref[...]


def _avgpool_kernel(p00_ref, p01_ref, p10_ref, p11_ref, invc_ref, o_ref):
    """3x3 / stride-2 / pad-1 sum-pool from 2x2 phase planes, analytic divisor."""
    Ho, Wo = o_ref.shape[1], o_ref.shape[2]
    p00 = p00_ref[0]          # (Ho+1, Wo+1, C)  even rows / even cols
    p01 = p01_ref[0]          # (Ho+1, Wo,   C)  even rows / odd  cols
    p10 = p10_ref[0]          # (Ho,   Wo+1, C)  odd  rows / even cols
    p11 = p11_ref[0]          # (Ho,   Wo,   C)  odd  rows / odd  cols
    s = (p00[:Ho, :Wo] + p00[:Ho, 1:] + p00[1:, :Wo] + p00[1:, 1:]
         + p01[:Ho, :] + p01[1:, :]
         + p10[:, :Wo] + p10[:, 1:]
         + p11)
    o_ref[0] = s * invc_ref[0]


# --------------------------- matmul / BN wrappers ---------------------------

def _matmul(a, b, bias, activation="none", with_stats=False):
    """(M,K) @ (K,N) + bias with optional fused activation or fused BN stats.

    bf16 MXU operands, f32 accumulation.  Returns (out_padded (Mp,N) f32,
    stats (2,N) f32 or None, pad_rows).
    """
    M, K = a.shape
    N = b.shape[1]
    tm, Mp = _pick_m_tile(M)
    tk = _pick_k_tile(K)
    tn = _pick_n_tile(N)

    a16 = a if a.dtype == jnp.bfloat16 else a.astype(jnp.bfloat16)
    if Mp != M:
        a16 = jnp.pad(a16, ((0, Mp - M), (0, 0)))
    b16 = b.astype(jnp.bfloat16)
    bias2 = bias.reshape(1, N).astype(jnp.float32)

    grid = (N // tn, Mp // tm, K // tk)
    in_specs = [
        pl.BlockSpec((tm, tk), lambda j, i, k: (i, k)),
        pl.BlockSpec((tk, tn), lambda j, i, k: (k, j)),
        pl.BlockSpec((1, tn), lambda j, i, k: (0, j)),
    ]
    if with_stats:
        out_shape = (jax.ShapeDtypeStruct((Mp, N), jnp.float32),
                     jax.ShapeDtypeStruct((2, N), jnp.float32))
        out_specs = (pl.BlockSpec((tm, tn), lambda j, i, k: (i, j)),
                     pl.BlockSpec((2, tn), lambda j, i, k: (0, j)))
        kern = _mm_bias_stats_kernel
        sem = ("parallel", "arbitrary", "arbitrary")
    else:
        out_shape = jax.ShapeDtypeStruct((Mp, N), jnp.float32)
        out_specs = pl.BlockSpec((tm, tn), lambda j, i, k: (i, j))
        kern = functools.partial(_mm_bias_kernel, activation=activation)
        sem = ("parallel", "parallel", "arbitrary")

    res = pl.pallas_call(
        kern,
        out_shape=out_shape,
        grid=grid,
        in_specs=in_specs,
        out_specs=out_specs,
        scratch_shapes=[pltpu.VMEM((tm, tn), jnp.float32)],
        compiler_params=pltpu.CompilerParams(
            dimension_semantics=sem, vmem_limit_bytes=_VMEM_LIMIT),
    )(a16, b16, bias2)

    if with_stats:
        out, stats = res
    else:
        out, stats = res, None
    return out, stats, Mp - M


def _bn_scale_shift(s0, s1, count, gamma, beta):
    """Training-mode BatchNorm2d scale/shift from per-channel sum / sumsq."""
    inv_n = 1.0 / float(count)
    mean = s0 * inv_n
    var = jnp.maximum(s1 * inv_n - mean * mean, 0.0)   # guard E[x^2]-mean^2
    scale = gamma * lax.rsqrt(var + EPS)
    shift = beta - mean * scale
    return scale, shift


def _bn_apply(yp, scale, shift, relu, residual=None):
    """Tiled normalize (rows, channels): y*scale + shift, fused ReLU / residual."""
    Mp, C = yp.shape
    tm, Mp2 = _pick_m_tile(Mp)
    if Mp2 != Mp:                                      # safety; no-op in practice
        yp = jnp.pad(yp, ((0, Mp2 - Mp), (0, 0)))
        if residual is not None:
            residual = jnp.pad(residual, ((0, Mp2 - Mp), (0, 0)))
        Mp = Mp2

    args = [yp, scale.reshape(1, C).astype(jnp.float32),
            shift.reshape(1, C).astype(jnp.float32)]
    in_specs = [pl.BlockSpec((tm, C), lambda i: (i, 0)),
                pl.BlockSpec((1, C), lambda i: (0, 0)),
                pl.BlockSpec((1, C), lambda i: (0, 0))]
    if residual is not None:
        args.append(residual)
        in_specs.append(pl.BlockSpec((tm, C), lambda i: (i, 0)))
        kern = functools.partial(_bn_apply_res_kernel, relu=relu)
    else:
        kern = functools.partial(_bn_apply_kernel, relu=relu)

    return pl.pallas_call(
        kern,
        out_shape=jax.ShapeDtypeStruct((Mp, C), jnp.float32),
        grid=(Mp // tm,),
        in_specs=in_specs,
        out_specs=pl.BlockSpec((tm, C), lambda i: (i, 0)),
        compiler_params=pltpu.CompilerParams(
            dimension_semantics=("parallel",), vmem_limit_bytes=_VMEM_LIMIT),
    )(*args)


# --------------------------- conv building blocks ---------------------------

def _extract_patches(x, kh, kw, stride):
    N, H, W, C = x.shape
    Ho = (H - kh) // stride + 1
    Wo = (W - kw) // stride + 1
    cols = []
    for i in range(kh):
        for j in range(kw):
            cols.append(
                x[:, i:i + (Ho - 1) * stride + 1:stride,
                  j:j + (Wo - 1) * stride + 1:stride, :])
    p = jnp.stack(cols, axis=3)                      # (N, Ho, Wo, kh*kw, C)
    return p.reshape(N * Ho * Wo, kh * kw * C), (N, Ho, Wo)


def _pad_input(x16, padding, pad_mode):
    if padding > 0:
        mode = "reflect" if pad_mode == "reflect" else "constant"
        x16 = jnp.pad(x16, ((0, 0), (padding, padding), (padding, padding), (0, 0)),
                      mode=mode)
    return x16


def conv2d(x, w, b, stride=1, padding=0, pad_mode="zero", activation="none"):
    """PyTorch Conv2d semantics.  x: NHWC, w: (Cout, Cin, kh, kw)."""
    Cout, Cin, kh, kw = w.shape
    x16 = _pad_input(x.astype(jnp.bfloat16), padding, pad_mode)
    patches, (N, Ho, Wo) = _extract_patches(x16, kh, kw, stride)
    wm = jnp.transpose(w, (2, 3, 1, 0)).reshape(kh * kw * Cin, Cout)
    out, _, _ = _matmul(patches, wm, b, activation=activation)
    M = N * Ho * Wo
    return out[:M].reshape(N, Ho, Wo, Cout)


def conv2d_bn(x, w, b, gamma, beta, stride=1, padding=0, pad_mode="zero",
              relu=True, residual=None):
    """Conv2d -> BatchNorm2d(batch stats) [-> ReLU] [+ residual], stats fused
    into the matmul epilogue."""
    Cout, Cin, kh, kw = w.shape
    x16 = _pad_input(x.astype(jnp.bfloat16), padding, pad_mode)
    patches, (N, Ho, Wo) = _extract_patches(x16, kh, kw, stride)
    wm = jnp.transpose(w, (2, 3, 1, 0)).reshape(kh * kw * Cin, Cout)
    yp, stats, pad_rows = _matmul(patches, wm, b, with_stats=True)

    M = N * Ho * Wo
    # zero-padded M rows evaluate to exactly `bias`; correct the fused stats.
    s0 = stats[0] - pad_rows * b
    s1 = stats[1] - pad_rows * b * b
    scale, shift = _bn_scale_shift(s0, s1, M, gamma, beta)

    res_p = None
    if residual is not None:
        res_p = residual.reshape(M, Cout).astype(jnp.float32)
        if yp.shape[0] != M:
            res_p = jnp.pad(res_p, ((0, yp.shape[0] - M), (0, 0)))
    out = _bn_apply(yp, scale, shift, relu=relu, residual=res_p)
    return out[:M].reshape(N, Ho, Wo, Cout)


def conv_transpose2d_bn(x, w, b, gamma, beta, relu=True):
    """PyTorch ConvTranspose2d (k=3, s=2, p=1, op=1) -> BatchNorm2d -> ReLU.

    Subpixel phase decomposition folded into ONE matmul: 2x2 patches of the
    (bottom/right padded) input against a (4*Cin, 4*Cout) combined weight whose
    unused taps are zero.  BN stats are fused into the matmul epilogue and BN is
    applied in the phase-blocked layout before the final interleave.
    x: NHWC, w: (Cin, Cout, 3, 3).
    """
    N, H, W, Cin = x.shape
    _, Cout, kh, kw = w.shape
    assert (kh, kw) == (3, 3)
    wt = jnp.transpose(w, (1, 0, 2, 3))              # (Cout, Cin, 3, 3)

    def g(ky, kx):
        return jnp.transpose(wt[:, :, ky, kx], (1, 0))   # (Cin, Cout)

    zero = jnp.zeros((Cin, Cout), w.dtype)
    # taps ordered (0,0),(0,1),(1,0),(1,1); phases ordered (even,even),(even,odd),
    # (odd,even),(odd,odd) -- derived from the transposed-conv index relation.
    phase_taps = [
        [g(1, 1), zero,     zero,     zero],
        [g(1, 2), g(1, 0),  zero,     zero],
        [g(2, 1), zero,     g(0, 1),  zero],
        [g(2, 2), g(2, 0),  g(0, 2),  g(0, 0)],
    ]
    wc = jnp.concatenate(
        [jnp.concatenate(taps, axis=0) for taps in phase_taps], axis=1)  # (4Cin,4Cout)
    bc = jnp.tile(b, 4)

    x16 = jnp.pad(x.astype(jnp.bfloat16), ((0, 0), (0, 1), (0, 1), (0, 0)))
    patches, _ = _extract_patches(x16, 2, 2, 1)      # (N*H*W, 4*Cin)
    yp, stats, pad_rows = _matmul(patches, wc, bc, with_stats=True)

    M = N * H * W
    s0 = (stats[0] - pad_rows * bc).reshape(4, Cout).sum(axis=0)
    s1 = (stats[1] - pad_rows * bc * bc).reshape(4, Cout).sum(axis=0)
    scale, shift = _bn_scale_shift(s0, s1, 4 * M, gamma, beta)

    out = _bn_apply(yp, jnp.tile(scale, 4), jnp.tile(shift, 4), relu=relu)
    out = out[:M].reshape(N, H, W, 2, 2, Cout)
    out = jnp.transpose(out, (0, 1, 3, 2, 4, 5)).reshape(N, 2 * H, 2 * W, Cout)
    return out


def avgpool_3x3_s2_p1(x):
    """nn.AvgPool2d(3, stride=2, padding=1, count_include_pad=False), NHWC."""
    N, H, W, C = x.shape
    Ho = (H - 1) // 2 + 1
    Wo = (W - 1) // 2 + 1
    xp = jnp.pad(x.astype(jnp.float32), ((0, 0), (1, 1), (1, 1), (0, 0)))
    # 2x2 phase decomposition of the padded input (single extra pass, no 9x copies)
    p00 = xp[:, 0:2 * Ho + 1:2, 0:2 * Wo + 1:2, :]
    p01 = xp[:, 0:2 * Ho + 1:2, 1:2 * Wo:2, :]
    p10 = xp[:, 1:2 * Ho:2, 0:2 * Wo + 1:2, :]
    p11 = xp[:, 1:2 * Ho:2, 1:2 * Wo:2, :]
    # analytic valid-count map (corner=4 / edge=6 / interior=9 for even H,W)
    taps = jnp.arange(3)
    r = jnp.arange(Ho) * 2
    c = jnp.arange(Wo) * 2
    rcount = ((r[:, None] + taps[None, :] >= 1) &
              (r[:, None] + taps[None, :] <= H)).sum(axis=1)
    ccount = ((c[:, None] + taps[None, :] >= 1) &
              (c[:, None] + taps[None, :] <= W)).sum(axis=1)
    inv_count = (1.0 / (rcount[:, None] * ccount[None, :]).astype(jnp.float32))
    inv_count = inv_count.reshape(1, Ho, Wo, 1)

    return pl.pallas_call(
        _avgpool_kernel,
        out_shape=jax.ShapeDtypeStruct((N, Ho, Wo, C), jnp.float32),
        grid=(N,),
        in_specs=[
            pl.BlockSpec((1, Ho + 1, Wo + 1, C), lambda n: (n, 0, 0, 0)),
            pl.BlockSpec((1, Ho + 1, Wo, C), lambda n: (n, 0, 0, 0)),
            pl.BlockSpec((1, Ho, Wo + 1, C), lambda n: (n, 0, 0, 0)),
            pl.BlockSpec((1, Ho, Wo, C), lambda n: (n, 0, 0, 0)),
            pl.BlockSpec((1, Ho, Wo, 1), lambda n: (0, 0, 0, 0)),
        ],
        out_specs=pl.BlockSpec((1, Ho, Wo, C), lambda n: (n, 0, 0, 0)),
        compiler_params=pltpu.CompilerParams(
            dimension_semantics=("parallel",), vmem_limit_bytes=_VMEM_LIMIT),
    )(p00, p01, p10, p11, inv_count)


def resnet_block(x, p):
    """ReflectPad1->Conv3->BN->ReLU->ReflectPad1->Conv3->BN; skip add fused into BN."""
    h = conv2d_bn(x, p["w1"], p["b1"], p["g1"], p["be1"],
                  padding=1, pad_mode="reflect", relu=True)
    return conv2d_bn(h, p["w2"], p["b2"], p["g2"], p["be2"],
                     padding=1, pad_mode="reflect", relu=False, residual=x)


# ------------------------------- parameters --------------------------------

def _conv_params(key, cout, cin, k, scale=0.1):
    kw, kb = jax.random.split(key)
    w = jax.random.normal(kw, (cout, cin, k, k), jnp.float32) * scale
    b = jax.random.normal(kb, (cout,), jnp.float32) * 0.01
    return w, b


def _convT_params(key, cin, cout, k, scale=0.1):
    kw, kb = jax.random.split(key)
    w = jax.random.normal(kw, (cin, cout, k, k), jnp.float32) * scale
    b = jax.random.normal(kb, (cout,), jnp.float32) * 0.01
    return w, b


def _bn_params(c):
    return jnp.ones((c,), jnp.float32), jnp.zeros((c,), jnp.float32)


def _res_params(key, dim):
    k1, k2 = jax.random.split(key)
    w1, b1 = _conv_params(k1, dim, dim, 3)
    w2, b2 = _conv_params(k2, dim, dim, 3)
    g1, be1 = _bn_params(dim)
    g2, be2 = _bn_params(dim)
    return dict(w1=w1, b1=b1, g1=g1, be1=be1, w2=w2, b2=b2, g2=g2, be2=be2)


def init_params(key, cfg):
    input_nc, output_nc, ngf = cfg["input_nc"], cfg["output_nc"], cfg["ngf"]
    nds, nbg = cfg["n_downsample_global"], cfg["n_blocks_global"]
    nle, nbl = cfg["n_local_enhancers"], cfg["n_blocks_local"]
    keys = iter(jax.random.split(key, 512))

    ngf_g = ngf * 2 ** nle
    g = {"conv0": _conv_params(next(keys), ngf_g, input_nc, 7),
         "bn0": _bn_params(ngf_g), "down": [], "res": [], "up": []}
    for i in range(nds):
        mult = 2 ** i
        g["down"].append((_conv_params(next(keys), ngf_g * mult * 2, ngf_g * mult, 3),
                          _bn_params(ngf_g * mult * 2)))
    mult = 2 ** nds
    for _ in range(nbg):
        g["res"].append(_res_params(next(keys), ngf_g * mult))
    for i in range(nds):
        mult = 2 ** (nds - i)
        g["up"].append((_convT_params(next(keys), ngf_g * mult, ngf_g * mult // 2, 3),
                        _bn_params(ngf_g * mult // 2)))

    locals_ = []
    for n in range(1, nle + 1):
        ngf_l = ngf * 2 ** (nle - n)
        L = {
            "down_conv0": _conv_params(next(keys), ngf_l, input_nc, 7),
            "down_bn0": _bn_params(ngf_l),
            "down_conv1": _conv_params(next(keys), ngf_l * 2, ngf_l, 3),
            "down_bn1": _bn_params(ngf_l * 2),
            "res": [_res_params(next(keys), ngf_l * 2) for _ in range(nbl)],
            "upT": _convT_params(next(keys), ngf_l * 2, ngf_l, 3),
            "up_bn": _bn_params(ngf_l),
        }
        if n == nle:
            L["final"] = _conv_params(next(keys), output_nc, ngf, 7)
        locals_.append(L)

    return {"global": g, "local": locals_}


# --------------------------------- forward ---------------------------------

def local_enhancer_forward(params, x_nchw, cfg):
    nle = cfg["n_local_enhancers"]
    x = jnp.transpose(x_nchw, (0, 2, 3, 1)).astype(jnp.float32)  # NCHW -> NHWC

    inputs = [x]
    for _ in range(nle):
        inputs.append(avgpool_3x3_s2_p1(inputs[-1]))

    # --- global generator trunk (last 3 layers removed) ---
    g = params["global"]
    h = inputs[-1]
    (w, b), (gm, be) = g["conv0"], g["bn0"]
    h = conv2d_bn(h, w, b, gm, be, padding=3, pad_mode="reflect", relu=True)
    for (w, b), (gm, be) in g["down"]:
        h = conv2d_bn(h, w, b, gm, be, stride=2, padding=1, relu=True)
    for rp in g["res"]:
        h = resnet_block(h, rp)
    for (w, b), (gm, be) in g["up"]:
        h = conv_transpose2d_bn(h, w, b, gm, be, relu=True)
    output_prev = h

    # --- local enhancer branches ---
    for n in range(1, nle + 1):
        L = params["local"][n - 1]
        xi = inputs[nle - n]
        w, b = L["down_conv0"]
        gm, be = L["down_bn0"]
        d = conv2d_bn(xi, w, b, gm, be, padding=3, pad_mode="reflect", relu=True)
        w, b = L["down_conv1"]
        gm, be = L["down_bn1"]
        # fused: Conv -> BN -> ReLU -> + output_prev  (model_downsample(x) + output_prev)
        u = conv2d_bn(d, w, b, gm, be, stride=2, padding=1, relu=True,
                      residual=output_prev)

        for rp in L["res"]:
            u = resnet_block(u, rp)
        w, b = L["upT"]
        gm, be = L["up_bn"]
        u = conv_transpose2d_bn(u, w, b, gm, be, relu=True)
        if n == nle:
            w, b = L["final"]
            u = conv2d(u, w, b, padding=3, pad_mode="reflect", activation="tanh")
        output_prev = u

    return jnp.transpose(output_prev, (0, 3, 1, 2))  # NHWC -> NCHW


# ----------------------------------- main -----------------------------------

if __name__ == "__main__":
    cfg = dict(input_nc=3, output_nc=3, ngf=4,
               n_downsample_global=1, n_blocks_global=1,
               n_local_enhancers=1, n_blocks_local=1)

    key = jax.random.PRNGKey(0)
    kp, kx = jax.random.split(key)
    params = init_params(kp, cfg)
    x = jax.random.normal(kx, (2, cfg["input_nc"], 16, 16), jnp.float32)

    fwd = jax.jit(functools.partial(local_enhancer_forward, cfg=cfg))
    out = fwd(params, x)
    jax.block_until_ready(out)
    assert out.shape == (2, cfg["output_nc"], 16, 16), out.shape
    assert bool(jnp.all(jnp.isfinite(out)))
    print("KERNEL_OK")
</pallas_src>

<mosaic_0001>
module attributes {stable_mosaic.version = 11 : i64} {
  func.func @_mm_bias_stats_kernel(%arg0: i32, %arg1: i32, %arg2: i32, %arg3: memref<512x147xbf16, #tpu.memory_space<vmem>>, %arg4: memref<147x4xbf16, #tpu.memory_space<vmem>>, %arg5: memref<1x4xf32, #tpu.memory_space<vmem>>, %arg6: memref<512x4xf32, #tpu.memory_space<vmem>>, %arg7: memref<2x4xf32, #tpu.memory_space<vmem>>, %arg8: memref<512x4xf32, #tpu.memory_space<vmem>>) attributes {dimension_semantics = [#tpu.dimension_semantics<parallel>, #tpu.dimension_semantics<arbitrary>, #tpu.dimension_semantics<arbitrary>], iteration_bounds = array<i64: 1, 1, 1>, scalar_prefetch = 0 : i64, scratch_operands = 1 : i64, tpu.core_type = #tpu.core_type<tc>, window_params = [{transform_indices = @transform_0, window_bounds = array<i64: 512, 147>}, {transform_indices = @transform_1, window_bounds = array<i64: 147, 4>}, {transform_indices = @transform_2, window_bounds = array<i64: 1, 4>}, {transform_indices = @transform_3, window_bounds = array<i64: 512, 4>}, {transform_indices = @transform_4, window_bounds = array<i64: 2, 4>}]} {
    %c0_i32 = arith.constant 0 : i32
    %0 = arith.cmpi eq, %arg2, %c0_i32 : i32
    %1 = arith.extui %0 : i1 to i32
    %c0_i32_0 = arith.constant 0 : i32
    %2 = arith.cmpi ne, %1, %c0_i32_0 : i32
    scf.if %2 {
      %cst_13 = arith.constant 0.000000e+00 : f32
      %17 = vector.broadcast %cst_13 : f32 to vector<512x4xf32>
      %c0_14 = arith.constant 0 : index
      %c0_15 = arith.constant 0 : index
      %18 = vector.load %arg8[%c0_14, %c0_15] : memref<512x4xf32, #tpu.memory_space<vmem>>, vector<512x4xf32>
      tpu.vector_store %arg8[%c0_14, %c0_15], %17 {strides = array<i32>} : memref<512x4xf32, #tpu.memory_space<vmem>>, vector<512x4xf32>,
    } else {
    }
    %c0_i32_1 = arith.constant 0 : i32
    %3 = arith.cmpi eq, %arg1, %c0_i32_1 : i32
    %c0_i32_2 = arith.constant 0 : i32
    %4 = arith.cmpi eq, %arg2, %c0_i32_2 : i32
    %5 = arith.andi %3, %4 : i1
    %6 = arith.extui %5 : i1 to i32
    %c0_i32_3 = arith.constant 0 : i32
    %7 = arith.cmpi ne, %6, %c0_i32_3 : i32
    scf.if %7 {
      %cst_13 = arith.constant 0.000000e+00 : f32
      %17 = vector.broadcast %cst_13 : f32 to vector<2x4xf32>
      %c0_14 = arith.constant 0 : index
      %c0_15 = arith.constant 0 : index
      %18 = vector.load %arg7[%c0_14, %c0_15] : memref<2x4xf32, #tpu.memory_space<vmem>>, vector<2x4xf32>
      tpu.vector_store %arg7[%c0_14, %c0_15], %17 {strides = array<i32>} : memref<2x4xf32, #tpu.memory_space<vmem>>, vector<2x4xf32>,
    } else {
    }
    %c0 = arith.constant 0 : index
    %c0_4 = arith.constant 0 : index
    %8 = vector.load %arg8[%c0, %c0_4] : memref<512x4xf32, #tpu.memory_space<vmem>>, vector<512x4xf32>
    %c0_5 = arith.constant 0 : index
    %c0_6 = arith.constant 0 : index
    %9 = vector.load %arg3[%c0_5, %c0_6] : memref<512x147xbf16, #tpu.memory_space<vmem>>, vector<512x147xbf16>
    %c0_7 = arith.constant 0 : index
    %c0_8 = arith.constant 0 : index
    %10 = vector.load %arg4[%c0_7, %c0_8] : memref<147x4xbf16, #tpu.memory_space<vmem>>, vector<147x4xbf16>
    %cst = arith.constant dense<0.000000e+00> : vector<512x4xf32>
    %11 = tpu.matmul %9, %10, %cst {dimension_numbers = #tpu.dot_dimension_numbers<[1], [0], [0], [1], [0, 0, 1, 1], [], []>} : vector<512x147xbf16>, vector<147x4xbf16>, vector<512x4xf32> -> vector<512x4xf32>
    %12 = arith.addf %8, %11 : vector<512x4xf32>
    %c0_9 = arith.constant 0 : index
    %c0_10 = arith.constant 0 : index
    %13 = vector.load %arg8[%c0_9, %c0_10] : memref<512x4xf32, #tpu.memory_space<vmem>>, vector<512x4xf32>
    tpu.vector_store %arg8[%c0_9, %c0_10], %12 {strides = array<i32>} : memref<512x4xf32, #tpu.memory_space<vmem>>, vector<512x4xf32>,
    %c0_i32_11 = arith.constant 0 : i32
    %14 = arith.cmpi eq, %arg2, %c0_i32_11 : i32
    %15 = arith.extui %14 : i1 to i32
    %c0_i32_12 = arith.constant 0 : i32
    %16 = arith.cmpi ne, %15, %c0_i32_12 : i32
    scf.if %16 {
      %c0_13 = arith.constant 0 : index
      %c0_14 = arith.constant 0 : index
      %17 = vector.load %arg8[%c0_13, %c0_14] : memref<512x4xf32, #tpu.memory_space<vmem>>, vector<512x4xf32>
      %c0_15 = arith.constant 0 : index
      %c0_16 = arith.constant 0 : index
      %18 = vector.load %arg5[%c0_15, %c0_16] : memref<1x4xf32, #tpu.memory_space<vmem>>, vector<1x4xf32>
      %19 = vector.broadcast %18 : vector<1x4xf32> to vector<512x4xf32>
      %20 = arith.addf %17, %19 : vector<512x4xf32>
      %c0_17 = arith.constant 0 : index
      %c0_18 = arith.constant 0 : index
      %21 = vector.load %arg6[%c0_17, %c0_18] : memref<512x4xf32, #tpu.memory_space<vmem>>, vector<512x4xf32>
      tpu.vector_store %arg6[%c0_17, %c0_18], %20 {strides = array<i32>} : memref<512x4xf32, #tpu.memory_space<vmem>>, vector<512x4xf32>,
      %c0_19 = arith.constant 0 : index
      %c0_20 = arith.constant 0 : index
      %22 = vector.load %arg7[%c0_19, %c0_20] : memref<2x4xf32, #tpu.memory_space<vmem>>, vector<2x4xf32>
      %cst_21 = arith.constant dense<0.000000e+00> : vector<4xf32>
      %23 = vector.multi_reduction <add>, %20, %cst_21 [0] : vector<512x4xf32> to vector<4xf32>
      %24 = vector.shape_cast %23 : vector<4xf32> to vector<1x4xf32>
      %25 = arith.mulf %20, %20 : vector<512x4xf32>
      %cst_22 = arith.constant dense<0.000000e+00> : vector<4xf32>
      %26 = vector.multi_reduction <add>, %25, %cst_22 [0] : vector<512x4xf32> to vector<4xf32>
      %27 = vector.shape_cast %26 : vector<4xf32> to vector<1x4xf32>
      %28 = tpu.concatenate %24, %27 in 0 : vector<1x4xf32>, vector<1x4xf32> -> vector<2x4xf32>
      %29 = arith.addf %22, %28 : vector<2x4xf32>
      %c0_23 = arith.constant 0 : index
      %c0_24 = arith.constant 0 : index
      %30 = vector.load %arg7[%c0_23, %c0_24] : memref<2x4xf32, #tpu.memory_space<vmem>>, vector<2x4xf32>
      tpu.vector_store %arg7[%c0_23, %c0_24], %29 {strides = array<i32>} : memref<2x4xf32, #tpu.memory_space<vmem>>, vector<2x4xf32>,
    } else {
    }
    return
  }
  func.func @transform_0(%arg0: i32, %arg1: i32, %arg2: i32) -> (i32, i32) {
    %c0_i32 = arith.constant 0 : i32
    return %arg1, %arg2 : i32, i32
  }
  func.func @transform_1(%arg0: i32, %arg1: i32, %arg2: i32) -> (i32, i32) {
    %c0_i32 = arith.constant 0 : i32
    return %arg2, %arg0 : i32, i32
  }
  func.func @transform_2(%arg0: i32, %arg1: i32, %arg2: i32) -> (i32, i32) {
    %c0_i32 = arith.constant 0 : i32
    %c0_i32_0 = arith.constant 0 : i32
    return %c0_i32, %arg0 : i32, i32
  }
  func.func @transform_3(%arg0: i32, %arg1: i32, %arg2: i32) -> (i32, i32) {
    %c0_i32 = arith.constant 0 : i32
    return %arg1, %arg0 : i32, i32
  }
  func.func @transform_4(%arg0: i32, %arg1: i32, %arg2: i32) -> (i32, i32) {
    %c0_i32 = arith.constant 0 : i32
    %c0_i32_0 = arith.constant 0 : i32
    return %c0_i32, %arg0 : i32, i32
  }
}

module attributes {stable_mosaic.version = 11 : i64} {
  func.func @_bn_apply_kernel(%arg0: i32, %arg1: memref<512x4xf32, #tpu.memory_space<vmem>>, %arg2: memref<1x4xf32, #tpu.memory_space<vmem>>, %arg3: memref<1x4xf32, #tpu.memory_space<vmem>>, %arg4: memref<512x4xf32, #tpu.memory_space<vmem>>) attributes {dimension_semantics = [#tpu.dimension_semantics<parallel>], iteration_bounds = array<i64: 1>, scalar_prefetch = 0 : i64, scratch_operands = 0 : i64, tpu.core_type = #tpu.core_type<tc>, window_params = [{transform_indices = @transform_0, window_bounds = array<i64: 512, 4>}, {pipeline_mode = #tpu.pipeline_mode<synchronous>, transform_indices = @transform_1, window_bounds = array<i64: 1, 4>}, {pipeline_mode = #tpu.pipeline_mode<synchronous>, transform_indices = @transform_2, window_bounds = array<i64: 1, 4>}, {transform_indices = @transform_3, window_bounds = array<i64: 512, 4>}]} {
    %c0 = arith.constant 0 : index
    %c0_0 = arith.constant 0 : index
    %0 = vector.load %arg1[%c0, %c0_0] : memref<512x4xf32, #tpu.memory_space<vmem>>, vector<512x4xf32>
    %c0_1 = arith.constant 0 : index
    %c0_2 = arith.constant 0 : index
    %1 = vector.load %arg2[%c0_1, %c0_2] : memref<1x4xf32, #tpu.memory_space<vmem>>, vector<1x4xf32>
    %2 = vector.broadcast %1 : vector<1x4xf32> to vector<512x4xf32>
    %3 = arith.mulf %0, %2 : vector<512x4xf32>
    %c0_3 = arith.constant 0 : index
    %c0_4 = arith.constant 0 : index
    %4 = vector.load %arg3[%c0_3, %c0_4] : memref<1x4xf32, #tpu.memory_space<vmem>>, vector<1x4xf32>
    %5 = vector.broadcast %4 : vector<1x4xf32> to vector<512x4xf32>
    %6 = arith.addf %3, %5 : vector<512x4xf32>
    %cst = arith.constant 0.000000e+00 : f32
    %7 = vector.broadcast %cst : f32 to vector<512x4xf32>
    %8 = arith.maximumf %6, %7 : vector<512x4xf32>
    %c0_5 = arith.constant 0 : index
    %c0_6 = arith.constant 0 : index
    %9 = vector.load %arg4[%c0_5, %c0_6] : memref<512x4xf32, #tpu.memory_space<vmem>>, vector<512x4xf32>
    tpu.vector_store %arg4[%c0_5, %c0_6], %8 {strides = array<i32>} : memref<512x4xf32, #tpu.memory_space<vmem>>, vector<512x4xf32>,
    return
  }
  func.func @transform_0(%arg0: i32) -> (i32, i32) {
    %c0_i32 = arith.constant 0 : i32
    %c0_i32_0 = arith.constant 0 : i32
    return %arg0, %c0_i32 : i32, i32
  }
  func.func @transform_1(%arg0: i32) -> (i32, i32) {
    %c0_i32 = arith.constant 0 : i32
    %c0_i32_0 = arith.constant 0 : i32
    %c0_i32_1 = arith.constant 0 : i32
    return %c0_i32, %c0_i32_0 : i32, i32
  }
  func.func @transform_2(%arg0: i32) -> (i32, i32) {
    %c0_i32 = arith.constant 0 : i32
    %c0_i32_0 = arith.constant 0 : i32
    %c0_i32_1 = arith.constant 0 : i32
    return %c0_i32, %c0_i32_0 : i32, i32
  }
  func.func @transform_3(%arg0: i32) -> (i32, i32) {
    %c0_i32 = arith.constant 0 : i32
    %c0_i32_0 = arith.constant 0 : i32
    return %arg0, %c0_i32 : i32, i32
  }
}

module attributes {stable_mosaic.version = 11 : i64} {
  func.func @_mm_bias_stats_kernel(%arg0: i32, %arg1: i32, %arg2: i32, %arg3: memref<128x36xbf16, #tpu.memory_space<vmem>>, %arg4: memref<36x8xbf16, #tpu.memory_space<vmem>>, %arg5: memref<1x8xf32, #tpu.memory_space<vmem>>, %arg6: memref<128x8xf32, #tpu.memory_space<vmem>>, %arg7: memref<2x8xf32, #tpu.memory_space<vmem>>, %arg8: memref<128x8xf32, #tpu.memory_space<vmem>>) attributes {dimension_semantics = [#tpu.dimension_semantics<parallel>, #tpu.dimension_semantics<arbitrary>, #tpu.dimension_semantics<arbitrary>], iteration_bounds = array<i64: 1, 1, 1>, scalar_prefetch = 0 : i64, scratch_operands = 1 : i64, tpu.core_type = #tpu.core_type<tc>, window_params = [{transform_indices = @transform_0, window_bounds = array<i64: 128, 36>}, {transform_indices = @transform_1, window_bounds = array<i64: 36, 8>}, {transform_indices = @transform_2, window_bounds = array<i64: 1, 8>}, {transform_indices = @transform_3, window_bounds = array<i64: 128, 8>}, {transform_indices = @transform_4, window_bounds = array<i64: 2, 8>}]} {
    %c0_i32 = arith.constant 0 : i32
    %0 = arith.cmpi eq, %arg2, %c0_i32 : i32
    %1 = arith.extui %0 : i1 to i32
    %c0_i32_0 = arith.constant 0 : i32
    %2 = arith.cmpi ne, %1, %c0_i32_0 : i32
    scf.if %2 {
      %cst_13 = arith.constant 0.000000e+00 : f32
      %17 = vector.broadcast %cst_13 : f32 to vector<128x8xf32>
      %c0_14 = arith.constant 0 : index
      %c0_15 = arith.constant 0 : index
      %18 = vector.load %arg8[%c0_14, %c0_15] : memref<128x8xf32, #tpu.memory_space<vmem>>, vector<128x8xf32>
      tpu.vector_store %arg8[%c0_14, %c0_15], %17 {strides = array<i32>} : memref<128x8xf32, #tpu.memory_space<vmem>>, vector<128x8xf32>,
    } else {
    }
    %c0_i32_1 = arith.constant 0 : i32
    %3 = arith.cmpi eq, %arg1, %c0_i32_1 : i32
    %c0_i32_2 = arith.constant 0 : i32
    %4 = arith.cmpi eq, %arg2, %c0_i32_2 : i32
    %5 = arith.andi %3, %4 : i1
    %6 = arith.extui %5 : i1 to i32
    %c0_i32_3 = arith.constant 0 : i32
    %7 = arith.cmpi ne, %6, %c0_i32_3 : i32
    scf.if %7 {
      %cst_13 = arith.constant 0.000000e+00 : f32
      %17 = vector.broadcast %cst_13 : f32 to vector<2x8xf32>
      %c0_14 = arith.constant 0 : index
      %c0_15 = arith.constant 0 : index
      %18 = vector.load %arg7[%c0_14, %c0_15] : memref<2x8xf32, #tpu.memory_space<vmem>>, vector<2x8xf32>
      tpu.vector_store %arg7[%c0_14, %c0_15], %17 {strides = array<i32>} : memref<2x8xf32, #tpu.memory_space<vmem>>, vector<2x8xf32>,
    } else {
    }
    %c0 = arith.constant 0 : index
    %c0_4 = arith.constant 0 : index
    %8 = vector.load %arg8[%c0, %c0_4] : memref<128x8xf32, #tpu.memory_space<vmem>>, vector<128x8xf32>
    %c0_5 = arith.constant 0 : index
    %c0_6 = arith.constant 0 : index
    %9 = vector.load %arg3[%c0_5, %c0_6] : memref<128x36xbf16, #tpu.memory_space<vmem>>, vector<128x36xbf16>
    %c0_7 = arith.constant 0 : index
    %c0_8 = arith.constant 0 : index
    %10 = vector.load %arg4[%c0_7, %c0_8] : memref<36x8xbf16, #tpu.memory_space<vmem>>, vector<36x8xbf16>
    %cst = arith.constant dense<0.000000e+00> : vector<128x8xf32>
    %11 = tpu.matmul %9, %10, %cst {dimension_numbers = #tpu.dot_dimension_numbers<[1], [0], [0], [1], [0, 0, 1, 1], [], []>} : vector<128x36xbf16>, vector<36x8xbf16>, vector<128x8xf32> -> vector<128x8xf32>
    %12 = arith.addf %8, %11 : vector<128x8xf32>
    %c0_9 = arith.constant 0 : index
    %c0_10 = arith.constant 0 : index
    %13 = vector.load %arg8[%c0_9, %c0_10] : memref<128x8xf32, #tpu.memory_space<vmem>>, vector<128x8xf32>
    tpu.vector_store %arg8[%c0_9, %c0_10], %12 {strides = array<i32>} : memref<128x8xf32, #tpu.memory_space<vmem>>, vector<128x8xf32>,
    %c0_i32_11 = arith.constant 0 : i32
    %14 = arith.cmpi eq, %arg2, %c0_i32_11 : i32
    %15 = arith.extui %14 : i1 to i32
    %c0_i32_12 = arith.constant 0 : i32
    %16 = arith.cmpi ne, %15, %c0_i32_12 : i32
    scf.if %16 {
      %c0_13 = arith.constant 0 : index
      %c0_14 = arith.constant 0 : index
      %17 = vector.load %arg8[%c0_13, %c0_14] : memref<128x8xf32, #tpu.memory_space<vmem>>, vector<128x8xf32>
      %c0_15 = arith.constant 0 : index
      %c0_16 = arith.constant 0 : index
      %18 = vector.load %arg5[%c0_15, %c0_16] : memref<1x8xf32, #tpu.memory_space<vmem>>, vector<1x8xf32>
      %19 = vector.broadcast %18 : vector<1x8xf32> to vector<128x8xf32>
      %20 = arith.addf %17, %19 : vector<128x8xf32>
      %c0_17 = arith.constant 0 : index
      %c0_18 = arith.constant 0 : index
      %21 = vector.load %arg6[%c0_17, %c0_18] : memref<128x8xf32, #tpu.memory_space<vmem>>, vector<128x8xf32>
      tpu.vector_store %arg6[%c0_17, %c0_18], %20 {strides = array<i32>} : memref<128x8xf32, #tpu.memory_space<vmem>>, vector<128x8xf32>,
      %c0_19 = arith.constant 0 : index
      %c0_20 = arith.constant 0 : index
      %22 = vector.load %arg7[%c0_19, %c0_20] : memref<2x8xf32, #tpu.memory_space<vmem>>, vector<2x8xf32>
      %cst_21 = arith.constant dense<0.000000e+00> : vector<8xf32>
      %23 = vector.multi_reduction <add>, %20, %cst_21 [0] : vector<128x8xf32> to vector<8xf32>
      %24 = vector.shape_cast %23 : vector<8xf32> to vector<1x8xf32>
      %25 = arith.mulf %20, %20 : vector<128x8xf32>
      %cst_22 = arith.constant dense<0.000000e+00> : vector<8xf32>
      %26 = vector.multi_reduction <add>, %25, %cst_22 [0] : vector<128x8xf32> to vector<8xf32>
      %27 = vector.shape_cast %26 : vector<8xf32> to vector<1x8xf32>
      %28 = tpu.concatenate %24, %27 in 0 : vector<1x8xf32>, vector<1x8xf32> -> vector<2x8xf32>
      %29 = arith.addf %22, %28 : vector<2x8xf32>
      %c0_23 = arith.constant 0 : index
      %c0_24 = arith.constant 0 : index
      %30 = vector.load %arg7[%c0_23, %c0_24] : memref<2x8xf32, #tpu.memory_space<vmem>>, vector<2x8xf32>
      tpu.vector_store %arg7[%c0_23, %c0_24], %29 {strides = array<i32>} : memref<2x8xf32, #tpu.memory_space<vmem>>, vector<2x8xf32>,
    } else {
    }
    return
  }
  func.func @transform_0(%arg0: i32, %arg1: i32, %arg2: i32) -> (i32, i32) {
    %c0_i32 = arith.constant 0 : i32
    return %arg1, %arg2 : i32, i32
  }
  func.func @transform_1(%arg0: i32, %arg1: i32, %arg2: i32) -> (i32, i32) {
    %c0_i32 = arith.constant 0 : i32
    return %arg2, %arg0 : i32, i32
  }
  func.func @transform_2(%arg0: i32, %arg1: i32, %arg2: i32) -> (i32, i32) {
    %c0_i32 = arith.constant 0 : i32
    %c0_i32_0 = arith.constant 0 : i32
    return %c0_i32, %arg0 : i32, i32
  }
  func.func @transform_3(%arg0: i32, %arg1: i32, %arg2: i32) -> (i32, i32) {
    %c0_i32 = arith.constant 0 : i32
    return %arg1, %arg0 : i32, i32
  }
  func.func @transform_4(%arg0: i32, %arg1: i32, %arg2: i32) -> (i32, i32) {
    %c0_i32 = arith.constant 0 : i32
    %c0_i32_0 = arith.constant 0 : i32
    return %c0_i32, %arg0 : i32, i32
  }
}

module attributes {stable_mosaic.version = 11 : i64} {
  func.func @_avgpool_kernel(%arg0: i32, %arg1: memref<1x9x9x3xf32, #tpu.memory_space<vmem>>, %arg2: memref<1x9x8x3xf32, #tpu.memory_space<vmem>>, %arg3: memref<1x8x9x3xf32, #tpu.memory_space<vmem>>, %arg4: memref<1x8x8x3xf32, #tpu.memory_space<vmem>>, %arg5: memref<1x8x8x1xf32, #tpu.memory_space<vmem>>, %arg6: memref<1x8x8x3xf32, #tpu.memory_space<vmem>>) attributes {dimension_semantics = [#tpu.dimension_semantics<parallel>], iteration_bounds = array<i64: 2>, scalar_prefetch = 0 : i64, scratch_operands = 0 : i64, tpu.core_type = #tpu.core_type<tc>, window_params = [{transform_indices = @transform_0, window_bounds = array<i64: 1, 9, 9, 3>}, {transform_indices = @transform_1, window_bounds = array<i64: 1, 9, 8, 3>}, {transform_indices = @transform_2, window_bounds = array<i64: 1, 8, 9, 3>}, {transform_indices = @transform_3, window_bounds = array<i64: 1, 8, 8, 3>}, {pipeline_mode = #tpu.pipeline_mode<synchronous>, transform_indices = @transform_4, window_bounds = array<i64: 1, 8, 8, 1>}, {transform_indices = @transform_5, window_bounds = array<i64: 1, 8, 8, 3>}]} {
    %c0 = arith.constant 0 : index
    %c0_0 = arith.constant 0 : index
    %c0_1 = arith.constant 0 : index
    %c0_2 = arith.constant 0 : index
    %0 = vector.load %arg1[%c0, %c0_0, %c0_1, %c0_2] : memref<1x9x9x3xf32, #tpu.memory_space<vmem>>, vector<1x9x9x3xf32>
    %1 = vector.shape_cast %0 : vector<1x9x9x3xf32> to vector<9x9x3xf32>
    %c0_3 = arith.constant 0 : index
    %c0_4 = arith.constant 0 : index
    %c0_5 = arith.constant 0 : index
    %c0_6 = arith.constant 0 : index
    %2 = vector.load %arg2[%c0_3, %c0_4, %c0_5, %c0_6] : memref<1x9x8x3xf32, #tpu.memory_space<vmem>>, vector<1x9x8x3xf32>
    %3 = vector.shape_cast %2 : vector<1x9x8x3xf32> to vector<9x8x3xf32>
    %c0_7 = arith.constant 0 : index
    %c0_8 = arith.constant 0 : index
    %c0_9 = arith.constant 0 : index
    %c0_10 = arith.constant 0 : index
    %4 = vector.load %arg3[%c0_7, %c0_8, %c0_9, %c0_10] : memref<1x8x9x3xf32, #tpu.memory_space<vmem>>, vector<1x8x9x3xf32>
    %5 = vector.shape_cast %4 : vector<1x8x9x3xf32> to vector<8x9x3xf32>
    %c0_11 = arith.constant 0 : index
    %c0_12 = arith.constant 0 : index
    %c0_13 = arith.constant 0 : index
    %c0_14 = arith.constant 0 : index
    %6 = vector.load %arg4[%c0_11, %c0_12, %c0_13, %c0_14] : memref<1x8x8x3xf32, #tpu.memory_space<vmem>>, vector<1x8x8x3xf32>
    %7 = vector.shape_cast %6 : vector<1x8x8x3xf32> to vector<8x8x3xf32>
    %8 = vector.extract_strided_slice %1 {offsets = [0, 0, 0], sizes = [8, 8, 3], strides = [1, 1, 1]} : vector<9x9x3xf32> to vector<8x8x3xf32>
    %9 = vector.extract_strided_slice %1 {offsets = [0, 1, 0], sizes = [8, 8, 3], strides = [1, 1, 1]} : vector<9x9x3xf32> to vector<8x8x3xf32>
    %10 = arith.addf %8, %9 : vector<8x8x3xf32>
    %11 = vector.extract_strided_slice %1 {offsets = [1, 0, 0], sizes = [8, 8, 3], strides = [1, 1, 1]} : vector<9x9x3xf32> to vector<8x8x3xf32>
    %12 = arith.addf %10, %11 : vector<8x8x3xf32>
    %13 = vector.extract_strided_slice %1 {offsets = [1, 1, 0], sizes = [8, 8, 3], strides = [1, 1, 1]} : vector<9x9x3xf32> to vector<8x8x3xf32>
    %14 = arith.addf %12, %13 : vector<8x8x3xf32>
    %15 = vector.extract_strided_slice %3 {offsets = [0, 0, 0], sizes = [8, 8, 3], strides = [1, 1, 1]} : vector<9x8x3xf32> to vector<8x8x3xf32>
    %16 = arith.addf %14, %15 : vector<8x8x3xf32>
    %17 = vector.extract_strided_slice %3 {offsets = [1, 0, 0], sizes = [8, 8, 3], strides = [1, 1, 1]} : vector<9x8x3xf32> to vector<8x8x3xf32>
    %18 = arith.addf %16, %17 : vector<8x8x3xf32>
    %19 = vector.extract_strided_slice %5 {offsets = [0, 0, 0], sizes = [8, 8, 3], strides = [1, 1, 1]} : vector<8x9x3xf32> to vector<8x8x3xf32>
    %20 = arith.addf %18, %19 : vector<8x8x3xf32>
    %21 = vector.extract_strided_slice %5 {offsets = [0, 1, 0], sizes = [8, 8, 3], strides = [1, 1, 1]} : vector<8x9x3xf32> to vector<8x8x3xf32>
    %22 = arith.addf %20, %21 : vector<8x8x3xf32>
    %23 = arith.addf %22, %7 : vector<8x8x3xf32>
    %c0_15 = arith.constant 0 : index
    %c0_16 = arith.constant 0 : index
    %c0_17 = arith.constant 0 : index
    %c0_18 = arith.constant 0 : index
    %24 = vector.load %arg5[%c0_15, %c0_16, %c0_17, %c0_18] : memref<1x8x8x1xf32, #tpu.memory_space<vmem>>, vector<1x8x8x1xf32>
    %25 = vector.shape_cast %24 : vector<1x8x8x1xf32> to vector<8x8x1xf32>
    %26 = vector.broadcast %25 : vector<8x8x1xf32> to vector<8x8x3xf32>
    %27 = arith.mulf %23, %26 : vector<8x8x3xf32>
    %c0_19 = arith.constant 0 : index
    %c0_20 = arith.constant 0 : index
    %c0_21 = arith.constant 0 : index
    %c0_22 = arith.constant 0 : index
    %28 = vector.load %arg6[%c0_19, %c0_20, %c0_21, %c0_22] : memref<1x8x8x3xf32, #tpu.memory_space<vmem>>, vector<1x8x8x3xf32>
    %29 = vector.shape_cast %28 : vector<1x8x8x3xf32> to vector<8x8x3xf32>
    %30 = vector.shape_cast %27 : vector<8x8x3xf32> to vector<1x8x8x3xf32>
    tpu.vector_store %arg6[%c0_19, %c0_20, %c0_21, %c0_22], %30 {strides = array<i32>} : memref<1x8x8x3xf32, #tpu.memory_space<vmem>>, vector<1x8x8x3xf32>,
    return
  }
  func.func @transform_0(%arg0: i32) -> (i32, i32, i32, i32) {
    %c0_i32 = arith.constant 0 : i32
    %c0_i32_0 = arith.constant 0 : i32
    %c0_i32_1 = arith.constant 0 : i32
    %c0_i32_2 = arith.constant 0 : i32
    return %arg0, %c0_i32, %c0_i32_0, %c0_i32_1 : i32, i32, i32, i32
  }
  func.func @transform_1(%arg0: i32) -> (i32, i32, i32, i32) {
    %c0_i32 = arith.constant 0 : i32
    %c0_i32_0 = arith.constant 0 : i32
    %c0_i32_1 = arith.constant 0 : i32
    %c0_i32_2 = arith.constant 0 : i32
    return %arg0, %c0_i32, %c0_i32_0, %c0_i32_1 : i32, i32, i32, i32
  }
  func.func @transform_2(%arg0: i32) -> (i32, i32, i32, i32) {
    %c0_i32 = arith.constant 0 : i32
    %c0_i32_0 = arith.constant 0 : i32
    %c0_i32_1 = arith.constant 0 : i32
    %c0_i32_2 = arith.constant 0 : i32
    return %arg0, %c0_i32, %c0_i32_0, %c0_i32_1 : i32, i32, i32, i32
  }
  func.func @transform_3(%arg0: i32) -> (i32, i32, i32, i32) {
    %c0_i32 = arith.constant 0 : i32
    %c0_i32_0 = arith.constant 0 : i32
    %c0_i32_1 = arith.constant 0 : i32
    %c0_i32_2 = arith.constant 0 : i32
    return %arg0, %c0_i32, %c0_i32_0, %c0_i32_1 : i32, i32, i32, i32
  }
  func.func @transform_4(%arg0: i32) -> (i32, i32, i32, i32) {
    %c0_i32 = arith.constant 0 : i32
    %c0_i32_0 = arith.constant 0 : i32
    %c0_i32_1 = arith.constant 0 : i32
    %c0_i32_2 = arith.constant 0 : i32
    %c0_i32_3 = arith.constant 0 : i32
    return %c0_i32, %c0_i32_0, %c0_i32_1, %c0_i32_2 : i32, i32, i32, i32
  }
  func.func @transform_5(%arg0: i32) -> (i32, i32, i32, i32) {
    %c0_i32 = arith.constant 0 : i32
    %c0_i32_0 = arith.constant 0 : i32
    %c0_i32_1 = arith.constant 0 : i32
    %c0_i32_2 = arith.constant 0 : i32
    return %arg0, %c0_i32, %c0_i32_0, %c0_i32_1 : i32, i32, i32, i32
  }
}

module attributes {stable_mosaic.version = 11 : i64} {
  func.func @_mm_bias_stats_kernel(%arg0: i32, %arg1: i32, %arg2: i32, %arg3: memref<128x147xbf16, #tpu.memory_space<vmem>>, %arg4: memref<147x8xbf16, #tpu.memory_space<vmem>>, %arg5: memref<1x8xf32, #tpu.memory_space<vmem>>, %arg6: memref<128x8xf32, #tpu.memory_space<vmem>>, %arg7: memref<2x8xf32, #tpu.memory_space<vmem>>, %arg8: memref<128x8xf32, #tpu.memory_space<vmem>>) attributes {dimension_semantics = [#tpu.dimension_semantics<parallel>, #tpu.dimension_semantics<arbitrary>, #tpu.dimension_semantics<arbitrary>], iteration_bounds = array<i64: 1, 1, 1>, scalar_prefetch = 0 : i64, scratch_operands = 1 : i64, tpu.core_type = #tpu.core_type<tc>, window_params = [{transform_indices = @transform_0, window_bounds = array<i64: 128, 147>}, {transform_indices = @transform_1, window_bounds = array<i64: 147, 8>}, {transform_indices = @transform_2, window_bounds = array<i64: 1, 8>}, {transform_indices = @transform_3, window_bounds = array<i64: 128, 8>}, {transform_indices = @transform_4, window_bounds = array<i64: 2, 8>}]} {
    %c0_i32 = arith.constant 0 : i32
    %0 = arith.cmpi eq, %arg2, %c0_i32 : i32
    %1 = arith.extui %0 : i1 to i32
    %c0_i32_0 = arith.constant 0 : i32
    %2 = arith.cmpi ne, %1, %c0_i32_0 : i32
    scf.if %2 {
      %cst_13 = arith.constant 0.000000e+00 : f32
      %17 = vector.broadcast %cst_13 : f32 to vector<128x8xf32>
      %c0_14 = arith.constant 0 : index
      %c0_15 = arith.constant 0 : index
      %18 = vector.load %arg8[%c0_14, %c0_15] : memref<128x8xf32, #tpu.memory_space<vmem>>, vector<128x8xf32>
      tpu.vector_store %arg8[%c0_14, %c0_15], %17 {strides = array<i32>} : memref<128x8xf32, #tpu.memory_space<vmem>>, vector<128x8xf32>,
    } else {
    }
    %c0_i32_1 = arith.constant 0 : i32
    %3 = arith.cmpi eq, %arg1, %c0_i32_1 : i32
    %c0_i32_2 = arith.constant 0 : i32
    %4 = arith.cmpi eq, %arg2, %c0_i32_2 : i32
    %5 = arith.andi %3, %4 : i1
    %6 = arith.extui %5 : i1 to i32
    %c0_i32_3 = arith.constant 0 : i32
    %7 = arith.cmpi ne, %6, %c0_i32_3 : i32
    scf.if %7 {
      %cst_13 = arith.constant 0.000000e+00 : f32
      %17 = vector.broadcast %cst_13 : f32 to vector<2x8xf32>
      %c0_14 = arith.constant 0 : index
      %c0_15 = arith.constant 0 : index
      %18 = vector.load %arg7[%c0_14, %c0_15] : memref<2x8xf32, #tpu.memory_space<vmem>>, vector<2x8xf32>
      tpu.vector_store %arg7[%c0_14, %c0_15], %17 {strides = array<i32>} : memref<2x8xf32, #tpu.memory_space<vmem>>, vector<2x8xf32>,
    } else {
    }
    %c0 = arith.constant 0 : index
    %c0_4 = arith.constant 0 : index
    %8 = vector.load %arg8[%c0, %c0_4] : memref<128x8xf32, #tpu.memory_space<vmem>>, vector<128x8xf32>
    %c0_5 = arith.constant 0 : index
    %c0_6 = arith.constant 0 : index
    %9 = vector.load %arg3[%c0_5, %c0_6] : memref<128x147xbf16, #tpu.memory_space<vmem>>, vector<128x147xbf16>
    %c0_7 = arith.constant 0 : index
    %c0_8 = arith.constant 0 : index
    %10 = vector.load %arg4[%c0_7, %c0_8] : memref<147x8xbf16, #tpu.memory_space<vmem>>, vector<147x8xbf16>
    %cst = arith.constant dense<0.000000e+00> : vector<128x8xf32>
    %11 = tpu.matmul %9, %10, %cst {dimension_numbers = #tpu.dot_dimension_numbers<[1], [0], [0], [1], [0, 0, 1, 1], [], []>} : vector<128x147xbf16>, vector<147x8xbf16>, vector<128x8xf32> -> vector<128x8xf32>
    %12 = arith.addf %8, %11 : vector<128x8xf32>
    %c0_9 = arith.constant 0 : index
    %c0_10 = arith.constant 0 : index
    %13 = vector.load %arg8[%c0_9, %c0_10] : memref<128x8xf32, #tpu.memory_space<vmem>>, vector<128x8xf32>
    tpu.vector_store %arg8[%c0_9, %c0_10], %12 {strides = array<i32>} : memref<128x8xf32, #tpu.memory_space<vmem>>, vector<128x8xf32>,
    %c0_i32_11 = arith.constant 0 : i32
    %14 = arith.cmpi eq, %arg2, %c0_i32_11 : i32
    %15 = arith.extui %14 : i1 to i32
    %c0_i32_12 = arith.constant 0 : i32
    %16 = arith.cmpi ne, %15, %c0_i32_12 : i32
    scf.if %16 {
      %c0_13 = arith.constant 0 : index
      %c0_14 = arith.constant 0 : index
      %17 = vector.load %arg8[%c0_13, %c0_14] : memref<128x8xf32, #tpu.memory_space<vmem>>, vector<128x8xf32>
      %c0_15 = arith.constant 0 : index
      %c0_16 = arith.constant 0 : index
      %18 = vector.load %arg5[%c0_15, %c0_16] : memref<1x8xf32, #tpu.memory_space<vmem>>, vector<1x8xf32>
      %19 = vector.broadcast %18 : vector<1x8xf32> to vector<128x8xf32>
      %20 = arith.addf %17, %19 : vector<128x8xf32>
      %c0_17 = arith.constant 0 : index
      %c0_18 = arith.constant 0 : index
      %21 = vector.load %arg6[%c0_17, %c0_18] : memref<128x8xf32, #tpu.memory_space<vmem>>, vector<128x8xf32>
      tpu.vector_store %arg6[%c0_17, %c0_18], %20 {strides = array<i32>} : memref<128x8xf32, #tpu.memory_space<vmem>>, vector<128x8xf32>,
      %c0_19 = arith.constant 0 : index
      %c0_20 = arith.constant 0 : index
      %22 = vector.load %arg7[%c0_19, %c0_20] : memref<2x8xf32, #tpu.memory_space<vmem>>, vector<2x8xf32>
      %cst_21 = arith.constant dense<0.000000e+00> : vector<8xf32>
      %23 = vector.multi_reduction <add>, %20, %cst_21 [0] : vector<128x8xf32> to vector<8xf32>
      %24 = vector.shape_cast %23 : vector<8xf32> to vector<1x8xf32>
      %25 = arith.mulf %20, %20 : vector<128x8xf32>
      %cst_22 = arith.constant dense<0.000000e+00> : vector<8xf32>
      %26 = vector.multi_reduction <add>, %25, %cst_22 [0] : vector<128x8xf32> to vector<8xf32>
      %27 = vector.shape_cast %26 : vector<8xf32> to vector<1x8xf32>
      %28 = tpu.concatenate %24, %27 in 0 : vector<1x8xf32>, vector<1x8xf32> -> vector<2x8xf32>
      %29 = arith.addf %22, %28 : vector<2x8xf32>
      %c0_23 = arith.constant 0 : index
      %c0_24 = arith.constant 0 : index
      %30 = vector.load %arg7[%c0_23, %c0_24] : memref<2x8xf32, #tpu.memory_space<vmem>>, vector<2x8xf32>
      tpu.vector_store %arg7[%c0_23, %c0_24], %29 {strides = array<i32>} : memref<2x8xf32, #tpu.memory_space<vmem>>, vector<2x8xf32>,
    } else {
    }
    return
  }
  func.func @transform_0(%arg0: i32, %arg1: i32, %arg2: i32) -> (i32, i32) {
    %c0_i32 = arith.constant 0 : i32
    return %arg1, %arg2 : i32, i32
  }
  func.func @transform_1(%arg0: i32, %arg1: i32, %arg2: i32) -> (i32, i32) {
    %c0_i32 = arith.constant 0 : i32
    return %arg2, %arg0 : i32, i32
  }
  func.func @transform_2(%arg0: i32, %arg1: i32, %arg2: i32) -> (i32, i32) {
    %c0_i32 = arith.constant 0 : i32
    %c0_i32_0 = arith.constant 0 : i32
    return %c0_i32, %arg0 : i32, i32
  }
  func.func @transform_3(%arg0: i32, %arg1: i32, %arg2: i32) -> (i32, i32) {
    %c0_i32 = arith.constant 0 : i32
    return %arg1, %arg0 : i32, i32
  }
  func.func @transform_4(%arg0: i32, %arg1: i32, %arg2: i32) -> (i32, i32) {
    %c0_i32 = arith.constant 0 : i32
    %c0_i32_0 = arith.constant 0 : i32
    return %c0_i32, %arg0 : i32, i32
  }
}

module attributes {stable_mosaic.version = 11 : i64} {
  func.func @_bn_apply_kernel(%arg0: i32, %arg1: memref<128x8xf32, #tpu.memory_space<vmem>>, %arg2: memref<1x8xf32, #tpu.memory_space<vmem>>, %arg3: memref<1x8xf32, #tpu.memory_space<vmem>>, %arg4: memref<128x8xf32, #tpu.memory_space<vmem>>) attributes {dimension_semantics = [#tpu.dimension_semantics<parallel>], iteration_bounds = array<i64: 1>, scalar_prefetch = 0 : i64, scratch_operands = 0 : i64, tpu.core_type = #tpu.core_type<tc>, window_params = [{transform_indices = @transform_0, window_bounds = array<i64: 128, 8>}, {pipeline_mode = #tpu.pipeline_mode<synchronous>, transform_indices = @transform_1, window_bounds = array<i64: 1, 8>}, {pipeline_mode = #tpu.pipeline_mode<synchronous>, transform_indices = @transform_2, window_bounds = array<i64: 1, 8>}, {transform_indices = @transform_3, window_bounds = array<i64: 128, 8>}]} {
    %c0 = arith.constant 0 : index
    %c0_0 = arith.constant 0 : index
    %0 = vector.load %arg1[%c0, %c0_0] : memref<128x8xf32, #tpu.memory_space<vmem>>, vector<128x8xf32>
    %c0_1 = arith.constant 0 : index
    %c0_2 = arith.constant 0 : index
    %1 = vector.load %arg2[%c0_1, %c0_2] : memref<1x8xf32, #tpu.memory_space<vmem>>, vector<1x8xf32>
    %2 = vector.broadcast %1 : vector<1x8xf32> to vector<128x8xf32>
    %3 = arith.mulf %0, %2 : vector<128x8xf32>
    %c0_3 = arith.constant 0 : index
    %c0_4 = arith.constant 0 : index
    %4 = vector.load %arg3[%c0_3, %c0_4] : memref<1x8xf32, #tpu.memory_space<vmem>>, vector<1x8xf32>
    %5 = vector.broadcast %4 : vector<1x8xf32> to vector<128x8xf32>
    %6 = arith.addf %3, %5 : vector<128x8xf32>
    %cst = arith.constant 0.000000e+00 : f32
    %7 = vector.broadcast %cst : f32 to vector<128x8xf32>
    %8 = arith.maximumf %6, %7 : vector<128x8xf32>
    %c0_5 = arith.constant 0 : index
    %c0_6 = arith.constant 0 : index
    %9 = vector.load %arg4[%c0_5, %c0_6] : memref<128x8xf32, #tpu.memory_space<vmem>>, vector<128x8xf32>
    tpu.vector_store %arg4[%c0_5, %c0_6], %8 {strides = array<i32>} : memref<128x8xf32, #tpu.memory_space<vmem>>, vector<128x8xf32>,
    return
  }
  func.func @transform_0(%arg0: i32) -> (i32, i32) {
    %c0_i32 = arith.constant 0 : i32
    %c0_i32_0 = arith.constant 0 : i32
    return %arg0, %c0_i32 : i32, i32
  }
  func.func @transform_1(%arg0: i32) -> (i32, i32) {
    %c0_i32 = arith.constant 0 : i32
    %c0_i32_0 = arith.constant 0 : i32
    %c0_i32_1 = arith.constant 0 : i32
    return %c0_i32, %c0_i32_0 : i32, i32
  }
  func.func @transform_2(%arg0: i32) -> (i32, i32) {
    %c0_i32 = arith.constant 0 : i32
    %c0_i32_0 = arith.constant 0 : i32
    %c0_i32_1 = arith.constant 0 : i32
    return %c0_i32, %c0_i32_0 : i32, i32
  }
  func.func @transform_3(%arg0: i32) -> (i32, i32) {
    %c0_i32 = arith.constant 0 : i32
    %c0_i32_0 = arith.constant 0 : i32
    return %arg0, %c0_i32 : i32, i32
  }
}

module attributes {stable_mosaic.version = 11 : i64} {
  func.func @_bn_apply_kernel(%arg0: i32, %arg1: memref<32x16xf32, #tpu.memory_space<vmem>>, %arg2: memref<1x16xf32, #tpu.memory_space<vmem>>, %arg3: memref<1x16xf32, #tpu.memory_space<vmem>>, %arg4: memref<32x16xf32, #tpu.memory_space<vmem>>) attributes {dimension_semantics = [#tpu.dimension_semantics<parallel>], iteration_bounds = array<i64: 1>, scalar_prefetch = 0 : i64, scratch_operands = 0 : i64, tpu.core_type = #tpu.core_type<tc>, window_params = [{transform_indices = @transform_0, window_bounds = array<i64: 32, 16>}, {pipeline_mode = #tpu.pipeline_mode<synchronous>, transform_indices = @transform_1, window_bounds = array<i64: 1, 16>}, {pipeline_mode = #tpu.pipeline_mode<synchronous>, transform_indices = @transform_2, window_bounds = array<i64: 1, 16>}, {transform_indices = @transform_3, window_bounds = array<i64: 32, 16>}]} {
    %c0 = arith.constant 0 : index
    %c0_0 = arith.constant 0 : index
    %0 = vector.load %arg1[%c0, %c0_0] : memref<32x16xf32, #tpu.memory_space<vmem>>, vector<32x16xf32>
    %c0_1 = arith.constant 0 : index
    %c0_2 = arith.constant 0 : index
    %1 = vector.load %arg2[%c0_1, %c0_2] : memref<1x16xf32, #tpu.memory_space<vmem>>, vector<1x16xf32>
    %2 = vector.broadcast %1 : vector<1x16xf32> to vector<32x16xf32>
    %3 = arith.mulf %0, %2 : vector<32x16xf32>
    %c0_3 = arith.constant 0 : index
    %c0_4 = arith.constant 0 : index
    %4 = vector.load %arg3[%c0_3, %c0_4] : memref<1x16xf32, #tpu.memory_space<vmem>>, vector<1x16xf32>
    %5 = vector.broadcast %4 : vector<1x16xf32> to vector<32x16xf32>
    %6 = arith.addf %3, %5 : vector<32x16xf32>
    %cst = arith.constant 0.000000e+00 : f32
    %7 = vector.broadcast %cst : f32 to vector<32x16xf32>
    %8 = arith.maximumf %6, %7 : vector<32x16xf32>
    %c0_5 = arith.constant 0 : index
    %c0_6 = arith.constant 0 : index
    %9 = vector.load %arg4[%c0_5, %c0_6] : memref<32x16xf32, #tpu.memory_space<vmem>>, vector<32x16xf32>
    tpu.vector_store %arg4[%c0_5, %c0_6], %8 {strides = array<i32>} : memref<32x16xf32, #tpu.memory_space<vmem>>, vector<32x16xf32>,
    return
  }
  func.func @transform_0(%arg0: i32) -> (i32, i32) {
    %c0_i32 = arith.constant 0 : i32
    %c0_i32_0 = arith.constant 0 : i32
    return %arg0, %c0_i32 : i32, i32
  }
  func.func @transform_1(%arg0: i32) -> (i32, i32) {
    %c0_i32 = arith.constant 0 : i32
    %c0_i32_0 = arith.constant 0 : i32
    %c0_i32_1 = arith.constant 0 : i32
    return %c0_i32, %c0_i32_0 : i32, i32
  }
  func.func @transform_2(%arg0: i32) -> (i32, i32) {
    %c0_i32 = arith.constant 0 : i32
    %c0_i32_0 = arith.constant 0 : i32
    %c0_i32_1 = arith.constant 0 : i32
    return %c0_i32, %c0_i32_0 : i32, i32
  }
  func.func @transform_3(%arg0: i32) -> (i32, i32) {
    %c0_i32 = arith.constant 0 : i32
    %c0_i32_0 = arith.constant 0 : i32
    return %arg0, %c0_i32 : i32, i32
  }
}

module attributes {stable_mosaic.version = 11 : i64} {
  func.func @_mm_bias_stats_kernel(%arg0: i32, %arg1: i32, %arg2: i32, %arg3: memref<32x72xbf16, #tpu.memory_space<vmem>>, %arg4: memref<72x16xbf16, #tpu.memory_space<vmem>>, %arg5: memref<1x16xf32, #tpu.memory_space<vmem>>, %arg6: memref<32x16xf32, #tpu.memory_space<vmem>>, %arg7: memref<2x16xf32, #tpu.memory_space<vmem>>, %arg8: memref<32x16xf32, #tpu.memory_space<vmem>>) attributes {dimension_semantics = [#tpu.dimension_semantics<parallel>, #tpu.dimension_semantics<arbitrary>, #tpu.dimension_semantics<arbitrary>], iteration_bounds = array<i64: 1, 1, 1>, scalar_prefetch = 0 : i64, scratch_operands = 1 : i64, tpu.core_type = #tpu.core_type<tc>, window_params = [{transform_indices = @transform_0, window_bounds = array<i64: 32, 72>}, {transform_indices = @transform_1, window_bounds = array<i64: 72, 16>}, {transform_indices = @transform_2, window_bounds = array<i64: 1, 16>}, {transform_indices = @transform_3, window_bounds = array<i64: 32, 16>}, {transform_indices = @transform_4, window_bounds = array<i64: 2, 16>}]} {
    %c0_i32 = arith.constant 0 : i32
    %0 = arith.cmpi eq, %arg2, %c0_i32 : i32
    %1 = arith.extui %0 : i1 to i32
    %c0_i32_0 = arith.constant 0 : i32
    %2 = arith.cmpi ne, %1, %c0_i32_0 : i32
    scf.if %2 {
      %cst_13 = arith.constant 0.000000e+00 : f32
      %17 = vector.broadcast %cst_13 : f32 to vector<32x16xf32>
      %c0_14 = arith.constant 0 : index
      %c0_15 = arith.constant 0 : index
      %18 = vector.load %arg8[%c0_14, %c0_15] : memref<32x16xf32, #tpu.memory_space<vmem>>, vector<32x16xf32>
      tpu.vector_store %arg8[%c0_14, %c0_15], %17 {strides = array<i32>} : memref<32x16xf32, #tpu.memory_space<vmem>>, vector<32x16xf32>,
    } else {
    }
    %c0_i32_1 = arith.constant 0 : i32
    %3 = arith.cmpi eq, %arg1, %c0_i32_1 : i32
    %c0_i32_2 = arith.constant 0 : i32
    %4 = arith.cmpi eq, %arg2, %c0_i32_2 : i32
    %5 = arith.andi %3, %4 : i1
    %6 = arith.extui %5 : i1 to i32
    %c0_i32_3 = arith.constant 0 : i32
    %7 = arith.cmpi ne, %6, %c0_i32_3 : i32
    scf.if %7 {
      %cst_13 = arith.constant 0.000000e+00 : f32
      %17 = vector.broadcast %cst_13 : f32 to vector<2x16xf32>
      %c0_14 = arith.constant 0 : index
      %c0_15 = arith.constant 0 : index
      %18 = vector.load %arg7[%c0_14, %c0_15] : memref<2x16xf32, #tpu.memory_space<vmem>>, vector<2x16xf32>
      tpu.vector_store %arg7[%c0_14, %c0_15], %17 {strides = array<i32>} : memref<2x16xf32, #tpu.memory_space<vmem>>, vector<2x16xf32>,
    } else {
    }
    %c0 = arith.constant 0 : index
    %c0_4 = arith.constant 0 : index
    %8 = vector.load %arg8[%c0, %c0_4] : memref<32x16xf32, #tpu.memory_space<vmem>>, vector<32x16xf32>
    %c0_5 = arith.constant 0 : index
    %c0_6 = arith.constant 0 : index
    %9 = vector.load %arg3[%c0_5, %c0_6] : memref<32x72xbf16, #tpu.memory_space<vmem>>, vector<32x72xbf16>
    %c0_7 = arith.constant 0 : index
    %c0_8 = arith.constant 0 : index
    %10 = vector.load %arg4[%c0_7, %c0_8] : memref<72x16xbf16, #tpu.memory_space<vmem>>, vector<72x16xbf16>
    %cst = arith.constant dense<0.000000e+00> : vector<32x16xf32>
    %11 = tpu.matmul %9, %10, %cst {dimension_numbers = #tpu.dot_dimension_numbers<[1], [0], [0], [1], [0, 0, 1, 1], [], []>} : vector<32x72xbf16>, vector<72x16xbf16>, vector<32x16xf32> -> vector<32x16xf32>
    %12 = arith.addf %8, %11 : vector<32x16xf32>
    %c0_9 = arith.constant 0 : index
    %c0_10 = arith.constant 0 : index
    %13 = vector.load %arg8[%c0_9, %c0_10] : memref<32x16xf32, #tpu.memory_space<vmem>>, vector<32x16xf32>
    tpu.vector_store %arg8[%c0_9, %c0_10], %12 {strides = array<i32>} : memref<32x16xf32, #tpu.memory_space<vmem>>, vector<32x16xf32>,
    %c0_i32_11 = arith.constant 0 : i32
    %14 = arith.cmpi eq, %arg2, %c0_i32_11 : i32
    %15 = arith.extui %14 : i1 to i32
    %c0_i32_12 = arith.constant 0 : i32
    %16 = arith.cmpi ne, %15, %c0_i32_12 : i32
    scf.if %16 {
      %c0_13 = arith.constant 0 : index
      %c0_14 = arith.constant 0 : index
      %17 = vector.load %arg8[%c0_13, %c0_14] : memref<32x16xf32, #tpu.memory_space<vmem>>, vector<32x16xf32>
      %c0_15 = arith.constant 0 : index
      %c0_16 = arith.constant 0 : index
      %18 = vector.load %arg5[%c0_15, %c0_16] : memref<1x16xf32, #tpu.memory_space<vmem>>, vector<1x16xf32>
      %19 = vector.broadcast %18 : vector<1x16xf32> to vector<32x16xf32>
      %20 = arith.addf %17, %19 : vector<32x16xf32>
      %c0_17 = arith.constant 0 : index
      %c0_18 = arith.constant 0 : index
      %21 = vector.load %arg6[%c0_17, %c0_18] : memref<32x16xf32, #tpu.memory_space<vmem>>, vector<32x16xf32>
      tpu.vector_store %arg6[%c0_17, %c0_18], %20 {strides = array<i32>} : memref<32x16xf32, #tpu.memory_space<vmem>>, vector<32x16xf32>,
      %c0_19 = arith.constant 0 : index
      %c0_20 = arith.constant 0 : index
      %22 = vector.load %arg7[%c0_19, %c0_20] : memref<2x16xf32, #tpu.memory_space<vmem>>, vector<2x16xf32>
      %cst_21 = arith.constant dense<0.000000e+00> : vector<16xf32>
      %23 = vector.multi_reduction <add>, %20, %cst_21 [0] : vector<32x16xf32> to vector<16xf32>
      %24 = vector.shape_cast %23 : vector<16xf32> to vector<1x16xf32>
      %25 = arith.mulf %20, %20 : vector<32x16xf32>
      %cst_22 = arith.constant dense<0.000000e+00> : vector<16xf32>
      %26 = vector.multi_reduction <add>, %25, %cst_22 [0] : vector<32x16xf32> to vector<16xf32>
      %27 = vector.shape_cast %26 : vector<16xf32> to vector<1x16xf32>
      %28 = tpu.concatenate %24, %27 in 0 : vector<1x16xf32>, vector<1x16xf32> -> vector<2x16xf32>
      %29 = arith.addf %22, %28 : vector<2x16xf32>
      %c0_23 = arith.constant 0 : index
      %c0_24 = arith.constant 0 : index
      %30 = vector.load %arg7[%c0_23, %c0_24] : memref<2x16xf32, #tpu.memory_space<vmem>>, vector<2x16xf32>
      tpu.vector_store %arg7[%c0_23, %c0_24], %29 {strides = array<i32>} : memref<2x16xf32, #tpu.memory_space<vmem>>, vector<2x16xf32>,
    } else {
    }
    return
  }
  func.func @transform_0(%arg0: i32, %arg1: i32, %arg2: i32) -> (i32, i32) {
    %c0_i32 = arith.constant 0 : i32
    return %arg1, %arg2 : i32, i32
  }
  func.func @transform_1(%arg0: i32, %arg1: i32, %arg2: i32) -> (i32, i32) {
    %c0_i32 = arith.constant 0 : i32
    return %arg2, %arg0 : i32, i32
  }
  func.func @transform_2(%arg0: i32, %arg1: i32, %arg2: i32) -> (i32, i32) {
    %c0_i32 = arith.constant 0 : i32
    %c0_i32_0 = arith.constant 0 : i32
    return %c0_i32, %arg0 : i32, i32
  }
  func.func @transform_3(%arg0: i32, %arg1: i32, %arg2: i32) -> (i32, i32) {
    %c0_i32 = arith.constant 0 : i32
    return %arg1, %arg0 : i32, i32
  }
  func.func @transform_4(%arg0: i32, %arg1: i32, %arg2: i32) -> (i32, i32) {
    %c0_i32 = arith.constant 0 : i32
    %c0_i32_0 = arith.constant 0 : i32
    return %c0_i32, %arg0 : i32, i32
  }
}

module attributes {stable_mosaic.version = 11 : i64} {
  func.func @_mm_bias_stats_kernel(%arg0: i32, %arg1: i32, %arg2: i32, %arg3: memref<32x144xbf16, #tpu.memory_space<vmem>>, %arg4: memref<144x16xbf16, #tpu.memory_space<vmem>>, %arg5: memref<1x16xf32, #tpu.memory_space<vmem>>, %arg6: memref<32x16xf32, #tpu.memory_space<vmem>>, %arg7: memref<2x16xf32, #tpu.memory_space<vmem>>, %arg8: memref<32x16xf32, #tpu.memory_space<vmem>>) attributes {dimension_semantics = [#tpu.dimension_semantics<parallel>, #tpu.dimension_semantics<arbitrary>, #tpu.dimension_semantics<arbitrary>], iteration_bounds = array<i64: 1, 1, 1>, scalar_prefetch = 0 : i64, scratch_operands = 1 : i64, tpu.core_type = #tpu.core_type<tc>, window_params = [{transform_indices = @transform_0, window_bounds = array<i64: 32, 144>}, {transform_indices = @transform_1, window_bounds = array<i64: 144, 16>}, {transform_indices = @transform_2, window_bounds = array<i64: 1, 16>}, {transform_indices = @transform_3, window_bounds = array<i64: 32, 16>}, {transform_indices = @transform_4, window_bounds = array<i64: 2, 16>}]} {
    %c0_i32 = arith.constant 0 : i32
    %0 = arith.cmpi eq, %arg2, %c0_i32 : i32
    %1 = arith.extui %0 : i1 to i32
    %c0_i32_0 = arith.constant 0 : i32
    %2 = arith.cmpi ne, %1, %c0_i32_0 : i32
    scf.if %2 {
      %cst_13 = arith.constant 0.000000e+00 : f32
      %17 = vector.broadcast %cst_13 : f32 to vector<32x16xf32>
      %c0_14 = arith.constant 0 : index
      %c0_15 = arith.constant 0 : index
      %18 = vector.load %arg8[%c0_14, %c0_15] : memref<32x16xf32, #tpu.memory_space<vmem>>, vector<32x16xf32>
      tpu.vector_store %arg8[%c0_14, %c0_15], %17 {strides = array<i32>} : memref<32x16xf32, #tpu.memory_space<vmem>>, vector<32x16xf32>,
    } else {
    }
    %c0_i32_1 = arith.constant 0 : i32
    %3 = arith.cmpi eq, %arg1, %c0_i32_1 : i32
    %c0_i32_2 = arith.constant 0 : i32
    %4 = arith.cmpi eq, %arg2, %c0_i32_2 : i32
    %5 = arith.andi %3, %4 : i1
    %6 = arith.extui %5 : i1 to i32
    %c0_i32_3 = arith.constant 0 : i32
    %7 = arith.cmpi ne, %6, %c0_i32_3 : i32
    scf.if %7 {
      %cst_13 = arith.constant 0.000000e+00 : f32
      %17 = vector.broadcast %cst_13 : f32 to vector<2x16xf32>
      %c0_14 = arith.constant 0 : index
      %c0_15 = arith.constant 0 : index
      %18 = vector.load %arg7[%c0_14, %c0_15] : memref<2x16xf32, #tpu.memory_space<vmem>>, vector<2x16xf32>
      tpu.vector_store %arg7[%c0_14, %c0_15], %17 {strides = array<i32>} : memref<2x16xf32, #tpu.memory_space<vmem>>, vector<2x16xf32>,
    } else {
    }
    %c0 = arith.constant 0 : index
    %c0_4 = arith.constant 0 : index
    %8 = vector.load %arg8[%c0, %c0_4] : memref<32x16xf32, #tpu.memory_space<vmem>>, vector<32x16xf32>
    %c0_5 = arith.constant 0 : index
    %c0_6 = arith.constant 0 : index
    %9 = vector.load %arg3[%c0_5, %c0_6] : memref<32x144xbf16, #tpu.memory_space<vmem>>, vector<32x144xbf16>
    %c0_7 = arith.constant 0 : index
    %c0_8 = arith.constant 0 : index
    %10 = vector.load %arg4[%c0_7, %c0_8] : memref<144x16xbf16, #tpu.memory_space<vmem>>, vector<144x16xbf16>
    %cst = arith.constant dense<0.000000e+00> : vector<32x16xf32>
    %11 = tpu.matmul %9, %10, %cst {dimension_numbers = #tpu.dot_dimension_numbers<[1], [0], [0], [1], [0, 0, 1, 1], [], []>} : vector<32x144xbf16>, vector<144x16xbf16>, vector<32x16xf32> -> vector<32x16xf32>
    %12 = arith.addf %8, %11 : vector<32x16xf32>
    %c0_9 = arith.constant 0 : index
    %c0_10 = arith.constant 0 : index
    %13 = vector.load %arg8[%c0_9, %c0_10] : memref<32x16xf32, #tpu.memory_space<vmem>>, vector<32x16xf32>
    tpu.vector_store %arg8[%c0_9, %c0_10], %12 {strides = array<i32>} : memref<32x16xf32, #tpu.memory_space<vmem>>, vector<32x16xf32>,
    %c0_i32_11 = arith.constant 0 : i32
    %14 = arith.cmpi eq, %arg2, %c0_i32_11 : i32
    %15 = arith.extui %14 : i1 to i32
    %c0_i32_12 = arith.constant 0 : i32
    %16 = arith.cmpi ne, %15, %c0_i32_12 : i32
    scf.if %16 {
      %c0_13 = arith.constant 0 : index
      %c0_14 = arith.constant 0 : index
      %17 = vector.load %arg8[%c0_13, %c0_14] : memref<32x16xf32, #tpu.memory_space<vmem>>, vector<32x16xf32>
      %c0_15 = arith.constant 0 : index
      %c0_16 = arith.constant 0 : index
      %18 = vector.load %arg5[%c0_15, %c0_16] : memref<1x16xf32, #tpu.memory_space<vmem>>, vector<1x16xf32>
      %19 = vector.broadcast %18 : vector<1x16xf32> to vector<32x16xf32>
      %20 = arith.addf %17, %19 : vector<32x16xf32>
      %c0_17 = arith.constant 0 : index
      %c0_18 = arith.constant 0 : index
      %21 = vector.load %arg6[%c0_17, %c0_18] : memref<32x16xf32, #tpu.memory_space<vmem>>, vector<32x16xf32>
      tpu.vector_store %arg6[%c0_17, %c0_18], %20 {strides = array<i32>} : memref<32x16xf32, #tpu.memory_space<vmem>>, vector<32x16xf32>,
      %c0_19 = arith.constant 0 : index
      %c0_20 = arith.constant 0 : index
      %22 = vector.load %arg7[%c0_19, %c0_20] : memref<2x16xf32, #tpu.memory_space<vmem>>, vector<2x16xf32>
      %cst_21 = arith.constant dense<0.000000e+00> : vector<16xf32>
      %23 = vector.multi_reduction <add>, %20, %cst_21 [0] : vector<32x16xf32> to vector<16xf32>
      %24 = vector.shape_cast %23 : vector<16xf32> to vector<1x16xf32>
      %25 = arith.mulf %20, %20 : vector<32x16xf32>
      %cst_22 = arith.constant dense<0.000000e+00> : vector<16xf32>
      %26 = vector.multi_reduction <add>, %25, %cst_22 [0] : vector<32x16xf32> to vector<16xf32>
      %27 = vector.shape_cast %26 : vector<16xf32> to vector<1x16xf32>
      %28 = tpu.concatenate %24, %27 in 0 : vector<1x16xf32>, vector<1x16xf32> -> vector<2x16xf32>
      %29 = arith.addf %22, %28 : vector<2x16xf32>
      %c0_23 = arith.constant 0 : index
      %c0_24 = arith.constant 0 : index
      %30 = vector.load %arg7[%c0_23, %c0_24] : memref<2x16xf32, #tpu.memory_space<vmem>>, vector<2x16xf32>
      tpu.vector_store %arg7[%c0_23, %c0_24], %29 {strides = array<i32>} : memref<2x16xf32, #tpu.memory_space<vmem>>, vector<2x16xf32>,
    } else {
    }
    return
  }
  func.func @transform_0(%arg0: i32, %arg1: i32, %arg2: i32) -> (i32, i32) {
    %c0_i32 = arith.constant 0 : i32
    return %arg1, %arg2 : i32, i32
  }
  func.func @transform_1(%arg0: i32, %arg1: i32, %arg2: i32) -> (i32, i32) {
    %c0_i32 = arith.constant 0 : i32
    return %arg2, %arg0 : i32, i32
  }
  func.func @transform_2(%arg0: i32, %arg1: i32, %arg2: i32) -> (i32, i32) {
    %c0_i32 = arith.constant 0 : i32
    %c0_i32_0 = arith.constant 0 : i32
    return %c0_i32, %arg0 : i32, i32
  }
  func.func @transform_3(%arg0: i32, %arg1: i32, %arg2: i32) -> (i32, i32) {
    %c0_i32 = arith.constant 0 : i32
    return %arg1, %arg0 : i32, i32
  }
  func.func @transform_4(%arg0: i32, %arg1: i32, %arg2: i32) -> (i32, i32) {
    %c0_i32 = arith.constant 0 : i32
    %c0_i32_0 = arith.constant 0 : i32
    return %c0_i32, %arg0 : i32, i32
  }
}

module attributes {stable_mosaic.version = 11 : i64} {
  func.func @_bn_apply_res_kernel(%arg0: i32, %arg1: memref<32x16xf32, #tpu.memory_space<vmem>>, %arg2: memref<1x16xf32, #tpu.memory_space<vmem>>, %arg3: memref<1x16xf32, #tpu.memory_space<vmem>>, %arg4: memref<32x16xf32, #tpu.memory_space<vmem>>, %arg5: memref<32x16xf32, #tpu.memory_space<vmem>>) attributes {dimension_semantics = [#tpu.dimension_semantics<parallel>], iteration_bounds = array<i64: 1>, scalar_prefetch = 0 : i64, scratch_operands = 0 : i64, tpu.core_type = #tpu.core_type<tc>, window_params = [{transform_indices = @transform_0, window_bounds = array<i64: 32, 16>}, {pipeline_mode = #tpu.pipeline_mode<synchronous>, transform_indices = @transform_1, window_bounds = array<i64: 1, 16>}, {pipeline_mode = #tpu.pipeline_mode<synchronous>, transform_indices = @transform_2, window_bounds = array<i64: 1, 16>}, {transform_indices = @transform_3, window_bounds = array<i64: 32, 16>}, {transform_indices = @transform_4, window_bounds = array<i64: 32, 16>}]} {
    %c0 = arith.constant 0 : index
    %c0_0 = arith.constant 0 : index
    %0 = vector.load %arg1[%c0, %c0_0] : memref<32x16xf32, #tpu.memory_space<vmem>>, vector<32x16xf32>
    %c0_1 = arith.constant 0 : index
    %c0_2 = arith.constant 0 : index
    %1 = vector.load %arg2[%c0_1, %c0_2] : memref<1x16xf32, #tpu.memory_space<vmem>>, vector<1x16xf32>
    %2 = vector.broadcast %1 : vector<1x16xf32> to vector<32x16xf32>
    %3 = arith.mulf %0, %2 : vector<32x16xf32>
    %c0_3 = arith.constant 0 : index
    %c0_4 = arith.constant 0 : index
    %4 = vector.load %arg3[%c0_3, %c0_4] : memref<1x16xf32, #tpu.memory_space<vmem>>, vector<1x16xf32>
    %5 = vector.broadcast %4 : vector<1x16xf32> to vector<32x16xf32>
    %6 = arith.addf %3, %5 : vector<32x16xf32>
    %c0_5 = arith.constant 0 : index
    %c0_6 = arith.constant 0 : index
    %7 = vector.load %arg4[%c0_5, %c0_6] : memref<32x16xf32, #tpu.memory_space<vmem>>, vector<32x16xf32>
    %8 = arith.addf %6, %7 : vector<32x16xf32>
    %c0_7 = arith.constant 0 : index
    %c0_8 = arith.constant 0 : index
    %9 = vector.load %arg5[%c0_7, %c0_8] : memref<32x16xf32, #tpu.memory_space<vmem>>, vector<32x16xf32>
    tpu.vector_store %arg5[%c0_7, %c0_8], %8 {strides = array<i32>} : memref<32x16xf32, #tpu.memory_space<vmem>>, vector<32x16xf32>,
    return
  }
  func.func @transform_0(%arg0: i32) -> (i32, i32) {
    %c0_i32 = arith.constant 0 : i32
    %c0_i32_0 = arith.constant 0 : i32
    return %arg0, %c0_i32 : i32, i32
  }
  func.func @transform_1(%arg0: i32) -> (i32, i32) {
    %c0_i32 = arith.constant 0 : i32
    %c0_i32_0 = arith.constant 0 : i32
    %c0_i32_1 = arith.constant 0 : i32
    return %c0_i32, %c0_i32_0 : i32, i32
  }
  func.func @transform_2(%arg0: i32) -> (i32, i32) {
    %c0_i32 = arith.constant 0 : i32
    %c0_i32_0 = arith.constant 0 : i32
    %c0_i32_1 = arith.constant 0 : i32
    return %c0_i32, %c0_i32_0 : i32, i32
  }
  func.func @transform_3(%arg0: i32) -> (i32, i32) {
    %c0_i32 = arith.constant 0 : i32
    %c0_i32_0 = arith.constant 0 : i32
    return %arg0, %c0_i32 : i32, i32
  }
  func.func @transform_4(%arg0: i32) -> (i32, i32) {
    %c0_i32 = arith.constant 0 : i32
    %c0_i32_0 = arith.constant 0 : i32
    return %arg0, %c0_i32 : i32, i32
  }
}

module attributes {stable_mosaic.version = 11 : i64} {
  func.func @_bn_apply_kernel(%arg0: i32, %arg1: memref<32x32xf32, #tpu.memory_space<vmem>>, %arg2: memref<1x32xf32, #tpu.memory_space<vmem>>, %arg3: memref<1x32xf32, #tpu.memory_space<vmem>>, %arg4: memref<32x32xf32, #tpu.memory_space<vmem>>) attributes {dimension_semantics = [#tpu.dimension_semantics<parallel>], iteration_bounds = array<i64: 1>, scalar_prefetch = 0 : i64, scratch_operands = 0 : i64, tpu.core_type = #tpu.core_type<tc>, window_params = [{transform_indices = @transform_0, window_bounds = array<i64: 32, 32>}, {pipeline_mode = #tpu.pipeline_mode<synchronous>, transform_indices = @transform_1, window_bounds = array<i64: 1, 32>}, {pipeline_mode = #tpu.pipeline_mode<synchronous>, transform_indices = @transform_2, window_bounds = array<i64: 1, 32>}, {transform_indices = @transform_3, window_bounds = array<i64: 32, 32>}]} {
    %c0 = arith.constant 0 : index
    %c0_0 = arith.constant 0 : index
    %0 = vector.load %arg1[%c0, %c0_0] : memref<32x32xf32, #tpu.memory_space<vmem>>, vector<32x32xf32>
    %c0_1 = arith.constant 0 : index
    %c0_2 = arith.constant 0 : index
    %1 = vector.load %arg2[%c0_1, %c0_2] : memref<1x32xf32, #tpu.memory_space<vmem>>, vector<1x32xf32>
    %2 = vector.broadcast %1 : vector<1x32xf32> to vector<32x32xf32>
    %3 = arith.mulf %0, %2 : vector<32x32xf32>
    %c0_3 = arith.constant 0 : index
    %c0_4 = arith.constant 0 : index
    %4 = vector.load %arg3[%c0_3, %c0_4] : memref<1x32xf32, #tpu.memory_space<vmem>>, vector<1x32xf32>
    %5 = vector.broadcast %4 : vector<1x32xf32> to vector<32x32xf32>
    %6 = arith.addf %3, %5 : vector<32x32xf32>
    %cst = arith.constant 0.000000e+00 : f32
    %7 = vector.broadcast %cst : f32 to vector<32x32xf32>
    %8 = arith.maximumf %6, %7 : vector<32x32xf32>
    %c0_5 = arith.constant 0 : index
    %c0_6 = arith.constant 0 : index
    %9 = vector.load %arg4[%c0_5, %c0_6] : memref<32x32xf32, #tpu.memory_space<vmem>>, vector<32x32xf32>
    tpu.vector_store %arg4[%c0_5, %c0_6], %8 {strides = array<i32>} : memref<32x32xf32, #tpu.memory_space<vmem>>, vector<32x32xf32>,
    return
  }
  func.func @transform_0(%arg0: i32) -> (i32, i32) {
    %c0_i32 = arith.constant 0 : i32
    %c0_i32_0 = arith.constant 0 : i32
    return %arg0, %c0_i32 : i32, i32
  }
  func.func @transform_1(%arg0: i32) -> (i32, i32) {
    %c0_i32 = arith.constant 0 : i32
    %c0_i32_0 = arith.constant 0 : i32
    %c0_i32_1 = arith.constant 0 : i32
    return %c0_i32, %c0_i32_0 : i32, i32
  }
  func.func @transform_2(%arg0: i32) -> (i32, i32) {
    %c0_i32 = arith.constant 0 : i32
    %c0_i32_0 = arith.constant 0 : i32
    %c0_i32_1 = arith.constant 0 : i32
    return %c0_i32, %c0_i32_0 : i32, i32
  }
  func.func @transform_3(%arg0: i32) -> (i32, i32) {
    %c0_i32 = arith.constant 0 : i32
    %c0_i32_0 = arith.constant 0 : i32
    return %arg0, %c0_i32 : i32, i32
  }
}

module attributes {stable_mosaic.version = 11 : i64} {
  func.func @_mm_bias_stats_kernel(%arg0: i32, %arg1: i32, %arg2: i32, %arg3: memref<32x64xbf16, #tpu.memory_space<vmem>>, %arg4: memref<64x32xbf16, #tpu.memory_space<vmem>>, %arg5: memref<1x32xf32, #tpu.memory_space<vmem>>, %arg6: memref<32x32xf32, #tpu.memory_space<vmem>>, %arg7: memref<2x32xf32, #tpu.memory_space<vmem>>, %arg8: memref<32x32xf32, #tpu.memory_space<vmem>>) attributes {dimension_semantics = [#tpu.dimension_semantics<parallel>, #tpu.dimension_semantics<arbitrary>, #tpu.dimension_semantics<arbitrary>], iteration_bounds = array<i64: 1, 1, 1>, scalar_prefetch = 0 : i64, scratch_operands = 1 : i64, tpu.core_type = #tpu.core_type<tc>, window_params = [{transform_indices = @transform_0, window_bounds = array<i64: 32, 64>}, {transform_indices = @transform_1, window_bounds = array<i64: 64, 32>}, {transform_indices = @transform_2, window_bounds = array<i64: 1, 32>}, {transform_indices = @transform_3, window_bounds = array<i64: 32, 32>}, {transform_indices = @transform_4, window_bounds = array<i64: 2, 32>}]} {
    %c0_i32 = arith.constant 0 : i32
    %0 = arith.cmpi eq, %arg2, %c0_i32 : i32
    %1 = arith.extui %0 : i1 to i32
    %c0_i32_0 = arith.constant 0 : i32
    %2 = arith.cmpi ne, %1, %c0_i32_0 : i32
    scf.if %2 {
      %cst_13 = arith.constant 0.000000e+00 : f32
      %17 = vector.broadcast %cst_13 : f32 to vector<32x32xf32>
      %c0_14 = arith.constant 0 : index
      %c0_15 = arith.constant 0 : index
      %18 = vector.load %arg8[%c0_14, %c0_15] : memref<32x32xf32, #tpu.memory_space<vmem>>, vector<32x32xf32>
      tpu.vector_store %arg8[%c0_14, %c0_15], %17 {strides = array<i32>} : memref<32x32xf32, #tpu.memory_space<vmem>>, vector<32x32xf32>,
    } else {
    }
    %c0_i32_1 = arith.constant 0 : i32
    %3 = arith.cmpi eq, %arg1, %c0_i32_1 : i32
    %c0_i32_2 = arith.constant 0 : i32
    %4 = arith.cmpi eq, %arg2, %c0_i32_2 : i32
    %5 = arith.andi %3, %4 : i1
    %6 = arith.extui %5 : i1 to i32
    %c0_i32_3 = arith.constant 0 : i32
    %7 = arith.cmpi ne, %6, %c0_i32_3 : i32
    scf.if %7 {
      %cst_13 = arith.constant 0.000000e+00 : f32
      %17 = vector.broadcast %cst_13 : f32 to vector<2x32xf32>
      %c0_14 = arith.constant 0 : index
      %c0_15 = arith.constant 0 : index
      %18 = vector.load %arg7[%c0_14, %c0_15] : memref<2x32xf32, #tpu.memory_space<vmem>>, vector<2x32xf32>
      tpu.vector_store %arg7[%c0_14, %c0_15], %17 {strides = array<i32>} : memref<2x32xf32, #tpu.memory_space<vmem>>, vector<2x32xf32>,
    } else {
    }
    %c0 = arith.constant 0 : index
    %c0_4 = arith.constant 0 : index
    %8 = vector.load %arg8[%c0, %c0_4] : memref<32x32xf32, #tpu.memory_space<vmem>>, vector<32x32xf32>
    %c0_5 = arith.constant 0 : index
    %c0_6 = arith.constant 0 : index
    %9 = vector.load %arg3[%c0_5, %c0_6] : memref<32x64xbf16, #tpu.memory_space<vmem>>, vector<32x64xbf16>
    %c0_7 = arith.constant 0 : index
    %c0_8 = arith.constant 0 : index
    %10 = vector.load %arg4[%c0_7, %c0_8] : memref<64x32xbf16, #tpu.memory_space<vmem>>, vector<64x32xbf16>
    %cst = arith.constant dense<0.000000e+00> : vector<32x32xf32>
    %11 = tpu.matmul %9, %10, %cst {dimension_numbers = #tpu.dot_dimension_numbers<[1], [0], [0], [1], [0, 0, 1, 1], [], []>} : vector<32x64xbf16>, vector<64x32xbf16>, vector<32x32xf32> -> vector<32x32xf32>
    %12 = arith.addf %8, %11 : vector<32x32xf32>
    %c0_9 = arith.constant 0 : index
    %c0_10 = arith.constant 0 : index
    %13 = vector.load %arg8[%c0_9, %c0_10] : memref<32x32xf32, #tpu.memory_space<vmem>>, vector<32x32xf32>
    tpu.vector_store %arg8[%c0_9, %c0_10], %12 {strides = array<i32>} : memref<32x32xf32, #tpu.memory_space<vmem>>, vector<32x32xf32>,
    %c0_i32_11 = arith.constant 0 : i32
    %14 = arith.cmpi eq, %arg2, %c0_i32_11 : i32
    %15 = arith.extui %14 : i1 to i32
    %c0_i32_12 = arith.constant 0 : i32
    %16 = arith.cmpi ne, %15, %c0_i32_12 : i32
    scf.if %16 {
      %c0_13 = arith.constant 0 : index
      %c0_14 = arith.constant 0 : index
      %17 = vector.load %arg8[%c0_13, %c0_14] : memref<32x32xf32, #tpu.memory_space<vmem>>, vector<32x32xf32>
      %c0_15 = arith.constant 0 : index
      %c0_16 = arith.constant 0 : index
      %18 = vector.load %arg5[%c0_15, %c0_16] : memref<1x32xf32, #tpu.memory_space<vmem>>, vector<1x32xf32>
      %19 = vector.broadcast %18 : vector<1x32xf32> to vector<32x32xf32>
      %20 = arith.addf %17, %19 : vector<32x32xf32>
      %c0_17 = arith.constant 0 : index
      %c0_18 = arith.constant 0 : index
      %21 = vector.load %arg6[%c0_17, %c0_18] : memref<32x32xf32, #tpu.memory_space<vmem>>, vector<32x32xf32>
      tpu.vector_store %arg6[%c0_17, %c0_18], %20 {strides = array<i32>} : memref<32x32xf32, #tpu.memory_space<vmem>>, vector<32x32xf32>,
      %c0_19 = arith.constant 0 : index
      %c0_20 = arith.constant 0 : index
      %22 = vector.load %arg7[%c0_19, %c0_20] : memref<2x32xf32, #tpu.memory_space<vmem>>, vector<2x32xf32>
      %cst_21 = arith.constant dense<0.000000e+00> : vector<32xf32>
      %23 = vector.multi_reduction <add>, %20, %cst_21 [0] : vector<32x32xf32> to vector<32xf32>
      %24 = vector.shape_cast %23 : vector<32xf32> to vector<1x32xf32>
      %25 = arith.mulf %20, %20 : vector<32x32xf32>
      %cst_22 = arith.constant dense<0.000000e+00> : vector<32xf32>
      %26 = vector.multi_reduction <add>, %25, %cst_22 [0] : vector<32x32xf32> to vector<32xf32>
      %27 = vector.shape_cast %26 : vector<32xf32> to vector<1x32xf32>
      %28 = tpu.concatenate %24, %27 in 0 : vector<1x32xf32>, vector<1x32xf32> -> vector<2x32xf32>
      %29 = arith.addf %22, %28 : vector<2x32xf32>
      %c0_23 = arith.constant 0 : index
      %c0_24 = arith.constant 0 : index
      %30 = vector.load %arg7[%c0_23, %c0_24] : memref<2x32xf32, #tpu.memory_space<vmem>>, vector<2x32xf32>
      tpu.vector_store %arg7[%c0_23, %c0_24], %29 {strides = array<i32>} : memref<2x32xf32, #tpu.memory_space<vmem>>, vector<2x32xf32>,
    } else {
    }
    return
  }
  func.func @transform_0(%arg0: i32, %arg1: i32, %arg2: i32) -> (i32, i32) {
    %c0_i32 = arith.constant 0 : i32
    return %arg1, %arg2 : i32, i32
  }
  func.func @transform_1(%arg0: i32, %arg1: i32, %arg2: i32) -> (i32, i32) {
    %c0_i32 = arith.constant 0 : i32
    return %arg2, %arg0 : i32, i32
  }
  func.func @transform_2(%arg0: i32, %arg1: i32, %arg2: i32) -> (i32, i32) {
    %c0_i32 = arith.constant 0 : i32
    %c0_i32_0 = arith.constant 0 : i32
    return %c0_i32, %arg0 : i32, i32
  }
  func.func @transform_3(%arg0: i32, %arg1: i32, %arg2: i32) -> (i32, i32) {
    %c0_i32 = arith.constant 0 : i32
    return %arg1, %arg0 : i32, i32
  }
  func.func @transform_4(%arg0: i32, %arg1: i32, %arg2: i32) -> (i32, i32) {
    %c0_i32 = arith.constant 0 : i32
    %c0_i32_0 = arith.constant 0 : i32
    return %c0_i32, %arg0 : i32, i32
  }
}

module attributes {stable_mosaic.version = 11 : i64} {
  func.func @_bn_apply_res_kernel(%arg0: i32, %arg1: memref<128x8xf32, #tpu.memory_space<vmem>>, %arg2: memref<1x8xf32, #tpu.memory_space<vmem>>, %arg3: memref<1x8xf32, #tpu.memory_space<vmem>>, %arg4: memref<128x8xf32, #tpu.memory_space<vmem>>, %arg5: memref<128x8xf32, #tpu.memory_space<vmem>>) attributes {dimension_semantics = [#tpu.dimension_semantics<parallel>], iteration_bounds = array<i64: 1>, scalar_prefetch = 0 : i64, scratch_operands = 0 : i64, tpu.core_type = #tpu.core_type<tc>, window_params = [{transform_indices = @transform_0, window_bounds = array<i64: 128, 8>}, {pipeline_mode = #tpu.pipeline_mode<synchronous>, transform_indices = @transform_1, window_bounds = array<i64: 1, 8>}, {pipeline_mode = #tpu.pipeline_mode<synchronous>, transform_indices = @transform_2, window_bounds = array<i64: 1, 8>}, {transform_indices = @transform_3, window_bounds = array<i64: 128, 8>}, {transform_indices = @transform_4, window_bounds = array<i64: 128, 8>}]} {
    %c0 = arith.constant 0 : index
    %c0_0 = arith.constant 0 : index
    %0 = vector.load %arg1[%c0, %c0_0] : memref<128x8xf32, #tpu.memory_space<vmem>>, vector<128x8xf32>
    %c0_1 = arith.constant 0 : index
    %c0_2 = arith.constant 0 : index
    %1 = vector.load %arg2[%c0_1, %c0_2] : memref<1x8xf32, #tpu.memory_space<vmem>>, vector<1x8xf32>
    %2 = vector.broadcast %1 : vector<1x8xf32> to vector<128x8xf32>
    %3 = arith.mulf %0, %2 : vector<128x8xf32>
    %c0_3 = arith.constant 0 : index
    %c0_4 = arith.constant 0 : index
    %4 = vector.load %arg3[%c0_3, %c0_4] : memref<1x8xf32, #tpu.memory_space<vmem>>, vector<1x8xf32>
    %5 = vector.broadcast %4 : vector<1x8xf32> to vector<128x8xf32>
    %6 = arith.addf %3, %5 : vector<128x8xf32>
    %cst = arith.constant 0.000000e+00 : f32
    %7 = vector.broadcast %cst : f32 to vector<128x8xf32>
    %8 = arith.maximumf %6, %7 : vector<128x8xf32>
    %c0_5 = arith.constant 0 : index
    %c0_6 = arith.constant 0 : index
    %9 = vector.load %arg4[%c0_5, %c0_6] : memref<128x8xf32, #tpu.memory_space<vmem>>, vector<128x8xf32>
    %10 = arith.addf %8, %9 : vector<128x8xf32>
    %c0_7 = arith.constant 0 : index
    %c0_8 = arith.constant 0 : index
    %11 = vector.load %arg5[%c0_7, %c0_8] : memref<128x8xf32, #tpu.memory_space<vmem>>, vector<128x8xf32>
    tpu.vector_store %arg5[%c0_7, %c0_8], %10 {strides = array<i32>} : memref<128x8xf32, #tpu.memory_space<vmem>>, vector<128x8xf32>,
    return
  }
  func.func @transform_0(%arg0: i32) -> (i32, i32) {
    %c0_i32 = arith.constant 0 : i32
    %c0_i32_0 = arith.constant 0 : i32
    return %arg0, %c0_i32 : i32, i32
  }
  func.func @transform_1(%arg0: i32) -> (i32, i32) {
    %c0_i32 = arith.constant 0 : i32
    %c0_i32_0 = arith.constant 0 : i32
    %c0_i32_1 = arith.constant 0 : i32
    return %c0_i32, %c0_i32_0 : i32, i32
  }
  func.func @transform_2(%arg0: i32) -> (i32, i32) {
    %c0_i32 = arith.constant 0 : i32
    %c0_i32_0 = arith.constant 0 : i32
    %c0_i32_1 = arith.constant 0 : i32
    return %c0_i32, %c0_i32_0 : i32, i32
  }
  func.func @transform_3(%arg0: i32) -> (i32, i32) {
    %c0_i32 = arith.constant 0 : i32
    %c0_i32_0 = arith.constant 0 : i32
    return %arg0, %c0_i32 : i32, i32
  }
  func.func @transform_4(%arg0: i32) -> (i32, i32) {
    %c0_i32 = arith.constant 0 : i32
    %c0_i32_0 = arith.constant 0 : i32
    return %arg0, %c0_i32 : i32, i32
  }
}

module attributes {stable_mosaic.version = 11 : i64} {
  func.func @_mm_bias_stats_kernel(%arg0: i32, %arg1: i32, %arg2: i32, %arg3: memref<128x72xbf16, #tpu.memory_space<vmem>>, %arg4: memref<72x8xbf16, #tpu.memory_space<vmem>>, %arg5: memref<1x8xf32, #tpu.memory_space<vmem>>, %arg6: memref<128x8xf32, #tpu.memory_space<vmem>>, %arg7: memref<2x8xf32, #tpu.memory_space<vmem>>, %arg8: memref<128x8xf32, #tpu.memory_space<vmem>>) attributes {dimension_semantics = [#tpu.dimension_semantics<parallel>, #tpu.dimension_semantics<arbitrary>, #tpu.dimension_semantics<arbitrary>], iteration_bounds = array<i64: 1, 1, 1>, scalar_prefetch = 0 : i64, scratch_operands = 1 : i64, tpu.core_type = #tpu.core_type<tc>, window_params = [{transform_indices = @transform_0, window_bounds = array<i64: 128, 72>}, {transform_indices = @transform_1, window_bounds = array<i64: 72, 8>}, {transform_indices = @transform_2, window_bounds = array<i64: 1, 8>}, {transform_indices = @transform_3, window_bounds = array<i64: 128, 8>}, {transform_indices = @transform_4, window_bounds = array<i64: 2, 8>}]} {
    %c0_i32 = arith.constant 0 : i32
    %0 = arith.cmpi eq, %arg2, %c0_i32 : i32
    %1 = arith.extui %0 : i1 to i32
    %c0_i32_0 = arith.constant 0 : i32
    %2 = arith.cmpi ne, %1, %c0_i32_0 : i32
    scf.if %2 {
      %cst_13 = arith.constant 0.000000e+00 : f32
      %17 = vector.broadcast %cst_13 : f32 to vector<128x8xf32>
      %c0_14 = arith.constant 0 : index
      %c0_15 = arith.constant 0 : index
      %18 = vector.load %arg8[%c0_14, %c0_15] : memref<128x8xf32, #tpu.memory_space<vmem>>, vector<128x8xf32>
      tpu.vector_store %arg8[%c0_14, %c0_15], %17 {strides = array<i32>} : memref<128x8xf32, #tpu.memory_space<vmem>>, vector<128x8xf32>,
    } else {
    }
    %c0_i32_1 = arith.constant 0 : i32
    %3 = arith.cmpi eq, %arg1, %c0_i32_1 : i32
    %c0_i32_2 = arith.constant 0 : i32
    %4 = arith.cmpi eq, %arg2, %c0_i32_2 : i32
    %5 = arith.andi %3, %4 : i1
    %6 = arith.extui %5 : i1 to i32
    %c0_i32_3 = arith.constant 0 : i32
    %7 = arith.cmpi ne, %6, %c0_i32_3 : i32
    scf.if %7 {
      %cst_13 = arith.constant 0.000000e+00 : f32
      %17 = vector.broadcast %cst_13 : f32 to vector<2x8xf32>
      %c0_14 = arith.constant 0 : index
      %c0_15 = arith.constant 0 : index
      %18 = vector.load %arg7[%c0_14, %c0_15] : memref<2x8xf32, #tpu.memory_space<vmem>>, vector<2x8xf32>
      tpu.vector_store %arg7[%c0_14, %c0_15], %17 {strides = array<i32>} : memref<2x8xf32, #tpu.memory_space<vmem>>, vector<2x8xf32>,
    } else {
    }
    %c0 = arith.constant 0 : index
    %c0_4 = arith.constant 0 : index
    %8 = vector.load %arg8[%c0, %c0_4] : memref<128x8xf32, #tpu.memory_space<vmem>>, vector<128x8xf32>
    %c0_5 = arith.constant 0 : index
    %c0_6 = arith.constant 0 : index
    %9 = vector.load %arg3[%c0_5, %c0_6] : memref<128x72xbf16, #tpu.memory_space<vmem>>, vector<128x72xbf16>
    %c0_7 = arith.constant 0 : index
    %c0_8 = arith.constant 0 : index
    %10 = vector.load %arg4[%c0_7, %c0_8] : memref<72x8xbf16, #tpu.memory_space<vmem>>, vector<72x8xbf16>
    %cst = arith.constant dense<0.000000e+00> : vector<128x8xf32>
    %11 = tpu.matmul %9, %10, %cst {dimension_numbers = #tpu.dot_dimension_numbers<[1], [0], [0], [1], [0, 0, 1, 1], [], []>} : vector<128x72xbf16>, vector<72x8xbf16>, vector<128x8xf32> -> vector<128x8xf32>
    %12 = arith.addf %8, %11 : vector<128x8xf32>
    %c0_9 = arith.constant 0 : index
    %c0_10 = arith.constant 0 : index
    %13 = vector.load %arg8[%c0_9, %c0_10] : memref<128x8xf32, #tpu.memory_space<vmem>>, vector<128x8xf32>
    tpu.vector_store %arg8[%c0_9, %c0_10], %12 {strides = array<i32>} : memref<128x8xf32, #tpu.memory_space<vmem>>, vector<128x8xf32>,
    %c0_i32_11 = arith.constant 0 : i32
    %14 = arith.cmpi eq, %arg2, %c0_i32_11 : i32
    %15 = arith.extui %14 : i1 to i32
    %c0_i32_12 = arith.constant 0 : i32
    %16 = arith.cmpi ne, %15, %c0_i32_12 : i32
    scf.if %16 {
      %c0_13 = arith.constant 0 : index
      %c0_14 = arith.constant 0 : index
      %17 = vector.load %arg8[%c0_13, %c0_14] : memref<128x8xf32, #tpu.memory_space<vmem>>, vector<128x8xf32>
      %c0_15 = arith.constant 0 : index
      %c0_16 = arith.constant 0 : index
      %18 = vector.load %arg5[%c0_15, %c0_16] : memref<1x8xf32, #tpu.memory_space<vmem>>, vector<1x8xf32>
      %19 = vector.broadcast %18 : vector<1x8xf32> to vector<128x8xf32>
      %20 = arith.addf %17, %19 : vector<128x8xf32>
      %c0_17 = arith.constant 0 : index
      %c0_18 = arith.constant 0 : index
      %21 = vector.load %arg6[%c0_17, %c0_18] : memref<128x8xf32, #tpu.memory_space<vmem>>, vector<128x8xf32>
      tpu.vector_store %arg6[%c0_17, %c0_18], %20 {strides = array<i32>} : memref<128x8xf32, #tpu.memory_space<vmem>>, vector<128x8xf32>,
      %c0_19 = arith.constant 0 : index
      %c0_20 = arith.constant 0 : index
      %22 = vector.load %arg7[%c0_19, %c0_20] : memref<2x8xf32, #tpu.memory_space<vmem>>, vector<2x8xf32>
      %cst_21 = arith.constant dense<0.000000e+00> : vector<8xf32>
      %23 = vector.multi_reduction <add>, %20, %cst_21 [0] : vector<128x8xf32> to vector<8xf32>
      %24 = vector.shape_cast %23 : vector<8xf32> to vector<1x8xf32>
      %25 = arith.mulf %20, %20 : vector<128x8xf32>
      %cst_22 = arith.constant dense<0.000000e+00> : vector<8xf32>
      %26 = vector.multi_reduction <add>, %25, %cst_22 [0] : vector<128x8xf32> to vector<8xf32>
      %27 = vector.shape_cast %26 : vector<8xf32> to vector<1x8xf32>
      %28 = tpu.concatenate %24, %27 in 0 : vector<1x8xf32>, vector<1x8xf32> -> vector<2x8xf32>
      %29 = arith.addf %22, %28 : vector<2x8xf32>
      %c0_23 = arith.constant 0 : index
      %c0_24 = arith.constant 0 : index
      %30 = vector.load %arg7[%c0_23, %c0_24] : memref<2x8xf32, #tpu.memory_space<vmem>>, vector<2x8xf32>
      tpu.vector_store %arg7[%c0_23, %c0_24], %29 {strides = array<i32>} : memref<2x8xf32, #tpu.memory_space<vmem>>, vector<2x8xf32>,
    } else {
    }
    return
  }
  func.func @transform_0(%arg0: i32, %arg1: i32, %arg2: i32) -> (i32, i32) {
    %c0_i32 = arith.constant 0 : i32
    return %arg1, %arg2 : i32, i32
  }
  func.func @transform_1(%arg0: i32, %arg1: i32, %arg2: i32) -> (i32, i32) {
    %c0_i32 = arith.constant 0 : i32
    return %arg2, %arg0 : i32, i32
  }
  func.func @transform_2(%arg0: i32, %arg1: i32, %arg2: i32) -> (i32, i32) {
    %c0_i32 = arith.constant 0 : i32
    %c0_i32_0 = arith.constant 0 : i32
    return %c0_i32, %arg0 : i32, i32
  }
  func.func @transform_3(%arg0: i32, %arg1: i32, %arg2: i32) -> (i32, i32) {
    %c0_i32 = arith.constant 0 : i32
    return %arg1, %arg0 : i32, i32
  }
  func.func @transform_4(%arg0: i32, %arg1: i32, %arg2: i32) -> (i32, i32) {
    %c0_i32 = arith.constant 0 : i32
    %c0_i32_0 = arith.constant 0 : i32
    return %c0_i32, %arg0 : i32, i32
  }
}

module attributes {stable_mosaic.version = 11 : i64} {
  func.func @_bn_apply_res_kernel(%arg0: i32, %arg1: memref<128x8xf32, #tpu.memory_space<vmem>>, %arg2: memref<1x8xf32, #tpu.memory_space<vmem>>, %arg3: memref<1x8xf32, #tpu.memory_space<vmem>>, %arg4: memref<128x8xf32, #tpu.memory_space<vmem>>, %arg5: memref<128x8xf32, #tpu.memory_space<vmem>>) attributes {dimension_semantics = [#tpu.dimension_semantics<parallel>], iteration_bounds = array<i64: 1>, scalar_prefetch = 0 : i64, scratch_operands = 0 : i64, tpu.core_type = #tpu.core_type<tc>, window_params = [{transform_indices = @transform_0, window_bounds = array<i64: 128, 8>}, {pipeline_mode = #tpu.pipeline_mode<synchronous>, transform_indices = @transform_1, window_bounds = array<i64: 1, 8>}, {pipeline_mode = #tpu.pipeline_mode<synchronous>, transform_indices = @transform_2, window_bounds = array<i64: 1, 8>}, {transform_indices = @transform_3, window_bounds = array<i64: 128, 8>}, {transform_indices = @transform_4, window_bounds = array<i64: 128, 8>}]} {
    %c0 = arith.constant 0 : index
    %c0_0 = arith.constant 0 : index
    %0 = vector.load %arg1[%c0, %c0_0] : memref<128x8xf32, #tpu.memory_space<vmem>>, vector<128x8xf32>
    %c0_1 = arith.constant 0 : index
    %c0_2 = arith.constant 0 : index
    %1 = vector.load %arg2[%c0_1, %c0_2] : memref<1x8xf32, #tpu.memory_space<vmem>>, vector<1x8xf32>
    %2 = vector.broadcast %1 : vector<1x8xf32> to vector<128x8xf32>
    %3 = arith.mulf %0, %2 : vector<128x8xf32>
    %c0_3 = arith.constant 0 : index
    %c0_4 = arith.constant 0 : index
    %4 = vector.load %arg3[%c0_3, %c0_4] : memref<1x8xf32, #tpu.memory_space<vmem>>, vector<1x8xf32>
    %5 = vector.broadcast %4 : vector<1x8xf32> to vector<128x8xf32>
    %6 = arith.addf %3, %5 : vector<128x8xf32>
    %c0_5 = arith.constant 0 : index
    %c0_6 = arith.constant 0 : index
    %7 = vector.load %arg4[%c0_5, %c0_6] : memref<128x8xf32, #tpu.memory_space<vmem>>, vector<128x8xf32>
    %8 = arith.addf %6, %7 : vector<128x8xf32>
    %c0_7 = arith.constant 0 : index
    %c0_8 = arith.constant 0 : index
    %9 = vector.load %arg5[%c0_7, %c0_8] : memref<128x8xf32, #tpu.memory_space<vmem>>, vector<128x8xf32>
    tpu.vector_store %arg5[%c0_7, %c0_8], %8 {strides = array<i32>} : memref<128x8xf32, #tpu.memory_space<vmem>>, vector<128x8xf32>,
    return
  }
  func.func @transform_0(%arg0: i32) -> (i32, i32) {
    %c0_i32 = arith.constant 0 : i32
    %c0_i32_0 = arith.constant 0 : i32
    return %arg0, %c0_i32 : i32, i32
  }
  func.func @transform_1(%arg0: i32) -> (i32, i32) {
    %c0_i32 = arith.constant 0 : i32
    %c0_i32_0 = arith.constant 0 : i32
    %c0_i32_1 = arith.constant 0 : i32
    return %c0_i32, %c0_i32_0 : i32, i32
  }
  func.func @transform_2(%arg0: i32) -> (i32, i32) {
    %c0_i32 = arith.constant 0 : i32
    %c0_i32_0 = arith.constant 0 : i32
    %c0_i32_1 = arith.constant 0 : i32
    return %c0_i32, %c0_i32_0 : i32, i32
  }
  func.func @transform_3(%arg0: i32) -> (i32, i32) {
    %c0_i32 = arith.constant 0 : i32
    %c0_i32_0 = arith.constant 0 : i32
    return %arg0, %c0_i32 : i32, i32
  }
  func.func @transform_4(%arg0: i32) -> (i32, i32) {
    %c0_i32 = arith.constant 0 : i32
    %c0_i32_0 = arith.constant 0 : i32
    return %arg0, %c0_i32 : i32, i32
  }
}

module attributes {stable_mosaic.version = 11 : i64} {
  func.func @_mm_bias_stats_kernel(%arg0: i32, %arg1: i32, %arg2: i32, %arg3: memref<128x32xbf16, #tpu.memory_space<vmem>>, %arg4: memref<32x16xbf16, #tpu.memory_space<vmem>>, %arg5: memref<1x16xf32, #tpu.memory_space<vmem>>, %arg6: memref<128x16xf32, #tpu.memory_space<vmem>>, %arg7: memref<2x16xf32, #tpu.memory_space<vmem>>, %arg8: memref<128x16xf32, #tpu.memory_space<vmem>>) attributes {dimension_semantics = [#tpu.dimension_semantics<parallel>, #tpu.dimension_semantics<arbitrary>, #tpu.dimension_semantics<arbitrary>], iteration_bounds = array<i64: 1, 1, 1>, scalar_prefetch = 0 : i64, scratch_operands = 1 : i64, tpu.core_type = #tpu.core_type<tc>, window_params = [{transform_indices = @transform_0, window_bounds = array<i64: 128, 32>}, {transform_indices = @transform_1, window_bounds = array<i64: 32, 16>}, {transform_indices = @transform_2, window_bounds = array<i64: 1, 16>}, {transform_indices = @transform_3, window_bounds = array<i64: 128, 16>}, {transform_indices = @transform_4, window_bounds = array<i64: 2, 16>}]} {
    %c0_i32 = arith.constant 0 : i32
    %0 = arith.cmpi eq, %arg2, %c0_i32 : i32
    %1 = arith.extui %0 : i1 to i32
    %c0_i32_0 = arith.constant 0 : i32
    %2 = arith.cmpi ne, %1, %c0_i32_0 : i32
    scf.if %2 {
      %cst_13 = arith.constant 0.000000e+00 : f32
      %17 = vector.broadcast %cst_13 : f32 to vector<128x16xf32>
      %c0_14 = arith.constant 0 : index
      %c0_15 = arith.constant 0 : index
      %18 = vector.load %arg8[%c0_14, %c0_15] : memref<128x16xf32, #tpu.memory_space<vmem>>, vector<128x16xf32>
      tpu.vector_store %arg8[%c0_14, %c0_15], %17 {strides = array<i32>} : memref<128x16xf32, #tpu.memory_space<vmem>>, vector<128x16xf32>,
    } else {
    }
    %c0_i32_1 = arith.constant 0 : i32
    %3 = arith.cmpi eq, %arg1, %c0_i32_1 : i32
    %c0_i32_2 = arith.constant 0 : i32
    %4 = arith.cmpi eq, %arg2, %c0_i32_2 : i32
    %5 = arith.andi %3, %4 : i1
    %6 = arith.extui %5 : i1 to i32
    %c0_i32_3 = arith.constant 0 : i32
    %7 = arith.cmpi ne, %6, %c0_i32_3 : i32
    scf.if %7 {
      %cst_13 = arith.constant 0.000000e+00 : f32
      %17 = vector.broadcast %cst_13 : f32 to vector<2x16xf32>
      %c0_14 = arith.constant 0 : index
      %c0_15 = arith.constant 0 : index
      %18 = vector.load %arg7[%c0_14, %c0_15] : memref<2x16xf32, #tpu.memory_space<vmem>>, vector<2x16xf32>
      tpu.vector_store %arg7[%c0_14, %c0_15], %17 {strides = array<i32>} : memref<2x16xf32, #tpu.memory_space<vmem>>, vector<2x16xf32>,
    } else {
    }
    %c0 = arith.constant 0 : index
    %c0_4 = arith.constant 0 : index
    %8 = vector.load %arg8[%c0, %c0_4] : memref<128x16xf32, #tpu.memory_space<vmem>>, vector<128x16xf32>
    %c0_5 = arith.constant 0 : index
    %c0_6 = arith.constant 0 : index
    %9 = vector.load %arg3[%c0_5, %c0_6] : memref<128x32xbf16, #tpu.memory_space<vmem>>, vector<128x32xbf16>
    %c0_7 = arith.constant 0 : index
    %c0_8 = arith.constant 0 : index
    %10 = vector.load %arg4[%c0_7, %c0_8] : memref<32x16xbf16, #tpu.memory_space<vmem>>, vector<32x16xbf16>
    %cst = arith.constant dense<0.000000e+00> : vector<128x16xf32>
    %11 = tpu.matmul %9, %10, %cst {dimension_numbers = #tpu.dot_dimension_numbers<[1], [0], [0], [1], [0, 0, 1, 1], [], []>} : vector<128x32xbf16>, vector<32x16xbf16>, vector<128x16xf32> -> vector<128x16xf32>
    %12 = arith.addf %8, %11 : vector<128x16xf32>
    %c0_9 = arith.constant 0 : index
    %c0_10 = arith.constant 0 : index
    %13 = vector.load %arg8[%c0_9, %c0_10] : memref<128x16xf32, #tpu.memory_space<vmem>>, vector<128x16xf32>
    tpu.vector_store %arg8[%c0_9, %c0_10], %12 {strides = array<i32>} : memref<128x16xf32, #tpu.memory_space<vmem>>, vector<128x16xf32>,
    %c0_i32_11 = arith.constant 0 : i32
    %14 = arith.cmpi eq, %arg2, %c0_i32_11 : i32
    %15 = arith.extui %14 : i1 to i32
    %c0_i32_12 = arith.constant 0 : i32
    %16 = arith.cmpi ne, %15, %c0_i32_12 : i32
    scf.if %16 {
      %c0_13 = arith.constant 0 : index
      %c0_14 = arith.constant 0 : index
      %17 = vector.load %arg8[%c0_13, %c0_14] : memref<128x16xf32, #tpu.memory_space<vmem>>, vector<128x16xf32>
      %c0_15 = arith.constant 0 : index
      %c0_16 = arith.constant 0 : index
      %18 = vector.load %arg5[%c0_15, %c0_16] : memref<1x16xf32, #tpu.memory_space<vmem>>, vector<1x16xf32>
      %19 = vector.broadcast %18 : vector<1x16xf32> to vector<128x16xf32>
      %20 = arith.addf %17, %19 : vector<128x16xf32>
      %c0_17 = arith.constant 0 : index
      %c0_18 = arith.constant 0 : index
      %21 = vector.load %arg6[%c0_17, %c0_18] : memref<128x16xf32, #tpu.memory_space<vmem>>, vector<128x16xf32>
      tpu.vector_store %arg6[%c0_17, %c0_18], %20 {strides = array<i32>} : memref<128x16xf32, #tpu.memory_space<vmem>>, vector<128x16xf32>,
      %c0_19 = arith.constant 0 : index
      %c0_20 = arith.constant 0 : index
      %22 = vector.load %arg7[%c0_19, %c0_20] : memref<2x16xf32, #tpu.memory_space<vmem>>, vector<2x16xf32>
      %cst_21 = arith.constant dense<0.000000e+00> : vector<16xf32>
      %23 = vector.multi_reduction <add>, %20, %cst_21 [0] : vector<128x16xf32> to vector<16xf32>
      %24 = vector.shape_cast %23 : vector<16xf32> to vector<1x16xf32>
      %25 = arith.mulf %20, %20 : vector<128x16xf32>
      %cst_22 = arith.constant dense<0.000000e+00> : vector<16xf32>
      %26 = vector.multi_reduction <add>, %25, %cst_22 [0] : vector<128x16xf32> to vector<16xf32>
      %27 = vector.shape_cast %26 : vector<16xf32> to vector<1x16xf32>
      %28 = tpu.concatenate %24, %27 in 0 : vector<1x16xf32>, vector<1x16xf32> -> vector<2x16xf32>
      %29 = arith.addf %22, %28 : vector<2x16xf32>
      %c0_23 = arith.constant 0 : index
      %c0_24 = arith.constant 0 : index
      %30 = vector.load %arg7[%c0_23, %c0_24] : memref<2x16xf32, #tpu.memory_space<vmem>>, vector<2x16xf32>
      tpu.vector_store %arg7[%c0_23, %c0_24], %29 {strides = array<i32>} : memref<2x16xf32, #tpu.memory_space<vmem>>, vector<2x16xf32>,
    } else {
    }
    return
  }
  func.func @transform_0(%arg0: i32, %arg1: i32, %arg2: i32) -> (i32, i32) {
    %c0_i32 = arith.constant 0 : i32
    return %arg1, %arg2 : i32, i32
  }
  func.func @transform_1(%arg0: i32, %arg1: i32, %arg2: i32) -> (i32, i32) {
    %c0_i32 = arith.constant 0 : i32
    return %arg2, %arg0 : i32, i32
  }
  func.func @transform_2(%arg0: i32, %arg1: i32, %arg2: i32) -> (i32, i32) {
    %c0_i32 = arith.constant 0 : i32
    %c0_i32_0 = arith.constant 0 : i32
    return %c0_i32, %arg0 : i32, i32
  }
  func.func @transform_3(%arg0: i32, %arg1: i32, %arg2: i32) -> (i32, i32) {
    %c0_i32 = arith.constant 0 : i32
    return %arg1, %arg0 : i32, i32
  }
  func.func @transform_4(%arg0: i32, %arg1: i32, %arg2: i32) -> (i32, i32) {
    %c0_i32 = arith.constant 0 : i32
    %c0_i32_0 = arith.constant 0 : i32
    return %c0_i32, %arg0 : i32, i32
  }
}

module attributes {stable_mosaic.version = 11 : i64} {
  func.func @_bn_apply_kernel(%arg0: i32, %arg1: memref<128x16xf32, #tpu.memory_space<vmem>>, %arg2: memref<1x16xf32, #tpu.memory_space<vmem>>, %arg3: memref<1x16xf32, #tpu.memory_space<vmem>>, %arg4: memref<128x16xf32, #tpu.memory_space<vmem>>) attributes {dimension_semantics = [#tpu.dimension_semantics<parallel>], iteration_bounds = array<i64: 1>, scalar_prefetch = 0 : i64, scratch_operands = 0 : i64, tpu.core_type = #tpu.core_type<tc>, window_params = [{transform_indices = @transform_0, window_bounds = array<i64: 128, 16>}, {pipeline_mode = #tpu.pipeline_mode<synchronous>, transform_indices = @transform_1, window_bounds = array<i64: 1, 16>}, {pipeline_mode = #tpu.pipeline_mode<synchronous>, transform_indices = @transform_2, window_bounds = array<i64: 1, 16>}, {transform_indices = @transform_3, window_bounds = array<i64: 128, 16>}]} {
    %c0 = arith.constant 0 : index
    %c0_0 = arith.constant 0 : index
    %0 = vector.load %arg1[%c0, %c0_0] : memref<128x16xf32, #tpu.memory_space<vmem>>, vector<128x16xf32>
    %c0_1 = arith.constant 0 : index
    %c0_2 = arith.constant 0 : index
    %1 = vector.load %arg2[%c0_1, %c0_2] : memref<1x16xf32, #tpu.memory_space<vmem>>, vector<1x16xf32>
    %2 = vector.broadcast %1 : vector<1x16xf32> to vector<128x16xf32>
    %3 = arith.mulf %0, %2 : vector<128x16xf32>
    %c0_3 = arith.constant 0 : index
    %c0_4 = arith.constant 0 : index
    %4 = vector.load %arg3[%c0_3, %c0_4] : memref<1x16xf32, #tpu.memory_space<vmem>>, vector<1x16xf32>
    %5 = vector.broadcast %4 : vector<1x16xf32> to vector<128x16xf32>
    %6 = arith.addf %3, %5 : vector<128x16xf32>
    %cst = arith.constant 0.000000e+00 : f32
    %7 = vector.broadcast %cst : f32 to vector<128x16xf32>
    %8 = arith.maximumf %6, %7 : vector<128x16xf32>
    %c0_5 = arith.constant 0 : index
    %c0_6 = arith.constant 0 : index
    %9 = vector.load %arg4[%c0_5, %c0_6] : memref<128x16xf32, #tpu.memory_space<vmem>>, vector<128x16xf32>
    tpu.vector_store %arg4[%c0_5, %c0_6], %8 {strides = array<i32>} : memref<128x16xf32, #tpu.memory_space<vmem>>, vector<128x16xf32>,
    return
  }
  func.func @transform_0(%arg0: i32) -> (i32, i32) {
    %c0_i32 = arith.constant 0 : i32
    %c0_i32_0 = arith.constant 0 : i32
    return %arg0, %c0_i32 : i32, i32
  }
  func.func @transform_1(%arg0: i32) -> (i32, i32) {
    %c0_i32 = arith.constant 0 : i32
    %c0_i32_0 = arith.constant 0 : i32
    %c0_i32_1 = arith.constant 0 : i32
    return %c0_i32, %c0_i32_0 : i32, i32
  }
  func.func @transform_2(%arg0: i32) -> (i32, i32) {
    %c0_i32 = arith.constant 0 : i32
    %c0_i32_0 = arith.constant 0 : i32
    %c0_i32_1 = arith.constant 0 : i32
    return %c0_i32, %c0_i32_0 : i32, i32
  }
  func.func @transform_3(%arg0: i32) -> (i32, i32) {
    %c0_i32 = arith.constant 0 : i32
    %c0_i32_0 = arith.constant 0 : i32
    return %arg0, %c0_i32 : i32, i32
  }
}

module attributes {stable_mosaic.version = 11 : i64} {
  func.func @_mm_bias_kernel(%arg0: i32, %arg1: i32, %arg2: i32, %arg3: memref<512x196xbf16, #tpu.memory_space<vmem>>, %arg4: memref<196x3xbf16, #tpu.memory_space<vmem>>, %arg5: memref<1x3xf32, #tpu.memory_space<vmem>>, %arg6: memref<512x3xf32, #tpu.memory_space<vmem>>, %arg7: memref<512x3xf32, #tpu.memory_space<vmem>>) attributes {dimension_semantics = [#tpu.dimension_semantics<parallel>, #tpu.dimension_semantics<parallel>, #tpu.dimension_semantics<arbitrary>], iteration_bounds = array<i64: 1, 1, 1>, scalar_prefetch = 0 : i64, scratch_operands = 1 : i64, tpu.core_type = #tpu.core_type<tc>, window_params = [{transform_indices = @transform_0, window_bounds = array<i64: 512, 196>}, {transform_indices = @transform_1, window_bounds = array<i64: 196, 3>}, {transform_indices = @transform_2, window_bounds = array<i64: 1, 3>}, {transform_indices = @transform_3, window_bounds = array<i64: 512, 3>}]} {
    %c0_i32 = arith.constant 0 : i32
    %0 = arith.cmpi eq, %arg2, %c0_i32 : i32
    %1 = arith.extui %0 : i1 to i32
    %c0_i32_0 = arith.constant 0 : i32
    %2 = arith.cmpi ne, %1, %c0_i32_0 : i32
    scf.if %2 {
      %cst_10 = arith.constant 0.000000e+00 : f32
      %12 = vector.broadcast %cst_10 : f32 to vector<512x3xf32>
      %c0_11 = arith.constant 0 : index
      %c0_12 = arith.constant 0 : index
      %13 = vector.load %arg7[%c0_11, %c0_12] : memref<512x3xf32, #tpu.memory_space<vmem>>, vector<512x3xf32>
      tpu.vector_store %arg7[%c0_11, %c0_12], %12 {strides = array<i32>} : memref<512x3xf32, #tpu.memory_space<vmem>>, vector<512x3xf32>,
    } else {
    }
    %c0 = arith.constant 0 : index
    %c0_1 = arith.constant 0 : index
    %3 = vector.load %arg7[%c0, %c0_1] : memref<512x3xf32, #tpu.memory_space<vmem>>, vector<512x3xf32>
    %c0_2 = arith.constant 0 : index
    %c0_3 = arith.constant 0 : index
    %4 = vector.load %arg3[%c0_2, %c0_3] : memref<512x196xbf16, #tpu.memory_space<vmem>>, vector<512x196xbf16>
    %c0_4 = arith.constant 0 : index
    %c0_5 = arith.constant 0 : index
    %5 = vector.load %arg4[%c0_4, %c0_5] : memref<196x3xbf16, #tpu.memory_space<vmem>>, vector<196x3xbf16>
    %cst = arith.constant dense<0.000000e+00> : vector<512x3xf32>
    %6 = tpu.matmul %4, %5, %cst {dimension_numbers = #tpu.dot_dimension_numbers<[1], [0], [0], [1], [0, 0, 1, 1], [], []>} : vector<512x196xbf16>, vector<196x3xbf16>, vector<512x3xf32> -> vector<512x3xf32>
    %7 = arith.addf %3, %6 : vector<512x3xf32>
    %c0_6 = arith.constant 0 : index
    %c0_7 = arith.constant 0 : index
    %8 = vector.load %arg7[%c0_6, %c0_7] : memref<512x3xf32, #tpu.memory_space<vmem>>, vector<512x3xf32>
    tpu.vector_store %arg7[%c0_6, %c0_7], %7 {strides = array<i32>} : memref<512x3xf32, #tpu.memory_space<vmem>>, vector<512x3xf32>,
    %c0_i32_8 = arith.constant 0 : i32
    %9 = arith.cmpi eq, %arg2, %c0_i32_8 : i32
    %10 = arith.extui %9 : i1 to i32
    %c0_i32_9 = arith.constant 0 : i32
    %11 = arith.cmpi ne, %10, %c0_i32_9 : i32
    scf.if %11 {
      %c0_10 = arith.constant 0 : index
      %c0_11 = arith.constant 0 : index
      %12 = vector.load %arg7[%c0_10, %c0_11] : memref<512x3xf32, #tpu.memory_space<vmem>>, vector<512x3xf32>
      %c0_12 = arith.constant 0 : index
      %c0_13 = arith.constant 0 : index
      %13 = vector.load %arg5[%c0_12, %c0_13] : memref<1x3xf32, #tpu.memory_space<vmem>>, vector<1x3xf32>
      %14 = vector.broadcast %13 : vector<1x3xf32> to vector<512x3xf32>
      %15 = arith.addf %12, %14 : vector<512x3xf32>
      %16 = math.tanh %15 : vector<512x3xf32>
      %c0_14 = arith.constant 0 : index
      %c0_15 = arith.constant 0 : index
      %17 = vector.load %arg6[%c0_14, %c0_15] : memref<512x3xf32, #tpu.memory_space<vmem>>, vector<512x3xf32>
      tpu.vector_store %arg6[%c0_14, %c0_15], %16 {strides = array<i32>} : memref<512x3xf32, #tpu.memory_space<vmem>>, vector<512x3xf32>,
    } else {
    }
    return
  }
  func.func @transform_0(%arg0: i32, %arg1: i32, %arg2: i32) -> (i32, i32) {
    %c0_i32 = arith.constant 0 : i32
    return %arg1, %arg2 : i32, i32
  }
  func.func @transform_1(%arg0: i32, %arg1: i32, %arg2: i32) -> (i32, i32) {
    %c0_i32 = arith.constant 0 : i32
    return %arg2, %arg0 : i32, i32
  }
  func.func @transform_2(%arg0: i32, %arg1: i32, %arg2: i32) -> (i32, i32) {
    %c0_i32 = arith.constant 0 : i32
    %c0_i32_0 = arith.constant 0 : i32
    return %c0_i32, %arg0 : i32, i32
  }
  func.func @transform_3(%arg0: i32, %arg1: i32, %arg2: i32) -> (i32, i32) {
    %c0_i32 = arith.constant 0 : i32
    return %arg1, %arg0 : i32, i32
  }
}

</mosaic_0001>

<bundles_post_ra>
// kernel: local_enhancer_forward.34
= control target key start
LH: loop header
LB: loop body
LE: loop exit
PB: predicated region body
PF: predicated region fallthrough
CT: control target
= control target key end

     0   :  { %vm284_vm0 = vcmask 31744   ;;  %s961_s0 = inlined_call_operand.vmem [shape: f32[512,4], index: 0, kind: input, shape index: {}]   ;;  %s962_s1 = inlined_call_operand.vmem [shape: f32[1,4], index: 1, kind: input, shape index: {}]   ;;  %s963_s2 = inlined_call_operand.vmem [shape: f32[1,4], index: 2, kind: input, shape index: {}]   ;;  %s964_s3 = inlined_call_operand.vmem [shape: f32[512,4], index: 3, kind: output, shape index: {}]  }
   0x1   :  { %v14_v0 = vld [vmem:[%s961_s0] sm:$0xff]  ;;  %v15_v4 = vld [vmem:[%s961_s0 + $0x8] sm:$0xff]  ;;  %v16_v5 = vld [vmem:[%s961_s0 + $0x10] sm:$0xff] }
   0x2   :  { %v381_v1 = vld [vmem:[%s962_s1] ss:$0 sm:$0xff]  ;;  %v17_v6 = vld [vmem:[%s961_s0 + $0x18] sm:$0xff]  ;;  %v19_v11 = vld [vmem:[%s961_s0 + $0x28] sm:$0xff] }
   0x3   :  { %v386_v2 = vld [vmem:[%s963_s2] ss:$0 sm:$0xff]  ;;  %v85_v3 = vmul.f32 %v381_v1, %v14_v0  ;;  %v86_v7 = vmul.f32 %v381_v1, %v15_v4  ;;  %v87_v8 = vmul.f32 %v381_v1, %v16_v5  ;;  %v88_v9 = vmul.f32 %v381_v1, %v17_v6  ;;  %v20_v12 = vld [vmem:[%s961_s0 + $0x30] sm:$0xff]  ;;  %v21_v17 = vld [vmem:[%s961_s0 + $0x38] sm:$0xff] }
   0x4   :  { %v18_v10 = vld [vmem:[%s961_s0 + $0x20] sm:$0xff]  ;;  %v90_v15 = vmul.f32 %v381_v1, %v19_v11  ;;  %v91_v16 = vmul.f32 %v381_v1, %v20_v12  ;;  %v92_v21 = vmul.f32 %v381_v1, %v21_v17  ;;  %v23_v27 = vld [vmem:[%s961_s0 + $0x48] sm:$0xff]  ;;  %v24_v28 = vld [vmem:[%s961_s0 + $0x50] sm:$0xff] }
   0x5   :  { %v156_v13 = vadd.f32 %v386_v2, %v85_v3  ;;  %v89_v14 = vmul.f32 %v381_v1, %v18_v10  ;;  %v157_v18 = vadd.f32 %v386_v2, %v86_v7  ;;  %v158_v19 = vadd.f32 %v386_v2, %v87_v8  ;;  %v22_v22 = vld [vmem:[%s961_s0 + $0x40] sm:$0xff]  ;;  %v25_v29 = vld [vmem:[%s961_s0 + $0x58] sm:$0xff]  ;;  %v27_v35 = vld [vmem:[%s961_s0 + $0x68] sm:$0xff] }
   0x6   :  { %v159_v20 = vadd.f32 %v386_v2, %v88_v9  ;;  %v161_v25 = vadd.f32 %v386_v2, %v90_v15  ;;  %v162_v26 = vadd.f32 %v386_v2, %v91_v16  ;;  %v163_v33 = vadd.f32 %v386_v2, %v92_v21  ;;  %v26_v34 = vld [vmem:[%s961_s0 + $0x60] sm:$0xff]  ;;  %v28_v36 = vld [vmem:[%s961_s0 + $0x70] sm:$0xff]  ;;  %v29_v41 = vld [vmem:[%s961_s0 + $0x78] sm:$0xff] }
   0x7   :  { %v220_v23 = vmax.f32 %v156_v13, 0.0  ;;  %v160_v24 = vadd.f32 %v386_v2, %v89_v14  ;;  %v221_v30 = vmax.f32 %v157_v18, 0.0  ;;  %v222_v31 = vmax.f32 %v158_v19, 0.0  ;;  %v30_v54 = vld [vmem:[%s961_s0 + $0x80] sm:$0xff]  ;;  %v31_v59 = vld [vmem:[%s961_s0 + $0x88] sm:$0xff]  ;;  %v32_v60 = vld [vmem:[%s961_s0 + $0x90] sm:$0xff] }
   0x8   :  { %v223_v32 = vmax.f32 %v159_v20, 0.0  ;;  %v225_v38 = vmax.f32 %v161_v25, 0.0  ;;  %v226_v39 = vmax.f32 %v162_v26, 0.0  ;;  %v93_v40 = vmul.f32 %v381_v1, %v22_v22  ;;  %v33_v61 = vld [vmem:[%s961_s0 + $0x98] sm:$0xff]  ;;  %v34_v4 = vld [vmem:[%s961_s0 + $0xa0] sm:$0xff]  ;;  %v35_v5 = vld [vmem:[%s961_s0 + $0xa8] sm:$0xff] }
   0x9   :  { %285 = vst.msk [vmem:[%s964_s3] sm:$0xff] %vm284_vm0, %v220_v23  ;;  %v224_v37 = vmax.f32 %v160_v24, 0.0  ;;  %286 = vst.msk [vmem:[%s964_s3 + $0x8] sm:$0xff] %vm284_vm0, %v221_v30  ;;  %v227_v42 = vmax.f32 %v163_v33, 0.0  ;;  %v94_v43 = vmul.f32 %v381_v1, %v23_v27  ;;  %v95_v44 = vmul.f32 %v381_v1, %v24_v28  ;;  %v36_v6 = vld [vmem:[%s961_s0 + $0xb0] sm:$0xff]  ;;  %v37_v11 = vld [vmem:[%s961_s0 + $0xb8] sm:$0xff] }
   0xa   :  { %287 = vst.msk [vmem:[%s964_s3 + $0x10] sm:$0xff] %vm284_vm0, %v222_v31  ;;  %288 = vst.msk [vmem:[%s964_s3 + $0x18] sm:$0xff] %vm284_vm0, %v223_v32  ;;  %v96_v45 = vmul.f32 %v381_v1, %v25_v29  ;;  %v164_v46 = vadd.f32 %v386_v2, %v93_v40  ;;  %v97_v47 = vmul.f32 %v381_v1, %v26_v34  ;;  %v38_v24 = vld [vmem:[%s961_s0 + $0xc0] sm:$0xff]  ;;  %v39_v29 = vld [vmem:[%s961_s0 + $0xc8] sm:$0xff] }
   0xb   :  { %289 = vst.msk [vmem:[%s964_s3 + $0x20] sm:$0xff] %vm284_vm0, %v224_v37  ;;  %290 = vst.msk [vmem:[%s964_s3 + $0x28] sm:$0xff] %vm284_vm0, %v225_v38  ;;  %v98_v48 = vmul.f32 %v381_v1, %v27_v35  ;;  %v99_v49 = vmul.f32 %v381_v1, %v28_v36  ;;  %v165_v50 = vadd.f32 %v386_v2, %v94_v43  ;;  %v40_v30 = vld [vmem:[%s961_s0 + $0xd0] sm:$0xff]  ;;  %v41_v31 = vld [vmem:[%s961_s0 + $0xd8] sm:$0xff] }
   0xc   :  { %291 = vst.msk [vmem:[%s964_s3 + $0x30] sm:$0xff] %vm284_vm0, %v226_v39  ;;  %292 = vst.msk [vmem:[%s964_s3 + $0x38] sm:$0xff] %vm284_vm0, %v227_v42  ;;  %v166_v51 = vadd.f32 %v386_v2, %v95_v44  ;;  %v167_v52 = vadd.f32 %v386_v2, %v96_v45  ;;  %v100_v53 = vmul.f32 %v381_v1, %v29_v41  ;;  %v228_v55 = vmax.f32 %v164_v46, 0.0  ;;  %v42_v36 = vld [vmem:[%s961_s0 + $0xe0] sm:$0xff]  ;;  %v43_v37 = vld [vmem:[%s961_s0 + $0xe8] sm:$0xff] }
   0xd   :  { %v168_v56 = vadd.f32 %v386_v2, %v97_v47  ;;  %v169_v57 = vadd.f32 %v386_v2, %v98_v48  ;;  %v170_v58 = vadd.f32 %v386_v2, %v99_v49  ;;  %v229_v62 = vmax.f32 %v165_v50, 0.0  ;;  %v44_v38 = vld [vmem:[%s961_s0 + $0xf0] sm:$0xff]  ;;  %v45_v43 = vld [vmem:[%s961_s0 + $0xf8] sm:$0xff] }
   0xe   :  { %v230_v63 = vmax.f32 %v166_v51, 0.0  ;;  %v231_v0 = vmax.f32 %v167_v52, 0.0  ;;  %v171_v3 = vadd.f32 %v386_v2, %v100_v53  ;;  %293 = vst.msk [vmem:[%s964_s3 + $0x40] sm:$0xff] %vm284_vm0, %v228_v55  ;;  %v101_v10 = vmul.f32 %v381_v1, %v30_v54 }
   0xf   :  { %v232_v7 = vmax.f32 %v168_v56, 0.0  ;;  %v233_v8 = vmax.f32 %v169_v57, 0.0  ;;  %v234_v9 = vmax.f32 %v170_v58, 0.0  ;;  %294 = vst.msk [vmem:[%s964_s3 + $0x48] sm:$0xff] %vm284_vm0, %v229_v62  ;;  %v102_v13 = vmul.f32 %v381_v1, %v31_v59  ;;  %v46_v56 = vld [vmem:[%s961_s0 + $0x100] sm:$0xff]  ;;  %v48_v62 = vld [vmem:[%s961_s0 + $0x110] sm:$0xff] }
  0x10   :  { %295 = vst.msk [vmem:[%s964_s3 + $0x50] sm:$0xff] %vm284_vm0, %v230_v63  ;;  %296 = vst.msk [vmem:[%s964_s3 + $0x58] sm:$0xff] %vm284_vm0, %v231_v0  ;;  %v235_v12 = vmax.f32 %v171_v3, 0.0  ;;  %v103_v14 = vmul.f32 %v381_v1, %v32_v60  ;;  %v104_v15 = vmul.f32 %v381_v1, %v33_v61  ;;  %v172_v16 = vadd.f32 %v386_v2, %v101_v10  ;;  %v47_v61 = vld [vmem:[%s961_s0 + $0x108] sm:$0xff]  ;;  %v49_v63 = vld [vmem:[%s961_s0 + $0x118] sm:$0xff] }
  0x11   :  { %297 = vst.msk [vmem:[%s964_s3 + $0x60] sm:$0xff] %vm284_vm0, %v232_v7  ;;  %298 = vst.msk [vmem:[%s964_s3 + $0x68] sm:$0xff] %vm284_vm0, %v233_v8  ;;  %v105_v17 = vmul.f32 %v381_v1, %v34_v4  ;;  %v106_v18 = vmul.f32 %v381_v1, %v35_v5  ;;  %v107_v19 = vmul.f32 %v381_v1, %v36_v6  ;;  %v50_v6 = vld [vmem:[%s961_s0 + $0x120] sm:$0xff]  ;;  %v51_v7 = vld [vmem:[%s961_s0 + $0x128] sm:$0xff] }
  0x12   :  { %299 = vst.msk [vmem:[%s964_s3 + $0x70] sm:$0xff] %vm284_vm0, %v234_v9  ;;  %300 = vst.msk [vmem:[%s964_s3 + $0x78] sm:$0xff] %vm284_vm0, %v235_v12  ;;  %v173_v20 = vadd.f32 %v386_v2, %v102_v13  ;;  %v174_v21 = vadd.f32 %v386_v2, %v103_v14  ;;  %v175_v22 = vadd.f32 %v386_v2, %v104_v15  ;;  %v236_v25 = vmax.f32 %v172_v16, 0.0  ;;  %v52_v8 = vld [vmem:[%s961_s0 + $0x130] sm:$0xff]  ;;  %v53_v13 = vld [vmem:[%s961_s0 + $0x138] sm:$0xff] }
  0x13   :  { %v108_v23 = vmul.f32 %v381_v1, %v37_v11  ;;  %v176_v26 = vadd.f32 %v386_v2, %v105_v17  ;;  %v177_v27 = vadd.f32 %v386_v2, %v106_v18  ;;  %v178_v28 = vadd.f32 %v386_v2, %v107_v19 }
  0x14   :  { %v237_v32 = vmax.f32 %v173_v20, 0.0  ;;  %v238_v33 = vmax.f32 %v174_v21, 0.0  ;;  %v239_v34 = vmax.f32 %v175_v22, 0.0  ;;  %301 = vst.msk [vmem:[%s964_s3 + $0x80] sm:$0xff] %vm284_vm0, %v236_v25  ;;  %v109_v42 = vmul.f32 %v381_v1, %v38_v24 }
  0x15   :  { %v179_v35 = vadd.f32 %v386_v2, %v108_v23  ;;  %v240_v39 = vmax.f32 %v176_v26, 0.0  ;;  %v241_v40 = vmax.f32 %v177_v27, 0.0  ;;  %v242_v41 = vmax.f32 %v178_v28, 0.0  ;;  %v54_v26 = vld [vmem:[%s961_s0 + $0x140] sm:$0xff] }
  0x16   :  { %302 = vst.msk [vmem:[%s964_s3 + $0x88] sm:$0xff] %vm284_vm0, %v237_v32  ;;  %303 = vst.msk [vmem:[%s964_s3 + $0x90] sm:$0xff] %vm284_vm0, %v238_v33  ;;  %v110_v45 = vmul.f32 %v381_v1, %v39_v29  ;;  %v111_v46 = vmul.f32 %v381_v1, %v40_v30  ;;  %v112_v47 = vmul.f32 %v381_v1, %v41_v31  ;;  %v55_v31 = vld [vmem:[%s961_s0 + $0x148] sm:$0xff]  ;;  %v56_v32 = vld [vmem:[%s961_s0 + $0x150] sm:$0xff] }
  0x17   :  { %304 = vst.msk [vmem:[%s964_s3 + $0x98] sm:$0xff] %vm284_vm0, %v239_v34  ;;  %v243_v44 = vmax.f32 %v179_v35, 0.0  ;;  %305 = vst.msk [vmem:[%s964_s3 + $0xa0] sm:$0xff] %vm284_vm0, %v240_v39  ;;  %v180_v48 = vadd.f32 %v386_v2, %v109_v42  ;;  %v113_v49 = vmul.f32 %v381_v1, %v42_v36  ;;  %v114_v50 = vmul.f32 %v381_v1, %v43_v37  ;;  %v57_v33 = vld [vmem:[%s961_s0 + $0x158] sm:$0xff]  ;;  %v59_v39 = vld [vmem:[%s961_s0 + $0x168] sm:$0xff] }
  0x18   :  { %306 = vst.msk [vmem:[%s964_s3 + $0xa8] sm:$0xff] %vm284_vm0, %v241_v40  ;;  %307 = vst.msk [vmem:[%s964_s3 + $0xb0] sm:$0xff] %vm284_vm0, %v242_v41  ;;  %v115_v51 = vmul.f32 %v381_v1, %v44_v38  ;;  %v181_v52 = vadd.f32 %v386_v2, %v110_v45  ;;  %v182_v53 = vadd.f32 %v386_v2, %v111_v46  ;;  %v58_v38 = vld [vmem:[%s961_s0 + $0x160] sm:$0xff]  ;;  %v60_v40 = vld [vmem:[%s961_s0 + $0x170] sm:$0xff] }
  0x19   :  { %308 = vst.msk [vmem:[%s964_s3 + $0xb8] sm:$0xff] %vm284_vm0, %v243_v44  ;;  %v183_v54 = vadd.f32 %v386_v2, %v112_v47  ;;  %v116_v55 = vmul.f32 %v381_v1, %v45_v43  ;;  %v244_v57 = vmax.f32 %v180_v48, 0.0  ;;  %v184_v58 = vadd.f32 %v386_v2, %v113_v49  ;;  %v61_v45 = vld [vmem:[%s961_s0 + $0x178] sm:$0xff] }
  0x1a   :  { %v185_v59 = vadd.f32 %v386_v2, %v114_v50  ;;  %v186_v60 = vadd.f32 %v386_v2, %v115_v51  ;;  %v245_v0 = vmax.f32 %v181_v52, 0.0  ;;  %v246_v3 = vmax.f32 %v182_v53, 0.0 }
  0x1b   :  { %v247_v4 = vmax.f32 %v183_v54, 0.0  ;;  %v187_v5 = vadd.f32 %v386_v2, %v116_v55  ;;  %309 = vst.msk [vmem:[%s964_s3 + $0xc0] sm:$0xff] %vm284_vm0, %v244_v57  ;;  %v248_v9 = vmax.f32 %v184_v58, 0.0  ;;  %v117_v12 = vmul.f32 %v381_v1, %v46_v56  ;;  %v62_v58 = vld [vmem:[%s961_s0 + $0x180] sm:$0xff] }
  0x1c   :  { %v249_v10 = vmax.f32 %v185_v59, 0.0  ;;  %v250_v11 = vmax.f32 %v186_v60, 0.0  ;;  %310 = vst.msk [vmem:[%s964_s3 + $0xc8] sm:$0xff] %vm284_vm0, %v245_v0  ;;  %311 = vst.msk [vmem:[%s964_s3 + $0xd0] sm:$0xff] %vm284_vm0, %v246_v3  ;;  %v118_v15 = vmul.f32 %v381_v1, %v47_v61  ;;  %v119_v16 = vmul.f32 %v381_v1, %v48_v62  ;;  %v64_v0 = vld [vmem:[%s961_s0 + $0x190] sm:$0xff]  ;;  %v65_v3 = vld [vmem:[%s961_s0 + $0x198] sm:$0xff] }
  0x1d   :  { %312 = vst.msk [vmem:[%s964_s3 + $0xd8] sm:$0xff] %vm284_vm0, %v247_v4  ;;  %v251_v14 = vmax.f32 %v187_v5, 0.0  ;;  %v120_v17 = vmul.f32 %v381_v1, %v49_v63  ;;  %313 = vst.msk [vmem:[%s964_s3 + $0xe0] sm:$0xff] %vm284_vm0, %v248_v9  ;;  %v188_v18 = vadd.f32 %v386_v2, %v117_v12  ;;  %v121_v19 = vmul.f32 %v381_v1, %v50_v6  ;;  %v63_v63 = vld [vmem:[%s961_s0 + $0x188] sm:$0xff] }
  0x1e   :  { %314 = vst.msk [vmem:[%s964_s3 + $0xe8] sm:$0xff] %vm284_vm0, %v249_v10  ;;  %315 = vst.msk [vmem:[%s964_s3 + $0xf0] sm:$0xff] %vm284_vm0, %v250_v11  ;;  %v122_v20 = vmul.f32 %v381_v1, %v51_v7  ;;  %v123_v21 = vmul.f32 %v381_v1, %v52_v8  ;;  %v189_v22 = vadd.f32 %v386_v2, %v118_v15  ;;  %v66_v8 = vld [vmem:[%s961_s0 + $0x1a0] sm:$0xff]  ;;  %v67_v9 = vld [vmem:[%s961_s0 + $0x1a8] sm:$0xff] }
  0x1f   :  { %316 = vst.msk [vmem:[%s964_s3 + $0xf8] sm:$0xff] %vm284_vm0, %v251_v14  ;;  %v190_v23 = vadd.f32 %v386_v2, %v119_v16  ;;  %v191_v24 = vadd.f32 %v386_v2, %v120_v17  ;;  %v124_v25 = vmul.f32 %v381_v1, %v53_v13  ;;  %v252_v27 = vmax.f32 %v188_v18, 0.0  ;;  %v68_v10 = vld [vmem:[%s961_s0 + $0x1b0] sm:$0xff]  ;;  %v69_v15 = vld [vmem:[%s961_s0 + $0x1b8] sm:$0xff] }
  0x20   :  { %v192_v28 = vadd.f32 %v386_v2, %v121_v19  ;;  %v193_v29 = vadd.f32 %v386_v2, %v122_v20  ;;  %v194_v30 = vadd.f32 %v386_v2, %v123_v21  ;;  %v253_v34 = vmax.f32 %v189_v22, 0.0 }
  0x21   :  { %v254_v35 = vmax.f32 %v190_v23, 0.0  ;;  %v255_v36 = vmax.f32 %v191_v24, 0.0  ;;  %v195_v37 = vadd.f32 %v386_v2, %v124_v25  ;;  %317 = vst.msk [vmem:[%s964_s3 + $0x100] sm:$0xff] %vm284_vm0, %v252_v27  ;;  %v125_v44 = vmul.f32 %v381_v1, %v54_v26 }
  0x22   :  { %v256_v41 = vmax.f32 %v192_v28, 0.0  ;;  %v257_v42 = vmax.f32 %v193_v29, 0.0  ;;  %v258_v43 = vmax.f32 %v194_v30, 0.0  ;;  %318 = vst.msk [vmem:[%s964_s3 + $0x108] sm:$0xff] %vm284_vm0, %v253_v34  ;;  %v126_v47 = vmul.f32 %v381_v1, %v55_v31  ;;  %v70_v28 = vld [vmem:[%s961_s0 + $0x1c0] sm:$0xff]  ;;  %v72_v34 = vld [vmem:[%s961_s0 + $0x1d0] sm:$0xff] }
  0x23   :  { %319 = vst.msk [vmem:[%s964_s3 + $0x110] sm:$0xff] %vm284_vm0, %v254_v35  ;;  %320 = vst.msk [vmem:[%s964_s3 + $0x118] sm:$0xff] %vm284_vm0, %v255_v36  ;;  %v259_v46 = vmax.f32 %v195_v37, 0.0  ;;  %v127_v48 = vmul.f32 %v381_v1, %v56_v32  ;;  %v128_v49 = vmul.f32 %v381_v1, %v57_v33  ;;  %v196_v50 = vadd.f32 %v386_v2, %v125_v44  ;;  %v71_v33 = vld [vmem:[%s961_s0 + $0x1c8] sm:$0xff]  ;;  %v73_v35 = vld [vmem:[%s961_s0 + $0x1d8] sm:$0xff] }
  0x24   :  { %321 = vst.msk [vmem:[%s964_s3 + $0x120] sm:$0xff] %vm284_vm0, %v256_v41  ;;  %322 = vst.msk [vmem:[%s964_s3 + $0x128] sm:$0xff] %vm284_vm0, %v257_v42  ;;  %v129_v51 = vmul.f32 %v381_v1, %v58_v38  ;;  %v130_v52 = vmul.f32 %v381_v1, %v59_v39  ;;  %v131_v53 = vmul.f32 %v381_v1, %v60_v40  ;;  %v74_v40 = vld [vmem:[%s961_s0 + $0x1e0] sm:$0xff]  ;;  %v75_v41 = vld [vmem:[%s961_s0 + $0x1e8] sm:$0xff] }
  0x25   :  { %323 = vst.msk [vmem:[%s964_s3 + $0x130] sm:$0xff] %vm284_vm0, %v258_v43  ;;  %324 = vst.msk [vmem:[%s964_s3 + $0x138] sm:$0xff] %vm284_vm0, %v259_v46  ;;  %v197_v54 = vadd.f32 %v386_v2, %v126_v47  ;;  %v198_v55 = vadd.f32 %v386_v2, %v127_v48  ;;  %v199_v56 = vadd.f32 %v386_v2, %v128_v49  ;;  %v260_v59 = vmax.f32 %v196_v50, 0.0  ;;  %v76_v42 = vld [vmem:[%s961_s0 + $0x1f0] sm:$0xff]  ;;  %v77_v47 = vld [vmem:[%s961_s0 + $0x1f8] sm:$0xff] }
  0x26   :  { %v132_v57 = vmul.f32 %v381_v1, %v61_v45  ;;  %v200_v60 = vadd.f32 %v386_v2, %v129_v51  ;;  %v201_v61 = vadd.f32 %v386_v2, %v130_v52  ;;  %v202_v62 = vadd.f32 %v386_v2, %v131_v53 }
  0x27   :  { %v261_v4 = vmax.f32 %v197_v54, 0.0  ;;  %v262_v5 = vmax.f32 %v198_v55, 0.0  ;;  %v263_v6 = vmax.f32 %v199_v56, 0.0  ;;  %325 = vst.msk [vmem:[%s964_s3 + $0x140] sm:$0xff] %vm284_vm0, %v260_v59  ;;  %v133_v14 = vmul.f32 %v381_v1, %v62_v58 }
  0x28   :  { %v203_v7 = vadd.f32 %v386_v2, %v132_v57  ;;  %v264_v11 = vmax.f32 %v200_v60, 0.0  ;;  %v265_v12 = vmax.f32 %v201_v61, 0.0  ;;  %v266_v13 = vmax.f32 %v202_v62, 0.0 }
  0x29   :  { %326 = vst.msk [vmem:[%s964_s3 + $0x148] sm:$0xff] %vm284_vm0, %v261_v4  ;;  %327 = vst.msk [vmem:[%s964_s3 + $0x150] sm:$0xff] %vm284_vm0, %v262_v5  ;;  %v134_v17 = vmul.f32 %v381_v1, %v63_v63  ;;  %v135_v18 = vmul.f32 %v381_v1, %v64_v0  ;;  %v136_v19 = vmul.f32 %v381_v1, %v65_v3 }
  0x2a   :  { %328 = vst.msk [vmem:[%s964_s3 + $0x158] sm:$0xff] %vm284_vm0, %v263_v6  ;;  %v267_v16 = vmax.f32 %v203_v7, 0.0  ;;  %329 = vst.msk [vmem:[%s964_s3 + $0x160] sm:$0xff] %vm284_vm0, %v264_v11  ;;  %v204_v20 = vadd.f32 %v386_v2, %v133_v14  ;;  %v137_v21 = vmul.f32 %v381_v1, %v66_v8  ;;  %v138_v22 = vmul.f32 %v381_v1, %v67_v9 }
  0x2b   :  { %330 = vst.msk [vmem:[%s964_s3 + $0x168] sm:$0xff] %vm284_vm0, %v265_v12  ;;  %331 = vst.msk [vmem:[%s964_s3 + $0x170] sm:$0xff] %vm284_vm0, %v266_v13  ;;  %v139_v23 = vmul.f32 %v381_v1, %v68_v10  ;;  %v205_v24 = vadd.f32 %v386_v2, %v134_v17  ;;  %v206_v25 = vadd.f32 %v386_v2, %v135_v18 }
  0x2c   :  { %332 = vst.msk [vmem:[%s964_s3 + $0x178] sm:$0xff] %vm284_vm0, %v267_v16  ;;  %v207_v26 = vadd.f32 %v386_v2, %v136_v19  ;;  %v140_v27 = vmul.f32 %v381_v1, %v69_v15  ;;  %v268_v29 = vmax.f32 %v204_v20, 0.0  ;;  %v208_v30 = vadd.f32 %v386_v2, %v137_v21 }
  0x2d   :  { %v209_v31 = vadd.f32 %v386_v2, %v138_v22  ;;  %v210_v32 = vadd.f32 %v386_v2, %v139_v23  ;;  %v269_v36 = vmax.f32 %v205_v24, 0.0  ;;  %v270_v37 = vmax.f32 %v206_v25, 0.0 }
  0x2e   :  { %v271_v38 = vmax.f32 %v207_v26, 0.0  ;;  %v211_v39 = vadd.f32 %v386_v2, %v140_v27  ;;  %333 = vst.msk [vmem:[%s964_s3 + $0x180] sm:$0xff] %vm284_vm0, %v268_v29  ;;  %v272_v43 = vmax.f32 %v208_v30, 0.0  ;;  %v141_v46 = vmul.f32 %v381_v1, %v70_v28 }
  0x2f   :  { %v273_v44 = vmax.f32 %v209_v31, 0.0  ;;  %v274_v45 = vmax.f32 %v210_v32, 0.0  ;;  %334 = vst.msk [vmem:[%s964_s3 + $0x188] sm:$0xff] %vm284_vm0, %v269_v36  ;;  %335 = vst.msk [vmem:[%s964_s3 + $0x190] sm:$0xff] %vm284_vm0, %v270_v37  ;;  %v142_v49 = vmul.f32 %v381_v1, %v71_v33  ;;  %v143_v50 = vmul.f32 %v381_v1, %v72_v34 }
  0x30   :  { %336 = vst.msk [vmem:[%s964_s3 + $0x198] sm:$0xff] %vm284_vm0, %v271_v38  ;;  %v275_v48 = vmax.f32 %v211_v39, 0.0  ;;  %v144_v51 = vmul.f32 %v381_v1, %v73_v35  ;;  %337 = vst.msk [vmem:[%s964_s3 + $0x1a0] sm:$0xff] %vm284_vm0, %v272_v43  ;;  %v212_v52 = vadd.f32 %v386_v2, %v141_v46  ;;  %v145_v53 = vmul.f32 %v381_v1, %v74_v40 }
  0x31   :  { %338 = vst.msk [vmem:[%s964_s3 + $0x1a8] sm:$0xff] %vm284_vm0, %v273_v44  ;;  %339 = vst.msk [vmem:[%s964_s3 + $0x1b0] sm:$0xff] %vm284_vm0, %v274_v45  ;;  %v146_v54 = vmul.f32 %v381_v1, %v75_v41  ;;  %v147_v55 = vmul.f32 %v381_v1, %v76_v42  ;;  %v213_v56 = vadd.f32 %v386_v2, %v142_v49 }
  0x32   :  { %340 = vst.msk [vmem:[%s964_s3 + $0x1b8] sm:$0xff] %vm284_vm0, %v275_v48  ;;  %v214_v57 = vadd.f32 %v386_v2, %v143_v50  ;;  %v215_v58 = vadd.f32 %v386_v2, %v144_v51  ;;  %v148_v59 = vmul.f32 %v381_v1, %v77_v47  ;;  %v276_v60 = vmax.f32 %v212_v52, 0.0 }
  0x33   :  { %v216_v61 = vadd.f32 %v386_v2, %v145_v53  ;;  %v217_v62 = vadd.f32 %v386_v2, %v146_v54  ;;  %v218_v63 = vadd.f32 %v386_v2, %v147_v55  ;;  %v277_v0 = vmax.f32 %v213_v56, 0.0 }
  0x34   :  { %v278_v3 = vmax.f32 %v214_v57, 0.0  ;;  %v279_v4 = vmax.f32 %v215_v58, 0.0  ;;  %v219_v5 = vadd.f32 %v386_v2, %v148_v59  ;;  %341 = vst.msk [vmem:[%s964_s3 + $0x1c0] sm:$0xff] %vm284_vm0, %v276_v60 }
  0x35   :  { %v280_v6 = vmax.f32 %v216_v61, 0.0  ;;  %v281_v7 = vmax.f32 %v217_v62, 0.0  ;;  %v282_v1 = vmax.f32 %v218_v63, 0.0  ;;  %342 = vst.msk [vmem:[%s964_s3 + $0x1c8] sm:$0xff] %vm284_vm0, %v277_v0 }
  0x36   :  { %343 = vst.msk [vmem:[%s964_s3 + $0x1d0] sm:$0xff] %vm284_vm0, %v278_v3  ;;  %344 = vst.msk [vmem:[%s964_s3 + $0x1d8] sm:$0xff] %vm284_vm0, %v279_v4  ;;  %v283_v2 = vmax.f32 %v219_v5, 0.0 }
  0x37   :  { %345 = vst.msk [vmem:[%s964_s3 + $0x1e0] sm:$0xff] %vm284_vm0, %v280_v6  ;;  %346 = vst.msk [vmem:[%s964_s3 + $0x1e8] sm:$0xff] %vm284_vm0, %v281_v7 }
  0x38   :  { %347 = vst.msk [vmem:[%s964_s3 + $0x1f0] sm:$0xff] %vm284_vm0, %v282_v1  ;;  %348 = vst.msk [vmem:[%s964_s3 + $0x1f8] sm:$0xff] %vm284_vm0, %v283_v2 }

// kernel: local_enhancer_forward.33
= control target key start
LH: loop header
LB: loop body
LE: loop exit
PB: predicated region body
PF: predicated region fallthrough
CT: control target
= control target key end

     0   :  { %v1889_v0 = vmov 0   ;;  %vm585_vm0 = vcmask 154624   ;;  %vm682_vm1 = vcmask 1040384   ;;  %vm683_vm2 = vcmask 1041408   ;;  %s3187_s1 = inlined_call_operand.vmem [shape: bf16[147,4], index: 1, kind: input, shape index: {}]   ;;  %s3188_s0 = inlined_call_operand.vmem [shape: bf16[512,147], index: 0, kind: input, shape index: {}]   ;;  %s3189_s2 = inlined_call_operand.vmem [shape: f32[1,4], index: 2, kind: input, shape index: {}]   ;;  %s3190_s3 = inlined_call_operand.vmem [shape: f32[512,4], index: 3, kind: output, shape index: {0}]   ;;  %s3191_s4 = inlined_call_operand.vmem [shape: f32[2,4], index: 4, kind: output, shape index: {1}]  }
   0x1   :  { %689 = vmatprep.subr.bf16.mxu0 %v1889_v0  ;;  %v1782_v1 = vld [vmem:[%s3187_s1 + $0x38] sm:$0xff]   ;;  %1759 = vmatprep.subr.bf16.mxu1 %v1889_v0  ;;  %v1783_v2 = vld [vmem:[%s3187_s1 + $0x30] sm:$0xff]   ;;  %v1784_v3 = vld [vmem:[%s3187_s1 + $0x28] sm:$0xff]   ;;  %v1890_v10 = vmov 65535   ;;  %vm21_vm3 = vcmask 31744   ;;  %v1891_v17 = vmov 0.0  }
   0x2   :  { %690 = vmatpush1.bf16.msra.mxu0 %v1782_v1  ;;  %1769 = vmatpush1.bf16.msra.mxu1 %v1782_v1  ;;  %v1785_v4 = vld [vmem:[%s3187_s1 + $0x20] sm:$0xff]   ;;  %v1786_v6 = vld [vmem:[%s3187_s1 + $0x18] sm:$0xff]   ;;  %v1787_v7 = vld [vmem:[%s3187_s1 + $0x10] sm:$0xff]   ;;  %v684_v11 = vsel %vm682_vm1, 4294967295, %v1890_v10  ;;  %22 = vst.msk [vmem:[#allocation2] sm:$0xff] %vm21_vm3, %v1891_v17  ;;  %vm91_vm4 = vcmask 25600  }
   0x3   :  { %691 = vmatprep.subr.bf16.mxu0 %v1889_v0  ;;  %1760 = vmatprep.subr.bf16.mxu1 %v1889_v0  ;;  %v1794_v5 = vld [vmem:[%s3188_s0 + $0x4] ss:$8 sps:$4 sm:$0xff]   ;;  %v1790_v13 = vld [vmem:[%s3187_s1 + $0x48] ss:$0 sps:$4 sm:$0x33]   ;;  %v685_v14 = vsel %vm683_vm2, %v684_v11, 0 }
   0x4   :  { %1726 = vmatprep.mubr.msk.bf16.mxu0 %vm585_vm0, %v1794_v5  ;;  %v1818_v8 = vld [vmem:[%s3188_s0 + $0x104] ss:$8 sps:$4 sm:$0xff]   ;;  %v687_v15 = vand.u32 %v1790_v13, %v685_v14  ;;  %23 = vst.msk [vmem:[#allocation2 + $0x8] sm:$0xff] %vm21_vm3, %v1891_v17  ;;  %24 = vst.msk [vmem:[#allocation2 + $0x10] sm:$0xff] %vm21_vm3, %v1891_v17  ;;  %v1792_v18 = vld [vmem:[%s3188_s0] ss:$8 sps:$4 sm:$0xff]  }
   0x5   :  { %v1788_v9 = vld [vmem:[%s3187_s1 + $0x8] sm:$0xff]   ;;  %1742 = vmatprep.mubr.msk.bf16.mxu1 %vm585_vm0, %v1818_v8  ;;  %v1789_v12 = vld [vmem:[%s3187_s1] sm:$0xff]   ;;  %25 = vst.msk [vmem:[#allocation2 + $0x18] sm:$0xff] %vm21_vm3, %v1891_v17  ;;  %26 = vst.msk [vmem:[#allocation2 + $0x20] sm:$0xff] %vm21_vm3, %v1891_v17 }
   0x6   :  { %692 = vmatpush1.bf16.msra.mxu0 %v1783_v2  ;;  %1770 = vmatpush1.bf16.msra.mxu1 %v1783_v2  ;;  %v1956_v16 = vld [vmem:[%s3187_s1 + $0x40] sm:$0xff]   ;;  %27 = vst.msk [vmem:[#allocation2 + $0x28] sm:$0xff] %vm21_vm3, %v1891_v17  ;;  %28 = vst.msk [vmem:[#allocation2 + $0x30] sm:$0xff] %vm21_vm3, %v1891_v17  ;;  %v1795_v20 = vld [vmem:[%s3188_s0 + $0x14] ss:$8 sps:$4 sm:$0xff]  }
   0x7   :  { %693 = vmatprep.subr.bf16.mxu0 %v1889_v0  ;;  %1761 = vmatprep.subr.bf16.mxu1 %v1889_v0  ;;  %29 = vst.msk [vmem:[#allocation2 + $0x38] sm:$0xff] %vm21_vm3, %v1891_v17  ;;  %30 = vst.msk [vmem:[#allocation2 + $0x40] sm:$0xff] %vm21_vm3, %v1891_v17  ;;  %v1816_v19 = vld [vmem:[%s3188_s0 + $0x100] ss:$8 sps:$4 sm:$0xff]   ;;  %v1822_v21 = vld [vmem:[%s3188_s0 + $0x114] ss:$8 sps:$4 sm:$0xff]  }
   0x8   :  { %31 = vst.msk [vmem:[#allocation2 + $0x48] sm:$0xff] %vm21_vm3, %v1891_v17  ;;  %32 = vst.msk [vmem:[#allocation2 + $0x50] sm:$0xff] %vm21_vm3, %v1891_v17  ;;  %v1797_v22 = vld [vmem:[%s3188_s0 + $0x10] ss:$8 sps:$4 sm:$0xff]   ;;  %v1798_v24 = vld [vmem:[%s3188_s0 + $0x24] ss:$8 sps:$4 sm:$0xff]  }
   0x9   :  { %33 = vst.msk [vmem:[#allocation2 + $0x58] sm:$0xff] %vm21_vm3, %v1891_v17  ;;  %34 = vst.msk [vmem:[#allocation2 + $0x60] sm:$0xff] %vm21_vm3, %v1891_v17  ;;  %v1824_v23 = vld [vmem:[%s3188_s0 + $0x110] ss:$8 sps:$4 sm:$0xff]   ;;  %v1828_v25 = vld [vmem:[%s3188_s0 + $0x124] ss:$8 sps:$4 sm:$0xff]  }
   0xa   :  { %694 = vmatpush1.bf16.msra.mxu0 %v1784_v3  ;;  %1771 = vmatpush1.bf16.msra.mxu1 %v1784_v3  ;;  %35 = vst.msk [vmem:[#allocation2 + $0x68] sm:$0xff] %vm21_vm3, %v1891_v17  ;;  %36 = vst.msk [vmem:[#allocation2 + $0x70] sm:$0xff] %vm21_vm3, %v1891_v17  ;;  %v1800_v26 = vld [vmem:[%s3188_s0 + $0x20] ss:$8 sps:$4 sm:$0xff]   ;;  %v1801_v28 = vld [vmem:[%s3188_s0 + $0x34] ss:$8 sps:$4 sm:$0xff]  }
   0xb   :  { %695 = vmatprep.subr.bf16.mxu0 %v1889_v0  ;;  %1762 = vmatprep.subr.bf16.mxu1 %v1889_v0  ;;  %37 = vst.msk [vmem:[#allocation2 + $0x78] sm:$0xff] %vm21_vm3, %v1891_v17  ;;  %38 = vst.msk [vmem:[#allocation2 + $0x80] sm:$0xff] %vm21_vm3, %v1891_v17  ;;  %v1830_v27 = vld [vmem:[%s3188_s0 + $0x120] ss:$8 sps:$4 sm:$0xff]   ;;  %v1834_v29 = vld [vmem:[%s3188_s0 + $0x134] ss:$8 sps:$4 sm:$0xff]  }
   0xc   :  { %39 = vst.msk [vmem:[#allocation2 + $0x88] sm:$0xff] %vm21_vm3, %v1891_v17  ;;  %40 = vst.msk [vmem:[#allocation2 + $0x90] sm:$0xff] %vm21_vm3, %v1891_v17  ;;  %v1803_v30 = vld [vmem:[%s3188_s0 + $0x30] ss:$8 sps:$4 sm:$0xff]   ;;  %v1804_v32 = vld [vmem:[%s3188_s0 + $0x44] ss:$8 sps:$4 sm:$0xff]  }
   0xd   :  { %41 = vst.msk [vmem:[#allocation2 + $0x98] sm:$0xff] %vm21_vm3, %v1891_v17  ;;  %42 = vst.msk [vmem:[#allocation2 + $0xa0] sm:$0xff] %vm21_vm3, %v1891_v17  ;;  %v1836_v31 = vld [vmem:[%s3188_s0 + $0x130] ss:$8 sps:$4 sm:$0xff]   ;;  %v1840_v33 = vld [vmem:[%s3188_s0 + $0x144] ss:$8 sps:$4 sm:$0xff]  }
   0xe   :  { %696 = vmatpush1.bf16.msra.mxu0 %v1785_v4  ;;  %1772 = vmatpush1.bf16.msra.mxu1 %v1785_v4  ;;  %43 = vst.msk [vmem:[#allocation2 + $0xa8] sm:$0xff] %vm21_vm3, %v1891_v17  ;;  %44 = vst.msk [vmem:[#allocation2 + $0xb0] sm:$0xff] %vm21_vm3, %v1891_v17  ;;  %v1806_v34 = vld [vmem:[%s3188_s0 + $0x40] ss:$8 sps:$4 sm:$0xff]   ;;  %v1807_v36 = vld [vmem:[%s3188_s0 + $0x54] ss:$8 sps:$4 sm:$0xff]  }
   0xf   :  { %697 = vmatprep.subr.bf16.mxu0 %v1889_v0  ;;  %1763 = vmatprep.subr.bf16.mxu1 %v1889_v0  ;;  %45 = vst.msk [vmem:[#allocation2 + $0xb8] sm:$0xff] %vm21_vm3, %v1891_v17  ;;  %46 = vst.msk [vmem:[#allocation2 + $0xc0] sm:$0xff] %vm21_vm3, %v1891_v17  ;;  %v1842_v35 = vld [vmem:[%s3188_s0 + $0x140] ss:$8 sps:$4 sm:$0xff]   ;;  %v1846_v37 = vld [vmem:[%s3188_s0 + $0x154] ss:$8 sps:$4 sm:$0xff]  }
  0x10   :  { %47 = vst.msk [vmem:[#allocation2 + $0xc8] sm:$0xff] %vm21_vm3, %v1891_v17  ;;  %48 = vst.msk [vmem:[#allocation2 + $0xd0] sm:$0xff] %vm21_vm3, %v1891_v17  ;;  %v1809_v38 = vld [vmem:[%s3188_s0 + $0x50] ss:$8 sps:$4 sm:$0xff]   ;;  %v1810_v40 = vld [vmem:[%s3188_s0 + $0x64] ss:$8 sps:$4 sm:$0xff]  }
  0x11   :  { %49 = vst.msk [vmem:[#allocation2 + $0xd8] sm:$0xff] %vm21_vm3, %v1891_v17  ;;  %50 = vst.msk [vmem:[#allocation2 + $0xe0] sm:$0xff] %vm21_vm3, %v1891_v17  ;;  %v1848_v39 = vld [vmem:[%s3188_s0 + $0x150] ss:$8 sps:$4 sm:$0xff]   ;;  %v1852_v41 = vld [vmem:[%s3188_s0 + $0x164] ss:$8 sps:$4 sm:$0xff]  }
  0x12   :  { %698 = vmatpush1.bf16.msra.mxu0 %v1786_v6  ;;  %1773 = vmatpush1.bf16.msra.mxu1 %v1786_v6  ;;  %51 = vst.msk [vmem:[#allocation2 + $0xe8] sm:$0xff] %vm21_vm3, %v1891_v17  ;;  %52 = vst.msk [vmem:[#allocation2 + $0xf0] sm:$0xff] %vm21_vm3, %v1891_v17  ;;  %v1812_v42 = vld [vmem:[%s3188_s0 + $0x60] ss:$8 sps:$4 sm:$0xff]   ;;  %v1813_v44 = vld [vmem:[%s3188_s0 + $0x74] ss:$8 sps:$4 sm:$0xff]  }
  0x13   :  { %699 = vmatprep.subr.bf16.mxu0 %v1889_v0  ;;  %1764 = vmatprep.subr.bf16.mxu1 %v1889_v0  ;;  %53 = vst.msk [vmem:[#allocation2 + $0xf8] sm:$0xff] %vm21_vm3, %v1891_v17  ;;  %54 = vst.msk [vmem:[#allocation2 + $0x100] sm:$0xff] %vm21_vm3, %v1891_v17  ;;  %v1854_v43 = vld [vmem:[%s3188_s0 + $0x160] ss:$8 sps:$4 sm:$0xff]   ;;  %v1858_v45 = vld [vmem:[%s3188_s0 + $0x174] ss:$8 sps:$4 sm:$0xff]  }
  0x14   :  { %55 = vst.msk [vmem:[#allocation2 + $0x108] sm:$0xff] %vm21_vm3, %v1891_v17  ;;  %56 = vst.msk [vmem:[#allocation2 + $0x110] sm:$0xff] %vm21_vm3, %v1891_v17  ;;  %v1815_v46 = vld [vmem:[%s3188_s0 + $0x70] ss:$8 sps:$4 sm:$0xff]   ;;  %v1819_v48 = vld [vmem:[%s3188_s0 + $0x84] ss:$8 sps:$4 sm:$0xff]  }
  0x15   :  { %57 = vst.msk [vmem:[#allocation2 + $0x118] sm:$0xff] %vm21_vm3, %v1891_v17  ;;  %58 = vst.msk [vmem:[#allocation2 + $0x120] sm:$0xff] %vm21_vm3, %v1891_v17  ;;  %v1860_v47 = vld [vmem:[%s3188_s0 + $0x170] ss:$8 sps:$4 sm:$0xff]   ;;  %v1864_v49 = vld [vmem:[%s3188_s0 + $0x184] ss:$8 sps:$4 sm:$0xff]  }
  0x16   :  { %700 = vmatpush1.bf16.msra.mxu0 %v1787_v7  ;;  %1774 = vmatpush1.bf16.msra.mxu1 %v1787_v7  ;;  %59 = vst.msk [vmem:[#allocation2 + $0x128] sm:$0xff] %vm21_vm3, %v1891_v17  ;;  %60 = vst.msk [vmem:[#allocation2 + $0x130] sm:$0xff] %vm21_vm3, %v1891_v17  ;;  %v1821_v50 = vld [vmem:[%s3188_s0 + $0x80] ss:$8 sps:$4 sm:$0xff]   ;;  %v1825_v52 = vld [vmem:[%s3188_s0 + $0x94] ss:$8 sps:$4 sm:$0xff]  }
  0x17   :  { %701 = vmatprep.subr.bf16.mxu0 %v1889_v0  ;;  %1765 = vmatprep.subr.bf16.mxu1 %v1889_v0  ;;  %61 = vst.msk [vmem:[#allocation2 + $0x138] sm:$0xff] %vm21_vm3, %v1891_v17  ;;  %62 = vst.msk [vmem:[#allocation2 + $0x140] sm:$0xff] %vm21_vm3, %v1891_v17  ;;  %v1866_v51 = vld [vmem:[%s3188_s0 + $0x180] ss:$8 sps:$4 sm:$0xff]   ;;  %v1867_v53 = vld [vmem:[%s3188_s0 + $0x194] ss:$8 sps:$4 sm:$0xff]  }
  0x18   :  { %63 = vst.msk [vmem:[#allocation2 + $0x148] sm:$0xff] %vm21_vm3, %v1891_v17  ;;  %64 = vst.msk [vmem:[#allocation2 + $0x150] sm:$0xff] %vm21_vm3, %v1891_v17  ;;  %v1827_v54 = vld [vmem:[%s3188_s0 + $0x90] ss:$8 sps:$4 sm:$0xff]   ;;  %v1831_v56 = vld [vmem:[%s3188_s0 + $0xa4] ss:$8 sps:$4 sm:$0xff]  }
  0x19   :  { %65 = vst.msk [vmem:[#allocation2 + $0x158] sm:$0xff] %vm21_vm3, %v1891_v17  ;;  %66 = vst.msk [vmem:[#allocation2 + $0x160] sm:$0xff] %vm21_vm3, %v1891_v17  ;;  %v1869_v55 = vld [vmem:[%s3188_s0 + $0x190] ss:$8 sps:$4 sm:$0xff]   ;;  %v1870_v57 = vld [vmem:[%s3188_s0 + $0x1a4] ss:$8 sps:$4 sm:$0xff]  }
  0x1a   :  { %702 = vmatpush1.bf16.msra.mxu0 %v1788_v9  ;;  %1775 = vmatpush1.bf16.msra.mxu1 %v1788_v9  ;;  %67 = vst.msk [vmem:[#allocation2 + $0x168] sm:$0xff] %vm21_vm3, %v1891_v17  ;;  %68 = vst.msk [vmem:[#allocation2 + $0x170] sm:$0xff] %vm21_vm3, %v1891_v17  ;;  %v1833_v58 = vld [vmem:[%s3188_s0 + $0xa0] ss:$8 sps:$4 sm:$0xff]   ;;  %v1837_v60 = vld [vmem:[%s3188_s0 + $0xb4] ss:$8 sps:$4 sm:$0xff]  }
  0x1b   :  { %703 = vmatprep.subr.bf16.mxu0 %v1889_v0  ;;  %1766 = vmatprep.subr.bf16.mxu1 %v1889_v0  ;;  %69 = vst.msk [vmem:[#allocation2 + $0x178] sm:$0xff] %vm21_vm3, %v1891_v17  ;;  %70 = vst.msk [vmem:[#allocation2 + $0x180] sm:$0xff] %vm21_vm3, %v1891_v17  ;;  %v1872_v59 = vld [vmem:[%s3188_s0 + $0x1a0] ss:$8 sps:$4 sm:$0xff]   ;;  %v1873_v61 = vld [vmem:[%s3188_s0 + $0x1b4] ss:$8 sps:$4 sm:$0xff]  }
  0x1c   :  { %71 = vst.msk [vmem:[#allocation2 + $0x188] sm:$0xff] %vm21_vm3, %v1891_v17  ;;  %72 = vst.msk [vmem:[#allocation2 + $0x190] sm:$0xff] %vm21_vm3, %v1891_v17  ;;  %v1839_v62 = vld [vmem:[%s3188_s0 + $0xb0] ss:$8 sps:$4 sm:$0xff]   ;;  %v1876_v1 = vld [vmem:[%s3188_s0 + $0x1c4] ss:$8 sps:$4 sm:$0xff]  }
  0x1d   :  { %73 = vst.msk [vmem:[#allocation2 + $0x198] sm:$0xff] %vm21_vm3, %v1891_v17  ;;  %74 = vst.msk [vmem:[#allocation2 + $0x1a0] sm:$0xff] %vm21_vm3, %v1891_v17  ;;  %v1875_v63 = vld [vmem:[%s3188_s0 + $0x1b0] ss:$8 sps:$4 sm:$0xff]   ;;  %v1845_v2 = vld [vmem:[%s3188_s0 + $0xc0] ss:$8 sps:$4 sm:$0xff]  }
  0x1e   :  { %704 = vmatpush1.bf16.msra.mxu0 %v1789_v12  ;;  %1776 = vmatpush1.bf16.msra.mxu1 %v1789_v12  ;;  %75 = vst.msk [vmem:[#allocation2 + $0x1a8] sm:$0xff] %vm21_vm3, %v1891_v17  ;;  %76 = vst.msk [vmem:[#allocation2 + $0x1b0] sm:$0xff] %vm21_vm3, %v1891_v17  ;;  %v1878_v3 = vld [vmem:[%s3188_s0 + $0x1c0] ss:$8 sps:$4 sm:$0xff]   ;;  %v1849_v4 = vld [vmem:[%s3188_s0 + $0xd4] ss:$8 sps:$4 sm:$0xff]  }
  0x1f   :  { %717 = vmatprep.subr.bf16.mxu0 %v1889_v0  ;;  %1767 = vmatprep.subr.bf16.mxu1 %v1889_v0  ;;  %77 = vst.msk [vmem:[#allocation2 + $0x1b8] sm:$0xff] %vm21_vm3, %v1891_v17  ;;  %78 = vst.msk [vmem:[#allocation2 + $0x1c0] sm:$0xff] %vm21_vm3, %v1891_v17  ;;  %v1879_v5 = vld [vmem:[%s3188_s0 + $0x1d4] ss:$8 sps:$4 sm:$0xff]   ;;  %v1851_v6 = vld [vmem:[%s3188_s0 + $0xd0] ss:$8 sps:$4 sm:$0xff]  }
  0x20   :  { %79 = vst.msk [vmem:[#allocation2 + $0x1c8] sm:$0xff] %vm21_vm3, %v1891_v17  ;;  %80 = vst.msk [vmem:[#allocation2 + $0x1d0] sm:$0xff] %vm21_vm3, %v1891_v17  ;;  %v1881_v7 = vld [vmem:[%s3188_s0 + $0x1d0] ss:$8 sps:$4 sm:$0xff]   ;;  %v1855_v8 = vld [vmem:[%s3188_s0 + $0xe4] ss:$8 sps:$4 sm:$0xff]  }
  0x21   :  { %81 = vst.msk [vmem:[#allocation2 + $0x1d8] sm:$0xff] %vm21_vm3, %v1891_v17  ;;  %82 = vst.msk [vmem:[#allocation2 + $0x1e0] sm:$0xff] %vm21_vm3, %v1891_v17  ;;  %v1882_v9 = vld [vmem:[%s3188_s0 + $0x1e4] ss:$8 sps:$4 sm:$0xff]   ;;  %v1857_v10 = vld [vmem:[%s3188_s0 + $0xe0] ss:$8 sps:$4 sm:$0xff]  }
  0x22   :  { %718 = vmatpush2.bf16.msra.mxu0 %v687_v15  ;;  %1777 = vmatpush2.bf16.msra.mxu1 %v687_v15  ;;  %83 = vst.msk [vmem:[#allocation2 + $0x1e8] sm:$0xff] %vm21_vm3, %v1891_v17  ;;  %84 = vst.msk [vmem:[#allocation2 + $0x1f0] sm:$0xff] %vm21_vm3, %v1891_v17  ;;  %v1884_v11 = vld [vmem:[%s3188_s0 + $0x1e0] ss:$8 sps:$4 sm:$0xff]   ;;  %v1861_v12 = vld [vmem:[%s3188_s0 + $0xf4] ss:$8 sps:$4 sm:$0xff]  }
  0x23   :  { %719 = vmatprep.subr.bf16.mxu0 %v1889_v0  ;;  %1768 = vmatprep.subr.bf16.mxu1 %v1889_v0  ;;  %85 = vst.msk [vmem:[#allocation2 + $0x1f8] sm:$0xff] %vm21_vm3, %v1891_v17  ;;  %v1843_v0 = vld [vmem:[%s3188_s0 + $0xc4] ss:$8 sps:$4 sm:$0xff]   ;;  %v1885_v13 = vld [vmem:[%s3188_s0 + $0x1f4] ss:$8 sps:$4 sm:$0xff]  }
  0x24   :  { %v1863_v14 = vld [vmem:[%s3188_s0 + $0xf0] ss:$8 sps:$4 sm:$0xff]   ;;  %92 = vst.msk [vmem:[%s3191_s4] sm:$0x3] %vm91_vm4, %v1891_v17 }
  0x25   :  { %v1887_v15 = vld [vmem:[%s3188_s0 + $0x1f0] ss:$8 sps:$4 sm:$0xff]  }
  0x26   :  { %720 = vmatpush2.bf16.msra.mxu0 %v1956_v16  ;;  %1778 = vmatpush2.bf16.msra.mxu1 %v1956_v16  ;;  %v93_v16 = vld [vmem:[#allocation2] sm:$0xff] }
  0x29   :  { %722 = vmatmul.mubr.bf16.vlgmr.msra.gmra.mxu0 %v1792_v18  ;;  %850 = vmatmul.mubr.bf16.vlgmr.msra.gmra.mxu1 %v1816_v19  ;;  %v125_v18 = vld [vmem:[#allocation2 + $0x100] sm:$0xff] }
  0x2a   :  { %1727 = vmatprep.mubr.msk.bf16.mxu0 %vm585_vm0, %v1795_v20  ;;  %1743 = vmatprep.mubr.msk.bf16.mxu1 %vm585_vm0, %v1822_v21 }
  0x31   :  { %730 = vmatmul.mubr.bf16.gmra.mxu0 %v1797_v22  ;;  %858 = vmatmul.mubr.bf16.gmra.mxu1 %v1824_v23 }
  0x32   :  { %1728 = vmatprep.mubr.msk.bf16.mxu0 %vm585_vm0, %v1798_v24  ;;  %1744 = vmatprep.mubr.msk.bf16.mxu1 %vm585_vm0, %v1828_v25  ;;  %v94_v24 = vld [vmem:[#allocation2 + $0x8] sm:$0xff] }
  0x39   :  { %738 = vmatmul.mubr.bf16.gmra.mxu0 %v1800_v26  ;;  %866 = vmatmul.mubr.bf16.gmra.mxu1 %v1830_v27  ;;  %v126_v26 = vld [vmem:[#allocation2 + $0x108] sm:$0xff] }
  0x3a   :  { %1729 = vmatprep.mubr.msk.bf16.mxu0 %vm585_vm0, %v1801_v28  ;;  %1745 = vmatprep.mubr.msk.bf16.mxu1 %vm585_vm0, %v1834_v29 }
  0x41   :  { %746 = vmatmul.mubr.bf16.gmra.mxu0 %v1803_v30  ;;  %874 = vmatmul.mubr.bf16.gmra.mxu1 %v1836_v31 }
  0x42   :  { %1730 = vmatprep.mubr.msk.bf16.mxu0 %vm585_vm0, %v1804_v32  ;;  %1746 = vmatprep.mubr.msk.bf16.mxu1 %vm585_vm0, %v1840_v33  ;;  %v95_v32 = vld [vmem:[#allocation2 + $0x10] sm:$0xff] }
  0x49   :  { %754 = vmatmul.mubr.bf16.gmra.mxu0 %v1806_v34  ;;  %882 = vmatmul.mubr.bf16.gmra.mxu1 %v1842_v35  ;;  %v127_v34 = vld [vmem:[#allocation2 + $0x110] sm:$0xff]  ;;  %v2311_v35 = vld [vmem:[%s3189_s2] ss:$0 sm:$0xff] }
  0x4a   :  { %1731 = vmatprep.mubr.msk.bf16.mxu0 %vm585_vm0, %v1807_v36  ;;  %1747 = vmatprep.mubr.msk.bf16.mxu1 %vm585_vm0, %v1846_v37 }
  0x51   :  { %762 = vmatmul.mubr.bf16.gmra.mxu0 %v1809_v38  ;;  %890 = vmatmul.mubr.bf16.gmra.mxu1 %v1848_v39 }
  0x52   :  { %1732 = vmatprep.mubr.msk.bf16.mxu0 %vm585_vm0, %v1810_v40  ;;  %1748 = vmatprep.mubr.msk.bf16.mxu1 %vm585_vm0, %v1852_v41 }
  0x59   :  { %770 = vmatmul.mubr.bf16.gmra.mxu0 %v1812_v42  ;;  %898 = vmatmul.mubr.bf16.gmra.mxu1 %v1854_v43  ;;  %v96_v42 = vld [vmem:[#allocation2 + $0x18] sm:$0xff] }
  0x5a   :  { %1733 = vmatprep.mubr.msk.bf16.mxu0 %vm585_vm0, %v1813_v44  ;;  %1749 = vmatprep.mubr.msk.bf16.mxu1 %vm585_vm0, %v1858_v45 }
  0x61   :  { %778 = vmatmul.mubr.bf16.gmra.mxu0 %v1815_v46  ;;  %906 = vmatmul.mubr.bf16.gmra.mxu1 %v1860_v47  ;;  %v128_v47 = vld [vmem:[#allocation2 + $0x118] sm:$0xff] }
  0x62   :  { %1734 = vmatprep.mubr.msk.bf16.mxu0 %vm585_vm0, %v1819_v48  ;;  %1750 = vmatprep.mubr.msk.bf16.mxu1 %vm585_vm0, %v1864_v49 }
  0x69   :  { %786 = vmatmul.mubr.bf16.gmra.mxu0 %v1821_v50  ;;  %914 = vmatmul.mubr.bf16.gmra.mxu1 %v1866_v51 }
  0x6a   :  { %1735 = vmatprep.mubr.msk.bf16.mxu0 %vm585_vm0, %v1825_v52  ;;  %1751 = vmatprep.mubr.msk.bf16.mxu1 %vm585_vm0, %v1867_v53  ;;  %v97_v53 = vld [vmem:[#allocation2 + $0x20] sm:$0xff] }
  0x71   :  { %794 = vmatmul.mubr.bf16.gmra.mxu0 %v1827_v54  ;;  %922 = vmatmul.mubr.bf16.gmra.mxu1 %v1869_v55 }
  0x72   :  { %1736 = vmatprep.mubr.msk.bf16.mxu0 %vm585_vm0, %v1831_v56  ;;  %1752 = vmatprep.mubr.msk.bf16.mxu1 %vm585_vm0, %v1870_v57 }
  0x79   :  { %802 = vmatmul.mubr.bf16.gmra.mxu0 %v1833_v58  ;;  %930 = vmatmul.mubr.bf16.gmra.mxu1 %v1872_v59  ;;  %v129_v59 = vld [vmem:[#allocation2 + $0x120] sm:$0xff] }
  0x7a   :  { %1737 = vmatprep.mubr.msk.bf16.mxu0 %vm585_vm0, %v1837_v60  ;;  %1753 = vmatprep.mubr.msk.bf16.mxu1 %vm585_vm0, %v1873_v61 }
  0x81   :  { %810 = vmatmul.mubr.bf16.gmra.mxu0 %v1839_v62  ;;  %938 = vmatmul.mubr.bf16.gmra.mxu1 %v1875_v63 }
  0x82   :  { %1738 = vmatprep.mubr.msk.bf16.mxu0 %vm585_vm0, %v1843_v0  ;;  %1754 = vmatprep.mubr.msk.bf16.mxu1 %vm585_vm0, %v1876_v1  ;;  %v98_v1 = vld [vmem:[#allocation2 + $0x28] sm:$0xff] }
  0x89   :  { %818 = vmatmul.mubr.bf16.gmra.mxu0 %v1845_v2  ;;  %946 = vmatmul.mubr.bf16.gmra.mxu1 %v1878_v3 }
  0x8a   :  { %1739 = vmatprep.mubr.msk.bf16.mxu0 %vm585_vm0, %v1849_v4  ;;  %1755 = vmatprep.mubr.msk.bf16.mxu1 %vm585_vm0, %v1879_v5 }
  0x91   :  { %826 = vmatmul.mubr.bf16.gmra.mxu0 %v1851_v6  ;;  %954 = vmatmul.mubr.bf16.gmra.mxu1 %v1881_v7  ;;  %v130_v7 = vld [vmem:[#allocation2 + $0x128] sm:$0xff] }
  0x92   :  { %1740 = vmatprep.mubr.msk.bf16.mxu0 %vm585_vm0, %v1855_v8  ;;  %1756 = vmatprep.mubr.msk.bf16.mxu1 %vm585_vm0, %v1882_v9 }
  0x99   :  { %834 = vmatmul.mubr.bf16.gmra.mxu0 %v1857_v10  ;;  %962 = vmatmul.mubr.bf16.gmra.mxu1 %v1884_v11 }
  0x9a   :  { %1741 = vmatprep.mubr.msk.bf16.mxu0 %vm585_vm0, %v1861_v12  ;;  %1757 = vmatprep.mubr.msk.bf16.mxu1 %vm585_vm0, %v1885_v13  ;;  %v99_v13 = vld [vmem:[#allocation2 + $0x30] sm:$0xff] }
  0xa1   :  { %842 = vmatmul.mubr.bf16.gmra.mxu0 %v1863_v14  ;;  %970 = vmatmul.mubr.bf16.gmra.mxu1 %v1887_v15 }
  0xe9   :  { %v723_v19 = vpop.f32.mrf.mxu0  ;;  %v851_v20 = vpop.f32.mrf.mxu1 }
  0xea   :  { %v978_v21 = vadd.f32 %v723_v19, %v93_v16  ;;  %v1010_v22 = vadd.f32 %v851_v20, %v125_v18  ;;  %v131_v16 = vld [vmem:[#allocation2 + $0x130] sm:$0xff] }
  0xeb   :  { %v725_v23 = vpop.f32.mrf.mxu0  ;;  %v853_v25 = vpop.f32.mrf.mxu1 }
  0xec   :  { %1043 = vst.msk [vmem:[#allocation2] sm:$0xff] %vm21_vm3, %v978_v21  ;;  %1075 = vst.msk [vmem:[#allocation2 + $0x100] sm:$0xff] %vm21_vm3, %v1010_v22 }
  0xed   :  { %v726_v27 = vpop.f32.mrf.mxu0  ;;  %v854_v28 = vpop.f32.mrf.mxu1 }
  0xee   :  { %v979_v29 = vadd.f32 %v726_v27, %v94_v24  ;;  %v1011_v30 = vadd.f32 %v854_v28, %v126_v26  ;;  %v100_v27 = vld [vmem:[#allocation2 + $0x38] sm:$0xff] }
  0xef   :  { %v728_v31 = vpop.f32.mrf.mxu0  ;;  %v856_v33 = vpop.f32.mrf.mxu1 }
  0xf0   :  { %1044 = vst.msk [vmem:[#allocation2 + $0x8] sm:$0xff] %vm21_vm3, %v979_v29  ;;  %1076 = vst.msk [vmem:[#allocation2 + $0x108] sm:$0xff] %vm21_vm3, %v1011_v30  ;;  %v132_v29 = vld [vmem:[#allocation2 + $0x138] sm:$0xff] }
  0xf1   :  { %v731_v36 = vpop.f32.mrf.mxu0  ;;  %v859_v37 = vpop.f32.mrf.mxu1 }
  0xf2   :  { %v980_v38 = vadd.f32 %v731_v36, %v95_v32  ;;  %v1012_v39 = vadd.f32 %v859_v37, %v127_v34 }
  0xf3   :  { %v1110_v40 = vld [vmem:[#allocation2] sm:$0xff]  ;;  %v733_v41 = vpop.f32.mrf.mxu0  ;;  %v861_v44 = vpop.f32.mrf.mxu1 }
  0xf4   :  { %v1142_v43 = vld [vmem:[#allocation2 + $0x100] sm:$0xff]  ;;  %v2314_v45 = vadd.f32 %v2311_v35, %v1110_v40  ;;  %1045 = vst.msk [vmem:[#allocation2 + $0x10] sm:$0xff] %vm21_vm3, %v980_v38  ;;  %1077 = vst.msk [vmem:[#allocation2 + $0x110] sm:$0xff] %vm21_vm3, %v1012_v39 }
  0xf5   :  { %v2318_v46 = vadd.f32 %v2311_v35, %v1142_v43  ;;  %v734_v48 = vpop.f32.mrf.mxu0  ;;  %v862_v49 = vpop.f32.mrf.mxu1  ;;  %v101_v40 = vld [vmem:[#allocation2 + $0x40] sm:$0xff] }
  0xf6   :  { %1245 = vst.msk [vmem:[%s3190_s3] sm:$0xff] %vm21_vm3, %v2314_v45  ;;  %v981_v50 = vadd.f32 %v734_v48, %v96_v42  ;;  %v1013_v55 = vadd.f32 %v862_v49, %v128_v47  ;;  %v133_v42 = vld [vmem:[#allocation2 + $0x140] sm:$0xff] }
  0xf7   :  { %1277 = vst.msk [vmem:[%s3190_s3 + $0x100] sm:$0xff] %vm21_vm3, %v2318_v46  ;;  %v1111_v51 = vld [vmem:[#allocation2 + $0x8] sm:$0xff]  ;;  %v736_v52 = vpop.f32.mrf.mxu0  ;;  %v864_v56 = vpop.f32.mrf.mxu1 }
  0xf8   :  { %v1143_v54 = vld [vmem:[#allocation2 + $0x108] sm:$0xff]  ;;  %v2332_v57 = vadd.f32 %v2311_v35, %v1111_v51  ;;  %1046 = vst.msk [vmem:[#allocation2 + $0x18] sm:$0xff] %vm21_vm3, %v981_v50  ;;  %1078 = vst.msk [vmem:[#allocation2 + $0x118] sm:$0xff] %vm21_vm3, %v1013_v55 }
  0xf9   :  { %v2336_v58 = vadd.f32 %v2311_v35, %v1143_v54  ;;  %v739_v60 = vpop.f32.mrf.mxu0  ;;  %v867_v61 = vpop.f32.mrf.mxu1  ;;  %v102_v54 = vld [vmem:[#allocation2 + $0x48] sm:$0xff] }
  0xfa   :  { %1246 = vst.msk [vmem:[%s3190_s3 + $0x8] sm:$0xff] %vm21_vm3, %v2332_v57  ;;  %v982_v62 = vadd.f32 %v739_v60, %v97_v53  ;;  %v1014_v3 = vadd.f32 %v867_v61, %v129_v59  ;;  %v134_v61 = vld [vmem:[#allocation2 + $0x148] sm:$0xff] }
  0xfb   :  { %1278 = vst.msk [vmem:[%s3190_s3 + $0x108] sm:$0xff] %vm21_vm3, %v2336_v58  ;;  %v1112_v63 = vld [vmem:[#allocation2 + $0x10] sm:$0xff]  ;;  %v741_v0 = vpop.f32.mrf.mxu0  ;;  %v869_v4 = vpop.f32.mrf.mxu1 }
  0xfc   :  { %v1144_v2 = vld [vmem:[#allocation2 + $0x110] sm:$0xff]  ;;  %v2350_v5 = vadd.f32 %v2311_v35, %v1112_v63  ;;  %1047 = vst.msk [vmem:[#allocation2 + $0x20] sm:$0xff] %vm21_vm3, %v982_v62  ;;  %1079 = vst.msk [vmem:[#allocation2 + $0x120] sm:$0xff] %vm21_vm3, %v1014_v3 }
  0xfd   :  { %v2354_v6 = vadd.f32 %v2311_v35, %v1144_v2  ;;  %v742_v8 = vpop.f32.mrf.mxu0  ;;  %v870_v9 = vpop.f32.mrf.mxu1  ;;  %v103_v3 = vld [vmem:[#allocation2 + $0x50] sm:$0xff] }
  0xfe   :  { %1247 = vst.msk [vmem:[%s3190_s3 + $0x10] sm:$0xff] %vm21_vm3, %v2350_v5  ;;  %v983_v10 = vadd.f32 %v742_v8, %v98_v1  ;;  %v1015_v14 = vadd.f32 %v870_v9, %v130_v7 }
  0xff   :  { %1279 = vst.msk [vmem:[%s3190_s3 + $0x110] sm:$0xff] %vm21_vm3, %v2354_v6  ;;  %v1113_v11 = vld [vmem:[#allocation2 + $0x18] sm:$0xff]  ;;  %v744_v12 = vpop.f32.mrf.mxu0  ;;  %v872_v15 = vpop.f32.mrf.mxu1 }
 0x100   :  { %v2368_v18 = vadd.f32 %v2311_v35, %v1113_v11  ;;  %1048 = vst.msk [vmem:[#allocation2 + $0x28] sm:$0xff] %vm21_vm3, %v983_v10  ;;  %v1145_v19 = vld [vmem:[#allocation2 + $0x118] sm:$0xff]  ;;  %1080 = vst.msk [vmem:[#allocation2 + $0x128] sm:$0xff] %vm21_vm3, %v1015_v14  ;;  %v135_v11 = vld [vmem:[#allocation2 + $0x150] sm:$0xff] }
 0x101   :  { %v747_v20 = vpop.f32.mrf.mxu0  ;;  %v2372_v21 = vadd.f32 %v2311_v35, %v1145_v19  ;;  %v875_v22 = vpop.f32.mrf.mxu1  ;;  %v104_v19 = vld [vmem:[#allocation2 + $0x58] sm:$0xff] }
 0x102   :  { %1248 = vst.msk [vmem:[%s3190_s3 + $0x18] sm:$0xff] %vm21_vm3, %v2368_v18  ;;  %v984_v23 = vadd.f32 %v747_v20, %v99_v13  ;;  %v1016_v24 = vadd.f32 %v875_v22, %v131_v16 }
 0x103   :  { %v1114_v25 = vld [vmem:[#allocation2 + $0x20] sm:$0xff]  ;;  %v749_v26 = vpop.f32.mrf.mxu0  ;;  %1280 = vst.msk [vmem:[%s3190_s3 + $0x118] sm:$0xff] %vm21_vm3, %v2372_v21  ;;  %v877_v28 = vpop.f32.mrf.mxu1 }
 0x104   :  { %v2386_v30 = vadd.f32 %v2311_v35, %v1114_v25  ;;  %1049 = vst.msk [vmem:[#allocation2 + $0x30] sm:$0xff] %vm21_vm3, %v984_v23  ;;  %v1146_v31 = vld [vmem:[#allocation2 + $0x120] sm:$0xff]  ;;  %1081 = vst.msk [vmem:[#allocation2 + $0x130] sm:$0xff] %vm21_vm3, %v1016_v24  ;;  %v136_v26 = vld [vmem:[#allocation2 + $0x158] sm:$0xff] }
 0x105   :  { %v750_v32 = vpop.f32.mrf.mxu0  ;;  %v2391_v33 = vadd.f32 %v2311_v35, %v1146_v31  ;;  %v878_v34 = vpop.f32.mrf.mxu1 }
 0x106   :  { %1249 = vst.msk [vmem:[%s3190_s3 + $0x20] sm:$0xff] %vm21_vm3, %v2386_v30  ;;  %v985_v36 = vadd.f32 %v750_v32, %v100_v27  ;;  %v1017_v37 = vadd.f32 %v878_v34, %v132_v29  ;;  %v105_v34 = vld [vmem:[#allocation2 + $0x60] sm:$0xff] }
 0x107   :  { %v1115_v38 = vld [vmem:[#allocation2 + $0x28] sm:$0xff]  ;;  %v752_v39 = vpop.f32.mrf.mxu0  ;;  %1281 = vst.msk [vmem:[%s3190_s3 + $0x120] sm:$0xff] %vm21_vm3, %v2391_v33  ;;  %v880_v41 = vpop.f32.mrf.mxu1 }
 0x108   :  { %v2404_v43 = vadd.f32 %v2311_v35, %v1115_v38  ;;  %1050 = vst.msk [vmem:[#allocation2 + $0x38] sm:$0xff] %vm21_vm3, %v985_v36  ;;  %v1147_v44 = vld [vmem:[#allocation2 + $0x128] sm:$0xff]  ;;  %1082 = vst.msk [vmem:[#allocation2 + $0x138] sm:$0xff] %vm21_vm3, %v1017_v37  ;;  %v137_v38 = vld [vmem:[#allocation2 + $0x160] sm:$0xff] }
 0x109   :  { %v755_v47 = vpop.f32.mrf.mxu0  ;;  %v2409_v48 = vadd.f32 %v2311_v35, %v1147_v44  ;;  %v883_v49 = vpop.f32.mrf.mxu1 }
 0x10a   :  { %1250 = vst.msk [vmem:[%s3190_s3 + $0x28] sm:$0xff] %vm21_vm3, %v2404_v43  ;;  %v986_v50 = vadd.f32 %v755_v47, %v101_v40  ;;  %v1018_v51 = vadd.f32 %v883_v49, %v133_v42 }
 0x10b   :  { %v1116_v52 = vld [vmem:[#allocation2 + $0x30] sm:$0xff]  ;;  %v757_v53 = vpop.f32.mrf.mxu0  ;;  %1282 = vst.msk [vmem:[%s3190_s3 + $0x128] sm:$0xff] %vm21_vm3, %v2409_v48  ;;  %v885_v56 = vpop.f32.mrf.mxu1 }
 0x10c   :  { %v1148_v55 = vld [vmem:[#allocation2 + $0x130] sm:$0xff]  ;;  %v2422_v59 = vadd.f32 %v2311_v35, %v1116_v52  ;;  %1051 = vst.msk [vmem:[#allocation2 + $0x40] sm:$0xff] %vm21_vm3, %v986_v50  ;;  %1083 = vst.msk [vmem:[#allocation2 + $0x140] sm:$0xff] %vm21_vm3, %v1018_v51  ;;  %v106_v52 = vld [vmem:[#allocation2 + $0x68] sm:$0xff] }
 0x10d   :  { %v2426_v60 = vadd.f32 %v2311_v35, %v1148_v55  ;;  %v758_v62 = vpop.f32.mrf.mxu0  ;;  %v886_v63 = vpop.f32.mrf.mxu1 }
 0x10e   :  { %1251 = vst.msk [vmem:[%s3190_s3 + $0x30] sm:$0xff] %vm21_vm3, %v2422_v59  ;;  %v987_v0 = vadd.f32 %v758_v62, %v102_v54  ;;  %v1019_v7 = vadd.f32 %v886_v63, %v134_v61  ;;  %v138_v54 = vld [vmem:[#allocation2 + $0x168] sm:$0xff] }
 0x10f   :  { %1283 = vst.msk [vmem:[%s3190_s3 + $0x130] sm:$0xff] %vm21_vm3, %v2426_v60  ;;  %v1117_v1 = vld [vmem:[#allocation2 + $0x38] sm:$0xff]  ;;  %v760_v2 = vpop.f32.mrf.mxu0  ;;  %v888_v8 = vpop.f32.mrf.mxu1 }
 0x110   :  { %v1149_v4 = vld [vmem:[#allocation2 + $0x138] sm:$0xff]  ;;  %v2440_v9 = vadd.f32 %v2311_v35, %v1117_v1  ;;  %1052 = vst.msk [vmem:[#allocation2 + $0x48] sm:$0xff] %vm21_vm3, %v987_v0  ;;  %1084 = vst.msk [vmem:[#allocation2 + $0x148] sm:$0xff] %vm21_vm3, %v1019_v7  ;;  %v139_v8 = vld [vmem:[#allocation2 + $0x170] sm:$0xff] }
 0x111   :  { %v2444_v10 = vadd.f32 %v2311_v35, %v1149_v4  ;;  %v763_v12 = vpop.f32.mrf.mxu0  ;;  %v891_v13 = vpop.f32.mrf.mxu1  ;;  %v107_v4 = vld [vmem:[#allocation2 + $0x70] sm:$0xff] }
 0x112   :  { %1252 = vst.msk [vmem:[%s3190_s3 + $0x38] sm:$0xff] %vm21_vm3, %v2440_v9  ;;  %v988_v14 = vadd.f32 %v763_v12, %v103_v3  ;;  %v1020_v22 = vadd.f32 %v891_v13, %v135_v11 }
 0x113   :  { %1284 = vst.msk [vmem:[%s3190_s3 + $0x138] sm:$0xff] %vm21_vm3, %v2444_v10  ;;  %v1118_v15 = vld [vmem:[#allocation2 + $0x40] sm:$0xff]  ;;  %v765_v16 = vpop.f32.mrf.mxu0  ;;  %v893_v23 = vpop.f32.mrf.mxu1 }
 0x114   :  { %v1150_v20 = vld [vmem:[#allocation2 + $0x140] sm:$0xff]  ;;  %v2458_v24 = vadd.f32 %v2311_v35, %v1118_v15  ;;  %1053 = vst.msk [vmem:[#allocation2 + $0x50] sm:$0xff] %vm21_vm3, %v988_v14  ;;  %1085 = vst.msk [vmem:[#allocation2 + $0x150] sm:$0xff] %vm21_vm3, %v1020_v22  ;;  %v108_v23 = vld [vmem:[#allocation2 + $0x78] sm:$0xff] }
 0x115   :  { %v2462_v25 = vadd.f32 %v2311_v35, %v1150_v20  ;;  %v766_v27 = vpop.f32.mrf.mxu0  ;;  %v894_v28 = vpop.f32.mrf.mxu1 }
 0x116   :  { %1253 = vst.msk [vmem:[%s3190_s3 + $0x40] sm:$0xff] %vm21_vm3, %v2458_v24  ;;  %v989_v29 = vadd.f32 %v766_v27, %v104_v19  ;;  %v1021_v36 = vadd.f32 %v894_v28, %v136_v26 }
 0x117   :  { %1285 = vst.msk [vmem:[%s3190_s3 + $0x140] sm:$0xff] %vm21_vm3, %v2462_v25  ;;  %v1119_v31 = vld [vmem:[#allocation2 + $0x48] sm:$0xff]  ;;  %v768_v32 = vpop.f32.mrf.mxu0  ;;  %v896_v37 = vpop.f32.mrf.mxu1 }
 0x118   :  { %v2476_v39 = vadd.f32 %v2311_v35, %v1119_v31  ;;  %1054 = vst.msk [vmem:[#allocation2 + $0x58] sm:$0xff] %vm21_vm3, %v989_v29  ;;  %v1151_v40 = vld [vmem:[#allocation2 + $0x148] sm:$0xff]  ;;  %1086 = vst.msk [vmem:[#allocation2 + $0x158] sm:$0xff] %vm21_vm3, %v1021_v36  ;;  %v140_v31 = vld [vmem:[#allocation2 + $0x178] sm:$0xff] }
 0x119   :  { %v771_v41 = vpop.f32.mrf.mxu0  ;;  %v2480_v42 = vadd.f32 %v2311_v35, %v1151_v40  ;;  %v899_v44 = vpop.f32.mrf.mxu1  ;;  %v109_v40 = vld [vmem:[#allocation2 + $0x80] sm:$0xff] }
 0x11a   :  { %1254 = vst.msk [vmem:[%s3190_s3 + $0x48] sm:$0xff] %vm21_vm3, %v2476_v39  ;;  %v990_v47 = vadd.f32 %v771_v41, %v105_v34  ;;  %v1022_v49 = vadd.f32 %v899_v44, %v137_v38 }
 0x11b   :  { %v1120_v50 = vld [vmem:[#allocation2 + $0x50] sm:$0xff]  ;;  %v773_v51 = vpop.f32.mrf.mxu0  ;;  %1286 = vst.msk [vmem:[%s3190_s3 + $0x148] sm:$0xff] %vm21_vm3, %v2480_v42  ;;  %v901_v53 = vpop.f32.mrf.mxu1 }
 0x11c   :  { %v2494_v55 = vadd.f32 %v2311_v35, %v1120_v50  ;;  %1055 = vst.msk [vmem:[#allocation2 + $0x60] sm:$0xff] %vm21_vm3, %v990_v47  ;;  %v1152_v56 = vld [vmem:[#allocation2 + $0x150] sm:$0xff]  ;;  %1087 = vst.msk [vmem:[#allocation2 + $0x160] sm:$0xff] %vm21_vm3, %v1022_v49  ;;  %v141_v51 = vld [vmem:[#allocation2 + $0x180] sm:$0xff] }
 0x11d   :  { %v774_v61 = vpop.f32.mrf.mxu0  ;;  %v2499_v62 = vadd.f32 %v2311_v35, %v1152_v56  ;;  %v902_v63 = vpop.f32.mrf.mxu1 }
 0x11e   :  { %1255 = vst.msk [vmem:[%s3190_s3 + $0x50] sm:$0xff] %vm21_vm3, %v2494_v55  ;;  %v991_v0 = vadd.f32 %v774_v61, %v106_v52  ;;  %v1023_v1 = vadd.f32 %v902_v63, %v138_v54  ;;  %v110_v63 = vld [vmem:[#allocation2 + $0x88] sm:$0xff] }
 0x11f   :  { %v1121_v2 = vld [vmem:[#allocation2 + $0x58] sm:$0xff]  ;;  %v776_v3 = vpop.f32.mrf.mxu0  ;;  %1287 = vst.msk [vmem:[%s3190_s3 + $0x150] sm:$0xff] %vm21_vm3, %v2499_v62  ;;  %v904_v7 = vpop.f32.mrf.mxu1 }
 0x120   :  { %v2512_v11 = vadd.f32 %v2311_v35, %v1121_v2  ;;  %1056 = vst.msk [vmem:[#allocation2 + $0x68] sm:$0xff] %vm21_vm3, %v991_v0  ;;  %v1153_v12 = vld [vmem:[#allocation2 + $0x158] sm:$0xff]  ;;  %1088 = vst.msk [vmem:[#allocation2 + $0x168] sm:$0xff] %vm21_vm3, %v1023_v1  ;;  %v142_v7 = vld [vmem:[#allocation2 + $0x188] sm:$0xff] }
 0x121   :  { %v779_v13 = vpop.f32.mrf.mxu0  ;;  %v2517_v14 = vadd.f32 %v2311_v35, %v1153_v12  ;;  %v907_v15 = vpop.f32.mrf.mxu1 }
 0x122   :  { %1256 = vst.msk [vmem:[%s3190_s3 + $0x58] sm:$0xff] %vm21_vm3, %v2512_v11  ;;  %v992_v16 = vadd.f32 %v779_v13, %v107_v4  ;;  %v1024_v19 = vadd.f32 %v907_v15, %v139_v8 }
 0x123   :  { %v1122_v20 = vld [vmem:[#allocation2 + $0x60] sm:$0xff]  ;;  %v781_v22 = vpop.f32.mrf.mxu0  ;;  %1288 = vst.msk [vmem:[%s3190_s3 + $0x158] sm:$0xff] %vm21_vm3, %v2517_v14  ;;  %v909_v27 = vpop.f32.mrf.mxu1 }
 0x124   :  { %v1154_v26 = vld [vmem:[#allocation2 + $0x160] sm:$0xff]  ;;  %v2530_v28 = vadd.f32 %v2311_v35, %v1122_v20  ;;  %1057 = vst.msk [vmem:[#allocation2 + $0x70] sm:$0xff] %vm21_vm3, %v992_v16  ;;  %1089 = vst.msk [vmem:[#allocation2 + $0x170] sm:$0xff] %vm21_vm3, %v1024_v19  ;;  %v111_v19 = vld [vmem:[#allocation2 + $0x90] sm:$0xff] }
 0x125   :  { %v2534_v29 = vadd.f32 %v2311_v35, %v1154_v26  ;;  %v782_v32 = vpop.f32.mrf.mxu0  ;;  %v910_v34 = vpop.f32.mrf.mxu1 }
 0x126   :  { %1257 = vst.msk [vmem:[%s3190_s3 + $0x60] sm:$0xff] %vm21_vm3, %v2530_v28  ;;  %v993_v36 = vadd.f32 %v782_v32, %v108_v23  ;;  %v1025_v44 = vadd.f32 %v910_v34, %v140_v31  ;;  %v143_v23 = vld [vmem:[#allocation2 + $0x190] sm:$0xff] }
 0x127   :  { %1289 = vst.msk [vmem:[%s3190_s3 + $0x160] sm:$0xff] %vm21_vm3, %v2534_v29  ;;  %v1123_v37 = vld [vmem:[#allocation2 + $0x68] sm:$0xff]  ;;  %v784_v38 = vpop.f32.mrf.mxu0  ;;  %v912_v47 = vpop.f32.mrf.mxu1 }
 0x128   :  { %v1155_v41 = vld [vmem:[#allocation2 + $0x168] sm:$0xff]  ;;  %v2548_v49 = vadd.f32 %v2311_v35, %v1123_v37  ;;  %1058 = vst.msk [vmem:[#allocation2 + $0x78] sm:$0xff] %vm21_vm3, %v993_v36  ;;  %1090 = vst.msk [vmem:[#allocation2 + $0x178] sm:$0xff] %vm21_vm3, %v1025_v44  ;;  %v1444_v36 = vmul.f32 %v2332_v57, %v2332_v57  ;;  %v112_v44 = vld [vmem:[#allocation2 + $0x98] sm:$0xff] }
 0x129   :  { %v2552_v50 = vadd.f32 %v2311_v35, %v1155_v41  ;;  %v787_v52 = vpop.f32.mrf.mxu0  ;;  %v915_v53 = vpop.f32.mrf.mxu1 }
 0x12a   :  { %1258 = vst.msk [vmem:[%s3190_s3 + $0x68] sm:$0xff] %vm21_vm3, %v2548_v49  ;;  %v994_v54 = vadd.f32 %v787_v52, %v109_v40  ;;  %v1026_v1 = vadd.f32 %v915_v53, %v141_v51  ;;  %v144_v51 = vld [vmem:[#allocation2 + $0x198] sm:$0xff]  ;;  %v1443_v52 = vmul.f32 %v2314_v45, %v2314_v45  ;;  %v1311_v53 = vsel %vm21_vm3, %v2332_v57, 0.0 }
 0x12b   :  { %1290 = vst.msk [vmem:[%s3190_s3 + $0x168] sm:$0xff] %vm21_vm3, %v2552_v50  ;;  %v1124_v56 = vld [vmem:[#allocation2 + $0x70] sm:$0xff]  ;;  %v789_v61 = vpop.f32.mrf.mxu0  ;;  %v917_v2 = vpop.f32.mrf.mxu1  ;;  %v1310_v57 = vsel %vm21_vm3, %v2314_v45, 0.0 }
 0x12c   :  { %v1156_v0 = vld [vmem:[#allocation2 + $0x170] sm:$0xff]  ;;  %v2566_v3 = vadd.f32 %v2311_v35, %v1124_v56  ;;  %1059 = vst.msk [vmem:[#allocation2 + $0x80] sm:$0xff] %vm21_vm3, %v994_v54  ;;  %1091 = vst.msk [vmem:[#allocation2 + $0x180] sm:$0xff] %vm21_vm3, %v1026_v1  ;;  %v1445_v54 = vmul.f32 %v2350_v5, %v2350_v5 }
 0x12d   :  { %v2570_v4 = vadd.f32 %v2311_v35, %v1156_v0  ;;  %v790_v8 = vpop.f32.mrf.mxu0  ;;  %v918_v12 = vpop.f32.mrf.mxu1 }
 0x12e   :  { %1259 = vst.msk [vmem:[%s3190_s3 + $0x70] sm:$0xff] %vm21_vm3, %v2566_v3  ;;  %v995_v13 = vadd.f32 %v790_v8, %v110_v63  ;;  %v1027_v20 = vadd.f32 %v918_v12, %v142_v7  ;;  %v1446_v63 = vmul.f32 %v2368_v18, %v2368_v18  ;;  %v1508_v7 = vsel %vm21_vm3, %v1444_v36, 0.0 }
 0x12f   :  { %1291 = vst.msk [vmem:[%s3190_s3 + $0x170] sm:$0xff] %vm21_vm3, %v2570_v4  ;;  %v1125_v15 = vld [vmem:[#allocation2 + $0x78] sm:$0xff]  ;;  %v792_v16 = vpop.f32.mrf.mxu0  ;;  %v920_v22 = vpop.f32.mrf.mxu1  ;;  %v1313_v8 = vsel %vm21_vm3, %v2350_v5, 0.0  ;;  %v1312_v12 = vadd.f32 %v1311_v53, %v1310_v57 }
 0x130   :  { %v2584_v26 = vadd.f32 %v2311_v35, %v1125_v15  ;;  %1060 = vst.msk [vmem:[#allocation2 + $0x88] sm:$0xff] %vm21_vm3, %v995_v13  ;;  %v1157_v27 = vld [vmem:[#allocation2 + $0x178] sm:$0xff]  ;;  %1092 = vst.msk [vmem:[#allocation2 + $0x188] sm:$0xff] %vm21_vm3, %v1027_v20  ;;  %v1447_v13 = vmul.f32 %v2386_v30, %v2386_v30  ;;  %v145_v20 = vld [vmem:[#allocation2 + $0x1a0] sm:$0xff]  ;;  %v1507_v22 = vsel %vm21_vm3, %v1443_v52, 0.0 }
 0x131   :  { %v795_v31 = vpop.f32.mrf.mxu0  ;;  %v2588_v32 = vadd.f32 %v2311_v35, %v1157_v27  ;;  %v923_v34 = vpop.f32.mrf.mxu1  ;;  %v1315_v27 = vsel %vm21_vm3, %v2368_v18, 0.0  ;;  %v1509_v36 = vadd.f32 %v1508_v7, %v1507_v22  ;;  %v1317_v18 = vsel %vm21_vm3, %v2386_v30, 0.0 }
 0x132   :  { %1260 = vst.msk [vmem:[%s3190_s3 + $0x78] sm:$0xff] %vm21_vm3, %v2584_v26  ;;  %v996_v37 = vadd.f32 %v795_v31, %v111_v19  ;;  %v1028_v38 = vadd.f32 %v923_v34, %v143_v23  ;;  %v113_v19 = vld [vmem:[#allocation2 + $0xa0] sm:$0xff]  ;;  %v1510_v23 = vsel %vm21_vm3, %v1445_v54, 0.0  ;;  %v1319_v7 = vsel %vm21_vm3, %v2404_v43, 0.0 }
 0x133   :  { %v1126_v40 = vld [vmem:[#allocation2 + $0x80] sm:$0xff]  ;;  %v797_v41 = vpop.f32.mrf.mxu0  ;;  %1292 = vst.msk [vmem:[%s3190_s3 + $0x178] sm:$0xff] %vm21_vm3, %v2588_v32  ;;  %v925_v47 = vpop.f32.mrf.mxu1  ;;  %v1511_v53 = vadd.f32 %v1510_v23, %v1509_v36 }
 0x134   :  { %v2610_v56 = vadd.f32 %v2311_v35, %v1126_v40  ;;  %1061 = vst.msk [vmem:[#allocation2 + $0x90] sm:$0xff] %vm21_vm3, %v996_v37  ;;  %v1158_v61 = vld [vmem:[#allocation2 + $0x180] sm:$0xff]  ;;  %1093 = vst.msk [vmem:[#allocation2 + $0x190] sm:$0xff] %vm21_vm3, %v1028_v38  ;;  %v1314_v37 = vadd.f32 %v1313_v8, %v1312_v12  ;;  %v1512_v38 = vsel %vm21_vm3, %v1446_v63, 0.0  ;;  %v1448_v47 = vmul.f32 %v2404_v43, %v2404_v43  ;;  %v146_v12 = vld [vmem:[#allocation2 + $0x1a8] sm:$0xff] }
 0x135   :  { %v798_v0 = vpop.f32.mrf.mxu0  ;;  %v2624_v1 = vadd.f32 %v2311_v35, %v1158_v61  ;;  %v926_v2 = vpop.f32.mrf.mxu1  ;;  %v1514_v61 = vsel %vm21_vm3, %v1447_v13, 0.0  ;;  %v1449_v8 = vmul.f32 %v2422_v59, %v2422_v59  ;;  %v1513_v13 = vadd.f32 %v1512_v38, %v1511_v53  ;;  %v147_v53 = vld [vmem:[#allocation2 + $0x1b0] sm:$0xff] }
 0x136   :  { %1261 = vst.msk [vmem:[%s3190_s3 + $0x80] sm:$0xff] %vm21_vm3, %v2610_v56  ;;  %v997_v17 = vadd.f32 %v798_v0, %v112_v44  ;;  %v1029_v45 = vadd.f32 %v926_v2, %v144_v51  ;;  %v1316_v54 = vadd.f32 %v1315_v27, %v1314_v37  ;;  %v114_v0 = vld [vmem:[#allocation2 + $0xa8] sm:$0xff]  ;;  %v1516_v43 = vsel %vm21_vm3, %v1448_v47, 0.0  ;;  %v115_v37 = vld [vmem:[#allocation2 + $0xb0] sm:$0xff] }
 0x137   :  { %v1127_v15 = vld [vmem:[#allocation2 + $0x88] sm:$0xff]  ;;  %v800_v16 = vpop.f32.mrf.mxu0  ;;  %1293 = vst.msk [vmem:[%s3190_s3 + $0x180] sm:$0xff] %vm21_vm3, %v2624_v1  ;;  %v928_v5 = vpop.f32.mrf.mxu1  ;;  %v1515_v23 = vadd.f32 %v1514_v61, %v1513_v13  ;;  %v1323_v47 = vsel %vm21_vm3, %v2440_v9, 0.0 }
 0x138   :  { %v2646_v31 = vadd.f32 %v2311_v35, %v1127_v15  ;;  %1062 = vst.msk [vmem:[#allocation2 + $0x98] sm:$0xff] %vm21_vm3, %v997_v17  ;;  %v1159_v34 = vld [vmem:[#allocation2 + $0x188] sm:$0xff]  ;;  %1094 = vst.msk [vmem:[#allocation2 + $0x198] sm:$0xff] %vm21_vm3, %v1029_v45  ;;  %v1318_v15 = vadd.f32 %v1317_v18, %v1316_v54  ;;  %v1321_v5 = vsel %vm21_vm3, %v2422_v59, 0.0  ;;  %v1451_v59 = vmul.f32 %v2458_v24, %v2458_v24 }
 0x139   :  { %v803_v40 = vpop.f32.mrf.mxu0  ;;  %v2652_v41 = vadd.f32 %v2311_v35, %v1159_v34  ;;  %v931_v44 = vpop.f32.mrf.mxu1  ;;  %v1518_v18 = vsel %vm21_vm3, %v1449_v8, 0.0  ;;  %v1517_v54 = vadd.f32 %v1516_v43, %v1515_v23 }
 0x13a   :  { %1262 = vst.msk [vmem:[%s3190_s3 + $0x88] sm:$0xff] %vm21_vm3, %v2646_v31  ;;  %v998_v51 = vadd.f32 %v803_v40, %v113_v19  ;;  %v1030_v52 = vadd.f32 %v931_v44, %v145_v20  ;;  %v1450_v20 = vmul.f32 %v2440_v9, %v2440_v9  ;;  %v1320_v27 = vadd.f32 %v1319_v7, %v1318_v15  ;;  %v116_v15 = vld [vmem:[#allocation2 + $0xb8] sm:$0xff] }
 0x13b   :  { %v1128_v57 = vld [vmem:[#allocation2 + $0x90] sm:$0xff]  ;;  %v805_v63 = vpop.f32.mrf.mxu0  ;;  %1294 = vst.msk [vmem:[%s3190_s3 + $0x188] sm:$0xff] %vm21_vm3, %v2652_v41  ;;  %v933_v2 = vpop.f32.mrf.mxu1  ;;  %v1325_v9 = vsel %vm21_vm3, %v2458_v24, 0.0  ;;  %v1519_v7 = vadd.f32 %v1518_v18, %v1517_v54  ;;  %v1522_v24 = vsel %vm21_vm3, %v1451_v59, 0.0 }
 0x13c   :  { %v1160_v30 = vld [vmem:[#allocation2 + $0x190] sm:$0xff]  ;;  %v2674_v17 = vadd.f32 %v2311_v35, %v1128_v57  ;;  %1063 = vst.msk [vmem:[#allocation2 + $0xa0] sm:$0xff] %vm21_vm3, %v998_v51  ;;  %1095 = vst.msk [vmem:[#allocation2 + $0x1a0] sm:$0xff] %vm21_vm3, %v1030_v52  ;;  %v1322_v61 = vadd.f32 %v1321_v5, %v1320_v27  ;;  %v1327_v5 = vsel %vm21_vm3, %v2476_v39, 0.0  ;;  %v148_v27 = vld [vmem:[#allocation2 + $0x1b8] sm:$0xff] }
 0x13d   :  { %v2678_v45 = vadd.f32 %v2311_v35, %v1160_v30  ;;  %v806_v16 = vpop.f32.mrf.mxu0  ;;  %v934_v19 = vpop.f32.mrf.mxu1  ;;  %v1452_v30 = vmul.f32 %v2476_v39, %v2476_v39 }
 0x13e   :  { %1263 = vst.msk [vmem:[%s3190_s3 + $0x90] sm:$0xff] %vm21_vm3, %v2674_v17  ;;  %v999_v22 = vadd.f32 %v806_v16, %v114_v0  ;;  %v1031_v40 = vadd.f32 %v934_v19, %v146_v12  ;;  %v1520_v0 = vsel %vm21_vm3, %v1450_v20, 0.0  ;;  %v1324_v8 = vadd.f32 %v1323_v47, %v1322_v61  ;;  %v117_v61 = vld [vmem:[#allocation2 + $0xc0] sm:$0xff] }
 0x13f   :  { %1295 = vst.msk [vmem:[%s3190_s3 + $0x190] sm:$0xff] %vm21_vm3, %v2678_v45  ;;  %v1129_v34 = vld [vmem:[#allocation2 + $0x98] sm:$0xff]  ;;  %v808_v36 = vpop.f32.mrf.mxu0  ;;  %v936_v44 = vpop.f32.mrf.mxu1  ;;  %v1453_v20 = vmul.f32 %v2494_v55, %v2494_v55  ;;  %v1521_v59 = vadd.f32 %v1520_v0, %v1519_v7 }
 0x140   :  { %v1161_v38 = vld [vmem:[#allocation2 + $0x198] sm:$0xff]  ;;  %v2702_v51 = vadd.f32 %v2311_v35, %v1129_v34  ;;  %1064 = vst.msk [vmem:[#allocation2 + $0xa8] sm:$0xff] %vm21_vm3, %v999_v22  ;;  %1096 = vst.msk [vmem:[#allocation2 + $0x1a8] sm:$0xff] %vm21_vm3, %v1031_v40  ;;  %v1326_v34 = vadd.f32 %v1325_v9, %v1324_v8  ;;  %v1454_v36 = vmul.f32 %v2512_v11, %v2512_v11  ;;  %v1329_v40 = vsel %vm21_vm3, %v2494_v55, 0.0 }
 0x141   :  { %v2706_v52 = vadd.f32 %v2311_v35, %v1161_v38  ;;  %v811_v57 = vpop.f32.mrf.mxu0  ;;  %v939_v63 = vpop.f32.mrf.mxu1  ;;  %v1524_v38 = vsel %vm21_vm3, %v1452_v30, 0.0  ;;  %v1523_v18 = vadd.f32 %v1522_v24, %v1521_v59  ;;  %v1526_v0 = vsel %vm21_vm3, %v1453_v20, 0.0 }
 0x142   :  { %1264 = vst.msk [vmem:[%s3190_s3 + $0x98] sm:$0xff] %vm21_vm3, %v2702_v51  ;;  %v1000_v2 = vadd.f32 %v811_v57, %v115_v37  ;;  %v1032_v19 = vadd.f32 %v939_v63, %v147_v53  ;;  %v1328_v47 = vadd.f32 %v1327_v5, %v1326_v34  ;;  %v149_v63 = vld [vmem:[#allocation2 + $0x1c0] sm:$0xff]  ;;  %v1331_v9 = vsel %vm21_vm3, %v2512_v11, 0.0 }
 0x143   :  { %1296 = vst.msk [vmem:[%s3190_s3 + $0x198] sm:$0xff] %vm21_vm3, %v2706_v52  ;;  %v1130_v12 = vld [vmem:[#allocation2 + $0xa0] sm:$0xff]  ;;  %v813_v13 = vpop.f32.mrf.mxu0  ;;  %v941_v43 = vpop.f32.mrf.mxu1  ;;  %v1455_v30 = vmul.f32 %v2530_v28, %v2530_v28  ;;  %v1525_v8 = vadd.f32 %v1524_v38, %v1523_v18  ;;  %v1335_v38 = vsel %vm21_vm3, %v2548_v49, 0.0 }
 0x144   :  { %v1162_v16 = vld [vmem:[#allocation2 + $0x1a0] sm:$0xff]  ;;  %v2730_v22 = vadd.f32 %v2311_v35, %v1130_v12  ;;  %1065 = vst.msk [vmem:[#allocation2 + $0xb0] sm:$0xff] %vm21_vm3, %v1000_v2  ;;  %1097 = vst.msk [vmem:[#allocation2 + $0x1b0] sm:$0xff] %vm21_vm3, %v1032_v19  ;;  %v1330_v24 = vadd.f32 %v1329_v40, %v1328_v47  ;;  %v1528_v12 = vsel %vm21_vm3, %v1454_v36, 0.0  ;;  %v1456_v19 = vmul.f32 %v2548_v49, %v2548_v49  ;;  %v118_v36 = vld [vmem:[#allocation2 + $0xc8] sm:$0xff] }
 0x145   :  { %v2734_v23 = vadd.f32 %v2311_v35, %v1162_v16  ;;  %v814_v37 = vpop.f32.mrf.mxu0  ;;  %v942_v39 = vpop.f32.mrf.mxu1  ;;  %v1333_v16 = vsel %vm21_vm3, %v2530_v28, 0.0  ;;  %v1527_v20 = vadd.f32 %v1526_v0, %v1525_v8  ;;  %v1457_v40 = vmul.f32 %v2566_v3, %v2566_v3 }
 0x146   :  { %1265 = vst.msk [vmem:[%s3190_s3 + $0xa0] sm:$0xff] %vm21_vm3, %v2730_v22  ;;  %v1001_v44 = vadd.f32 %v814_v37, %v116_v15  ;;  %v1033_v57 = vadd.f32 %v942_v39, %v148_v27  ;;  %v1332_v27 = vadd.f32 %v1331_v9, %v1330_v24  ;;  %v150_v37 = vld [vmem:[#allocation2 + $0x1c8] sm:$0xff]  ;;  %v1530_v39 = vsel %vm21_vm3, %v1455_v30, 0.0 }
 0x147   :  { %1297 = vst.msk [vmem:[%s3190_s3 + $0x1a0] sm:$0xff] %vm21_vm3, %v2734_v23  ;;  %v1131_v53 = vld [vmem:[#allocation2 + $0xa8] sm:$0xff]  ;;  %v816_v54 = vpop.f32.mrf.mxu0  ;;  %v944_v55 = vpop.f32.mrf.mxu1  ;;  %v1529_v47 = vadd.f32 %v1528_v12, %v1527_v20  ;;  %v1459_v8 = vmul.f32 %v2610_v56, %v2610_v56 }
 0x148   :  { %v2758_v2 = vadd.f32 %v2311_v35, %v1131_v53  ;;  %1066 = vst.msk [vmem:[#allocation2 + $0xb8] sm:$0xff] %vm21_vm3, %v1001_v44  ;;  %v1163_v7 = vld [vmem:[#allocation2 + $0x1a8] sm:$0xff]  ;;  %1098 = vst.msk [vmem:[#allocation2 + $0x1b8] sm:$0xff] %vm21_vm3, %v1033_v57  ;;  %v1334_v53 = vadd.f32 %v1333_v16, %v1332_v27  ;;  %v1458_v54 = vmul.f32 %v2584_v26, %v2584_v26  ;;  %v1532_v55 = vsel %vm21_vm3, %v1456_v19, 0.0 }
 0x149   :  { %v819_v13 = vpop.f32.mrf.mxu0  ;;  %v2763_v15 = vadd.f32 %v2311_v35, %v1163_v7  ;;  %v947_v11 = vpop.f32.mrf.mxu1  ;;  %v1531_v30 = vadd.f32 %v1530_v39, %v1529_v47  ;;  %v1534_v16 = vsel %vm21_vm3, %v1457_v40, 0.0  ;;  %v1339_v19 = vsel %vm21_vm3, %v2584_v26, 0.0 }
 0x14a   :  { %1266 = vst.msk [vmem:[%s3190_s3 + $0xa8] sm:$0xff] %vm21_vm3, %v2758_v2  ;;  %v1002_v43 = vadd.f32 %v819_v13, %v117_v61  ;;  %v1034_v5 = vadd.f32 %v947_v11, %v149_v63  ;;  %v1337_v63 = vsel %vm21_vm3, %v2566_v3, 0.0  ;;  %v1336_v7 = vadd.f32 %v1335_v38, %v1334_v53  ;;  %v119_v13 = vld [vmem:[#allocation2 + $0xd0] sm:$0xff] }
 0x14b   :  { %v1132_v59 = vld [vmem:[#allocation2 + $0xb0] sm:$0xff]  ;;  %v821_v34 = vpop.f32.mrf.mxu0  ;;  %1298 = vst.msk [vmem:[%s3190_s3 + $0x1a8] sm:$0xff] %vm21_vm3, %v2763_v15  ;;  %v949_v28 = vpop.f32.mrf.mxu1  ;;  %v1533_v20 = vadd.f32 %v1532_v55, %v1531_v30  ;;  %v1341_v26 = vsel %vm21_vm3, %v2610_v56, 0.0  ;;  %v1538_v47 = vsel %vm21_vm3, %v1459_v8, 0.0  ;;  %v1343_v55 = vsel %vm21_vm3, %v2646_v31, 0.0  ;;  %v152_v30 = vld [vmem:[#allocation2 + $0x1d8] sm:$0xff] }
 0x14c   :  { %v2786_v44 = vadd.f32 %v2311_v35, %v1132_v59  ;;  %1067 = vst.msk [vmem:[#allocation2 + $0xc0] sm:$0xff] %vm21_vm3, %v1002_v43  ;;  %v1164_v18 = vld [vmem:[#allocation2 + $0x1b0] sm:$0xff]  ;;  %1099 = vst.msk [vmem:[#allocation2 + $0x1c0] sm:$0xff] %vm21_vm3, %v1034_v5  ;;  %v1338_v27 = vadd.f32 %v1337_v63, %v1336_v7  ;;  %v1536_v59 = vsel %vm21_vm3, %v1458_v54, 0.0  ;;  %v1461_v63 = vmul.f32 %v2674_v17, %v2674_v17 }
 0x14d   :  { %v822_v61 = vpop.f32.mrf.mxu0  ;;  %v2793_v57 = vadd.f32 %v2311_v35, %v1164_v18  ;;  %v950_v49 = vpop.f32.mrf.mxu1  ;;  %v151_v11 = vld [vmem:[#allocation2 + $0x1d0] sm:$0xff]  ;;  %v1535_v40 = vadd.f32 %v1534_v16, %v1533_v20 }
 0x14e   :  { %1267 = vst.msk [vmem:[%s3190_s3 + $0xb0] sm:$0xff] %vm21_vm3, %v2786_v44  ;;  %v1003_v0 = vadd.f32 %v822_v61, %v118_v36  ;;  %v1035_v9 = vadd.f32 %v950_v49, %v150_v37  ;;  %v1460_v37 = vmul.f32 %v2646_v31, %v2646_v31  ;;  %v1340_v18 = vadd.f32 %v1339_v19, %v1338_v27  ;;  %v120_v61 = vld [vmem:[#allocation2 + $0xd8] sm:$0xff]  ;;  %v121_v27 = vld [vmem:[#allocation2 + $0xe0] sm:$0xff] }
 0x14f   :  { %v1133_v24 = vld [vmem:[#allocation2 + $0xb8] sm:$0xff]  ;;  %v824_v12 = vpop.f32.mrf.mxu0  ;;  %1299 = vst.msk [vmem:[%s3190_s3 + $0x1b0] sm:$0xff] %vm21_vm3, %v2793_v57  ;;  %v952_v3 = vpop.f32.mrf.mxu1  ;;  %v1537_v7 = vadd.f32 %v1536_v59, %v1535_v40  ;;  %v153_v40 = vld [vmem:[#allocation2 + $0x1e0] sm:$0xff] }
 0x150   :  { %v2814_v43 = vadd.f32 %v2311_v35, %v1133_v24  ;;  %1068 = vst.msk [vmem:[#allocation2 + $0xc8] sm:$0xff] %vm21_vm3, %v1003_v0  ;;  %v1165_v5 = vld [vmem:[#allocation2 + $0x1b8] sm:$0xff]  ;;  %1100 = vst.msk [vmem:[#allocation2 + $0x1c8] sm:$0xff] %vm21_vm3, %v1035_v9  ;;  %v1342_v8 = vadd.f32 %v1341_v26, %v1340_v18  ;;  %v1540_v31 = vsel %vm21_vm3, %v1460_v37, 0.0  ;;  %v1462_v3 = vmul.f32 %v2702_v51, %v2702_v51 }
 0x151   :  { %v827_v34 = vpop.f32.mrf.mxu0  ;;  %v2820_v36 = vadd.f32 %v2311_v35, %v1165_v5  ;;  %v955_v28 = vpop.f32.mrf.mxu1  ;;  %v1539_v16 = vadd.f32 %v1538_v47, %v1537_v7  ;;  %v1542_v26 = vsel %vm21_vm3, %v1461_v63, 0.0  ;;  %v1347_v37 = vsel %vm21_vm3, %v2702_v51, 0.0  ;;  %v122_v7 = vld [vmem:[#allocation2 + $0xe8] sm:$0xff] }
 0x152   :  { %1268 = vst.msk [vmem:[%s3190_s3 + $0xb8] sm:$0xff] %vm21_vm3, %v2814_v43  ;;  %v1004_v39 = vadd.f32 %v827_v34, %v119_v13  ;;  %v1036_v38 = vadd.f32 %v955_v28, %v151_v11  ;;  %v1345_v13 = vsel %vm21_vm3, %v2674_v17, 0.0  ;;  %v1344_v19 = vadd.f32 %v1343_v55, %v1342_v8 }
 0x153   :  { %v1134_v53 = vld [vmem:[#allocation2 + $0xc0] sm:$0xff]  ;;  %v829_v54 = vpop.f32.mrf.mxu0  ;;  %1300 = vst.msk [vmem:[%s3190_s3 + $0x1b8] sm:$0xff] %vm21_vm3, %v2820_v36  ;;  %v957_v49 = vpop.f32.mrf.mxu1  ;;  %v1463_v17 = vmul.f32 %v2730_v22, %v2730_v22  ;;  %v1541_v18 = vadd.f32 %v1540_v31, %v1539_v16  ;;  %v1349_v51 = vsel %vm21_vm3, %v2730_v22, 0.0  ;;  %v1351_v31 = vsel %vm21_vm3, %v2758_v2, 0.0 }
 0x154   :  { %v1166_v56 = vld [vmem:[#allocation2 + $0x1c0] sm:$0xff]  ;;  %v2842_v0 = vadd.f32 %v2311_v35, %v1134_v53  ;;  %1069 = vst.msk [vmem:[#allocation2 + $0xd0] sm:$0xff] %vm21_vm3, %v1004_v39  ;;  %1101 = vst.msk [vmem:[#allocation2 + $0x1d0] sm:$0xff] %vm21_vm3, %v1036_v38  ;;  %v1346_v47 = vadd.f32 %v1345_v13, %v1344_v19  ;;  %v1465_v13 = vmul.f32 %v2786_v44, %v2786_v44  ;;  %v154_v19 = vld [vmem:[#allocation2 + $0x1e8] sm:$0xff] }
 0x155   :  { %v2846_v9 = vadd.f32 %v2311_v35, %v1166_v56  ;;  %v830_v24 = vpop.f32.mrf.mxu0  ;;  %v958_v12 = vpop.f32.mrf.mxu1  ;;  %v1464_v56 = vmul.f32 %v2758_v2, %v2758_v2  ;;  %v1543_v49 = vadd.f32 %v1542_v26, %v1541_v18  ;;  %v1546_v22 = vsel %vm21_vm3, %v1463_v17, 0.0 }
 0x156   :  { %1269 = vst.msk [vmem:[%s3190_s3 + $0xc0] sm:$0xff] %vm21_vm3, %v2842_v0  ;;  %v1005_v11 = vadd.f32 %v830_v24, %v120_v61  ;;  %v1037_v34 = vadd.f32 %v958_v12, %v152_v30  ;;  %v1544_v61 = vsel %vm21_vm3, %v1462_v3, 0.0  ;;  %v1348_v55 = vadd.f32 %v1347_v37, %v1346_v47  ;;  %v2900_v3 = vld [vmem:[%s3189_s2] ss:$0 sm:$0xff] }
 0x157   :  { %1301 = vst.msk [vmem:[%s3190_s3 + $0x1c0] sm:$0xff] %vm21_vm3, %v2846_v9  ;;  %v1135_v5 = vld [vmem:[#allocation2 + $0xc8] sm:$0xff]  ;;  %v832_v20 = vpop.f32.mrf.mxu0  ;;  %v960_v28 = vpop.f32.mrf.mxu1  ;;  %v1545_v17 = vadd.f32 %v1544_v61, %v1543_v49  ;;  %v1550_v61 = vsel %vm21_vm3, %v1465_v13, 0.0 }
 0x158   :  { %v1167_v59 = vld [vmem:[#allocation2 + $0x1c8] sm:$0xff]  ;;  %v2870_v39 = vadd.f32 %v2311_v35, %v1135_v5  ;;  %1070 = vst.msk [vmem:[#allocation2 + $0xd8] sm:$0xff] %vm21_vm3, %v1005_v11  ;;  %1102 = vst.msk [vmem:[#allocation2 + $0x1d8] sm:$0xff] %vm21_vm3, %v1037_v34  ;;  %v1350_v5 = vadd.f32 %v1349_v51, %v1348_v55  ;;  %v1466_v34 = vmul.f32 %v2814_v43, %v2814_v43  ;;  %v1355_v51 = vsel %vm21_vm3, %v2814_v43, 0.0 }
 0x159   :  { %v2874_v38 = vadd.f32 %v2311_v35, %v1167_v59  ;;  %v835_v53 = vpop.f32.mrf.mxu0  ;;  %v963_v54 = vpop.f32.mrf.mxu1  ;;  %v1353_v59 = vsel %vm21_vm3, %v2786_v44, 0.0  ;;  %v1547_v26 = vadd.f32 %v1546_v22, %v1545_v17  ;;  %v123_v44 = vld [vmem:[#allocation2 + $0xf0] sm:$0xff] }
 0x15a   :  { %1270 = vst.msk [vmem:[%s3190_s3 + $0xc8] sm:$0xff] %vm21_vm3, %v2870_v39  ;;  %v1006_v35 = vadd.f32 %v835_v53, %v121_v27  ;;  %v1038_v24 = vadd.f32 %v963_v54, %v153_v40  ;;  %v1548_v27 = vsel %vm21_vm3, %v1464_v56, 0.0  ;;  %v1352_v37 = vadd.f32 %v1351_v31, %v1350_v5  ;;  %v155_v54 = vld [vmem:[#allocation2 + $0x1f0] sm:$0xff] }
 0x15b   :  { %1302 = vst.msk [vmem:[%s3190_s3 + $0x1c8] sm:$0xff] %vm21_vm3, %v2874_v38  ;;  %v1136_v63 = vld [vmem:[#allocation2 + $0xd0] sm:$0xff]  ;;  %v837_v30 = vpop.f32.mrf.mxu0  ;;  %v965_v12 = vpop.f32.mrf.mxu1  ;;  %v1467_v56 = vmul.f32 %v2842_v0, %v2842_v0  ;;  %v1549_v55 = vadd.f32 %v1548_v27, %v1547_v26 }
 0x15c   :  { %v1168_v8 = vld [vmem:[#allocation2 + $0x1d0] sm:$0xff]  ;;  %v1207_v11 = vadd.f32 %v2900_v3, %v1136_v63  ;;  %1071 = vst.msk [vmem:[#allocation2 + $0xe0] sm:$0xff] %vm21_vm3, %v1006_v35  ;;  %1103 = vst.msk [vmem:[#allocation2 + $0x1e0] sm:$0xff] %vm21_vm3, %v1038_v24  ;;  %v1354_v22 = vadd.f32 %v1353_v59, %v1352_v37  ;;  %v1468_v63 = vmul.f32 %v2870_v39, %v2870_v39  ;;  %v1357_v24 = vsel %vm21_vm3, %v2842_v0, 0.0  ;;  %v156_v0 = vld [vmem:[#allocation2 + $0x1f8] sm:$0xff] }
 0x15d   :  { %v2905_v16 = vadd.f32 %v2900_v3, %v1168_v8  ;;  %v838_v20 = vpop.f32.mrf.mxu0  ;;  %v966_v2 = vpop.f32.mrf.mxu1  ;;  %v1552_v8 = vsel %vm21_vm3, %v1466_v34, 0.0  ;;  %v1551_v13 = vadd.f32 %v1550_v61, %v1549_v55  ;;  %v1554_v27 = vsel %vm21_vm3, %v1467_v56, 0.0 }
 0x15e   :  { %1271 = vst.msk [vmem:[%s3190_s3 + $0xd0] sm:$0xff] %vm21_vm3, %v1207_v11  ;;  %v1007_v28 = vadd.f32 %v838_v20, %v122_v7  ;;  %v1039_v47 = vadd.f32 %v966_v2, %v154_v19  ;;  %v1356_v19 = vadd.f32 %v1355_v51, %v1354_v22  ;;  %v124_v20 = vld [vmem:[#allocation2 + $0xf8] sm:$0xff]  ;;  %v1359_v59 = vsel %vm21_vm3, %v2870_v39, 0.0 }
 0x15f   :  { %1303 = vst.msk [vmem:[%s3190_s3 + $0x1d0] sm:$0xff] %vm21_vm3, %v2905_v16  ;;  %v1137_v40 = vld [vmem:[#allocation2 + $0xd8] sm:$0xff]  ;;  %v840_v18 = vpop.f32.mrf.mxu0  ;;  %v968_v53 = vpop.f32.mrf.mxu1  ;;  %v1469_v34 = vmul.f32 %v1207_v11, %v1207_v11  ;;  %v1553_v37 = vadd.f32 %v1552_v8, %v1551_v13 }
 0x160   :  { %v1208_v35 = vadd.f32 %v2900_v3, %v1137_v40  ;;  %1072 = vst.msk [vmem:[#allocation2 + $0xe8] sm:$0xff] %vm21_vm3, %v1007_v28  ;;  %v1169_v49 = vld [vmem:[#allocation2 + $0x1d8] sm:$0xff]  ;;  %1104 = vst.msk [vmem:[#allocation2 + $0x1e8] sm:$0xff] %vm21_vm3, %v1039_v47  ;;  %v1358_v40 = vadd.f32 %v1357_v24, %v1356_v19  ;;  %v1556_v18 = vsel %vm21_vm3, %v1468_v63, 0.0 }
 0x161   :  { %v843_v30 = vpop.f32.mrf.mxu0  ;;  %v2932_v7 = vadd.f32 %v2900_v3, %v1169_v49  ;;  %v971_v43 = vpop.f32.mrf.mxu1  ;;  %v1555_v56 = vadd.f32 %v1554_v27, %v1553_v37 }
 0x162   :  { %1272 = vst.msk [vmem:[%s3190_s3 + $0xd8] sm:$0xff] %vm21_vm3, %v1208_v35  ;;  %v1008_v12 = vadd.f32 %v843_v30, %v123_v44  ;;  %v1040_v31 = vadd.f32 %v971_v43, %v155_v54  ;;  %v1361_v54 = vsel %vm21_vm3, %v1207_v11, 0.0  ;;  %v1470_v39 = vmul.f32 %v1208_v35, %v1208_v35 }
 0x163   :  { %v1138_v17 = vld [vmem:[#allocation2 + $0xe0] sm:$0xff]  ;;  %v845_v5 = vpop.f32.mrf.mxu0  ;;  %1304 = vst.msk [vmem:[%s3190_s3 + $0x1d8] sm:$0xff] %vm21_vm3, %v2932_v7  ;;  %v973_v2 = vpop.f32.mrf.mxu1  ;;  %v1360_v49 = vadd.f32 %v1359_v59, %v1358_v40  ;;  %v1558_v11 = vsel %vm21_vm3, %v1469_v34, 0.0  ;;  %v1363_v30 = vsel %vm21_vm3, %v1208_v35, 0.0 }
 0x164   :  { %v1209_v28 = vadd.f32 %v2900_v3, %v1138_v17  ;;  %1073 = vst.msk [vmem:[#allocation2 + $0xf0] sm:$0xff] %vm21_vm3, %v1008_v12  ;;  %v1170_v26 = vld [vmem:[#allocation2 + $0x1e0] sm:$0xff]  ;;  %1105 = vst.msk [vmem:[#allocation2 + $0x1f0] sm:$0xff] %vm21_vm3, %v1040_v31  ;;  %v1557_v12 = vadd.f32 %v1556_v18, %v1555_v56  ;;  %v1560_v19 = vsel %vm21_vm3, %v1470_v39, 0.0 }
 0x165   :  { %v846_v44 = vpop.f32.mrf.mxu0  ;;  %v2955_v47 = vadd.f32 %v2900_v3, %v1170_v26  ;;  %v974_v53 = vpop.f32.mrf.mxu1  ;;  %v1362_v31 = vadd.f32 %v1361_v54, %v1360_v49 }
 0x166   :  { %1273 = vst.msk [vmem:[%s3190_s3 + $0xe0] sm:$0xff] %vm21_vm3, %v1209_v28  ;;  %v1009_v61 = vadd.f32 %v846_v44, %v124_v20  ;;  %v1041_v51 = vadd.f32 %v974_v53, %v156_v0  ;;  %v1471_v43 = vmul.f32 %v1209_v28, %v1209_v28  ;;  %v1365_v17 = vsel %vm21_vm3, %v1209_v28, 0.0 }
 0x167   :  { %v1139_v55 = vld [vmem:[#allocation2 + $0xe8] sm:$0xff]  ;;  %v848_v22 = vpop.f32.mrf.mxu0  ;;  %1305 = vst.msk [vmem:[%s3190_s3 + $0x1e0] sm:$0xff] %vm21_vm3, %v2955_v47  ;;  %v976_v63 = vpop.f32.mrf.mxu1  ;;  %v1559_v5 = vadd.f32 %v1558_v11, %v1557_v12  ;;  %v1364_v20 = vadd.f32 %v1363_v30, %v1362_v31 }
 0x168   :  { %v1210_v8 = vadd.f32 %v2900_v3, %v1139_v55  ;;  %1074 = vst.msk [vmem:[#allocation2 + $0xf8] sm:$0xff] %vm21_vm3, %v1009_v61  ;;  %v1171_v24 = vld [vmem:[#allocation2 + $0x1e8] sm:$0xff]  ;;  %1106 = vst.msk [vmem:[#allocation2 + $0x1f8] sm:$0xff] %vm21_vm3, %v1041_v51  ;;  %v1562_v27 = vsel %vm21_vm3, %v1471_v43, 0.0  ;;  %v1475_v63 = vmul.f32 %v2318_v46, %v2318_v46 }
 0x169   :  { %v2973_v13 = vadd.f32 %v2900_v3, %v1171_v24  ;;  %v1561_v26 = vadd.f32 %v1560_v19, %v1559_v5  ;;  %v1366_v37 = vadd.f32 %v1365_v17, %v1364_v20  ;;  %v1476_v24 = vmul.f32 %v2336_v58, %v2336_v58 }
 0x16a   :  { %1274 = vst.msk [vmem:[%s3190_s3 + $0xe8] sm:$0xff] %vm21_vm3, %v1210_v8  ;;  %v1472_v35 = vmul.f32 %v1210_v8, %v1210_v8  ;;  %v1367_v59 = vsel %vm21_vm3, %v1210_v8, 0.0  ;;  %v1373_v8 = vsel %vm21_vm3, %v2318_v46, 0.0  ;;  %v1570_v17 = vsel %vm21_vm3, %v1475_v63, 0.0 }
 0x16b   :  { %v1140_v2 = vld [vmem:[#allocation2 + $0xf0] sm:$0xff]  ;;  %1306 = vst.msk [vmem:[%s3190_s3 + $0x1e8] sm:$0xff] %vm21_vm3, %v2973_v13  ;;  %v1563_v53 = vadd.f32 %v1562_v27, %v1561_v26  ;;  %v1368_v54 = vadd.f32 %v1367_v59, %v1366_v37  ;;  %v1477_v5 = vmul.f32 %v2354_v6, %v2354_v6  ;;  %v1377_v46 = vsel %vm21_vm3, %v2354_v6, 0.0 }
 0x16c   :  { %v1172_v0 = vld [vmem:[#allocation2 + $0x1f0] sm:$0xff]  ;;  %v1211_v34 = vadd.f32 %v2900_v3, %v1140_v2  ;;  %v1564_v40 = vsel %vm21_vm3, %v1472_v35, 0.0  ;;  %v1375_v35 = vsel %vm21_vm3, %v2336_v58, 0.0  ;;  %v1478_v27 = vmul.f32 %v2372_v21, %v2372_v21 }
 0x16d   :  { %v2990_v28 = vadd.f32 %v2900_v3, %v1172_v0  ;;  %v1565_v55 = vadd.f32 %v1564_v40, %v1563_v53  ;;  %v1572_v0 = vsel %vm21_vm3, %v1476_v24, 0.0  ;;  %v1574_v26 = vsel %vm21_vm3, %v1477_v5, 0.0 }
 0x16e   :  { %1275 = vst.msk [vmem:[%s3190_s3 + $0xf0] sm:$0xff] %vm21_vm3, %v1211_v34  ;;  %v1369_v18 = vsel %vm21_vm3, %v1211_v34, 0.0  ;;  %v1473_v44 = vmul.f32 %v1211_v34, %v1211_v34  ;;  %v1379_v58 = vsel %vm21_vm3, %v2372_v21, 0.0  ;;  %v1479_v37 = vmul.f32 %v2391_v33, %v2391_v33 }
 0x16f   :  { %1307 = vst.msk [vmem:[%s3190_s3 + $0x1f0] sm:$0xff] %vm21_vm3, %v2990_v28  ;;  %v1141_v39 = vld [vmem:[#allocation2 + $0xf8] sm:$0xff]  ;;  %v1370_v22 = vadd.f32 %v1369_v18, %v1368_v54  ;;  %v1381_v6 = vsel %vm21_vm3, %v2391_v33, 0.0  ;;  %v1480_v53 = vmul.f32 %v2409_v48, %v2409_v48  ;;  %v1383_v21 = vsel %vm21_vm3, %v2409_v48, 0.0 }
 0x170   :  { %v1173_v61 = vld [vmem:[#allocation2 + $0x1f8] sm:$0xff]  ;;  %v1566_v51 = vsel %vm21_vm3, %v1473_v44, 0.0  ;;  %v1212_v56 = vadd.f32 %v2900_v3, %v1141_v39  ;;  %v1576_v44 = vsel %vm21_vm3, %v1478_v27, 0.0  ;;  %v1385_v33 = vsel %vm21_vm3, %v2426_v60, 0.0 }
 0x171   :  { %v3006_v49 = vadd.f32 %v2900_v3, %v1173_v61  ;;  %v1567_v3 = vadd.f32 %v1566_v51, %v1565_v55  ;;  %v1578_v61 = vsel %vm21_vm3, %v1479_v37, 0.0  ;;  %v1481_v51 = vmul.f32 %v2426_v60, %v2426_v60 }
 0x172   :  { %1276 = vst.msk [vmem:[%s3190_s3 + $0xf8] sm:$0xff] %vm21_vm3, %v1212_v56  ;;  %v1371_v11 = vsel %vm21_vm3, %v1212_v56, 0.0  ;;  %v1474_v30 = vmul.f32 %v1212_v56, %v1212_v56  ;;  %v1482_v63 = vmul.f32 %v2444_v10, %v2444_v10  ;;  %v1387_v48 = vsel %vm21_vm3, %v2444_v10, 0.0 }
 0x173   :  { %1308 = vst.msk [vmem:[%s3190_s3 + $0x1f8] sm:$0xff] %vm21_vm3, %v3006_v49  ;;  %v1372_v43 = vadd.f32 %v1371_v11, %v1370_v22  ;;  %v1580_v22 = vsel %vm21_vm3, %v1480_v53, 0.0  ;;  %v1389_v60 = vsel %vm21_vm3, %v2462_v25, 0.0  ;;  %v1391_v10 = vsel %vm21_vm3, %v2480_v42, 0.0 }
 0x174   :  { %v1568_v12 = vsel %vm21_vm3, %v1474_v30, 0.0  ;;  %v1485_v5 = vmul.f32 %v2499_v62, %v2499_v62 }
 0x175   :  { %v1374_v31 = vadd.f32 %v1373_v8, %v1372_v43  ;;  %v1569_v19 = vadd.f32 %v1568_v12, %v1567_v3  ;;  %v1582_v3 = vsel %vm21_vm3, %v1481_v51, 0.0  ;;  %v1483_v43 = vmul.f32 %v2462_v25, %v2462_v25 }
 0x176   :  { %v1584_v12 = vsel %vm21_vm3, %v1482_v63, 0.0  ;;  %v1393_v25 = vsel %vm21_vm3, %v2499_v62, 0.0  ;;  %v1397_v62 = vsel %vm21_vm3, %v2534_v29, 0.0  ;;  %v1490_v51 = vmul.f32 %v2588_v32, %v2588_v32 }
 0x177   :  { %v1376_v20 = vadd.f32 %v1375_v35, %v1374_v31  ;;  %v1571_v2 = vadd.f32 %v1570_v17, %v1569_v19  ;;  %v1484_v31 = vmul.f32 %v2480_v42, %v2480_v42  ;;  %v1586_v35 = vsel %vm21_vm3, %v1483_v43, 0.0 }
 0x178   :  { %v1395_v42 = vsel %vm21_vm3, %v2517_v14, 0.0 }
 0x179   :  { %v1378_v59 = vadd.f32 %v1377_v46, %v1376_v20  ;;  %v1573_v34 = vadd.f32 %v1572_v0, %v1571_v2  ;;  %v1588_v0 = vsel %vm21_vm3, %v1484_v31, 0.0  ;;  %v1486_v46 = vmul.f32 %v2517_v14, %v2517_v14 }
 0x17a   :  { %v1399_v14 = vsel %vm21_vm3, %v2552_v50, 0.0 }
 0x17b   :  { %v1380_v40 = vadd.f32 %v1379_v58, %v1378_v59  ;;  %v1575_v18 = vadd.f32 %v1574_v26, %v1573_v34  ;;  %v1590_v34 = vsel %vm21_vm3, %v1485_v5, 0.0  ;;  %v1487_v26 = vmul.f32 %v2534_v29, %v2534_v29 }
 0x17c   :  { %v1401_v29 = vsel %vm21_vm3, %v2570_v4, 0.0  ;;  %v1495_v5 = vmul.f32 %v2734_v23, %v2734_v23 }
 0x17d   :  { %v1382_v54 = vadd.f32 %v1381_v6, %v1380_v40  ;;  %v1577_v39 = vadd.f32 %v1576_v44, %v1575_v18  ;;  %v1592_v40 = vsel %vm21_vm3, %v1486_v46, 0.0  ;;  %v1488_v18 = vmul.f32 %v2552_v50, %v2552_v50 }
 0x17e   :  { %v1594_v53 = vsel %vm21_vm3, %v1487_v26, 0.0  ;;  %v1403_v50 = vsel %vm21_vm3, %v2588_v32, 0.0  ;;  %v1407_v32 = vsel %vm21_vm3, %v2652_v41, 0.0 }
 0x17f   :  { %v1384_v56 = vadd.f32 %v1383_v21, %v1382_v54  ;;  %v1579_v55 = vadd.f32 %v1578_v61, %v1577_v39  ;;  %v1489_v54 = vmul.f32 %v2570_v4, %v2570_v4  ;;  %v1596_v21 = vsel %vm21_vm3, %v1488_v18, 0.0 }
 0x180   :  { %v1405_v4 = vsel %vm21_vm3, %v2624_v1, 0.0 }
 0x181   :  { %v1386_v11 = vadd.f32 %v1385_v33, %v1384_v56  ;;  %v1581_v30 = vadd.f32 %v1580_v22, %v1579_v55  ;;  %v1598_v22 = vsel %vm21_vm3, %v1489_v54, 0.0  ;;  %v1491_v33 = vmul.f32 %v2624_v1, %v2624_v1 }
 0x182   :  { %v1409_v1 = vsel %vm21_vm3, %v2678_v45, 0.0  ;;  %v1500_v54 = vmul.f32 %v2874_v38, %v2874_v38 }
 0x183   :  { %v1388_v8 = vadd.f32 %v1387_v48, %v1386_v11  ;;  %v1583_v24 = vadd.f32 %v1582_v3, %v1581_v30  ;;  %v1600_v30 = vsel %vm21_vm3, %v1490_v51, 0.0  ;;  %v1492_v3 = vmul.f32 %v2652_v41, %v2652_v41 }
 0x184   :  { %v1411_v41 = vsel %vm21_vm3, %v2706_v52, 0.0 }
 0x185   :  { %v1585_v19 = vadd.f32 %v1584_v12, %v1583_v24  ;;  %v1390_v17 = vadd.f32 %v1389_v60, %v1388_v8  ;;  %v1602_v8 = vsel %vm21_vm3, %v1491_v33, 0.0  ;;  %v1493_v24 = vmul.f32 %v2678_v45, %v2678_v45 }
 0x186   :  { %v1604_v31 = vsel %vm21_vm3, %v1492_v3, 0.0  ;;  %v1413_v45 = vsel %vm21_vm3, %v2734_v23, 0.0  ;;  %v1417_v23 = vsel %vm21_vm3, %v2793_v57, 0.0 }
 0x187   :  { %v1392_v20 = vadd.f32 %v1391_v10, %v1390_v17  ;;  %v1587_v2 = vadd.f32 %v1586_v35, %v1585_v19  ;;  %v1494_v19 = vmul.f32 %v2706_v52, %v2706_v52  ;;  %v1606_v10 = vsel %vm21_vm3, %v1493_v24, 0.0 }
 0x188   :  { %v1415_v52 = vsel %vm21_vm3, %v2763_v15, 0.0  ;;  %v1505_v24 = vmul.f32 %v2990_v28, %v2990_v28 }
 0x189   :  { %v1394_v27 = vadd.f32 %v1393_v25, %v1392_v20  ;;  %v1589_v59 = vadd.f32 %v1588_v0, %v1587_v2  ;;  %v1608_v0 = vsel %vm21_vm3, %v1494_v19, 0.0  ;;  %v1496_v25 = vmul.f32 %v2763_v15, %v2763_v15 }
 0x18a   :  { %v1419_v15 = vsel %vm21_vm3, %v2820_v36, 0.0 }
 0x18b   :  { %v1396_v58 = vadd.f32 %v1395_v42, %v1394_v27  ;;  %v1591_v37 = vadd.f32 %v1590_v34, %v1589_v59  ;;  %v1610_v59 = vsel %vm21_vm3, %v1495_v5, 0.0  ;;  %v1497_v34 = vmul.f32 %v2793_v57, %v2793_v57 }
 0x18c   :  { %v1421_v57 = vsel %vm21_vm3, %v2846_v9, 0.0 }
 0x18d   :  { %v1398_v44 = vadd.f32 %v1397_v62, %v1396_v58  ;;  %v1593_v6 = vadd.f32 %v1592_v40, %v1591_v37  ;;  %v1612_v58 = vsel %vm21_vm3, %v1496_v25, 0.0  ;;  %v1498_v37 = vmul.f32 %v2820_v36, %v2820_v36 }
 0x18e   :  { %v1614_v18 = vsel %vm21_vm3, %v1497_v34, 0.0  ;;  %v1423_v36 = vsel %vm21_vm3, %v2874_v38, 0.0  ;;  %v1427_v38 = vsel %vm21_vm3, %v2932_v7, 0.0 }
 0x18f   :  { %v1400_v39 = vadd.f32 %v1399_v14, %v1398_v44  ;;  %v1595_v61 = vadd.f32 %v1594_v53, %v1593_v6  ;;  %v1499_v44 = vmul.f32 %v2846_v9, %v2846_v9  ;;  %v1616_v14 = vsel %vm21_vm3, %v1498_v37, 0.0 }
 0x190   :  { %v1425_v9 = vsel %vm21_vm3, %v2905_v16, 0.0 }
 0x191   :  { %v1402_v56 = vadd.f32 %v1401_v29, %v1400_v39  ;;  %v1597_v55 = vadd.f32 %v1596_v21, %v1595_v61  ;;  %v1618_v21 = vsel %vm21_vm3, %v1499_v44, 0.0  ;;  %v1501_v29 = vmul.f32 %v2905_v16, %v2905_v16 }
 0x192   :  { %v1429_v16 = vsel %vm21_vm3, %v2955_v47, 0.0 }
 0x193   :  { %v1404_v63 = vadd.f32 %v1403_v50, %v1402_v56  ;;  %v1599_v11 = vadd.f32 %v1598_v22, %v1597_v55  ;;  %v1620_v55 = vsel %vm21_vm3, %v1500_v54, 0.0  ;;  %v1502_v22 = vmul.f32 %v2932_v7, %v2932_v7 }
 0x194   :  { %v1431_v7 = vsel %vm21_vm3, %v2973_v13, 0.0 }
 0x195   :  { %v1406_v48 = vadd.f32 %v1405_v4, %v1404_v63  ;;  %v1601_v43 = vadd.f32 %v1600_v30, %v1599_v11  ;;  %v1622_v63 = vsel %vm21_vm3, %v1501_v29, 0.0  ;;  %v1503_v11 = vmul.f32 %v2955_v47, %v2955_v47 }
 0x196   :  { %v1624_v3 = vsel %vm21_vm3, %v1502_v22, 0.0  ;;  %v1433_v47 = vsel %vm21_vm3, %v2990_v28, 0.0 }
 0x197   :  { %v1408_v12 = vadd.f32 %v1407_v32, %v1406_v48  ;;  %v1603_v60 = vadd.f32 %v1602_v8, %v1601_v43  ;;  %v1504_v48 = vmul.f32 %v2973_v13, %v2973_v13  ;;  %v1626_v32 = vsel %vm21_vm3, %v1503_v11, 0.0 }
 0x198   :  { %v1435_v13 = vsel %vm21_vm3, %v3006_v49, 0.0 }
 0x199   :  { %v1605_v17 = vadd.f32 %v1604_v31, %v1603_v60  ;;  %v1410_v35 = vadd.f32 %v1409_v1, %v1408_v12  ;;  %v1628_v31 = vsel %vm21_vm3, %v1504_v48, 0.0  ;;  %v1506_v1 = vmul.f32 %v3006_v49, %v3006_v49 }
 0x19b   :  { %v1607_v20 = vadd.f32 %v1606_v10, %v1605_v17  ;;  %v1412_v2 = vadd.f32 %v1411_v41, %v1410_v35  ;;  %v1630_v35 = vsel %vm21_vm3, %v1505_v24, 0.0  ;;  %v1632_v5 = vsel %vm21_vm3, %v1506_v1, 0.0 }
 0x19d   :  { %v1609_v46 = vadd.f32 %v1608_v0, %v1607_v20  ;;  %v1414_v27 = vadd.f32 %v1413_v45, %v1412_v2 }
 0x19f   :  { %v1611_v42 = vadd.f32 %v1610_v59, %v1609_v46  ;;  %v1416_v26 = vadd.f32 %v1415_v52, %v1414_v27 }
 0x1a1   :  { %v1613_v40 = vadd.f32 %v1612_v58, %v1611_v42  ;;  %v1418_v62 = vadd.f32 %v1417_v23, %v1416_v26  ;;  %v1309_v42 = vld [vmem:[%s3191_s4] sm:$0x3] }
 0x1a3   :  { %v1615_v6 = vadd.f32 %v1614_v18, %v1613_v40  ;;  %v1420_v53 = vadd.f32 %v1419_v15, %v1418_v62 }
 0x1a5   :  { %v1617_v39 = vadd.f32 %v1616_v14, %v1615_v6  ;;  %v1422_v61 = vadd.f32 %v1421_v57, %v1420_v53 }
 0x1a7   :  { %v1619_v51 = vadd.f32 %v1618_v21, %v1617_v39  ;;  %v1424_v56 = vadd.f32 %v1423_v36, %v1422_v61 }
 0x1a9   :  { %v1621_v50 = vadd.f32 %v1620_v55, %v1619_v51  ;;  %v1426_v33 = vadd.f32 %v1425_v9, %v1424_v56 }
 0x1ab   :  { %v1623_v30 = vadd.f32 %v1622_v63, %v1621_v50  ;;  %v1428_v4 = vadd.f32 %v1427_v38, %v1426_v33 }
 0x1ad   :  { %v1625_v43 = vadd.f32 %v1624_v3, %v1623_v30  ;;  %v1430_v8 = vadd.f32 %v1429_v16, %v1428_v4 }
 0x1af   :  { %v1627_v12 = vadd.f32 %v1626_v32, %v1625_v43  ;;  %v1432_v60 = vadd.f32 %v1431_v7, %v1430_v8 }
 0x1b1   :  { %v1629_v19 = vadd.f32 %v1628_v31, %v1627_v12  ;;  %v1434_v17 = vadd.f32 %v1433_v47, %v1432_v60 }
 0x1b3   :  { %v1631_v10 = vadd.f32 %v1630_v35, %v1629_v19  ;;  %v1436_v41 = vadd.f32 %v1435_v13, %v1434_v17 }
 0x1b5   :  { %v1437_v20 = vrot.slane %v1436_v41, 4  ;;  %v1633_v2 = vadd.f32 %v1632_v5, %v1631_v10 }
 0x1b7   :  { %v1438_v0 = vadd.f32 %v1437_v20, %v1436_v41  ;;  %v1634_v45 = vrot.slane %v1633_v2, 4 }
 0x1b9   :  { %v1439_v25 = vrot.slane %v1438_v0, 2  ;;  %v1635_v28 = vadd.f32 %v1634_v45, %v1633_v2 }
 0x1bb   :  { %v1440_v46 = vadd.f32 %v1439_v25, %v1438_v0  ;;  %v1636_v27 = vrot.slane %v1635_v28, 2 }
 0x1bd   :  { %v1441_v59 = vrot.slane %v1440_v46, 1  ;;  %v1637_v52 = vadd.f32 %v1636_v27, %v1635_v28 }
 0x1bf   :  { %v1638_v34 = vrot.slane %v1637_v52, 1  ;;  %v1442_v49 = vadd.f32 %v1441_v59, %v1440_v46 }
 0x1c1   :  { %v1639_v26 = vadd.f32 %v1638_v34, %v1637_v52 }
 0x1c3   :  { %v1640_v58 = vsel %vm682_vm1, %v1442_v49, %v1639_v26 }
 0x1c4   :  { %v1641_v23 = vadd.f32 %v1640_v58, %v1309_v42 }
 0x1c6   :  { %1643 = vst.msk [vmem:[%s3191_s4] sm:$0x3] %vm91_vm4, %v1641_v23 }

// kernel: local_enhancer_forward.35
= control target key start
LH: loop header
LB: loop body
LE: loop exit
PB: predicated region body
PF: predicated region fallthrough
CT: control target
= control target key end

     0   :  { %vm162_vm0 = vcmask 1041408   ;;  %vm21_vm1 = vcmask 64512   ;;  %v531_v2 = vmov 0.0   ;;  %vm137_vm2 = vcmask 293888   ;;  %s791_s1 = inlined_call_operand.vmem [shape: bf16[36,8], index: 1, kind: input, shape index: {}]   ;;  %s792_s0 = inlined_call_operand.vmem [shape: bf16[128,36], index: 0, kind: input, shape index: {}]   ;;  %s793_s4 = inlined_call_operand.vmem [shape: f32[2,8], index: 4, kind: output, shape index: {1}]   ;;  %s794_s2 = inlined_call_operand.vmem [shape: f32[1,8], index: 2, kind: input, shape index: {}]   ;;  %s795_s3 = inlined_call_operand.vmem [shape: f32[128,8], index: 3, kind: output, shape index: {0}]  }
   0x1   :  { %v520_v0 = vld [vmem:[%s791_s1 + $0x10] ss:$0 sps:$4 sm:$0x33]   ;;  %v521_v1 = vld [vmem:[%s791_s1 + $0x8] sm:$0xff]   ;;  %24 = vst.msk [vmem:[#allocation2 + $0x10] sm:$0xff] %vm21_vm1, %v531_v2  ;;  %22 = vst.msk [vmem:[#allocation2] sm:$0xff] %vm21_vm1, %v531_v2 }
   0x2   :  { %23 = vst.msk [vmem:[#allocation2 + $0x8] sm:$0xff] %vm21_vm1, %v531_v2  ;;  %25 = vst.msk [vmem:[#allocation2 + $0x18] sm:$0xff] %vm21_vm1, %v531_v2  ;;  %517 = vmatprep.subr.msk.bf16.mxu0 %vm162_vm0, %v520_v0  ;;  %v164_v3 = vsel %vm162_vm0, %v520_v0, 0  ;;  %518 = vmatprep.subr.msk.bf16.mxu1 %vm162_vm0, %v520_v0  ;;  %v523_v4 = vld [vmem:[%s792_s0] sm:$0xff]   ;;  %v524_v7 = vld [vmem:[%s792_s0 + $0x8] sm:$0xff]   ;;  %vm43_vm3 = vcmask 58368  }
   0x3   :  { %26 = vst.msk [vmem:[#allocation2 + $0x20] sm:$0xff] %vm21_vm1, %v531_v2  ;;  %27 = vst.msk [vmem:[#allocation2 + $0x28] sm:$0xff] %vm21_vm1, %v531_v2  ;;  %490 = vmatpush3.bf16.msra.mxu0 %v164_v3  ;;  %514 = vmatpush3.bf16.msra.mxu1 %v164_v3  ;;  %v522_v5 = vld [vmem:[%s791_s1] sm:$0xff]   ;;  %v528_v8 = vld [vmem:[%s792_s0 + $0x28] sm:$0xff]   ;;  %vm445_vm4 = vcmask 1040384  }
   0x4   :  { %28 = vst.msk [vmem:[#allocation2 + $0x30] sm:$0xff] %vm21_vm1, %v531_v2  ;;  %29 = vst.msk [vmem:[#allocation2 + $0x38] sm:$0xff] %vm21_vm1, %v531_v2  ;;  %491 = vmatprep.subr.bf16.mxu0 %v521_v1  ;;  %512 = vmatprep.subr.bf16.mxu1 %v521_v1  ;;  %v527_v6 = vld [vmem:[%s792_s0 + $0x20] sm:$0xff]   ;;  %v525_v9 = vld [vmem:[%s792_s0 + $0x10] sm:$0xff]  }
   0x5   :  { %30 = vst.msk [vmem:[#allocation2 + $0x40] sm:$0xff] %vm21_vm1, %v531_v2  ;;  %31 = vst.msk [vmem:[#allocation2 + $0x48] sm:$0xff] %vm21_vm1, %v531_v2  ;;  %495 = vmatprep.mubr.msk.bf16.mxu0 %vm137_vm2, %v523_v4  ;;  %503 = vmatprep.mubr.msk.bf16.mxu1 %vm137_vm2, %v527_v6  ;;  %v529_v10 = vld [vmem:[%s792_s0 + $0x30] sm:$0xff]   ;;  %v526_v11 = vld [vmem:[%s792_s0 + $0x18] sm:$0xff]  }
   0x6   :  { %32 = vst.msk [vmem:[#allocation2 + $0x50] sm:$0xff] %vm21_vm1, %v531_v2  ;;  %33 = vst.msk [vmem:[#allocation2 + $0x58] sm:$0xff] %vm21_vm1, %v531_v2  ;;  %v530_v12 = vld [vmem:[%s792_s0 + $0x38] sm:$0xff]   ;;  %v630_v39 = vld [vmem:[%s794_s2] ss:$0 sm:$0xff] }
   0x7   :  { %34 = vst.msk [vmem:[#allocation2 + $0x60] sm:$0xff] %vm21_vm1, %v531_v2  ;;  %35 = vst.msk [vmem:[#allocation2 + $0x68] sm:$0xff] %vm21_vm1, %v531_v2  ;;  %492 = vmatpush3.bf16.msra.mxu0 %v521_v1  ;;  %515 = vmatpush3.bf16.msra.mxu1 %v521_v1 }
   0x8   :  { %36 = vst.msk [vmem:[#allocation2 + $0x70] sm:$0xff] %vm21_vm1, %v531_v2  ;;  %37 = vst.msk [vmem:[#allocation2 + $0x78] sm:$0xff] %vm21_vm1, %v531_v2  ;;  %493 = vmatprep.subr.bf16.mxu0 %v522_v5  ;;  %513 = vmatprep.subr.bf16.mxu1 %v522_v5  ;;  %v47_v13 = vld [vmem:[#allocation2 + $0x10] sm:$0xff]  ;;  %v45_v16 = vld [vmem:[#allocation2] sm:$0xff] }
   0x9   :  { %44 = vst.msk [vmem:[%s793_s4] sm:$0x3] %vm43_vm3, %v531_v2  ;;  %v48_v22 = vld [vmem:[#allocation2 + $0x18] sm:$0xff]  ;;  %v46_v28 = vld [vmem:[#allocation2 + $0x8] sm:$0xff] }
   0xa   :  { %v49_v41 = vld [vmem:[#allocation2 + $0x20] sm:$0xff]  ;;  %v50_v61 = vld [vmem:[#allocation2 + $0x28] sm:$0xff] }
   0xb   :  { %494 = vmatpush3.bf16.msra.mxu0 %v522_v5  ;;  %516 = vmatpush3.bf16.msra.mxu1 %v522_v5  ;;  %v51_v34 = vld [vmem:[#allocation2 + $0x30] sm:$0xff]  ;;  %v52_v53 = vld [vmem:[#allocation2 + $0x38] sm:$0xff] }
   0xc   :  { %v53_v18 = vld [vmem:[#allocation2 + $0x40] sm:$0xff]  ;;  %v54_v30 = vld [vmem:[#allocation2 + $0x48] sm:$0xff] }
   0xd   :  { %v55_v14 = vld [vmem:[#allocation2 + $0x50] sm:$0xff]  ;;  %v56_v24 = vld [vmem:[#allocation2 + $0x58] sm:$0xff] }
   0xe   :  { %496 = vmatmul.mubr.msk.bf16.vlgmr.msra.gmra.mxu0 %vm137_vm2, %v524_v7  ;;  %504 = vmatmul.mubr.msk.bf16.vlgmr.msra.gmra.mxu1 %vm137_vm2, %v528_v8  ;;  %v57_v43 = vld [vmem:[#allocation2 + $0x60] sm:$0xff]  ;;  %v58_v5 = vld [vmem:[#allocation2 + $0x68] sm:$0xff] }
   0xf   :  { %499 = vmatprep.mubr.msk.bf16.mxu0 %vm137_vm2, %v525_v9  ;;  %507 = vmatprep.mubr.msk.bf16.mxu1 %vm137_vm2, %v529_v10  ;;  %v59_v36 = vld [vmem:[#allocation2 + $0x70] sm:$0xff]  ;;  %v60_v55 = vld [vmem:[#allocation2 + $0x78] sm:$0xff] }
  0x16   :  { %500 = vmatmul.mubr.msk.bf16.gmra.mxu0 %vm137_vm2, %v526_v11  ;;  %508 = vmatmul.mubr.msk.bf16.gmra.mxu1 %vm137_vm2, %v530_v12 }
  0xce   :  { %v497_v15 = vpop.f32.mrf.mxu0  ;;  %v505_v17 = vpop.f32.mrf.mxu1 }
  0xcf   :  { %v265_v19 = vadd.f32 %v497_v15, %v47_v13  ;;  %v273_v20 = vadd.f32 %v505_v17, %v55_v14 }
  0xd0   :  { %v200_v21 = vpop.f32.mrf.mxu0  ;;  %v232_v23 = vpop.f32.mrf.mxu1 }
  0xd1   :  { %282 = vst.msk [vmem:[#allocation2 + $0x10] sm:$0xff] %vm21_vm1, %v265_v19  ;;  %v263_v25 = vadd.f32 %v200_v21, %v45_v16  ;;  %290 = vst.msk [vmem:[#allocation2 + $0x50] sm:$0xff] %vm21_vm1, %v273_v20  ;;  %v271_v26 = vadd.f32 %v232_v23, %v53_v18 }
  0xd2   :  { %v498_v27 = vpop.f32.mrf.mxu0  ;;  %v506_v29 = vpop.f32.mrf.mxu1 }
  0xd3   :  { %280 = vst.msk [vmem:[#allocation2] sm:$0xff] %vm21_vm1, %v263_v25  ;;  %v266_v31 = vadd.f32 %v498_v27, %v48_v22  ;;  %288 = vst.msk [vmem:[#allocation2 + $0x40] sm:$0xff] %vm21_vm1, %v271_v26  ;;  %v274_v32 = vadd.f32 %v506_v29, %v56_v24 }
  0xd4   :  { %v203_v33 = vpop.f32.mrf.mxu0  ;;  %v235_v35 = vpop.f32.mrf.mxu1 }
  0xd5   :  { %283 = vst.msk [vmem:[#allocation2 + $0x18] sm:$0xff] %vm21_vm1, %v266_v31  ;;  %v264_v37 = vadd.f32 %v203_v33, %v46_v28  ;;  %291 = vst.msk [vmem:[#allocation2 + $0x58] sm:$0xff] %vm21_vm1, %v274_v32  ;;  %v272_v38 = vadd.f32 %v235_v35, %v54_v30 }
  0xd6   :  { %v501_v40 = vpop.f32.mrf.mxu0  ;;  %v509_v42 = vpop.f32.mrf.mxu1 }
  0xd7   :  { %281 = vst.msk [vmem:[#allocation2 + $0x8] sm:$0xff] %vm21_vm1, %v264_v37  ;;  %v269_v44 = vadd.f32 %v501_v40, %v51_v34  ;;  %289 = vst.msk [vmem:[#allocation2 + $0x48] sm:$0xff] %vm21_vm1, %v272_v38  ;;  %v277_v45 = vadd.f32 %v509_v42, %v59_v36 }
  0xd8   :  { %v301_v46 = vld [vmem:[#allocation2 + $0x10] sm:$0xff]  ;;  %v216_v47 = vpop.f32.mrf.mxu0  ;;  %v248_v49 = vpop.f32.mrf.mxu1 }
  0xd9   :  { %v309_v48 = vld [vmem:[#allocation2 + $0x50] sm:$0xff]  ;;  %v324_v50 = vadd.f32 %v630_v39, %v301_v46  ;;  %286 = vst.msk [vmem:[#allocation2 + $0x30] sm:$0xff] %vm21_vm1, %v269_v44  ;;  %v267_v51 = vadd.f32 %v216_v47, %v49_v41  ;;  %294 = vst.msk [vmem:[#allocation2 + $0x70] sm:$0xff] %vm21_vm1, %v277_v45  ;;  %v275_v54 = vadd.f32 %v248_v49, %v57_v43 }
  0xda   :  { %v637_v52 = vadd.f32 %v630_v39, %v309_v48  ;;  %v299_v56 = vld [vmem:[#allocation2] sm:$0xff]  ;;  %v502_v57 = vpop.f32.mrf.mxu0  ;;  %v510_v59 = vpop.f32.mrf.mxu1 }
  0xdb   :  { %v307_v58 = vld [vmem:[#allocation2 + $0x40] sm:$0xff]  ;;  %340 = vst.msk [vmem:[%s795_s3 + $0x10] sm:$0xff] %vm21_vm1, %v324_v50  ;;  %v322_v60 = vadd.f32 %v630_v39, %v299_v56  ;;  %284 = vst.msk [vmem:[#allocation2 + $0x20] sm:$0xff] %vm21_vm1, %v267_v51  ;;  %v270_v63 = vadd.f32 %v502_v57, %v52_v53  ;;  %v278_v2 = vadd.f32 %v510_v59, %v60_v55  ;;  %v358_v21 = vsel %vm21_vm1, %v324_v50, 0.0 }
  0xdc   :  { %348 = vst.msk [vmem:[%s795_s3 + $0x50] sm:$0xff] %vm21_vm1, %v637_v52  ;;  %292 = vst.msk [vmem:[#allocation2 + $0x60] sm:$0xff] %vm21_vm1, %v275_v54  ;;  %v302_v62 = vld [vmem:[#allocation2 + $0x18] sm:$0xff]  ;;  %v653_v0 = vadd.f32 %v630_v39, %v307_v58  ;;  %v219_v1 = vpop.f32.mrf.mxu0  ;;  %v251_v6 = vpop.f32.mrf.mxu1  ;;  %v394_v12 = vmul.f32 %v324_v50, %v324_v50 }
  0xdd   :  { %338 = vst.msk [vmem:[%s795_s3] sm:$0xff] %vm21_vm1, %v322_v60  ;;  %v325_v3 = vadd.f32 %v630_v39, %v302_v62  ;;  %v310_v4 = vld [vmem:[#allocation2 + $0x58] sm:$0xff]  ;;  %287 = vst.msk [vmem:[#allocation2 + $0x38] sm:$0xff] %vm21_vm1, %v270_v63  ;;  %v268_v8 = vadd.f32 %v219_v1, %v50_v61  ;;  %v392_v10 = vmul.f32 %v322_v60, %v322_v60  ;;  %v355_v17 = vsel %vm21_vm1, %v322_v60, 0.0 }
  0xde   :  { %v300_v7 = vld [vmem:[#allocation2 + $0x8] sm:$0xff]  ;;  %346 = vst.msk [vmem:[%s795_s3 + $0x40] sm:$0xff] %vm21_vm1, %v653_v0  ;;  %295 = vst.msk [vmem:[#allocation2 + $0x78] sm:$0xff] %vm21_vm1, %v278_v2  ;;  %v674_v14 = vadd.f32 %v630_v39, %v310_v4  ;;  %v276_v16 = vadd.f32 %v251_v6, %v58_v5  ;;  %v411_v32 = vsel %vm21_vm1, %v394_v12, 0.0  ;;  %v400_v2 = vmul.f32 %v653_v0, %v653_v0 }
  0xdf   :  { %v308_v9 = vld [vmem:[#allocation2 + $0x48] sm:$0xff]  ;;  %341 = vst.msk [vmem:[%s795_s3 + $0x18] sm:$0xff] %vm21_vm1, %v325_v3  ;;  %v323_v11 = vadd.f32 %v630_v39, %v300_v7  ;;  %285 = vst.msk [vmem:[#allocation2 + $0x28] sm:$0xff] %vm21_vm1, %v268_v8  ;;  %v408_v25 = vsel %vm21_vm1, %v392_v10, 0.0  ;;  %v395_v26 = vmul.f32 %v325_v3, %v325_v3  ;;  %v360_v33 = vsel %vm21_vm1, %v325_v3, 0.0 }
  0xe0   :  { %v305_v13 = vld [vmem:[#allocation2 + $0x30] sm:$0xff]  ;;  %v677_v15 = vadd.f32 %v630_v39, %v308_v9  ;;  %349 = vst.msk [vmem:[%s795_s3 + $0x58] sm:$0xff] %vm21_vm1, %v674_v14  ;;  %293 = vst.msk [vmem:[#allocation2 + $0x68] sm:$0xff] %vm21_vm1, %v276_v16  ;;  %v370_v6 = vsel %vm21_vm1, %v653_v0, 0.0  ;;  %v402_v10 = vmul.f32 %v637_v52, %v637_v52  ;;  %v403_v0 = vmul.f32 %v674_v14, %v674_v14 }
  0xe1   :  { %339 = vst.msk [vmem:[%s795_s3 + $0x8] sm:$0xff] %vm21_vm1, %v323_v11  ;;  %v356_v18 = vsel %vm21_vm1, %v323_v11, 0.0  ;;  %v393_v19 = vmul.f32 %v323_v11, %v323_v11  ;;  %v328_v20 = vadd.f32 %v630_v39, %v305_v13  ;;  %v313_v24 = vld [vmem:[#allocation2 + $0x70] sm:$0xff]  ;;  %v413_v41 = vsel %vm21_vm1, %v395_v26, 0.0 }
  0xe2   :  { %v357_v22 = vadd.f32 %v356_v18, %v355_v17  ;;  %v303_v23 = vld [vmem:[#allocation2 + $0x20] sm:$0xff]  ;;  %347 = vst.msk [vmem:[%s795_s3 + $0x48] sm:$0xff] %vm21_vm1, %v677_v15  ;;  %v712_v36 = vadd.f32 %v630_v39, %v313_v24  ;;  %v401_v7 = vmul.f32 %v677_v15, %v677_v15  ;;  %v423_v11 = vsel %vm21_vm1, %v400_v2, 0.0 }
  0xe3   :  { %v409_v27 = vsel %vm21_vm1, %v393_v19, 0.0  ;;  %344 = vst.msk [vmem:[%s795_s3 + $0x30] sm:$0xff] %vm21_vm1, %v328_v20  ;;  %v326_v28 = vadd.f32 %v630_v39, %v303_v23  ;;  %v311_v31 = vld [vmem:[#allocation2 + $0x60] sm:$0xff]  ;;  %v398_v55 = vmul.f32 %v328_v20, %v328_v20  ;;  %v372_v12 = vsel %vm21_vm1, %v677_v15, 0.0 }
  0xe4   :  { %v359_v29 = vadd.f32 %v358_v21, %v357_v22  ;;  %v410_v30 = vadd.f32 %v409_v27, %v408_v25  ;;  %v306_v35 = vld [vmem:[#allocation2 + $0x38] sm:$0xff]  ;;  %352 = vst.msk [vmem:[%s795_s3 + $0x70] sm:$0xff] %vm21_vm1, %v712_v36  ;;  %v334_v44 = vadd.f32 %v630_v39, %v311_v31  ;;  %v374_v17 = vsel %vm21_vm1, %v637_v52, 0.0 }
  0xe5   :  { %342 = vst.msk [vmem:[%s795_s3 + $0x20] sm:$0xff] %vm21_vm1, %v326_v28  ;;  %v396_v34 = vmul.f32 %v326_v28, %v326_v28  ;;  %v329_v40 = vadd.f32 %v630_v39, %v306_v35  ;;  %v362_v42 = vsel %vm21_vm1, %v326_v28, 0.0  ;;  %v314_v45 = vld [vmem:[#allocation2 + $0x78] sm:$0xff]  ;;  %v419_v63 = vsel %vm21_vm1, %v398_v55, 0.0 }
  0xe6   :  { %v412_v37 = vadd.f32 %v411_v32, %v410_v30  ;;  %v361_v38 = vadd.f32 %v360_v33, %v359_v29  ;;  %v304_v43 = vld [vmem:[#allocation2 + $0x28] sm:$0xff]  ;;  %350 = vst.msk [vmem:[%s795_s3 + $0x60] sm:$0xff] %vm21_vm1, %v334_v44  ;;  %v337_v53 = vadd.f32 %v630_v39, %v314_v45  ;;  %v425_v18 = vsel %vm21_vm1, %v401_v7, 0.0 }
  0xe7   :  { %345 = vst.msk [vmem:[%s795_s3 + $0x38] sm:$0xff] %vm21_vm1, %v329_v40  ;;  %v415_v48 = vsel %vm21_vm1, %v396_v34, 0.0  ;;  %v327_v49 = vadd.f32 %v630_v39, %v304_v43  ;;  %v312_v50 = vld [vmem:[#allocation2 + $0x68] sm:$0xff]  ;;  %v399_v59 = vmul.f32 %v329_v40, %v329_v40  ;;  %v368_v1 = vsel %vm21_vm1, %v329_v40, 0.0 }
  0xe8   :  { %v363_v46 = vadd.f32 %v362_v42, %v361_v38  ;;  %v414_v47 = vadd.f32 %v413_v41, %v412_v37  ;;  %v335_v54 = vadd.f32 %v630_v39, %v312_v50  ;;  %353 = vst.msk [vmem:[%s795_s3 + $0x78] sm:$0xff] %vm21_vm1, %v337_v53  ;;  %v366_v39 = vsel %vm21_vm1, %v328_v20, 0.0 }
  0xe9   :  { %343 = vst.msk [vmem:[%s795_s3 + $0x28] sm:$0xff] %vm21_vm1, %v327_v49  ;;  %v364_v56 = vsel %vm21_vm1, %v327_v49, 0.0  ;;  %v397_v57 = vmul.f32 %v327_v49, %v327_v49  ;;  %v421_v5 = vsel %vm21_vm1, %v399_v59, 0.0  ;;  %v427_v21 = vsel %vm21_vm1, %v402_v10, 0.0 }
  0xea   :  { %v416_v51 = vadd.f32 %v415_v48, %v414_v47  ;;  %v365_v58 = vadd.f32 %v364_v56, %v363_v46  ;;  %351 = vst.msk [vmem:[%s795_s3 + $0x68] sm:$0xff] %vm21_vm1, %v335_v54  ;;  %v376_v22 = vsel %vm21_vm1, %v674_v14, 0.0  ;;  %v404_v23 = vmul.f32 %v334_v44, %v334_v44 }
  0xeb   :  { %v417_v60 = vsel %vm21_vm1, %v397_v57, 0.0  ;;  %v429_v25 = vsel %vm21_vm1, %v403_v0, 0.0  ;;  %v378_v26 = vsel %vm21_vm1, %v334_v44, 0.0  ;;  %v405_v52 = vmul.f32 %v335_v54, %v335_v54 }
  0xec   :  { %v367_v61 = vadd.f32 %v366_v39, %v365_v58  ;;  %v418_v62 = vadd.f32 %v417_v60, %v416_v51  ;;  %v406_v29 = vmul.f32 %v712_v36, %v712_v36  ;;  %v431_v30 = vsel %vm21_vm1, %v404_v23, 0.0 }
  0xed   :  { %v380_v31 = vsel %vm21_vm1, %v335_v54, 0.0  ;;  %v382_v14 = vsel %vm21_vm1, %v712_v36, 0.0  ;;  %v407_v34 = vmul.f32 %v337_v53, %v337_v53  ;;  %v433_v35 = vsel %vm21_vm1, %v405_v52, 0.0 }
  0xee   :  { %v420_v3 = vadd.f32 %v419_v63, %v418_v62  ;;  %v369_v4 = vadd.f32 %v368_v1, %v367_v61  ;;  %v435_v40 = vsel %vm21_vm1, %v406_v29, 0.0  ;;  %v384_v41 = vsel %vm21_vm1, %v337_v53, 0.0  ;;  %v354_v53 = vld [vmem:[%s793_s4] sm:$0x3] }
  0xef   :  { %v437_v44 = vsel %vm21_vm1, %v407_v34, 0.0 }
  0xf0   :  { %v371_v8 = vadd.f32 %v370_v6, %v369_v4  ;;  %v422_v9 = vadd.f32 %v421_v5, %v420_v3 }
  0xf2   :  { %v373_v13 = vadd.f32 %v372_v12, %v371_v8  ;;  %v424_v16 = vadd.f32 %v423_v11, %v422_v9 }
  0xf4   :  { %v375_v19 = vadd.f32 %v374_v17, %v373_v13  ;;  %v426_v20 = vadd.f32 %v425_v18, %v424_v16 }
  0xf6   :  { %v428_v24 = vadd.f32 %v427_v21, %v426_v20  ;;  %v377_v15 = vadd.f32 %v376_v22, %v375_v19 }
  0xf8   :  { %v379_v27 = vadd.f32 %v378_v26, %v377_v15  ;;  %v430_v28 = vadd.f32 %v429_v25, %v428_v24 }
  0xfa   :  { %v432_v32 = vadd.f32 %v431_v30, %v430_v28  ;;  %v381_v33 = vadd.f32 %v380_v31, %v379_v27 }
  0xfc   :  { %v383_v37 = vadd.f32 %v382_v14, %v381_v33  ;;  %v434_v38 = vadd.f32 %v433_v35, %v432_v32 }
  0xfe   :  { %v385_v42 = vadd.f32 %v384_v41, %v383_v37  ;;  %v436_v43 = vadd.f32 %v435_v40, %v434_v38 }
 0x100   :  { %v386_v45 = vrot.slane %v385_v42, 4  ;;  %v438_v46 = vadd.f32 %v437_v44, %v436_v43 }
 0x102   :  { %v387_v47 = vadd.f32 %v386_v45, %v385_v42  ;;  %v439_v48 = vrot.slane %v438_v46, 4 }
 0x104   :  { %v388_v49 = vrot.slane %v387_v47, 2  ;;  %v440_v50 = vadd.f32 %v439_v48, %v438_v46 }
 0x106   :  { %v389_v36 = vadd.f32 %v388_v49, %v387_v47  ;;  %v441_v51 = vrot.slane %v440_v50, 2 }
 0x108   :  { %v390_v54 = vrot.slane %v389_v36, 1  ;;  %v442_v55 = vadd.f32 %v441_v51, %v440_v50 }
 0x10a   :  { %v443_v56 = vrot.slane %v442_v55, 1  ;;  %v391_v57 = vadd.f32 %v390_v54, %v389_v36 }
 0x10c   :  { %v444_v58 = vadd.f32 %v443_v56, %v442_v55 }
 0x10e   :  { %v446_v39 = vsel %vm445_vm4, %v391_v57, %v444_v58 }
 0x10f   :  { %v447_v59 = vadd.f32 %v446_v39, %v354_v53 }
 0x111   :  { %449 = vst.msk [vmem:[%s793_s4] sm:$0x3] %vm43_vm3, %v447_v59 }

// kernel: local_enhancer_forward.22
= control target key start
LH: loop header
LB: loop body
LE: loop exit
PB: predicated region body
PF: predicated region fallthrough
CT: control target
= control target key end

     0   :  { %s729_s18 = smov 0   ;;  %s883_s0 = inlined_call_operand.vmem [shape: f32[2,9,9,3], index: 0, kind: input, shape index: {}]   ;;  %s884_s1 = inlined_call_operand.vmem [shape: f32[2,9,8,3], index: 1, kind: input, shape index: {}]   ;;  %s885_s2 = inlined_call_operand.vmem [shape: f32[2,8,9,3], index: 2, kind: input, shape index: {}]   ;;  %s886_s3 = inlined_call_operand.vmem [shape: f32[2,8,8,3], index: 3, kind: input, shape index: {}]   ;;  %s887_s4 = inlined_call_operand.vmem [shape: f32[1,8,8,1], index: 4, kind: input, shape index: {}]   ;;  %s888_s5 = inlined_call_operand.vmem [shape: f32[2,8,8,3], index: 5, kind: output, shape index: {}]  }
   0x1 LB: > { %s659_s19 = sadd.s32 4294967295, %s696_s18   ;;  %p663_p0 = scmp.ge.s32.totalorder %s696_s18, 1  ;;  %s696_s18 = sphi %s729_s18, %s15_s18  }
   0x2   : > { %p217_p1 = scmp.lt.s32.totalorder %s696_s18, 3 }
   0x4   : > { %p218_p2 = pnand %p663_p0, %p217_p1 }
   0x5   : > { %p260_p3 = scmp.lt.s32.totalorder (!%p218_p2), %s659_s19, 1 }
   0x6   : > { %221 = sbr.rel (%p218_p2) target bundleno = 152 (0x98), region = 40 }
   0xb   : > { %v505_v0 = vld [vmem:[%s887_s4 + $0x10] sm:$0xff]  ;;  %v503_v1 = vld [vmem:[%s887_s4] sm:$0xff]  ;;  %v698_v2 = vmov 0   ;;  %v506_v3 = vld [vmem:[%s887_s4 + $0x18] sm:$0xff]  ;;  %s890_s19 = smov (!%p260_p3, %s659_s19), 1  ;;  %vm352_vm0 = vcmask 1046528  }
   0xc   : > { %689 = vset.pattern.permute.xlu1 %v698_v2  ;;  %688 = vset.pattern.permute.xlu0 %v698_v2  ;;  %v504_v4 = vld [vmem:[%s887_s4 + $0x8] sm:$0xff]  ;;  %v507_v6 = vld [vmem:[%s887_s4 + $0x20] sm:$0xff]  ;;  %v510_v7 = vld [vmem:[%s887_s4 + $0x38] sm:$0xff]  ;;  %s677_s11 = smul.u32 144, %s890_s19  ;;  %s674_s16 = sshll.u32 %s890_s19, 7  ;;  %vm559_vm1 = vcmask 23552  }
   0xd   : > { %523 = vperm.xlu1 %689, %v505_v0   ;;  %513 = vperm.xlu0 %688, %v503_v1   ;;  %v508_v5 = vld [vmem:[%s887_s4 + $0x28] sm:$0xff]  ;;  %v509_v8 = vld [vmem:[%s887_s4 + $0x30] sm:$0xff]  ;;  %s678_s15 = smul.u32 72, %s890_s19  ;;  %s801_s24 = scalar_lea.vmem %s885_s2, %s674_s16 }
   0xe   : > { %s767_s14 = scalar_lea.vmem %s883_s0, %s677_s11  ;;  %v316_v61 = vld [vmem:[%s801_s24 + $0x20] sm:$0xff]  ;;  %v317_v0 = vld [vmem:[%s801_s24 + $0x28] sm:$0x1]  ;;  %s675_s25 = sshll.u32 %s890_s19, 6 }
   0xf   : > { %v289_v9 = vld [vmem:[%s767_s14 + $0x20] sm:$0xff]  ;;  %v290_v10 = vld [vmem:[%s767_s14 + $0x28] sm:$0x1]  ;;  %v291_v13 = vld [vmem:[%s767_s14 + $0x30] sm:$0xff]  ;;  %s794_s21 = scalar_lea.vmem %s884_s1, %s678_s15  ;;  %s831_s28 = scalar_lea.vmem %s886_s3, %s675_s25 }
  0x10   : > { %v285_v11 = vld [vmem:[%s767_s14] sm:$0xff]  ;;  %v286_v12 = vld [vmem:[%s767_s14 + $0x8] sm:$0x1]  ;;  %v292_v14 = vld [vmem:[%s767_s14 + $0x38] sm:$0x1]  ;;  %v359_v15 = vrot.slane %v289_v9, 1  ;;  %s856_s6 = scalar_lea.vmem %s888_s5, %s675_s25 }
  0x11   : > { %528 = vperm.xlu1 %689, %v506_v3   ;;  %518 = vperm.xlu0 %688, %v504_v4   ;;  %v360_v16 = vrot.slane %v290_v10, 1  ;;  %v287_v17 = vld [vmem:[%s767_s14 + $0x10] sm:$0xff]  ;;  %v288_v18 = vld [vmem:[%s767_s14 + $0x18] sm:$0x1]  ;;  %v353_v19 = vrot.slane %v285_v11, 1  ;;  %v354_v20 = vrot.slane %v286_v12, 1 }
  0x12   : > { %v362_v21 = vrot.slane %v291_v13, 1  ;;  %v363_v23 = vrot.slane %v292_v14, 1  ;;  %v356_v24 = vrot.slane %v287_v17, 1  ;;  %v357_v25 = vrot.slane %v288_v18, 1  ;;  %v293_v27 = vld [vmem:[%s767_s14 + $0x40] sm:$0xff]  ;;  %v295_v29 = vld [vmem:[%s767_s14 + $0x50] sm:$0xff] }
  0x13   : > { %v361_v22 = vsel %vm352_vm0, %v359_v15, %v360_v16  ;;  %v355_v26 = vsel %vm352_vm0, %v353_v19, %v354_v20  ;;  %v294_v28 = vld [vmem:[%s767_s14 + $0x48] sm:$0x1]  ;;  %v296_v30 = vld [vmem:[%s767_s14 + $0x58] sm:$0x1]  ;;  %v365_v35 = vrot.slane %v293_v27, 1  ;;  %v368_v37 = vrot.slane %v295_v29, 1 }
  0x14   : > { %v387_v31 = vadd.f32 %v361_v22, %v289_v9  ;;  %v364_v32 = vsel %vm352_vm0, %v362_v21, %v363_v23  ;;  %v358_v33 = vsel %vm352_vm0, %v356_v24, %v357_v25  ;;  %v385_v34 = vadd.f32 %v355_v26, %v285_v11  ;;  %v297_v39 = vld [vmem:[%s767_s14 + $0x60] sm:$0xff]  ;;  %v298_v42 = vld [vmem:[%s767_s14 + $0x68] sm:$0x1]  ;;  %v299_v43 = vld [vmem:[%s767_s14 + $0x70] sm:$0xff] }
  0x15   : > { %538 = vperm.xlu1 %689, %v508_v5   ;;  %533 = vperm.xlu0 %688, %v507_v6   ;;  %v366_v36 = vrot.slane %v294_v28, 1  ;;  %v369_v38 = vrot.slane %v296_v30, 1  ;;  %v388_v40 = vadd.f32 %v364_v32, %v291_v13  ;;  %v300_v44 = vld [vmem:[%s767_s14 + $0x78] sm:$0x1]  ;;  %v386_v45 = vadd.f32 %v358_v33, %v287_v17  ;;  %v305_v55 = vld [vmem:[%s794_s21 + $0x10] sm:$0xff]  ;;  %v303_v60 = vld [vmem:[%s794_s21] sm:$0xff] }
  0x16   : > { %v395_v41 = vadd.f32 %v387_v31, %v291_v13  ;;  %v393_v46 = vadd.f32 %v385_v34, %v287_v17  ;;  %v371_v49 = vrot.slane %v297_v39, 1  ;;  %v372_v50 = vrot.slane %v298_v42, 1  ;;  %v301_v3 = vld [vmem:[%s767_s14 + $0x80] sm:$0xff]  ;;  %v302_v4 = vld [vmem:[%s767_s14 + $0x88] sm:$0x1]  ;;  %v306_v5 = vld [vmem:[%s794_s21 + $0x18] sm:$0xff] }
  0x17   : > { %v367_v47 = vsel %vm352_vm0, %v365_v35, %v366_v36  ;;  %v370_v48 = vsel %vm352_vm0, %v368_v37, %v369_v38  ;;  %v374_v51 = vrot.slane %v299_v43, 1  ;;  %v375_v52 = vrot.slane %v300_v44, 1  ;;  %v312_v6 = vld [vmem:[%s801_s24] sm:$0xff]  ;;  %v304_v12 = vld [vmem:[%s794_s21 + $0x8] sm:$0xff]  ;;  %v318_v17 = vld [vmem:[%s801_s24 + $0x30] sm:$0xff] }
  0x18   : > { %v409_v53 = vadd.f32 %v395_v41, %v364_v32  ;;  %v396_v54 = vadd.f32 %v388_v40, %v293_v27  ;;  %v407_v56 = vadd.f32 %v393_v46, %v358_v33  ;;  %v389_v57 = vadd.f32 %v367_v47, %v293_v27  ;;  %v313_v16 = vld [vmem:[%s801_s24 + $0x8] sm:$0x1]  ;;  %v319_v23 = vld [vmem:[%s801_s24 + $0x38] sm:$0x1]  ;;  %v314_v24 = vld [vmem:[%s801_s24 + $0x10] sm:$0xff] }
  0x19   : > { %548 = vperm.xlu1 %689, %v510_v7   ;;  %543 = vperm.xlu0 %688, %v509_v8   ;;  %v394_v58 = vadd.f32 %v386_v45, %v289_v9  ;;  %v390_v59 = vadd.f32 %v370_v48, %v295_v29  ;;  %v373_v62 = vsel %vm352_vm0, %v371_v49, %v372_v50  ;;  %v461_v11 = vrot.slane %v316_v61, 1  ;;  %v315_v25 = vld [vmem:[%s801_s24 + $0x18] sm:$0x1]  ;;  %v307_v27 = vld [vmem:[%s794_s21 + $0x20] sm:$0xff]  ;;  %v308_v33 = vld [vmem:[%s794_s21 + $0x28] sm:$0xff] }
  0x1a   : > { %v376_v63 = vsel %vm352_vm0, %v374_v51, %v375_v52  ;;  %v417_v1 = vadd.f32 %v409_v53, %v305_v55  ;;  %v410_v2 = vadd.f32 %v396_v54, %v367_v47  ;;  %v415_v7 = vadd.f32 %v407_v56, %v303_v60  ;;  %v322_v46 = vld [vmem:[%s801_s24 + $0x50] sm:$0xff]  ;;  %v323_v47 = vld [vmem:[%s801_s24 + $0x58] sm:$0x1]  ;;  %v321_v56 = vld [vmem:[%s801_s24 + $0x48] sm:$0x1] }
  0x1b   : > { %v408_v8 = vadd.f32 %v394_v58, %v361_v22  ;;  %v398_v9 = vadd.f32 %v390_v59, %v297_v39  ;;  %v397_v10 = vadd.f32 %v389_v57, %v295_v29  ;;  %v391_v13 = vadd.f32 %v373_v62, %v297_v39  ;;  %v309_v50 = vld [vmem:[%s794_s21 + $0x30] sm:$0xff]  ;;  %v310_v57 = vld [vmem:[%s794_s21 + $0x38] sm:$0xff] }
  0x1c   : > { %v392_v14 = vadd.f32 %v376_v63, %v299_v43  ;;  %v462_v15 = vrot.slane %v317_v0, 1  ;;  %v403_v18 = vrot.slane %v301_v3, 1  ;;  %v404_v19 = vrot.slane %v302_v4, 1 }
  0x1d   : > { %v425_v20 = vadd.f32 %v417_v1, %v306_v5  ;;  %v455_v21 = vrot.slane %v312_v6, 1  ;;  %v418_v22 = vadd.f32 %v410_v2, %v306_v5  ;;  %v423_v26 = vadd.f32 %v415_v7, %v304_v12  ;;  %v328_v7 = vld [vmem:[%s831_s28] sm:$0xff] }
  0x1e   : > { %v416_v28 = vadd.f32 %v408_v8, %v304_v12  ;;  %v412_v29 = vadd.f32 %v398_v9, %v373_v62  ;;  %v411_v30 = vadd.f32 %v397_v10, %v370_v48  ;;  %v456_v31 = vrot.slane %v313_v16, 1  ;;  %v330_v62 = vld [vmem:[%s831_s28 + $0x10] sm:$0xff]  ;;  %v311_v8 = vld [vmem:[%s794_s21 + $0x40] sm:$0xff]  ;;  %v327_v12 = vld [vmem:[%s801_s24 + $0x78] sm:$0x1] }
  0x1f   : > { %v464_v32 = vrot.slane %v318_v17, 1  ;;  %v400_v34 = vadd.f32 %v392_v14, %v301_v3  ;;  %v399_v35 = vadd.f32 %v391_v13, %v299_v43  ;;  %v465_v36 = vrot.slane %v319_v23, 1  ;;  %v326_v9 = vld [vmem:[%s801_s24 + $0x70] sm:$0xff]  ;;  %v324_v13 = vld [vmem:[%s801_s24 + $0x60] sm:$0xff]  ;;  %v325_v14 = vld [vmem:[%s801_s24 + $0x68] sm:$0x1] }
  0x20   : > { %v458_v37 = vrot.slane %v314_v24, 1  ;;  %v459_v38 = vrot.slane %v315_v25, 1  ;;  %v405_v39 = vsel %vm352_vm0, %v403_v18, %v404_v19  ;;  %v433_v40 = vadd.f32 %v425_v20, %v316_v61  ;;  %v331_v20 = vld [vmem:[%s831_s28 + $0x18] sm:$0xff] }
  0x21   : > { %v463_v41 = vsel %vm352_vm0, %v461_v11, %v462_v15  ;;  %v426_v42 = vadd.f32 %v418_v22, %v307_v27  ;;  %v431_v44 = vadd.f32 %v423_v26, %v312_v6  ;;  %v424_v45 = vadd.f32 %v416_v28, %v305_v55  ;;  %v320_v55 = vld [vmem:[%s801_s24 + $0x40] sm:$0xff] }
  0x22   : > { %v420_v48 = vadd.f32 %v412_v29, %v308_v33  ;;  %v419_v43 = vadd.f32 %v411_v30, %v307_v27  ;;  %v457_v49 = vsel %vm352_vm0, %v455_v21, %v456_v31  ;;  %v414_v51 = vadd.f32 %v405_v39, %v400_v34  ;;  %v329_v21 = vld [vmem:[%s831_s28 + $0x8] sm:$0xff] }
  0x23   : > { %v413_v52 = vadd.f32 %v399_v35, %v376_v63  ;;  %v466_v53 = vsel %vm352_vm0, %v464_v32, %v465_v36  ;;  %v460_v54 = vsel %vm352_vm0, %v458_v37, %v459_v38  ;;  %v489_v58 = vadd.f32 %v463_v41, %v433_v40  ;;  %v333_v37 = vld [vmem:[%s831_s28 + $0x28] sm:$0xff]  ;;  %v332_v38 = vld [vmem:[%s831_s28 + $0x20] sm:$0xff] }
  0x24   : > { %v434_v59 = vadd.f32 %v426_v42, %v318_v17  ;;  %v470_v60 = vrot.slane %v322_v46, 1  ;;  %v471_v61 = vrot.slane %v323_v47, 1  ;;  %v487_v0 = vadd.f32 %v457_v49, %v431_v44 }
  0x25   : > { %v432_v63 = vadd.f32 %v424_v45, %v314_v24  ;;  %v428_v1 = vadd.f32 %v420_v48, %v309_v50  ;;  %v427_v2 = vadd.f32 %v419_v43, %v308_v33  ;;  %v467_v3 = vrot.slane %v320_v55, 1 }
  0x26   : > { %v468_v4 = vrot.slane %v321_v56, 1  ;;  %v422_v5 = vadd.f32 %v414_v51, %v310_v57  ;;  %v421_v6 = vadd.f32 %v413_v52, %v309_v50  ;;  %v497_v10 = vadd.f32 %v489_v58, %v330_v62  ;;  %v335_v51 = vld [vmem:[%s831_s28 + $0x38] sm:$0xff]  ;;  %v334_v52 = vld [vmem:[%s831_s28 + $0x30] sm:$0xff] }
  0x27   : > { %v472_v11 = vsel %vm352_vm0, %v470_v60, %v471_v61  ;;  %v490_v15 = vadd.f32 %v466_v53, %v434_v59  ;;  %v488_v16 = vadd.f32 %v460_v54, %v432_v63  ;;  %v436_v17 = vadd.f32 %v428_v1, %v322_v46 }
  0x28   : > { %v435_v18 = vadd.f32 %v427_v2, %v320_v55  ;;  %v495_v19 = vadd.f32 %v487_v0, %v328_v7  ;;  %v469_v23 = vsel %vm352_vm0, %v467_v3, %v468_v4  ;;  %v430_v22 = vadd.f32 %v422_v5, %v311_v8 }
  0x29   : > { %v429_v24 = vadd.f32 %v421_v6, %v310_v57  ;;  %v476_v25 = vrot.slane %v326_v9, 1  ;;  %v477_v26 = vrot.slane %v327_v12, 1  ;;  %v473_v27 = vrot.slane %v324_v13, 1 }
  0x2a   : > { %v474_v28 = vrot.slane %v325_v14, 1  ;;  %v498_v31 = vadd.f32 %v490_v15, %v331_v20  ;;  %v496_v32 = vadd.f32 %v488_v16, %v329_v21  ;;  %v492_v33 = vadd.f32 %v472_v11, %v436_v17 }
  0x2b   : > { %v491_v34 = vadd.f32 %v469_v23, %v435_v18  ;;  %v438_v39 = vadd.f32 %v430_v22, %v326_v9  ;;  %v437_v40 = vadd.f32 %v429_v24, %v324_v13  ;;  %v478_v41 = vsel %vm352_vm0, %v476_v25, %v477_v26 }
  0x2c   : > { %v475_v42 = vsel %vm352_vm0, %v473_v27, %v474_v28  ;;  %v500_v46 = vadd.f32 %v492_v33, %v333_v37 }
  0x2d   : > { %v499_v47 = vadd.f32 %v491_v34, %v332_v38  ;;  %v494_v49 = vadd.f32 %v478_v41, %v438_v39  ;;  %v493_v50 = vadd.f32 %v475_v42, %v437_v40 }
  0x2f   : > { %v502_v57 = vadd.f32 %v494_v49, %v335_v51  ;;  %v501_v58 = vadd.f32 %v493_v50, %v334_v52 }
  0x88   : > { %v524_v29 = vpop.permute.xlu1 %523  ;;  %v514_v30 = vpop.permute.xlu0 %513 }
  0x89   : > { %v553_v35 = vmul.f32 %v524_v29, %v497_v10  ;;  %v551_v36 = vmul.f32 %v514_v30, %v495_v19 }
  0x8b   : > { %562 = vst.msk [vmem:[%s856_s6 + $0x10] sm:$0xff] %vm559_vm1, %v553_v35  ;;  %560 = vst.msk [vmem:[%s856_s6] sm:$0xff] %vm559_vm1, %v551_v36 }
  0x8c   : > { %v529_v44 = vpop.permute.xlu1 %528  ;;  %v519_v45 = vpop.permute.xlu0 %518 }
  0x8d   : > { %v554_v48 = vmul.f32 %v529_v44, %v498_v31  ;;  %v552_v43 = vmul.f32 %v519_v45, %v496_v32 }
  0x8f   : > { %563 = vst.msk [vmem:[%s856_s6 + $0x18] sm:$0xff] %vm559_vm1, %v554_v48  ;;  %561 = vst.msk [vmem:[%s856_s6 + $0x8] sm:$0xff] %vm559_vm1, %v552_v43 }
  0x90   : > { %v539_v53 = vpop.permute.xlu1 %538  ;;  %v534_v54 = vpop.permute.xlu0 %533 }
  0x91   : > { %v556_v55 = vmul.f32 %v539_v53, %v500_v46  ;;  %v555_v56 = vmul.f32 %v534_v54, %v499_v47 }
  0x93   : > { %565 = vst.msk [vmem:[%s856_s6 + $0x28] sm:$0xff] %vm559_vm1, %v556_v55  ;;  %564 = vst.msk [vmem:[%s856_s6 + $0x20] sm:$0xff] %vm559_vm1, %v555_v56 }
  0x94   : > { %v549_v59 = vpop.permute.xlu1 %548  ;;  %v544_v60 = vpop.permute.xlu0 %543 }
  0x95   : > { %v558_v61 = vmul.f32 %v549_v59, %v502_v57  ;;  %v557_v62 = vmul.f32 %v544_v60, %v501_v58 }
  0x97   : > { %567 = vst.msk [vmem:[%s856_s6 + $0x38] sm:$0xff] %vm559_vm1, %v558_v61  ;;  %566 = vst.msk [vmem:[%s856_s6 + $0x30] sm:$0xff] %vm559_vm1, %v557_v62 }
  0x98 PF: > { %s15_s18 = sadd.s32 1, %s696_s18  }
  0x99   : > { %p12_p4 = scmp.ge.s32.totalorder %s15_s18, 4  }
  0x9b   :  { %14 = sbr.rel (!%p12_p4) target bundleno = 1 (0x1), region = 79 }

// kernel: local_enhancer_forward.23
= control target key start
LH: loop header
LB: loop body
LE: loop exit
PB: predicated region body
PF: predicated region fallthrough
CT: control target
= control target key end

     0   :  { %v640_v0 = vmov 0   ;;  %vm21_vm0 = vcmask 64512   ;;  %v641_v3 = vmov 0.0   ;;  %vm225_vm1 = vcmask 154624   ;;  %s995_s1 = inlined_call_operand.vmem [shape: bf16[147,8], index: 1, kind: input, shape index: {}]   ;;  %s996_s0 = inlined_call_operand.vmem [shape: bf16[128,147], index: 0, kind: input, shape index: {}]   ;;  %s997_s4 = inlined_call_operand.vmem [shape: f32[2,8], index: 4, kind: output, shape index: {1}]   ;;  %s998_s2 = inlined_call_operand.vmem [shape: f32[1,8], index: 2, kind: input, shape index: {}]   ;;  %s999_s3 = inlined_call_operand.vmem [shape: f32[128,8], index: 3, kind: output, shape index: {0}]  }
   0x1   :  { %257 = vmatprep.subr.bf16.mxu0 %v640_v0  ;;  %v606_v1 = vld [vmem:[%s995_s1 + $0x38] sm:$0xff]   ;;  %583 = vmatprep.subr.bf16.mxu1 %v640_v0  ;;  %v607_v2 = vld [vmem:[%s995_s1 + $0x30] sm:$0xff]   ;;  %22 = vst.msk [vmem:[#allocation2] sm:$0xff] %vm21_vm0, %v641_v3  ;;  %23 = vst.msk [vmem:[#allocation2 + $0x8] sm:$0xff] %vm21_vm0, %v641_v3  ;;  %vm250_vm2 = vcmask 1040384   ;;  %vm251_vm3 = vcmask 1041408  }
   0x2   :  { %258 = vmatpush1.bf16.msra.mxu0 %v606_v1  ;;  %593 = vmatpush1.bf16.msra.mxu1 %v606_v1  ;;  %24 = vst.msk [vmem:[#allocation2 + $0x10] sm:$0xff] %vm21_vm0, %v641_v3  ;;  %25 = vst.msk [vmem:[#allocation2 + $0x18] sm:$0xff] %vm21_vm0, %v641_v3  ;;  %v608_v4 = vld [vmem:[%s995_s1 + $0x28] sm:$0xff]   ;;  %v609_v5 = vld [vmem:[%s995_s1 + $0x20] sm:$0xff]   ;;  %v642_v11 = vmov 65535   ;;  %vm43_vm4 = vcmask 58368  }
   0x3   :  { %259 = vmatprep.subr.bf16.mxu0 %v640_v0  ;;  %584 = vmatprep.subr.bf16.mxu1 %v640_v0  ;;  %26 = vst.msk [vmem:[#allocation2 + $0x20] sm:$0xff] %vm21_vm0, %v641_v3  ;;  %27 = vst.msk [vmem:[#allocation2 + $0x28] sm:$0xff] %vm21_vm0, %v641_v3  ;;  %v618_v6 = vld [vmem:[%s996_s0 + $0x4] ss:$8 sps:$4 sm:$0xff]   ;;  %v610_v8 = vld [vmem:[%s995_s1 + $0x18] sm:$0xff]   ;;  %v252_v12 = vsel %vm250_vm2, 4294967295, %v642_v11 }
   0x4   :  { %28 = vst.msk [vmem:[#allocation2 + $0x30] sm:$0xff] %vm21_vm0, %v641_v3  ;;  %29 = vst.msk [vmem:[#allocation2 + $0x38] sm:$0xff] %vm21_vm0, %v641_v3  ;;  %574 = vmatprep.mubr.msk.bf16.mxu0 %vm225_vm1, %v618_v6  ;;  %v624_v7 = vld [vmem:[%s996_s0 + $0x44] ss:$8 sps:$4 sm:$0xff]   ;;  %v611_v9 = vld [vmem:[%s995_s1 + $0x10] sm:$0xff]   ;;  %v253_v15 = vsel %vm251_vm3, %v252_v12, 0 }
   0x5   :  { %30 = vst.msk [vmem:[#allocation2 + $0x40] sm:$0xff] %vm21_vm0, %v641_v3  ;;  %31 = vst.msk [vmem:[#allocation2 + $0x48] sm:$0xff] %vm21_vm0, %v641_v3  ;;  %578 = vmatprep.mubr.msk.bf16.mxu1 %vm225_vm1, %v624_v7  ;;  %v612_v10 = vld [vmem:[%s995_s1 + $0x8] sm:$0xff]   ;;  %v613_v13 = vld [vmem:[%s995_s1] sm:$0xff]  }
   0x6   :  { %32 = vst.msk [vmem:[#allocation2 + $0x50] sm:$0xff] %vm21_vm0, %v641_v3  ;;  %33 = vst.msk [vmem:[#allocation2 + $0x58] sm:$0xff] %vm21_vm0, %v641_v3  ;;  %260 = vmatpush1.bf16.msra.mxu0 %v607_v2  ;;  %594 = vmatpush1.bf16.msra.mxu1 %v607_v2  ;;  %v614_v14 = vld [vmem:[%s995_s1 + $0x48] ss:$0 sps:$4 sm:$0x33]   ;;  %v615_v17 = vld [vmem:[%s995_s1 + $0x40] sm:$0xff]  }
   0x7   :  { %34 = vst.msk [vmem:[#allocation2 + $0x60] sm:$0xff] %vm21_vm0, %v641_v3  ;;  %35 = vst.msk [vmem:[#allocation2 + $0x68] sm:$0xff] %vm21_vm0, %v641_v3  ;;  %261 = vmatprep.subr.bf16.mxu0 %v640_v0  ;;  %585 = vmatprep.subr.bf16.mxu1 %v640_v0  ;;  %v255_v16 = vand.u32 %v614_v14, %v253_v15  ;;  %v616_v18 = vld [vmem:[%s996_s0] ss:$8 sps:$4 sm:$0xff]   ;;  %v619_v20 = vld [vmem:[%s996_s0 + $0x14] ss:$8 sps:$4 sm:$0xff]  }
   0x8   :  { %36 = vst.msk [vmem:[#allocation2 + $0x70] sm:$0xff] %vm21_vm0, %v641_v3  ;;  %37 = vst.msk [vmem:[#allocation2 + $0x78] sm:$0xff] %vm21_vm0, %v641_v3  ;;  %v622_v19 = vld [vmem:[%s996_s0 + $0x40] ss:$8 sps:$4 sm:$0xff]   ;;  %v628_v21 = vld [vmem:[%s996_s0 + $0x54] ss:$8 sps:$4 sm:$0xff]  }
   0x9   :  { %v621_v22 = vld [vmem:[%s996_s0 + $0x10] ss:$8 sps:$4 sm:$0xff]   ;;  %v625_v24 = vld [vmem:[%s996_s0 + $0x24] ss:$8 sps:$4 sm:$0xff]   ;;  %v627_v26 = vld [vmem:[%s996_s0 + $0x20] ss:$8 sps:$4 sm:$0xff]  }
   0xa   :  { %262 = vmatpush1.bf16.msra.mxu0 %v608_v4  ;;  %595 = vmatpush1.bf16.msra.mxu1 %v608_v4  ;;  %v630_v23 = vld [vmem:[%s996_s0 + $0x50] ss:$8 sps:$4 sm:$0xff]   ;;  %v634_v25 = vld [vmem:[%s996_s0 + $0x64] ss:$8 sps:$4 sm:$0xff]   ;;  %v636_v27 = vld [vmem:[%s996_s0 + $0x60] ss:$8 sps:$4 sm:$0xff]  }
   0xb   :  { %263 = vmatprep.subr.bf16.mxu0 %v640_v0  ;;  %586 = vmatprep.subr.bf16.mxu1 %v640_v0  ;;  %v631_v28 = vld [vmem:[%s996_s0 + $0x34] ss:$8 sps:$4 sm:$0xff]   ;;  %v633_v30 = vld [vmem:[%s996_s0 + $0x30] ss:$8 sps:$4 sm:$0xff]   ;;  %44 = vst.msk [vmem:[%s997_s4] sm:$0x3] %vm43_vm4, %v641_v3 }
   0xc   :  { %v637_v29 = vld [vmem:[%s996_s0 + $0x74] ss:$8 sps:$4 sm:$0xff]   ;;  %v639_v31 = vld [vmem:[%s996_s0 + $0x70] ss:$8 sps:$4 sm:$0xff]   ;;  %v45_v32 = vld [vmem:[#allocation2] sm:$0xff] }
   0xd   :  { %v53_v33 = vld [vmem:[#allocation2 + $0x40] sm:$0xff]  ;;  %v46_v39 = vld [vmem:[#allocation2 + $0x8] sm:$0xff]  ;;  %v47_v47 = vld [vmem:[#allocation2 + $0x10] sm:$0xff] }
   0xe   :  { %264 = vmatpush1.bf16.msra.mxu0 %v609_v5  ;;  %596 = vmatpush1.bf16.msra.mxu1 %v609_v5  ;;  %v54_v41 = vld [vmem:[#allocation2 + $0x48] sm:$0xff]  ;;  %v55_v49 = vld [vmem:[#allocation2 + $0x50] sm:$0xff]  ;;  %v819_v50 = vld [vmem:[%s998_s2] ss:$0 sm:$0xff] }
   0xf   :  { %265 = vmatprep.subr.bf16.mxu0 %v640_v0  ;;  %587 = vmatprep.subr.bf16.mxu1 %v640_v0  ;;  %v48_v61 = vld [vmem:[#allocation2 + $0x18] sm:$0xff] }
  0x10   :  { %v56_v62 = vld [vmem:[#allocation2 + $0x58] sm:$0xff] }
  0x12   :  { %266 = vmatpush1.bf16.msra.mxu0 %v610_v8  ;;  %597 = vmatpush1.bf16.msra.mxu1 %v610_v8 }
  0x13   :  { %267 = vmatprep.subr.bf16.mxu0 %v640_v0  ;;  %588 = vmatprep.subr.bf16.mxu1 %v640_v0 }
  0x16   :  { %268 = vmatpush1.bf16.msra.mxu0 %v611_v9  ;;  %598 = vmatpush1.bf16.msra.mxu1 %v611_v9  ;;  %v49_v9 = vld [vmem:[#allocation2 + $0x20] sm:$0xff] }
  0x17   :  { %269 = vmatprep.subr.bf16.mxu0 %v640_v0  ;;  %589 = vmatprep.subr.bf16.mxu1 %v640_v0 }
  0x1a   :  { %270 = vmatpush1.bf16.msra.mxu0 %v612_v10  ;;  %599 = vmatpush1.bf16.msra.mxu1 %v612_v10  ;;  %v57_v10 = vld [vmem:[#allocation2 + $0x60] sm:$0xff] }
  0x1b   :  { %271 = vmatprep.subr.bf16.mxu0 %v640_v0  ;;  %590 = vmatprep.subr.bf16.mxu1 %v640_v0 }
  0x1e   :  { %272 = vmatpush1.bf16.msra.mxu0 %v613_v13  ;;  %600 = vmatpush1.bf16.msra.mxu1 %v613_v13 }
  0x1f   :  { %285 = vmatprep.subr.bf16.mxu0 %v640_v0  ;;  %591 = vmatprep.subr.bf16.mxu1 %v640_v0 }
  0x22   :  { %286 = vmatpush2.bf16.msra.mxu0 %v255_v16  ;;  %601 = vmatpush2.bf16.msra.mxu1 %v255_v16 }
  0x23   :  { %287 = vmatprep.subr.bf16.mxu0 %v640_v0  ;;  %592 = vmatprep.subr.bf16.mxu1 %v640_v0 }
  0x26   :  { %288 = vmatpush2.bf16.msra.mxu0 %v615_v17  ;;  %602 = vmatpush2.bf16.msra.mxu1 %v615_v17 }
  0x29   :  { %290 = vmatmul.mubr.bf16.vlgmr.msra.gmra.mxu0 %v616_v18  ;;  %322 = vmatmul.mubr.bf16.vlgmr.msra.gmra.mxu1 %v622_v19 }
  0x2a   :  { %575 = vmatprep.mubr.msk.bf16.mxu0 %vm225_vm1, %v619_v20  ;;  %579 = vmatprep.mubr.msk.bf16.mxu1 %vm225_vm1, %v628_v21  ;;  %v50_v21 = vld [vmem:[#allocation2 + $0x28] sm:$0xff] }
  0x31   :  { %298 = vmatmul.mubr.bf16.gmra.mxu0 %v621_v22  ;;  %330 = vmatmul.mubr.bf16.gmra.mxu1 %v630_v23  ;;  %v58_v22 = vld [vmem:[#allocation2 + $0x68] sm:$0xff] }
  0x32   :  { %576 = vmatprep.mubr.msk.bf16.mxu0 %vm225_vm1, %v625_v24  ;;  %580 = vmatprep.mubr.msk.bf16.mxu1 %vm225_vm1, %v634_v25 }
  0x39   :  { %306 = vmatmul.mubr.bf16.gmra.mxu0 %v627_v26  ;;  %338 = vmatmul.mubr.bf16.gmra.mxu1 %v636_v27  ;;  %v51_v27 = vld [vmem:[#allocation2 + $0x30] sm:$0xff] }
  0x3a   :  { %577 = vmatprep.mubr.msk.bf16.mxu0 %vm225_vm1, %v631_v28  ;;  %581 = vmatprep.mubr.msk.bf16.mxu1 %vm225_vm1, %v637_v29 }
  0x41   :  { %314 = vmatmul.mubr.bf16.gmra.mxu0 %v633_v30  ;;  %346 = vmatmul.mubr.bf16.gmra.mxu1 %v639_v31  ;;  %v59_v30 = vld [vmem:[#allocation2 + $0x70] sm:$0xff] }
  0xe9   :  { %v291_v34 = vpop.f32.mrf.mxu0  ;;  %v323_v35 = vpop.f32.mrf.mxu1 }
  0xea   :  { %v354_v36 = vadd.f32 %v291_v34, %v45_v32  ;;  %v362_v37 = vadd.f32 %v323_v35, %v53_v33 }
  0xeb   :  { %v293_v38 = vpop.f32.mrf.mxu0  ;;  %v325_v40 = vpop.f32.mrf.mxu1 }
  0xec   :  { %371 = vst.msk [vmem:[#allocation2] sm:$0xff] %vm21_vm0, %v354_v36  ;;  %379 = vst.msk [vmem:[#allocation2 + $0x40] sm:$0xff] %vm21_vm0, %v362_v37 }
  0xed   :  { %v294_v42 = vpop.f32.mrf.mxu0  ;;  %v326_v43 = vpop.f32.mrf.mxu1 }
  0xee   :  { %v355_v44 = vadd.f32 %v294_v42, %v46_v39  ;;  %v363_v45 = vadd.f32 %v326_v43, %v54_v41  ;;  %v52_v41 = vld [vmem:[#allocation2 + $0x38] sm:$0xff] }
  0xef   :  { %v296_v46 = vpop.f32.mrf.mxu0  ;;  %v328_v48 = vpop.f32.mrf.mxu1  ;;  %v60_v43 = vld [vmem:[#allocation2 + $0x78] sm:$0xff] }
  0xf0   :  { %372 = vst.msk [vmem:[#allocation2 + $0x8] sm:$0xff] %vm21_vm0, %v355_v44  ;;  %380 = vst.msk [vmem:[#allocation2 + $0x48] sm:$0xff] %vm21_vm0, %v363_v45 }
  0xf1   :  { %v299_v51 = vpop.f32.mrf.mxu0  ;;  %v331_v52 = vpop.f32.mrf.mxu1 }
  0xf2   :  { %v356_v53 = vadd.f32 %v299_v51, %v47_v47  ;;  %v364_v54 = vadd.f32 %v331_v52, %v55_v49 }
  0xf3   :  { %v390_v55 = vld [vmem:[#allocation2] sm:$0xff]  ;;  %v301_v56 = vpop.f32.mrf.mxu0  ;;  %v333_v58 = vpop.f32.mrf.mxu1 }
  0xf4   :  { %v398_v57 = vld [vmem:[#allocation2 + $0x40] sm:$0xff]  ;;  %v822_v59 = vadd.f32 %v819_v50, %v390_v55  ;;  %373 = vst.msk [vmem:[#allocation2 + $0x10] sm:$0xff] %vm21_vm0, %v356_v53  ;;  %381 = vst.msk [vmem:[#allocation2 + $0x50] sm:$0xff] %vm21_vm0, %v364_v54 }
  0xf5   :  { %v826_v60 = vadd.f32 %v819_v50, %v398_v57  ;;  %v302_v63 = vpop.f32.mrf.mxu0  ;;  %v334_v0 = vpop.f32.mrf.mxu1 }
  0xf6   :  { %429 = vst.msk [vmem:[%s999_s3] sm:$0xff] %vm21_vm0, %v822_v59  ;;  %v357_v2 = vadd.f32 %v302_v63, %v48_v61  ;;  %v365_v5 = vadd.f32 %v334_v0, %v56_v62  ;;  %v483_v44 = vmul.f32 %v822_v59, %v822_v59  ;;  %v446_v49 = vsel %vm21_vm0, %v822_v59, 0.0 }
  0xf7   :  { %437 = vst.msk [vmem:[%s999_s3 + $0x40] sm:$0xff] %vm21_vm0, %v826_v60  ;;  %v391_v1 = vld [vmem:[#allocation2 + $0x8] sm:$0xff]  ;;  %v304_v3 = vpop.f32.mrf.mxu0  ;;  %v336_v6 = vpop.f32.mrf.mxu1 }
  0xf8   :  { %v399_v4 = vld [vmem:[#allocation2 + $0x48] sm:$0xff]  ;;  %v414_v7 = vadd.f32 %v819_v50, %v391_v1  ;;  %374 = vst.msk [vmem:[#allocation2 + $0x18] sm:$0xff] %vm21_vm0, %v357_v2  ;;  %382 = vst.msk [vmem:[#allocation2 + $0x58] sm:$0xff] %vm21_vm0, %v365_v5  ;;  %v499_v0 = vsel %vm21_vm0, %v483_v44, 0.0 }
  0xf9   :  { %v841_v8 = vadd.f32 %v819_v50, %v399_v4  ;;  %v307_v11 = vpop.f32.mrf.mxu0  ;;  %v339_v12 = vpop.f32.mrf.mxu1 }
  0xfa   :  { %430 = vst.msk [vmem:[%s999_s3 + $0x8] sm:$0xff] %vm21_vm0, %v414_v7  ;;  %v358_v14 = vadd.f32 %v307_v11, %v49_v9  ;;  %v366_v17 = vadd.f32 %v339_v12, %v57_v10  ;;  %v484_v33 = vmul.f32 %v414_v7, %v414_v7  ;;  %v447_v45 = vsel %vm21_vm0, %v414_v7, 0.0 }
  0xfb   :  { %438 = vst.msk [vmem:[%s999_s3 + $0x48] sm:$0xff] %vm21_vm0, %v841_v8  ;;  %v392_v13 = vld [vmem:[#allocation2 + $0x10] sm:$0xff]  ;;  %v309_v15 = vpop.f32.mrf.mxu0  ;;  %v341_v18 = vpop.f32.mrf.mxu1  ;;  %v448_v62 = vadd.f32 %v447_v45, %v446_v49 }
  0xfc   :  { %v400_v16 = vld [vmem:[#allocation2 + $0x50] sm:$0xff]  ;;  %v415_v19 = vadd.f32 %v819_v50, %v392_v13  ;;  %375 = vst.msk [vmem:[#allocation2 + $0x20] sm:$0xff] %vm21_vm0, %v358_v14  ;;  %383 = vst.msk [vmem:[#allocation2 + $0x60] sm:$0xff] %vm21_vm0, %v366_v17  ;;  %v500_v51 = vsel %vm21_vm0, %v484_v33, 0.0 }
  0xfd   :  { %v856_v20 = vadd.f32 %v819_v50, %v400_v16  ;;  %v310_v23 = vpop.f32.mrf.mxu0  ;;  %v342_v24 = vpop.f32.mrf.mxu1  ;;  %v501_v6 = vadd.f32 %v500_v51, %v499_v0 }
  0xfe   :  { %431 = vst.msk [vmem:[%s999_s3 + $0x10] sm:$0xff] %vm21_vm0, %v415_v19  ;;  %v359_v25 = vadd.f32 %v310_v23, %v50_v21  ;;  %v367_v28 = vadd.f32 %v342_v24, %v58_v22  ;;  %v485_v46 = vmul.f32 %v415_v19, %v415_v19  ;;  %v449_v56 = vsel %vm21_vm0, %v415_v19, 0.0 }
  0xff   :  { %439 = vst.msk [vmem:[%s999_s3 + $0x50] sm:$0xff] %vm21_vm0, %v856_v20  ;;  %v312_v26 = vpop.f32.mrf.mxu0  ;;  %v344_v29 = vpop.f32.mrf.mxu1  ;;  %v393_v31 = vld [vmem:[#allocation2 + $0x18] sm:$0xff]  ;;  %v450_v7 = vadd.f32 %v449_v56, %v448_v62  ;;  %v493_v49 = vmul.f32 %v856_v20, %v856_v20 }
 0x100   :  { %v401_v32 = vld [vmem:[#allocation2 + $0x58] sm:$0xff]  ;;  %v416_v34 = vadd.f32 %v819_v50, %v393_v31  ;;  %376 = vst.msk [vmem:[#allocation2 + $0x28] sm:$0xff] %vm21_vm0, %v359_v25  ;;  %384 = vst.msk [vmem:[#allocation2 + $0x68] sm:$0xff] %vm21_vm0, %v367_v28  ;;  %v502_v1 = vsel %vm21_vm0, %v485_v46, 0.0 }
 0x101   :  { %v872_v35 = vadd.f32 %v819_v50, %v401_v32  ;;  %v315_v36 = vpop.f32.mrf.mxu0  ;;  %v347_v37 = vpop.f32.mrf.mxu1  ;;  %v503_v13 = vadd.f32 %v502_v1, %v501_v6 }
 0x102   :  { %v360_v38 = vadd.f32 %v315_v36, %v51_v27  ;;  %v368_v39 = vadd.f32 %v347_v37, %v59_v30  ;;  %432 = vst.msk [vmem:[%s999_s3 + $0x18] sm:$0xff] %vm21_vm0, %v416_v34  ;;  %v486_v57 = vmul.f32 %v416_v34, %v416_v34  ;;  %v451_v2 = vsel %vm21_vm0, %v416_v34, 0.0 }
 0x103   :  { %440 = vst.msk [vmem:[%s999_s3 + $0x58] sm:$0xff] %vm21_vm0, %v872_v35  ;;  %v317_v40 = vpop.f32.mrf.mxu0  ;;  %v349_v42 = vpop.f32.mrf.mxu1  ;;  %v394_v47 = vld [vmem:[#allocation2 + $0x20] sm:$0xff]  ;;  %v452_v14 = vadd.f32 %v451_v2, %v450_v7 }
 0x104   :  { %377 = vst.msk [vmem:[#allocation2 + $0x30] sm:$0xff] %vm21_vm0, %v360_v38  ;;  %v402_v48 = vld [vmem:[#allocation2 + $0x60] sm:$0xff]  ;;  %385 = vst.msk [vmem:[#allocation2 + $0x70] sm:$0xff] %vm21_vm0, %v368_v39  ;;  %v417_v52 = vadd.f32 %v819_v50, %v394_v47  ;;  %v504_v11 = vsel %vm21_vm0, %v486_v57, 0.0  ;;  %v491_v38 = vmul.f32 %v826_v60, %v826_v60  ;;  %v461_v42 = vsel %vm21_vm0, %v826_v60, 0.0 }
 0x105   :  { %v894_v53 = vadd.f32 %v819_v50, %v402_v48  ;;  %v318_v54 = vpop.f32.mrf.mxu0  ;;  %v350_v55 = vpop.f32.mrf.mxu1  ;;  %v505_v23 = vadd.f32 %v504_v11, %v503_v13  ;;  %v463_v48 = vsel %vm21_vm0, %v841_v8, 0.0  ;;  %v465_v60 = vsel %vm21_vm0, %v856_v20, 0.0 }
 0x106   :  { %v361_v58 = vadd.f32 %v318_v54, %v52_v41  ;;  %v369_v61 = vadd.f32 %v350_v55, %v60_v43  ;;  %433 = vst.msk [vmem:[%s999_s3 + $0x20] sm:$0xff] %vm21_vm0, %v417_v52  ;;  %v487_v3 = vmul.f32 %v417_v52, %v417_v52  ;;  %v453_v12 = vsel %vm21_vm0, %v417_v52, 0.0 }
 0x107   :  { %441 = vst.msk [vmem:[%s999_s3 + $0x60] sm:$0xff] %vm21_vm0, %v894_v53  ;;  %v320_v59 = vpop.f32.mrf.mxu0  ;;  %v352_v63 = vpop.f32.mrf.mxu1  ;;  %v395_v4 = vld [vmem:[#allocation2 + $0x28] sm:$0xff]  ;;  %v454_v24 = vadd.f32 %v453_v12, %v452_v14  ;;  %v492_v43 = vmul.f32 %v841_v8, %v841_v8  ;;  %v514_v47 = vsel %vm21_vm0, %v491_v38, 0.0  ;;  %v494_v55 = vmul.f32 %v872_v35, %v872_v35 }
 0x108   :  { %378 = vst.msk [vmem:[#allocation2 + $0x38] sm:$0xff] %vm21_vm0, %v361_v58  ;;  %v403_v5 = vld [vmem:[#allocation2 + $0x68] sm:$0xff]  ;;  %386 = vst.msk [vmem:[#allocation2 + $0x78] sm:$0xff] %vm21_vm0, %v369_v61  ;;  %v418_v9 = vadd.f32 %v819_v50, %v395_v4  ;;  %v506_v18 = vsel %vm21_vm0, %v487_v3, 0.0  ;;  %v518_v58 = vsel %vm21_vm0, %v493_v49, 0.0  ;;  %v467_v8 = vsel %vm21_vm0, %v872_v35, 0.0 }
 0x109   :  { %v913_v10 = vadd.f32 %v819_v50, %v403_v5  ;;  %v507_v28 = vadd.f32 %v506_v18, %v505_v23  ;;  %v516_v54 = vsel %vm21_vm0, %v492_v43, 0.0  ;;  %v495_v61 = vmul.f32 %v894_v53, %v894_v53 }
 0x10a   :  { %434 = vst.msk [vmem:[%s999_s3 + $0x28] sm:$0xff] %vm21_vm0, %v418_v9  ;;  %v488_v15 = vmul.f32 %v418_v9, %v418_v9  ;;  %v455_v19 = vsel %vm21_vm0, %v418_v9, 0.0  ;;  %v520_v63 = vsel %vm21_vm0, %v494_v55, 0.0  ;;  %v469_v20 = vsel %vm21_vm0, %v894_v53, 0.0 }
 0x10b   :  { %v396_v16 = vld [vmem:[#allocation2 + $0x30] sm:$0xff]  ;;  %442 = vst.msk [vmem:[%s999_s3 + $0x68] sm:$0xff] %vm21_vm0, %v913_v10  ;;  %v456_v29 = vadd.f32 %v455_v19, %v454_v24  ;;  %v496_v0 = vmul.f32 %v913_v10, %v913_v10  ;;  %v522_v3 = vsel %vm21_vm0, %v495_v61, 0.0  ;;  %v471_v35 = vsel %vm21_vm0, %v913_v10, 0.0 }
 0x10c   :  { %v404_v17 = vld [vmem:[#allocation2 + $0x70] sm:$0xff]  ;;  %v419_v21 = vadd.f32 %v819_v50, %v396_v16  ;;  %v508_v25 = vsel %vm21_vm0, %v488_v15, 0.0 }
 0x10d   :  { %v427_v22 = vadd.f32 %v819_v50, %v404_v17  ;;  %v509_v36 = vadd.f32 %v508_v25, %v507_v28  ;;  %v524_v7 = vsel %vm21_vm0, %v496_v0, 0.0 }
 0x10e   :  { %435 = vst.msk [vmem:[%s999_s3 + $0x30] sm:$0xff] %vm21_vm0, %v419_v21  ;;  %v457_v26 = vsel %vm21_vm0, %v419_v21, 0.0  ;;  %v489_v27 = vmul.f32 %v419_v21, %v419_v21 }
 0x10f   :  { %443 = vst.msk [vmem:[%s999_s3 + $0x70] sm:$0xff] %vm21_vm0, %v427_v22  ;;  %v397_v30 = vld [vmem:[#allocation2 + $0x38] sm:$0xff]  ;;  %v458_v37 = vadd.f32 %v457_v26, %v456_v29  ;;  %v497_v4 = vmul.f32 %v427_v22, %v427_v22  ;;  %v473_v9 = vsel %vm21_vm0, %v427_v22, 0.0  ;;  %v445_v29 = vld [vmem:[%s997_s4] sm:$0x3] }
 0x110   :  { %v405_v31 = vld [vmem:[#allocation2 + $0x78] sm:$0xff]  ;;  %v510_v32 = vsel %vm21_vm0, %v489_v27, 0.0  ;;  %v420_v33 = vadd.f32 %v819_v50, %v397_v30 }
 0x111   :  { %v428_v34 = vadd.f32 %v819_v50, %v405_v31  ;;  %v511_v41 = vadd.f32 %v510_v32, %v509_v36  ;;  %v526_v13 = vsel %vm21_vm0, %v497_v4, 0.0 }
 0x112   :  { %436 = vst.msk [vmem:[%s999_s3 + $0x38] sm:$0xff] %vm21_vm0, %v420_v33  ;;  %v459_v39 = vsel %vm21_vm0, %v420_v33, 0.0  ;;  %v490_v40 = vmul.f32 %v420_v33, %v420_v33 }
 0x113   :  { %444 = vst.msk [vmem:[%s999_s3 + $0x78] sm:$0xff] %vm21_vm0, %v428_v34  ;;  %v460_v50 = vadd.f32 %v459_v39, %v458_v37  ;;  %v498_v11 = vmul.f32 %v428_v34, %v428_v34  ;;  %v475_v14 = vsel %vm21_vm0, %v428_v34, 0.0 }
 0x114   :  { %v512_v44 = vsel %vm21_vm0, %v490_v40, 0.0 }
 0x115   :  { %v462_v45 = vadd.f32 %v461_v42, %v460_v50  ;;  %v513_v46 = vadd.f32 %v512_v44, %v511_v41  ;;  %v528_v17 = vsel %vm21_vm0, %v498_v11, 0.0 }
 0x117   :  { %v464_v51 = vadd.f32 %v463_v48, %v462_v45  ;;  %v515_v52 = vadd.f32 %v514_v47, %v513_v46 }
 0x119   :  { %v517_v56 = vadd.f32 %v516_v54, %v515_v52  ;;  %v466_v57 = vadd.f32 %v465_v60, %v464_v51 }
 0x11b   :  { %v468_v62 = vadd.f32 %v467_v8, %v466_v57  ;;  %v519_v59 = vadd.f32 %v518_v58, %v517_v56 }
 0x11d   :  { %v470_v1 = vadd.f32 %v469_v20, %v468_v62  ;;  %v521_v2 = vadd.f32 %v520_v63, %v519_v59 }
 0x11f   :  { %v472_v5 = vadd.f32 %v471_v35, %v470_v1  ;;  %v523_v6 = vadd.f32 %v522_v3, %v521_v2 }
 0x121   :  { %v525_v12 = vadd.f32 %v524_v7, %v523_v6  ;;  %v474_v53 = vadd.f32 %v473_v9, %v472_v5 }
 0x123   :  { %v527_v15 = vadd.f32 %v526_v13, %v525_v12  ;;  %v476_v16 = vadd.f32 %v475_v14, %v474_v53 }
 0x125   :  { %v477_v18 = vrot.slane %v476_v16, 4  ;;  %v529_v10 = vadd.f32 %v528_v17, %v527_v15 }
 0x127   :  { %v478_v19 = vadd.f32 %v477_v18, %v476_v16  ;;  %v530_v21 = vrot.slane %v529_v10, 4 }
 0x129   :  { %v479_v23 = vrot.slane %v478_v19, 2  ;;  %v531_v24 = vadd.f32 %v530_v21, %v529_v10 }
 0x12b   :  { %v480_v25 = vadd.f32 %v479_v23, %v478_v19  ;;  %v532_v26 = vrot.slane %v531_v24, 2 }
 0x12d   :  { %v481_v22 = vrot.slane %v480_v25, 1  ;;  %v533_v27 = vadd.f32 %v532_v26, %v531_v24 }
 0x12f   :  { %v534_v28 = vrot.slane %v533_v27, 1  ;;  %v482_v30 = vadd.f32 %v481_v22, %v480_v25 }
 0x131   :  { %v535_v31 = vadd.f32 %v534_v28, %v533_v27 }
 0x133   :  { %v536_v32 = vsel %vm250_vm2, %v482_v30, %v535_v31 }
 0x134   :  { %v537_v33 = vadd.f32 %v536_v32, %v445_v29 }
 0x136   :  { %539 = vst.msk [vmem:[%s997_s4] sm:$0x3] %vm43_vm4, %v537_v33 }

// kernel: local_enhancer_forward.24
= control target key start
LH: loop header
LB: loop body
LE: loop exit
PB: predicated region body
PF: predicated region fallthrough
CT: control target
= control target key end

     0   :  { %vm92_vm0 = vcmask 64512   ;;  %s271_s0 = inlined_call_operand.vmem [shape: f32[128,8], index: 0, kind: input, shape index: {}]   ;;  %s272_s1 = inlined_call_operand.vmem [shape: f32[1,8], index: 1, kind: input, shape index: {}]   ;;  %s273_s2 = inlined_call_operand.vmem [shape: f32[1,8], index: 2, kind: input, shape index: {}]   ;;  %s274_s3 = inlined_call_operand.vmem [shape: f32[128,8], index: 3, kind: output, shape index: {}]  }
   0x1   :  { %v14_v0 = vld [vmem:[%s271_s0] sm:$0xff]  ;;  %v15_v4 = vld [vmem:[%s271_s0 + $0x8] sm:$0xff]  ;;  %v16_v5 = vld [vmem:[%s271_s0 + $0x10] sm:$0xff] }
   0x2   :  { %v113_v1 = vld [vmem:[%s272_s1] ss:$0 sm:$0xff]  ;;  %v17_v6 = vld [vmem:[%s271_s0 + $0x18] sm:$0xff]  ;;  %v19_v11 = vld [vmem:[%s271_s0 + $0x28] sm:$0xff] }
   0x3   :  { %v144_v2 = vld [vmem:[%s273_s2] ss:$0 sm:$0xff]  ;;  %v37_v3 = vmul.f32 %v113_v1, %v14_v0  ;;  %v38_v7 = vmul.f32 %v113_v1, %v15_v4  ;;  %v39_v8 = vmul.f32 %v113_v1, %v16_v5  ;;  %v40_v9 = vmul.f32 %v113_v1, %v17_v6  ;;  %v20_v12 = vld [vmem:[%s271_s0 + $0x30] sm:$0xff]  ;;  %v21_v17 = vld [vmem:[%s271_s0 + $0x38] sm:$0xff] }
   0x4   :  { %v18_v10 = vld [vmem:[%s271_s0 + $0x20] sm:$0xff]  ;;  %v42_v15 = vmul.f32 %v113_v1, %v19_v11  ;;  %v43_v16 = vmul.f32 %v113_v1, %v20_v12  ;;  %v44_v21 = vmul.f32 %v113_v1, %v21_v17  ;;  %v23_v27 = vld [vmem:[%s271_s0 + $0x48] sm:$0xff]  ;;  %v24_v28 = vld [vmem:[%s271_s0 + $0x50] sm:$0xff] }
   0x5   :  { %v60_v13 = vadd.f32 %v144_v2, %v37_v3  ;;  %v41_v14 = vmul.f32 %v113_v1, %v18_v10  ;;  %v61_v18 = vadd.f32 %v144_v2, %v38_v7  ;;  %v62_v19 = vadd.f32 %v144_v2, %v39_v8  ;;  %v22_v22 = vld [vmem:[%s271_s0 + $0x40] sm:$0xff]  ;;  %v25_v29 = vld [vmem:[%s271_s0 + $0x58] sm:$0xff]  ;;  %v27_v35 = vld [vmem:[%s271_s0 + $0x68] sm:$0xff] }
   0x6   :  { %v63_v20 = vadd.f32 %v144_v2, %v40_v9  ;;  %v65_v25 = vadd.f32 %v144_v2, %v42_v15  ;;  %v66_v26 = vadd.f32 %v144_v2, %v43_v16  ;;  %v67_v33 = vadd.f32 %v144_v2, %v44_v21  ;;  %v26_v34 = vld [vmem:[%s271_s0 + $0x60] sm:$0xff]  ;;  %v28_v36 = vld [vmem:[%s271_s0 + $0x70] sm:$0xff]  ;;  %v29_v41 = vld [vmem:[%s271_s0 + $0x78] sm:$0xff] }
   0x7   :  { %v76_v23 = vmax.f32 %v60_v13, 0.0  ;;  %v64_v24 = vadd.f32 %v144_v2, %v41_v14  ;;  %v77_v30 = vmax.f32 %v61_v18, 0.0  ;;  %v78_v31 = vmax.f32 %v62_v19, 0.0 }
   0x8   :  { %v79_v32 = vmax.f32 %v63_v20, 0.0  ;;  %v81_v38 = vmax.f32 %v65_v25, 0.0  ;;  %v82_v39 = vmax.f32 %v66_v26, 0.0  ;;  %v45_v40 = vmul.f32 %v113_v1, %v22_v22 }
   0x9   :  { %93 = vst.msk [vmem:[%s274_s3] sm:$0xff] %vm92_vm0, %v76_v23  ;;  %v80_v37 = vmax.f32 %v64_v24, 0.0  ;;  %94 = vst.msk [vmem:[%s274_s3 + $0x8] sm:$0xff] %vm92_vm0, %v77_v30  ;;  %v83_v42 = vmax.f32 %v67_v33, 0.0  ;;  %v46_v43 = vmul.f32 %v113_v1, %v23_v27  ;;  %v47_v44 = vmul.f32 %v113_v1, %v24_v28 }
   0xa   :  { %95 = vst.msk [vmem:[%s274_s3 + $0x10] sm:$0xff] %vm92_vm0, %v78_v31  ;;  %96 = vst.msk [vmem:[%s274_s3 + $0x18] sm:$0xff] %vm92_vm0, %v79_v32  ;;  %v48_v45 = vmul.f32 %v113_v1, %v25_v29  ;;  %v68_v46 = vadd.f32 %v144_v2, %v45_v40  ;;  %v49_v47 = vmul.f32 %v113_v1, %v26_v34 }
   0xb   :  { %97 = vst.msk [vmem:[%s274_s3 + $0x20] sm:$0xff] %vm92_vm0, %v80_v37  ;;  %98 = vst.msk [vmem:[%s274_s3 + $0x28] sm:$0xff] %vm92_vm0, %v81_v38  ;;  %v50_v48 = vmul.f32 %v113_v1, %v27_v35  ;;  %v51_v49 = vmul.f32 %v113_v1, %v28_v36  ;;  %v69_v50 = vadd.f32 %v144_v2, %v46_v43 }
   0xc   :  { %99 = vst.msk [vmem:[%s274_s3 + $0x30] sm:$0xff] %vm92_vm0, %v82_v39  ;;  %100 = vst.msk [vmem:[%s274_s3 + $0x38] sm:$0xff] %vm92_vm0, %v83_v42  ;;  %v70_v51 = vadd.f32 %v144_v2, %v47_v44  ;;  %v71_v52 = vadd.f32 %v144_v2, %v48_v45  ;;  %v52_v53 = vmul.f32 %v113_v1, %v29_v41  ;;  %v84_v54 = vmax.f32 %v68_v46, 0.0 }
   0xd   :  { %v72_v55 = vadd.f32 %v144_v2, %v49_v47  ;;  %v73_v56 = vadd.f32 %v144_v2, %v50_v48  ;;  %v74_v57 = vadd.f32 %v144_v2, %v51_v49  ;;  %v85_v58 = vmax.f32 %v69_v50, 0.0 }
   0xe   :  { %v86_v59 = vmax.f32 %v70_v51, 0.0  ;;  %v87_v60 = vmax.f32 %v71_v52, 0.0  ;;  %v75_v61 = vadd.f32 %v144_v2, %v52_v53  ;;  %101 = vst.msk [vmem:[%s274_s3 + $0x40] sm:$0xff] %vm92_vm0, %v84_v54 }
   0xf   :  { %v88_v62 = vmax.f32 %v72_v55, 0.0  ;;  %v89_v63 = vmax.f32 %v73_v56, 0.0  ;;  %v90_v0 = vmax.f32 %v74_v57, 0.0  ;;  %102 = vst.msk [vmem:[%s274_s3 + $0x48] sm:$0xff] %vm92_vm0, %v85_v58 }
  0x10   :  { %103 = vst.msk [vmem:[%s274_s3 + $0x50] sm:$0xff] %vm92_vm0, %v86_v59  ;;  %104 = vst.msk [vmem:[%s274_s3 + $0x58] sm:$0xff] %vm92_vm0, %v87_v60  ;;  %v91_v1 = vmax.f32 %v75_v61, 0.0 }
  0x11   :  { %105 = vst.msk [vmem:[%s274_s3 + $0x60] sm:$0xff] %vm92_vm0, %v88_v62  ;;  %106 = vst.msk [vmem:[%s274_s3 + $0x68] sm:$0xff] %vm92_vm0, %v89_v63 }
  0x12   :  { %107 = vst.msk [vmem:[%s274_s3 + $0x70] sm:$0xff] %vm92_vm0, %v90_v0  ;;  %108 = vst.msk [vmem:[%s274_s3 + $0x78] sm:$0xff] %vm92_vm0, %v91_v1 }

// kernel: local_enhancer_forward.26
= control target key start
LH: loop header
LB: loop body
LE: loop exit
PB: predicated region body
PF: predicated region fallthrough
CT: control target
= control target key end

     0   :  { %vm44_vm0 = vcmask 130048   ;;  %s105_s0 = inlined_call_operand.vmem [shape: f32[32,16], index: 0, kind: input, shape index: {}]   ;;  %s106_s1 = inlined_call_operand.vmem [shape: f32[1,16], index: 1, kind: input, shape index: {}]   ;;  %s107_s2 = inlined_call_operand.vmem [shape: f32[1,16], index: 2, kind: input, shape index: {}]   ;;  %s108_s3 = inlined_call_operand.vmem [shape: f32[32,16], index: 3, kind: output, shape index: {}]  }
   0x1   :  { %v14_v0 = vld [vmem:[%s105_s0] sm:$0xff]  ;;  %v15_v4 = vld [vmem:[%s105_s0 + $0x8] sm:$0xff]  ;;  %v16_v5 = vld [vmem:[%s105_s0 + $0x10] sm:$0xff] }
   0x2   :  { %v53_v1 = vld [vmem:[%s106_s1] ss:$0 sm:$0xff]  ;;  %v17_v6 = vld [vmem:[%s105_s0 + $0x18] sm:$0xff] }
   0x3   :  { %v54_v2 = vld [vmem:[%s107_s2] ss:$0 sm:$0xff]  ;;  %v25_v3 = vmul.f32 %v53_v1, %v14_v0  ;;  %v26_v7 = vmul.f32 %v53_v1, %v15_v4  ;;  %v27_v8 = vmul.f32 %v53_v1, %v16_v5  ;;  %v28_v9 = vmul.f32 %v53_v1, %v17_v6 }
   0x5   :  { %v36_v10 = vadd.f32 %v54_v2, %v25_v3  ;;  %v37_v11 = vadd.f32 %v54_v2, %v26_v7  ;;  %v38_v12 = vadd.f32 %v54_v2, %v27_v8  ;;  %v39_v13 = vadd.f32 %v54_v2, %v28_v9 }
   0x7   :  { %v40_v14 = vmax.f32 %v36_v10, 0.0  ;;  %v41_v15 = vmax.f32 %v37_v11, 0.0  ;;  %v42_v16 = vmax.f32 %v38_v12, 0.0  ;;  %v43_v17 = vmax.f32 %v39_v13, 0.0 }
   0x9   :  { %45 = vst.msk [vmem:[%s108_s3] sm:$0xff] %vm44_vm0, %v40_v14  ;;  %46 = vst.msk [vmem:[%s108_s3 + $0x8] sm:$0xff] %vm44_vm0, %v41_v15 }
   0xa   :  { %47 = vst.msk [vmem:[%s108_s3 + $0x10] sm:$0xff] %vm44_vm0, %v42_v16  ;;  %48 = vst.msk [vmem:[%s108_s3 + $0x18] sm:$0xff] %vm44_vm0, %v43_v17 }

// kernel: local_enhancer_forward.25
= control target key start
LH: loop header
LB: loop body
LE: loop exit
PB: predicated region body
PF: predicated region fallthrough
CT: control target
= control target key end

     0   :  { %vm94_vm0 = vcmask 1043456   ;;  %vm21_vm1 = vcmask 130048   ;;  %v262_v1 = vmov 0.0   ;;  %vm31_vm2 = vcmask 123904   ;;  %s355_s1 = inlined_call_operand.vmem [shape: bf16[72,16], index: 1, kind: input, shape index: {}]   ;;  %s356_s4 = inlined_call_operand.vmem [shape: f32[2,16], index: 4, kind: output, shape index: {1}]   ;;  %s357_s0 = inlined_call_operand.vmem [shape: bf16[32,72], index: 0, kind: input, shape index: {}]   ;;  %s358_s2 = inlined_call_operand.vmem [shape: f32[1,16], index: 2, kind: input, shape index: {}]   ;;  %s359_s3 = inlined_call_operand.vmem [shape: f32[32,16], index: 3, kind: output, shape index: {0}]  }
   0x1   :  { %v255_v0 = vld [vmem:[%s355_s1 + $0x20] ss:$0 sps:$4 sm:$0xff]   ;;  %24 = vst.msk [vmem:[#allocation2 + $0x10] sm:$0xff] %vm21_vm1, %v262_v1  ;;  %22 = vst.msk [vmem:[#allocation2] sm:$0xff] %vm21_vm1, %v262_v1  ;;  %v256_v2 = vld [vmem:[%s355_s1 + $0x18] sm:$0xff]   ;;  %vm87_vm3 = vcmask 588800  }
   0x2   :  { %23 = vst.msk [vmem:[#allocation2 + $0x8] sm:$0xff] %vm21_vm1, %v262_v1  ;;  %25 = vst.msk [vmem:[#allocation2 + $0x18] sm:$0xff] %vm21_vm1, %v262_v1  ;;  %253 = vmatprep.subr.msk.bf16.mxu0 %vm94_vm0, %v255_v0  ;;  %v96_v3 = vsel %vm94_vm0, %v255_v0, 0  ;;  %v257_v4 = vld [vmem:[%s355_s1 + $0x10] sm:$0xff]   ;;  %v260_v5 = vld [vmem:[%s357_s0] sm:$0xff]   ;;  %vm209_vm4 = vcmask 1040384  }
   0x3   :  { %32 = vst.msk [vmem:[%s356_s4] sm:$0x3] %vm31_vm2, %v262_v1  ;;  %240 = vmatpush3.bf16.msra.mxu0 %v96_v3  ;;  %249 = vmatprep.mubr.msk.bf16.mxu0 %vm87_vm3, %v260_v5  ;;  %v258_v6 = vld [vmem:[%s355_s1 + $0x8] sm:$0xff]   ;;  %v259_v7 = vld [vmem:[%s355_s1] sm:$0xff]  }
   0x4   :  { %241 = vmatprep.subr.bf16.mxu0 %v256_v2  ;;  %v261_v8 = vld [vmem:[%s357_s0 + $0x8] sm:$0xff]   ;;  %v231_v21 = vld [vmem:[%s358_s2] ss:$0 sm:$0xff] }
   0x7   :  { %242 = vmatpush3.bf16.msra.mxu0 %v256_v2 }
   0x8   :  { %243 = vmatprep.subr.bf16.mxu0 %v257_v4  ;;  %v35_v9 = vld [vmem:[#allocation2 + $0x10] sm:$0xff]  ;;  %v33_v11 = vld [vmem:[#allocation2] sm:$0xff] }
   0x9   :  { %v36_v14 = vld [vmem:[#allocation2 + $0x18] sm:$0xff]  ;;  %v34_v17 = vld [vmem:[#allocation2 + $0x8] sm:$0xff] }
   0xa   :  { %v178_v58 = vld [vmem:[%s356_s4] sm:$0x3] }
   0xb   :  { %244 = vmatpush3.bf16.msra.mxu0 %v257_v4 }
   0xc   :  { %245 = vmatprep.subr.bf16.mxu0 %v258_v6 }
   0xf   :  { %246 = vmatpush3.bf16.msra.mxu0 %v258_v6 }
  0x10   :  { %247 = vmatprep.subr.bf16.mxu0 %v259_v7 }
  0x13   :  { %248 = vmatpush3.bf16.msra.mxu0 %v259_v7 }
  0x16   :  { %250 = vmatmul.mubr.msk.bf16.vlgmr.msra.gmra.mxu0 %vm87_vm3, %v261_v8 }
  0xd6   :  { %v251_v10 = vpop.f32.mrf.mxu0 }
  0xd7   :  { %v149_v12 = vadd.f32 %v251_v10, %v35_v9 }
  0xd8   :  { %v132_v13 = vpop.f32.mrf.mxu0 }
  0xd9   :  { %154 = vst.msk [vmem:[#allocation2 + $0x10] sm:$0xff] %vm21_vm1, %v149_v12  ;;  %v147_v15 = vadd.f32 %v132_v13, %v33_v11 }
  0xda   :  { %v252_v16 = vpop.f32.mrf.mxu0 }
  0xdb   :  { %152 = vst.msk [vmem:[#allocation2] sm:$0xff] %vm21_vm1, %v147_v15  ;;  %v150_v18 = vadd.f32 %v252_v16, %v36_v14 }
  0xdc   :  { %v135_v19 = vpop.f32.mrf.mxu0 }
  0xdd   :  { %155 = vst.msk [vmem:[#allocation2 + $0x18] sm:$0xff] %vm21_vm1, %v150_v18  ;;  %v148_v20 = vadd.f32 %v135_v19, %v34_v17 }
  0xdf   :  { %153 = vst.msk [vmem:[#allocation2 + $0x8] sm:$0xff] %vm21_vm1, %v148_v20 }
  0xe0   :  { %v161_v22 = vld [vmem:[#allocation2 + $0x10] sm:$0xff] }
  0xe1   :  { %v172_v23 = vadd.f32 %v231_v21, %v161_v22 }
  0xe2   :  { %v159_v24 = vld [vmem:[#allocation2] sm:$0xff] }
  0xe3   :  { %176 = vst.msk [vmem:[%s359_s3 + $0x10] sm:$0xff] %vm21_vm1, %v172_v23  ;;  %v170_v25 = vadd.f32 %v231_v21, %v159_v24  ;;  %v194_v31 = vmul.f32 %v172_v23, %v172_v23  ;;  %v182_v36 = vsel %vm21_vm1, %v172_v23, 0.0 }
  0xe4   :  { %v162_v26 = vld [vmem:[#allocation2 + $0x18] sm:$0xff] }
  0xe5   :  { %174 = vst.msk [vmem:[%s359_s3] sm:$0xff] %vm21_vm1, %v170_v25  ;;  %v173_v27 = vadd.f32 %v231_v21, %v162_v26  ;;  %v192_v29 = vmul.f32 %v170_v25, %v170_v25  ;;  %v179_v32 = vsel %vm21_vm1, %v170_v25, 0.0  ;;  %v199_v42 = vsel %vm21_vm1, %v194_v31, 0.0 }
  0xe6   :  { %v160_v28 = vld [vmem:[#allocation2 + $0x8] sm:$0xff] }
  0xe7   :  { %177 = vst.msk [vmem:[%s359_s3 + $0x18] sm:$0xff] %vm21_vm1, %v173_v27  ;;  %v171_v30 = vadd.f32 %v231_v21, %v160_v28  ;;  %v196_v37 = vsel %vm21_vm1, %v192_v29, 0.0  ;;  %v195_v38 = vmul.f32 %v173_v27, %v173_v27  ;;  %v184_v43 = vsel %vm21_vm1, %v173_v27, 0.0 }
  0xe9   :  { %175 = vst.msk [vmem:[%s359_s3 + $0x8] sm:$0xff] %vm21_vm1, %v171_v30  ;;  %v180_v33 = vsel %vm21_vm1, %v171_v30, 0.0  ;;  %v193_v34 = vmul.f32 %v171_v30, %v171_v30  ;;  %v201_v46 = vsel %vm21_vm1, %v195_v38, 0.0 }
  0xea   :  { %v181_v35 = vadd.f32 %v180_v33, %v179_v32 }
  0xeb   :  { %v197_v39 = vsel %vm21_vm1, %v193_v34, 0.0 }
  0xec   :  { %v183_v40 = vadd.f32 %v182_v36, %v181_v35  ;;  %v198_v41 = vadd.f32 %v197_v39, %v196_v37 }
  0xee   :  { %v185_v44 = vadd.f32 %v184_v43, %v183_v40  ;;  %v200_v45 = vadd.f32 %v199_v42, %v198_v41 }
  0xf0   :  { %v186_v47 = vrot.slane %v185_v44, 4  ;;  %v202_v48 = vadd.f32 %v201_v46, %v200_v45 }
  0xf2   :  { %v187_v49 = vadd.f32 %v186_v47, %v185_v44  ;;  %v203_v50 = vrot.slane %v202_v48, 4 }
  0xf4   :  { %v188_v51 = vrot.slane %v187_v49, 2  ;;  %v204_v52 = vadd.f32 %v203_v50, %v202_v48 }
  0xf6   :  { %v189_v53 = vadd.f32 %v188_v51, %v187_v49  ;;  %v205_v54 = vrot.slane %v204_v52, 2 }
  0xf8   :  { %v190_v55 = vrot.slane %v189_v53, 1  ;;  %v206_v56 = vadd.f32 %v205_v54, %v204_v52 }
  0xfa   :  { %v207_v57 = vrot.slane %v206_v56, 1  ;;  %v191_v59 = vadd.f32 %v190_v55, %v189_v53 }
  0xfc   :  { %v208_v60 = vadd.f32 %v207_v57, %v206_v56 }
  0xfe   :  { %v210_v61 = vsel %vm209_vm4, %v191_v59, %v208_v60 }
  0xff   :  { %v211_v62 = vadd.f32 %v210_v61, %v178_v58 }
 0x101   :  { %213 = vst.msk [vmem:[%s356_s4] sm:$0x3] %vm31_vm2, %v211_v62 }

// kernel: local_enhancer_forward.27
= control target key start
LH: loop header
LB: loop body
LE: loop exit
PB: predicated region body
PF: predicated region fallthrough
CT: control target
= control target key end

     0   :  { %vm21_vm0 = vcmask 130048   ;;  %vm31_vm1 = vcmask 123904   ;;  %v312_v0 = vmov 0   ;;  %v313_v2 = vmov 0.0   ;;  %s426_s1 = inlined_call_operand.vmem [shape: bf16[144,16], index: 1, kind: input, shape index: {}]   ;;  %s427_s4 = inlined_call_operand.vmem [shape: f32[2,16], index: 4, kind: output, shape index: {1}]   ;;  %s428_s0 = inlined_call_operand.vmem [shape: bf16[32,144], index: 0, kind: input, shape index: {}]   ;;  %s429_s2 = inlined_call_operand.vmem [shape: f32[1,16], index: 2, kind: input, shape index: {}]   ;;  %s430_s3 = inlined_call_operand.vmem [shape: f32[32,16], index: 3, kind: output, shape index: {0}]  }
   0x1   :  { %138 = vmatprep.subr.bf16.mxu0 %v312_v0  ;;  %277 = vmatprep.subr.bf16.mxu1 %v312_v0  ;;  %v297_v1 = vld [vmem:[%s426_s1 + $0x38] sm:$0xff]   ;;  %22 = vst.msk [vmem:[#allocation2] sm:$0xff] %vm21_vm0, %v313_v2  ;;  %23 = vst.msk [vmem:[#allocation2 + $0x8] sm:$0xff] %vm21_vm0, %v313_v2  ;;  %v298_v3 = vld [vmem:[%s426_s1 + $0x30] sm:$0xff]   ;;  %vm248_vm2 = vcmask 1040384  }
   0x2   :  { %32 = vst.msk [vmem:[%s427_s4] sm:$0x3] %vm31_vm1, %v313_v2  ;;  %139 = vmatpush1.bf16.msra.mxu0 %v297_v1  ;;  %286 = vmatpush1.bf16.msra.mxu1 %v297_v1  ;;  %v299_v4 = vld [vmem:[%s426_s1 + $0x28] sm:$0xff]   ;;  %v300_v5 = vld [vmem:[%s426_s1 + $0x20] sm:$0xff]   ;;  %v311_v7 = vld [vmem:[%s428_s0 + $0x14] ss:$8 sps:$4 sm:$0xff]  }
   0x3   :  { %24 = vst.msk [vmem:[#allocation2 + $0x10] sm:$0xff] %vm21_vm0, %v313_v2  ;;  %25 = vst.msk [vmem:[#allocation2 + $0x18] sm:$0xff] %vm21_vm0, %v313_v2  ;;  %140 = vmatprep.subr.bf16.mxu0 %v312_v0  ;;  %278 = vmatprep.subr.bf16.mxu1 %v312_v0  ;;  %v308_v6 = vld [vmem:[%s428_s0 + $0x4] ss:$8 sps:$4 sm:$0xff]   ;;  %v301_v8 = vld [vmem:[%s426_s1 + $0x18] sm:$0xff]  }
   0x4   :  { %274 = vmatprep.mubr.msk.bf16.mxu0 %vm21_vm0, %v308_v6  ;;  %275 = vmatprep.mubr.msk.bf16.mxu1 %vm21_vm0, %v311_v7  ;;  %v302_v9 = vld [vmem:[%s426_s1 + $0x10] sm:$0xff]   ;;  %v303_v10 = vld [vmem:[%s426_s1 + $0x8] sm:$0xff]   ;;  %v304_v11 = vld [vmem:[%s426_s1] sm:$0xff]  }
   0x5   :  { %v305_v12 = vld [vmem:[%s426_s1 + $0x40] sm:$0xff]   ;;  %v309_v14 = vld [vmem:[%s428_s0 + $0x10] ss:$8 sps:$4 sm:$0xff]  }
   0x6   :  { %141 = vmatpush1.bf16.msra.mxu0 %v298_v3  ;;  %287 = vmatpush1.bf16.msra.mxu1 %v298_v3  ;;  %v306_v13 = vld [vmem:[%s428_s0] ss:$8 sps:$4 sm:$0xff]  }
   0x7   :  { %142 = vmatprep.subr.bf16.mxu0 %v312_v0  ;;  %279 = vmatprep.subr.bf16.mxu1 %v312_v0  ;;  %v276_v31 = vld [vmem:[%s429_s2] ss:$0 sm:$0xff] }
   0x8   :  { %v33_v15 = vld [vmem:[#allocation2] sm:$0xff]  ;;  %v34_v23 = vld [vmem:[#allocation2 + $0x8] sm:$0xff] }
   0xa   :  { %143 = vmatpush1.bf16.msra.mxu0 %v299_v4  ;;  %288 = vmatpush1.bf16.msra.mxu1 %v299_v4  ;;  %v35_v16 = vld [vmem:[#allocation2 + $0x10] sm:$0xff]  ;;  %v36_v24 = vld [vmem:[#allocation2 + $0x18] sm:$0xff]  ;;  %v217_v4 = vld [vmem:[%s427_s4] sm:$0x3] }
   0xb   :  { %144 = vmatprep.subr.bf16.mxu0 %v312_v0  ;;  %280 = vmatprep.subr.bf16.mxu1 %v312_v0 }
   0xe   :  { %145 = vmatpush1.bf16.msra.mxu0 %v300_v5  ;;  %289 = vmatpush1.bf16.msra.mxu1 %v300_v5 }
   0xf   :  { %146 = vmatprep.subr.bf16.mxu0 %v312_v0  ;;  %281 = vmatprep.subr.bf16.mxu1 %v312_v0 }
  0x12   :  { %147 = vmatpush1.bf16.msra.mxu0 %v301_v8  ;;  %290 = vmatpush1.bf16.msra.mxu1 %v301_v8 }
  0x13   :  { %148 = vmatprep.subr.bf16.mxu0 %v312_v0  ;;  %282 = vmatprep.subr.bf16.mxu1 %v312_v0 }
  0x16   :  { %149 = vmatpush1.bf16.msra.mxu0 %v302_v9  ;;  %291 = vmatpush1.bf16.msra.mxu1 %v302_v9 }
  0x17   :  { %150 = vmatprep.subr.bf16.mxu0 %v312_v0  ;;  %283 = vmatprep.subr.bf16.mxu1 %v312_v0 }
  0x1a   :  { %151 = vmatpush1.bf16.msra.mxu0 %v303_v10  ;;  %292 = vmatpush1.bf16.msra.mxu1 %v303_v10 }
  0x1b   :  { %152 = vmatprep.subr.bf16.mxu0 %v312_v0  ;;  %284 = vmatprep.subr.bf16.mxu1 %v312_v0 }
  0x1e   :  { %153 = vmatpush1.bf16.msra.mxu0 %v304_v11  ;;  %293 = vmatpush1.bf16.msra.mxu1 %v304_v11 }
  0x1f   :  { %168 = vmatprep.subr.bf16.mxu0 %v312_v0  ;;  %285 = vmatprep.subr.bf16.mxu1 %v312_v0 }
  0x22   :  { %169 = vmatpush2.bf16.msra.mxu0 %v305_v12  ;;  %294 = vmatpush2.bf16.msra.mxu1 %v305_v12 }
  0x25   :  { %171 = vmatmul.mubr.bf16.vlgmr.msra.gmra.mxu0 %v306_v13  ;;  %179 = vmatmul.mubr.bf16.vlgmr.msra.gmra.mxu1 %v309_v14 }
  0xe5   :  { %v172_v17 = vpop.f32.mrf.mxu0  ;;  %v180_v18 = vpop.f32.mrf.mxu1 }
  0xe6   :  { %v187_v19 = vadd.f32 %v172_v17, %v33_v15  ;;  %v189_v20 = vadd.f32 %v180_v18, %v35_v16 }
  0xe7   :  { %v174_v21 = vpop.f32.mrf.mxu0  ;;  %v182_v22 = vpop.f32.mrf.mxu1 }
  0xe8   :  { %191 = vst.msk [vmem:[#allocation2] sm:$0xff] %vm21_vm0, %v187_v19  ;;  %193 = vst.msk [vmem:[#allocation2 + $0x10] sm:$0xff] %vm21_vm0, %v189_v20 }
  0xe9   :  { %v175_v25 = vpop.f32.mrf.mxu0  ;;  %v183_v26 = vpop.f32.mrf.mxu1 }
  0xea   :  { %v188_v27 = vadd.f32 %v175_v25, %v34_v23  ;;  %v190_v28 = vadd.f32 %v183_v26, %v36_v24 }
  0xeb   :  { %v177_v29 = vpop.f32.mrf.mxu0  ;;  %v185_v30 = vpop.f32.mrf.mxu1 }
  0xec   :  { %192 = vst.msk [vmem:[#allocation2 + $0x8] sm:$0xff] %vm21_vm0, %v188_v27  ;;  %194 = vst.msk [vmem:[#allocation2 + $0x18] sm:$0xff] %vm21_vm0, %v190_v28 }
  0xef   :  { %v198_v32 = vld [vmem:[#allocation2] sm:$0xff]  ;;  %v200_v33 = vld [vmem:[#allocation2 + $0x10] sm:$0xff] }
  0xf0   :  { %v209_v34 = vadd.f32 %v276_v31, %v198_v32  ;;  %v211_v35 = vadd.f32 %v276_v31, %v200_v33 }
  0xf2   :  { %213 = vst.msk [vmem:[%s430_s3] sm:$0xff] %vm21_vm0, %v209_v34  ;;  %215 = vst.msk [vmem:[%s430_s3 + $0x10] sm:$0xff] %vm21_vm0, %v211_v35  ;;  %v231_v38 = vmul.f32 %v209_v34, %v209_v34  ;;  %v218_v41 = vsel %vm21_vm0, %v209_v34, 0.0  ;;  %v233_v42 = vmul.f32 %v211_v35, %v211_v35  ;;  %v221_v47 = vsel %vm21_vm0, %v211_v35, 0.0 }
  0xf3   :  { %v199_v36 = vld [vmem:[#allocation2 + $0x8] sm:$0xff]  ;;  %v201_v37 = vld [vmem:[#allocation2 + $0x18] sm:$0xff] }
  0xf4   :  { %v210_v39 = vadd.f32 %v276_v31, %v199_v36  ;;  %v212_v40 = vadd.f32 %v276_v31, %v201_v37  ;;  %v235_v46 = vsel %vm21_vm0, %v231_v38, 0.0  ;;  %v238_v52 = vsel %vm21_vm0, %v233_v42, 0.0 }
  0xf6   :  { %214 = vst.msk [vmem:[%s430_s3 + $0x8] sm:$0xff] %vm21_vm0, %v210_v39  ;;  %v219_v43 = vsel %vm21_vm0, %v210_v39, 0.0  ;;  %v232_v44 = vmul.f32 %v210_v39, %v210_v39  ;;  %216 = vst.msk [vmem:[%s430_s3 + $0x18] sm:$0xff] %vm21_vm0, %v212_v40  ;;  %v234_v49 = vmul.f32 %v212_v40, %v212_v40  ;;  %v223_v53 = vsel %vm21_vm0, %v212_v40, 0.0 }
  0xf7   :  { %v220_v45 = vadd.f32 %v219_v43, %v218_v41 }
  0xf8   :  { %v236_v48 = vsel %vm21_vm0, %v232_v44, 0.0  ;;  %v240_v56 = vsel %vm21_vm0, %v234_v49, 0.0 }
  0xf9   :  { %v237_v50 = vadd.f32 %v236_v48, %v235_v46  ;;  %v222_v51 = vadd.f32 %v221_v47, %v220_v45 }
  0xfb   :  { %v224_v54 = vadd.f32 %v223_v53, %v222_v51  ;;  %v239_v55 = vadd.f32 %v238_v52, %v237_v50 }
  0xfd   :  { %v225_v57 = vrot.slane %v224_v54, 4  ;;  %v241_v58 = vadd.f32 %v240_v56, %v239_v55 }
  0xff   :  { %v226_v59 = vadd.f32 %v225_v57, %v224_v54  ;;  %v242_v60 = vrot.slane %v241_v58, 4 }
 0x101   :  { %v227_v61 = vrot.slane %v226_v59, 2  ;;  %v243_v62 = vadd.f32 %v242_v60, %v241_v58 }
 0x103   :  { %v228_v63 = vadd.f32 %v227_v61, %v226_v59  ;;  %v244_v0 = vrot.slane %v243_v62, 2 }
 0x105   :  { %v229_v1 = vrot.slane %v228_v63, 1  ;;  %v245_v2 = vadd.f32 %v244_v0, %v243_v62 }
 0x107   :  { %v246_v3 = vrot.slane %v245_v2, 1  ;;  %v230_v5 = vadd.f32 %v229_v1, %v228_v63 }
 0x109   :  { %v247_v6 = vadd.f32 %v246_v3, %v245_v2 }
 0x10b   :  { %v249_v7 = vsel %vm248_vm2, %v230_v5, %v247_v6 }
 0x10c   :  { %v250_v8 = vadd.f32 %v249_v7, %v217_v4 }
 0x10e   :  { %252 = vst.msk [vmem:[%s427_s4] sm:$0x3] %vm31_vm1, %v250_v8 }

// kernel: local_enhancer_forward.30
= control target key start
LH: loop header
LB: loop body
LE: loop exit
PB: predicated region body
PF: predicated region fallthrough
CT: control target
= control target key end

     0   :  { %vm51_vm0 = vcmask 130048   ;;  %s129_s0 = inlined_call_operand.vmem [shape: f32[32,16], index: 0, kind: input, shape index: {}]   ;;  %s130_s1 = inlined_call_operand.vmem [shape: f32[1,16], index: 1, kind: input, shape index: {}]   ;;  %s131_s2 = inlined_call_operand.vmem [shape: f32[1,16], index: 2, kind: input, shape index: {}]   ;;  %s132_s3 = inlined_call_operand.vmem [shape: f32[32,16], index: 3, kind: input, shape index: {}]   ;;  %s133_s4 = inlined_call_operand.vmem [shape: f32[32,16], index: 4, kind: output, shape index: {}]  }
   0x1   :  { %v17_v0 = vld [vmem:[%s129_s0] sm:$0xff]  ;;  %v18_v4 = vld [vmem:[%s129_s0 + $0x8] sm:$0xff]  ;;  %v19_v7 = vld [vmem:[%s129_s0 + $0x10] sm:$0xff] }
   0x2   :  { %v60_v1 = vld [vmem:[%s130_s1] ss:$0 sm:$0xff]  ;;  %v20_v8 = vld [vmem:[%s129_s0 + $0x18] sm:$0xff]  ;;  %v44_v10 = vld [vmem:[%s132_s3 + $0x8] sm:$0xff] }
   0x3   :  { %v61_v2 = vld [vmem:[%s131_s2] ss:$0 sm:$0xff]  ;;  %v28_v3 = vmul.f32 %v60_v1, %v17_v0  ;;  %v29_v6 = vmul.f32 %v60_v1, %v18_v4  ;;  %v30_v11 = vmul.f32 %v60_v1, %v19_v7  ;;  %v31_v12 = vmul.f32 %v60_v1, %v20_v8  ;;  %v45_v14 = vld [vmem:[%s132_s3 + $0x10] sm:$0xff]  ;;  %v46_v15 = vld [vmem:[%s132_s3 + $0x18] sm:$0xff] }
   0x4   :  { %v43_v5 = vld [vmem:[%s132_s3] sm:$0xff] }
   0x5   :  { %v39_v9 = vadd.f32 %v61_v2, %v28_v3  ;;  %v40_v13 = vadd.f32 %v61_v2, %v29_v6  ;;  %v41_v17 = vadd.f32 %v61_v2, %v30_v11  ;;  %v42_v18 = vadd.f32 %v61_v2, %v31_v12 }
   0x7   :  { %v47_v16 = vadd.f32 %v43_v5, %v39_v9  ;;  %v48_v19 = vadd.f32 %v44_v10, %v40_v13  ;;  %v49_v20 = vadd.f32 %v45_v14, %v41_v17  ;;  %v50_v21 = vadd.f32 %v46_v15, %v42_v18 }
   0x9   :  { %52 = vst.msk [vmem:[%s133_s4] sm:$0xff] %vm51_vm0, %v47_v16  ;;  %53 = vst.msk [vmem:[%s133_s4 + $0x8] sm:$0xff] %vm51_vm0, %v48_v19 }
   0xa   :  { %54 = vst.msk [vmem:[%s133_s4 + $0x10] sm:$0xff] %vm51_vm0, %v49_v20  ;;  %55 = vst.msk [vmem:[%s133_s4 + $0x18] sm:$0xff] %vm51_vm0, %v50_v21 }

// kernel: tile.35
= control target key start
LH: loop header
LB: loop body
LE: loop exit
PB: predicated region body
PF: predicated region fallthrough
CT: control target
= control target key end

     0   :  { %s22_s0 = inlined_call_operand.vmem [shape: f32[8], index: 0, kind: input, shape index: {}]   ;;  %s23_s1 = inlined_call_operand.vmem [shape: f32[4,8], index: 1, kind: output, shape index: {}]  }
   0x1   :  { %v4_v0 = vld [vmem:[%s22_s0] ss:$0 sm:$0xff] }
   0x2   :  { %5 = vst [vmem:[%s23_s1] sm:$0xf] %v4_v0 }

// kernel: tile.37
= control target key start
LH: loop header
LB: loop body
LE: loop exit
PB: predicated region body
PF: predicated region fallthrough
CT: control target
= control target key end

     0   :  { %vm8_vm0 = vcmask 64512   ;;  %s40_s8 = smov 8   ;;  %s41_s9 = smov 16   ;;  %vm14_vm1 = vcmask 261312   ;;  %vm20_vm2 = vcmask 195712   ;;  %vm26_vm3 = vcmask 130112   ;;  %s58_s0 = inlined_call_operand.vmem [shape: f32[4,8], index: 0, kind: input, shape index: {}]   ;;  %s59_s1 = inlined_call_operand.vmem [shape: f32[1,32], index: 1, kind: output, shape index: {}]  }
   0x1   :  { %v5_v0 = vld [vmem:[%s58_s0] sm:$0xf]  ;;  %s39_s0 = smov 24  }
   0x2   :  { %6 = vst [vmem:[#allocation1] sm:$0xf] %v5_v0 }
   0x9   :  { %v11_v1 = vld [vmem:[#allocation1 + $0x3] sm:$0x1]   ;;  %v23_v2 = vld [vmem:[#allocation1 + $0x1] sm:$0x1]   ;;  %v7_v3 = vld [vmem:[#allocation1] sm:$0x1]  }
   0xa   :  { %12 = vrot.lane.b32.xlu0 %v11_v1, %s39_s0  ;;  %24 = vrot.lane.b32.xlu1 %v23_v2, %s40_s8  ;;  %v17_v4 = vld [vmem:[#allocation1 + $0x2] sm:$0x1]   ;;  %9 = vst.msk [vmem:[#allocation0] sm:$0x1] %vm8_vm0, %v7_v3  }
   0xe   :  { %18 = vrot.lane.b32.xlu0 %v17_v4, %s41_s9 }
  0x7c   :  { %v13_v5 = vpop.permute.xlu0 %12   ;;  %v25_v6 = vpop.permute.xlu1 %24  }
  0x7d   :  { %15 = vst.msk [vmem:[#allocation0] sm:$0x1] %vm14_vm1, %v13_v5  }
  0x80   :  { %v19_v7 = vpop.permute.xlu0 %18  }
  0x81   :  { %21 = vst.msk [vmem:[#allocation0] sm:$0x1] %vm20_vm2, %v19_v7  }
  0x82   :  { %27 = vst.msk [vmem:[#allocation0] sm:$0x1] %vm26_vm3, %v25_v6  }
  0x89   :  { %v32_v8 = vld [vmem:[#allocation0] sm:$0x1] }
  0x8a   :  { %35 = vst [vmem:[%s59_s1] sm:$0x1] %v32_v8 }

// kernel: local_enhancer_forward.32
= control target key start
LH: loop header
LB: loop body
LE: loop exit
PB: predicated region body
PF: predicated region fallthrough
CT: control target
= control target key end

     0   :  { %vm44_vm0 = vcmask 261120   ;;  %s105_s0 = inlined_call_operand.vmem [shape: f32[32,32], index: 0, kind: input, shape index: {}]   ;;  %s106_s1 = inlined_call_operand.vmem [shape: f32[1,32], index: 1, kind: input, shape index: {}]   ;;  %s107_s2 = inlined_call_operand.vmem [shape: f32[1,32], index: 2, kind: input, shape index: {}]   ;;  %s108_s3 = inlined_call_operand.vmem [shape: f32[32,32], index: 3, kind: output, shape index: {}]  }
   0x1   :  { %v14_v0 = vld [vmem:[%s105_s0] sm:$0xff]  ;;  %v15_v4 = vld [vmem:[%s105_s0 + $0x8] sm:$0xff]  ;;  %v16_v5 = vld [vmem:[%s105_s0 + $0x10] sm:$0xff] }
   0x2   :  { %v53_v1 = vld [vmem:[%s106_s1] ss:$0 sm:$0xff]  ;;  %v17_v6 = vld [vmem:[%s105_s0 + $0x18] sm:$0xff] }
   0x3   :  { %v54_v2 = vld [vmem:[%s107_s2] ss:$0 sm:$0xff]  ;;  %v25_v3 = vmul.f32 %v53_v1, %v14_v0  ;;  %v26_v7 = vmul.f32 %v53_v1, %v15_v4  ;;  %v27_v8 = vmul.f32 %v53_v1, %v16_v5  ;;  %v28_v9 = vmul.f32 %v53_v1, %v17_v6 }
   0x5   :  { %v36_v10 = vadd.f32 %v54_v2, %v25_v3  ;;  %v37_v11 = vadd.f32 %v54_v2, %v26_v7  ;;  %v38_v12 = vadd.f32 %v54_v2, %v27_v8  ;;  %v39_v13 = vadd.f32 %v54_v2, %v28_v9 }
   0x7   :  { %v40_v14 = vmax.f32 %v36_v10, 0.0  ;;  %v41_v15 = vmax.f32 %v37_v11, 0.0  ;;  %v42_v16 = vmax.f32 %v38_v12, 0.0  ;;  %v43_v17 = vmax.f32 %v39_v13, 0.0 }
   0x9   :  { %45 = vst.msk [vmem:[%s108_s3] sm:$0xff] %vm44_vm0, %v40_v14  ;;  %46 = vst.msk [vmem:[%s108_s3 + $0x8] sm:$0xff] %vm44_vm0, %v41_v15 }
   0xa   :  { %47 = vst.msk [vmem:[%s108_s3 + $0x10] sm:$0xff] %vm44_vm0, %v42_v16  ;;  %48 = vst.msk [vmem:[%s108_s3 + $0x18] sm:$0xff] %vm44_vm0, %v43_v17 }

// kernel: local_enhancer_forward.31
= control target key start
LH: loop header
LB: loop body
LE: loop exit
PB: predicated region body
PF: predicated region fallthrough
CT: control target
= control target key end

     0   :  { %vm21_vm0 = vcmask 261120   ;;  %vm31_vm1 = vcmask 254976   ;;  %v248_v1 = vmov 0.0   ;;  %vm83_vm2 = vcmask 523264   ;;  %s338_s1 = inlined_call_operand.vmem [shape: bf16[64,32], index: 1, kind: input, shape index: {}]   ;;  %s339_s4 = inlined_call_operand.vmem [shape: f32[2,32], index: 4, kind: output, shape index: {1}]   ;;  %s340_s0 = inlined_call_operand.vmem [shape: bf16[32,64], index: 0, kind: input, shape index: {}]   ;;  %s341_s2 = inlined_call_operand.vmem [shape: f32[1,32], index: 2, kind: input, shape index: {}]   ;;  %s342_s3 = inlined_call_operand.vmem [shape: f32[32,32], index: 3, kind: output, shape index: {0}]  }
   0x1   :  { %v242_v0 = vld [vmem:[%s338_s1 + $0x18] sm:$0xff]   ;;  %24 = vst.msk [vmem:[#allocation2 + $0x10] sm:$0xff] %vm21_vm0, %v248_v1  ;;  %22 = vst.msk [vmem:[#allocation2] sm:$0xff] %vm21_vm0, %v248_v1  ;;  %v243_v2 = vld [vmem:[%s338_s1 + $0x10] sm:$0xff]   ;;  %vm201_vm3 = vcmask 1040384  }
   0x2   :  { %32 = vst.msk [vmem:[%s339_s4] sm:$0x3] %vm31_vm1, %v248_v1  ;;  %229 = vmatprep.subr.bf16.mxu0 %v242_v0  ;;  %v244_v3 = vld [vmem:[%s338_s1 + $0x8] sm:$0xff]   ;;  %v246_v4 = vld [vmem:[%s340_s0] sm:$0xff]  }
   0x3   :  { %23 = vst.msk [vmem:[#allocation2 + $0x8] sm:$0xff] %vm21_vm0, %v248_v1  ;;  %25 = vst.msk [vmem:[#allocation2 + $0x18] sm:$0xff] %vm21_vm0, %v248_v1  ;;  %230 = vmatpush3.bf16.msra.mxu0 %v242_v0  ;;  %237 = vmatprep.mubr.msk.bf16.mxu0 %vm83_vm2, %v246_v4  ;;  %v245_v5 = vld [vmem:[%s338_s1] sm:$0xff]   ;;  %v247_v6 = vld [vmem:[%s340_s0 + $0x8] sm:$0xff]  }
   0x4   :  { %231 = vmatprep.subr.bf16.mxu0 %v243_v2  ;;  %v222_v19 = vld [vmem:[%s341_s2] ss:$0 sm:$0xff] }
   0x7   :  { %232 = vmatpush3.bf16.msra.mxu0 %v243_v2 }
   0x8   :  { %233 = vmatprep.subr.bf16.mxu0 %v244_v3  ;;  %v35_v7 = vld [vmem:[#allocation2 + $0x10] sm:$0xff]  ;;  %v33_v9 = vld [vmem:[#allocation2] sm:$0xff] }
   0x9   :  { %v170_v56 = vld [vmem:[%s339_s4] sm:$0x3] }
   0xa   :  { %v36_v12 = vld [vmem:[#allocation2 + $0x18] sm:$0xff]  ;;  %v34_v15 = vld [vmem:[#allocation2 + $0x8] sm:$0xff] }
   0xb   :  { %234 = vmatpush3.bf16.msra.mxu0 %v244_v3 }
   0xc   :  { %235 = vmatprep.subr.bf16.mxu0 %v245_v5 }
   0xf   :  { %236 = vmatpush3.bf16.msra.mxu0 %v245_v5 }
  0x12   :  { %238 = vmatmul.mubr.msk.bf16.vlgmr.msra.gmra.mxu0 %vm83_vm2, %v247_v6 }
  0xd2   :  { %v239_v8 = vpop.f32.mrf.mxu0 }
  0xd3   :  { %v141_v10 = vadd.f32 %v239_v8, %v35_v7 }
  0xd4   :  { %v124_v11 = vpop.f32.mrf.mxu0 }
  0xd5   :  { %146 = vst.msk [vmem:[#allocation2 + $0x10] sm:$0xff] %vm21_vm0, %v141_v10  ;;  %v139_v13 = vadd.f32 %v124_v11, %v33_v9 }
  0xd6   :  { %v240_v14 = vpop.f32.mrf.mxu0 }
  0xd7   :  { %144 = vst.msk [vmem:[#allocation2] sm:$0xff] %vm21_vm0, %v139_v13  ;;  %v142_v16 = vadd.f32 %v240_v14, %v36_v12 }
  0xd8   :  { %v127_v17 = vpop.f32.mrf.mxu0 }
  0xd9   :  { %147 = vst.msk [vmem:[#allocation2 + $0x18] sm:$0xff] %vm21_vm0, %v142_v16  ;;  %v140_v18 = vadd.f32 %v127_v17, %v34_v15 }
  0xdb   :  { %145 = vst.msk [vmem:[#allocation2 + $0x8] sm:$0xff] %vm21_vm0, %v140_v18 }
  0xdc   :  { %v153_v20 = vld [vmem:[#allocation2 + $0x10] sm:$0xff] }
  0xdd   :  { %v164_v21 = vadd.f32 %v222_v19, %v153_v20 }
  0xde   :  { %v151_v22 = vld [vmem:[#allocation2] sm:$0xff] }
  0xdf   :  { %168 = vst.msk [vmem:[%s342_s3 + $0x10] sm:$0xff] %vm21_vm0, %v164_v21  ;;  %v162_v23 = vadd.f32 %v222_v19, %v151_v22  ;;  %v186_v29 = vmul.f32 %v164_v21, %v164_v21  ;;  %v174_v34 = vsel %vm21_vm0, %v164_v21, 0.0 }
  0xe0   :  { %v154_v24 = vld [vmem:[#allocation2 + $0x18] sm:$0xff] }
  0xe1   :  { %166 = vst.msk [vmem:[%s342_s3] sm:$0xff] %vm21_vm0, %v162_v23  ;;  %v165_v25 = vadd.f32 %v222_v19, %v154_v24  ;;  %v184_v27 = vmul.f32 %v162_v23, %v162_v23  ;;  %v171_v30 = vsel %vm21_vm0, %v162_v23, 0.0  ;;  %v191_v40 = vsel %vm21_vm0, %v186_v29, 0.0 }
  0xe2   :  { %v152_v26 = vld [vmem:[#allocation2 + $0x8] sm:$0xff] }
  0xe3   :  { %169 = vst.msk [vmem:[%s342_s3 + $0x18] sm:$0xff] %vm21_vm0, %v165_v25  ;;  %v163_v28 = vadd.f32 %v222_v19, %v152_v26  ;;  %v188_v35 = vsel %vm21_vm0, %v184_v27, 0.0  ;;  %v187_v36 = vmul.f32 %v165_v25, %v165_v25  ;;  %v176_v41 = vsel %vm21_vm0, %v165_v25, 0.0 }
  0xe5   :  { %167 = vst.msk [vmem:[%s342_s3 + $0x8] sm:$0xff] %vm21_vm0, %v163_v28  ;;  %v172_v31 = vsel %vm21_vm0, %v163_v28, 0.0  ;;  %v185_v32 = vmul.f32 %v163_v28, %v163_v28  ;;  %v193_v44 = vsel %vm21_vm0, %v187_v36, 0.0 }
  0xe6   :  { %v173_v33 = vadd.f32 %v172_v31, %v171_v30 }
  0xe7   :  { %v189_v37 = vsel %vm21_vm0, %v185_v32, 0.0 }
  0xe8   :  { %v175_v38 = vadd.f32 %v174_v34, %v173_v33  ;;  %v190_v39 = vadd.f32 %v189_v37, %v188_v35 }
  0xea   :  { %v177_v42 = vadd.f32 %v176_v41, %v175_v38  ;;  %v192_v43 = vadd.f32 %v191_v40, %v190_v39 }
  0xec   :  { %v178_v45 = vrot.slane %v177_v42, 4  ;;  %v194_v46 = vadd.f32 %v193_v44, %v192_v43 }
  0xee   :  { %v179_v47 = vadd.f32 %v178_v45, %v177_v42  ;;  %v195_v48 = vrot.slane %v194_v46, 4 }
  0xf0   :  { %v180_v49 = vrot.slane %v179_v47, 2  ;;  %v196_v50 = vadd.f32 %v195_v48, %v194_v46 }
  0xf2   :  { %v181_v51 = vadd.f32 %v180_v49, %v179_v47  ;;  %v197_v52 = vrot.slane %v196_v50, 2 }
  0xf4   :  { %v182_v53 = vrot.slane %v181_v51, 1  ;;  %v198_v54 = vadd.f32 %v197_v52, %v196_v50 }
  0xf6   :  { %v199_v55 = vrot.slane %v198_v54, 1  ;;  %v183_v57 = vadd.f32 %v182_v53, %v181_v51 }
  0xf8   :  { %v200_v58 = vadd.f32 %v199_v55, %v198_v54 }
  0xfa   :  { %v202_v59 = vsel %vm201_vm3, %v183_v57, %v200_v58 }
  0xfb   :  { %v203_v60 = vadd.f32 %v202_v59, %v170_v56 }
  0xfd   :  { %205 = vst.msk [vmem:[%s339_s4] sm:$0x3] %vm31_vm1, %v203_v60 }

// kernel: local_enhancer_forward.36
= control target key start
LH: loop header
LB: loop body
LE: loop exit
PB: predicated region body
PF: predicated region fallthrough
CT: control target
= control target key end

     0   :  { %vm127_vm0 = vcmask 64512   ;;  %s377_s0 = inlined_call_operand.vmem [shape: f32[128,8], index: 0, kind: input, shape index: {}]   ;;  %s378_s1 = inlined_call_operand.vmem [shape: f32[1,8], index: 1, kind: input, shape index: {}]   ;;  %s379_s2 = inlined_call_operand.vmem [shape: f32[1,8], index: 2, kind: input, shape index: {}]   ;;  %s380_s3 = inlined_call_operand.vmem [shape: f32[128,8], index: 3, kind: input, shape index: {}]   ;;  %s381_s4 = inlined_call_operand.vmem [shape: f32[128,8], index: 4, kind: output, shape index: {}]  }
   0x1   :  { %v17_v0 = vld [vmem:[%s377_s0] sm:$0xff]  ;;  %v18_v4 = vld [vmem:[%s377_s0 + $0x8] sm:$0xff]  ;;  %v19_v6 = vld [vmem:[%s377_s0 + $0x10] sm:$0xff] }
   0x2   :  { %v181_v1 = vld [vmem:[%s378_s1] ss:$0 sm:$0xff]  ;;  %v20_v7 = vld [vmem:[%s377_s0 + $0x18] sm:$0xff]  ;;  %v22_v15 = vld [vmem:[%s377_s0 + $0x28] sm:$0xff] }
   0x3   :  { %v186_v2 = vld [vmem:[%s379_s2] ss:$0 sm:$0xff]  ;;  %v40_v3 = vmul.f32 %v181_v1, %v17_v0  ;;  %v41_v5 = vmul.f32 %v181_v1, %v18_v4  ;;  %v42_v9 = vmul.f32 %v181_v1, %v19_v6  ;;  %v43_v10 = vmul.f32 %v181_v1, %v20_v7  ;;  %v23_v16 = vld [vmem:[%s377_s0 + $0x30] sm:$0xff]  ;;  %v96_v18 = vld [vmem:[%s380_s3 + $0x8] sm:$0xff] }
   0x4   :  { %v21_v11 = vld [vmem:[%s377_s0 + $0x20] sm:$0xff]  ;;  %v45_v21 = vmul.f32 %v181_v1, %v22_v15  ;;  %v24_v22 = vld [vmem:[%s377_s0 + $0x38] sm:$0xff]  ;;  %v97_v24 = vld [vmem:[%s380_s3 + $0x10] sm:$0xff]  ;;  %v46_v27 = vmul.f32 %v181_v1, %v23_v16 }
   0x5   :  { %v63_v8 = vadd.f32 %v186_v2, %v40_v3  ;;  %v95_v12 = vld [vmem:[%s380_s3] sm:$0xff]  ;;  %v64_v13 = vadd.f32 %v186_v2, %v41_v5  ;;  %v44_v14 = vmul.f32 %v181_v1, %v21_v11  ;;  %v65_v19 = vadd.f32 %v186_v2, %v42_v9  ;;  %v98_v25 = vld [vmem:[%s380_s3 + $0x18] sm:$0xff]  ;;  %v26_v35 = vld [vmem:[%s377_s0 + $0x48] sm:$0xff] }
   0x6   :  { %v66_v20 = vadd.f32 %v186_v2, %v43_v10  ;;  %v47_v28 = vmul.f32 %v181_v1, %v24_v22  ;;  %v25_v29 = vld [vmem:[%s377_s0 + $0x40] sm:$0xff]  ;;  %v68_v34 = vadd.f32 %v186_v2, %v45_v21  ;;  %v100_v38 = vld [vmem:[%s380_s3 + $0x28] sm:$0xff]  ;;  %v69_v39 = vadd.f32 %v186_v2, %v46_v27  ;;  %v27_v41 = vld [vmem:[%s377_s0 + $0x50] sm:$0xff] }
   0x7   :  { %v79_v17 = vmax.f32 %v63_v8, 0.0  ;;  %v80_v23 = vmax.f32 %v64_v13, 0.0  ;;  %v67_v26 = vadd.f32 %v186_v2, %v44_v14  ;;  %v81_v31 = vmax.f32 %v65_v19, 0.0  ;;  %v99_v33 = vld [vmem:[%s380_s3 + $0x20] sm:$0xff]  ;;  %v28_v42 = vld [vmem:[%s377_s0 + $0x58] sm:$0xff]  ;;  %v101_v46 = vld [vmem:[%s380_s3 + $0x30] sm:$0xff] }
   0x8   :  { %v82_v32 = vmax.f32 %v66_v20, 0.0  ;;  %v70_v40 = vadd.f32 %v186_v2, %v47_v28  ;;  %v84_v45 = vmax.f32 %v68_v34, 0.0  ;;  %v102_v47 = vld [vmem:[%s380_s3 + $0x38] sm:$0xff]  ;;  %v48_v48 = vmul.f32 %v181_v1, %v25_v29  ;;  %v29_v49 = vld [vmem:[%s377_s0 + $0x60] sm:$0xff]  ;;  %v30_v54 = vld [vmem:[%s377_s0 + $0x68] sm:$0xff] }
   0x9   :  { %v111_v30 = vadd.f32 %v95_v12, %v79_v17  ;;  %v112_v36 = vadd.f32 %v96_v18, %v80_v23  ;;  %v83_v37 = vmax.f32 %v67_v26, 0.0  ;;  %v113_v43 = vadd.f32 %v97_v24, %v81_v31  ;;  %v31_v59 = vld [vmem:[%s377_s0 + $0x70] sm:$0xff]  ;;  %v32_v60 = vld [vmem:[%s377_s0 + $0x78] sm:$0xff]  ;;  %v103_v63 = vld [vmem:[%s380_s3 + $0x40] sm:$0xff] }
   0xa   :  { %v114_v44 = vadd.f32 %v98_v25, %v82_v32  ;;  %v85_v51 = vmax.f32 %v69_v39, 0.0  ;;  %v86_v52 = vmax.f32 %v70_v40, 0.0  ;;  %v49_v53 = vmul.f32 %v181_v1, %v26_v35  ;;  %v104_v5 = vld [vmem:[%s380_s3 + $0x48] sm:$0xff]  ;;  %v105_v10 = vld [vmem:[%s380_s3 + $0x50] sm:$0xff]  ;;  %v106_v11 = vld [vmem:[%s380_s3 + $0x58] sm:$0xff] }
   0xb   :  { %128 = vst.msk [vmem:[%s381_s4] sm:$0xff] %vm127_vm0, %v111_v30  ;;  %129 = vst.msk [vmem:[%s381_s4 + $0x8] sm:$0xff] %vm127_vm0, %v112_v36  ;;  %v115_v50 = vadd.f32 %v99_v33, %v83_v37  ;;  %v116_v55 = vadd.f32 %v100_v38, %v84_v45  ;;  %v71_v56 = vadd.f32 %v186_v2, %v48_v48  ;;  %v107_v18 = vld [vmem:[%s380_s3 + $0x60] sm:$0xff]  ;;  %v108_v22 = vld [vmem:[%s380_s3 + $0x68] sm:$0xff] }
   0xc   :  { %130 = vst.msk [vmem:[%s381_s4 + $0x10] sm:$0xff] %vm127_vm0, %v113_v43  ;;  %131 = vst.msk [vmem:[%s381_s4 + $0x18] sm:$0xff] %vm127_vm0, %v114_v44  ;;  %v50_v57 = vmul.f32 %v181_v1, %v27_v41  ;;  %v51_v58 = vmul.f32 %v181_v1, %v28_v42  ;;  %v117_v61 = vadd.f32 %v101_v46, %v85_v51  ;;  %v109_v27 = vld [vmem:[%s380_s3 + $0x70] sm:$0xff]  ;;  %v110_v28 = vld [vmem:[%s380_s3 + $0x78] sm:$0xff] }
   0xd   :  { %132 = vst.msk [vmem:[%s381_s4 + $0x20] sm:$0xff] %vm127_vm0, %v115_v50  ;;  %v118_v62 = vadd.f32 %v102_v47, %v86_v52  ;;  %v72_v0 = vadd.f32 %v186_v2, %v49_v53  ;;  %v52_v3 = vmul.f32 %v181_v1, %v29_v49  ;;  %133 = vst.msk [vmem:[%s381_s4 + $0x28] sm:$0xff] %vm127_vm0, %v116_v55  ;;  %v87_v4 = vmax.f32 %v71_v56, 0.0 }
   0xe   :  { %v73_v6 = vadd.f32 %v186_v2, %v50_v57  ;;  %v74_v7 = vadd.f32 %v186_v2, %v51_v58  ;;  %v53_v8 = vmul.f32 %v181_v1, %v30_v54  ;;  %134 = vst.msk [vmem:[%s381_s4 + $0x30] sm:$0xff] %vm127_vm0, %v117_v61  ;;  %v54_v13 = vmul.f32 %v181_v1, %v31_v59 }
   0xf   :  { %135 = vst.msk [vmem:[%s381_s4 + $0x38] sm:$0xff] %vm127_vm0, %v118_v62  ;;  %v88_v9 = vmax.f32 %v72_v0, 0.0  ;;  %v75_v12 = vadd.f32 %v186_v2, %v52_v3  ;;  %v55_v14 = vmul.f32 %v181_v1, %v32_v60  ;;  %v119_v15 = vadd.f32 %v103_v63, %v87_v4 }
  0x10   :  { %v89_v16 = vmax.f32 %v73_v6, 0.0  ;;  %v90_v17 = vmax.f32 %v74_v7, 0.0  ;;  %v76_v19 = vadd.f32 %v186_v2, %v53_v8  ;;  %v77_v23 = vadd.f32 %v186_v2, %v54_v13 }
  0x11   :  { %v120_v20 = vadd.f32 %v104_v5, %v88_v9  ;;  %v91_v21 = vmax.f32 %v75_v12, 0.0  ;;  %v78_v24 = vadd.f32 %v186_v2, %v55_v14  ;;  %136 = vst.msk [vmem:[%s381_s4 + $0x40] sm:$0xff] %vm127_vm0, %v119_v15 }
  0x12   :  { %v121_v1 = vadd.f32 %v105_v10, %v89_v16  ;;  %v122_v25 = vadd.f32 %v106_v11, %v90_v17  ;;  %v92_v26 = vmax.f32 %v76_v19, 0.0  ;;  %v93_v29 = vmax.f32 %v77_v23, 0.0 }
  0x13   :  { %137 = vst.msk [vmem:[%s381_s4 + $0x48] sm:$0xff] %vm127_vm0, %v120_v20  ;;  %v123_v2 = vadd.f32 %v107_v18, %v91_v21  ;;  %v94_v30 = vmax.f32 %v78_v24, 0.0 }
  0x14   :  { %138 = vst.msk [vmem:[%s381_s4 + $0x50] sm:$0xff] %vm127_vm0, %v121_v1  ;;  %139 = vst.msk [vmem:[%s381_s4 + $0x58] sm:$0xff] %vm127_vm0, %v122_v25  ;;  %v124_v31 = vadd.f32 %v108_v22, %v92_v26  ;;  %v125_v32 = vadd.f32 %v109_v27, %v93_v29 }
  0x15   :  { %140 = vst.msk [vmem:[%s381_s4 + $0x60] sm:$0xff] %vm127_vm0, %v123_v2  ;;  %v126_v33 = vadd.f32 %v110_v28, %v94_v30 }
  0x16   :  { %141 = vst.msk [vmem:[%s381_s4 + $0x68] sm:$0xff] %vm127_vm0, %v124_v31  ;;  %142 = vst.msk [vmem:[%s381_s4 + $0x70] sm:$0xff] %vm127_vm0, %v125_v32 }
  0x17   :  { %143 = vst.msk [vmem:[%s381_s4 + $0x78] sm:$0xff] %vm127_vm0, %v126_v33 }

// kernel: local_enhancer_forward.37
= control target key start
LH: loop header
LB: loop body
LE: loop exit
PB: predicated region body
PF: predicated region fallthrough
CT: control target
= control target key end

     0   :  { %vm178_vm0 = vcmask 1043456   ;;  %vm21_vm1 = vcmask 64512   ;;  %v561_v1 = vmov 0.0   ;;  %vm153_vm2 = vcmask 588800   ;;  %s827_s1 = inlined_call_operand.vmem [shape: bf16[72,8], index: 1, kind: input, shape index: {}]   ;;  %s828_s0 = inlined_call_operand.vmem [shape: bf16[128,72], index: 0, kind: input, shape index: {}]   ;;  %s829_s4 = inlined_call_operand.vmem [shape: f32[2,8], index: 4, kind: output, shape index: {1}]   ;;  %s830_s2 = inlined_call_operand.vmem [shape: f32[1,8], index: 2, kind: input, shape index: {}]   ;;  %s831_s3 = inlined_call_operand.vmem [shape: f32[128,8], index: 3, kind: output, shape index: {0}]  }
   0x1   :  { %v548_v0 = vld [vmem:[%s827_s1 + $0x20] ss:$0 sps:$4 sm:$0xff]   ;;  %24 = vst.msk [vmem:[#allocation2 + $0x10] sm:$0xff] %vm21_vm1, %v561_v1  ;;  %22 = vst.msk [vmem:[#allocation2] sm:$0xff] %vm21_vm1, %v561_v1  ;;  %v549_v2 = vld [vmem:[%s827_s1 + $0x18] sm:$0xff]   ;;  %vm43_vm3 = vcmask 58368  }
   0x2   :  { %23 = vst.msk [vmem:[#allocation2 + $0x8] sm:$0xff] %vm21_vm1, %v561_v1  ;;  %25 = vst.msk [vmem:[#allocation2 + $0x18] sm:$0xff] %vm21_vm1, %v561_v1  ;;  %545 = vmatprep.subr.msk.bf16.mxu0 %vm178_vm0, %v548_v0  ;;  %v180_v3 = vsel %vm178_vm0, %v548_v0, 0  ;;  %546 = vmatprep.subr.msk.bf16.mxu1 %vm178_vm0, %v548_v0  ;;  %v550_v4 = vld [vmem:[%s827_s1 + $0x10] sm:$0xff]   ;;  %v553_v5 = vld [vmem:[%s828_s0] sm:$0xff]   ;;  %vm461_vm4 = vcmask 1040384  }
   0x3   :  { %26 = vst.msk [vmem:[#allocation2 + $0x20] sm:$0xff] %vm21_vm1, %v561_v1  ;;  %27 = vst.msk [vmem:[#allocation2 + $0x28] sm:$0xff] %vm21_vm1, %v561_v1  ;;  %510 = vmatpush3.bf16.msra.mxu0 %v180_v3  ;;  %540 = vmatpush3.bf16.msra.mxu1 %v180_v3  ;;  %v551_v6 = vld [vmem:[%s827_s1 + $0x8] sm:$0xff]   ;;  %v557_v7 = vld [vmem:[%s828_s0 + $0x20] sm:$0xff]  }
   0x4   :  { %28 = vst.msk [vmem:[#allocation2 + $0x30] sm:$0xff] %vm21_vm1, %v561_v1  ;;  %29 = vst.msk [vmem:[#allocation2 + $0x38] sm:$0xff] %vm21_vm1, %v561_v1  ;;  %511 = vmatprep.subr.bf16.mxu0 %v549_v2  ;;  %536 = vmatprep.subr.bf16.mxu1 %v549_v2  ;;  %v552_v8 = vld [vmem:[%s827_s1] sm:$0xff]   ;;  %v554_v9 = vld [vmem:[%s828_s0 + $0x8] sm:$0xff]  }
   0x5   :  { %30 = vst.msk [vmem:[#allocation2 + $0x40] sm:$0xff] %vm21_vm1, %v561_v1  ;;  %31 = vst.msk [vmem:[#allocation2 + $0x48] sm:$0xff] %vm21_vm1, %v561_v1  ;;  %519 = vmatprep.mubr.msk.bf16.mxu0 %vm153_vm2, %v553_v5  ;;  %527 = vmatprep.mubr.msk.bf16.mxu1 %vm153_vm2, %v557_v7  ;;  %v558_v10 = vld [vmem:[%s828_s0 + $0x28] sm:$0xff]   ;;  %v555_v11 = vld [vmem:[%s828_s0 + $0x10] sm:$0xff]  }
   0x6   :  { %32 = vst.msk [vmem:[#allocation2 + $0x50] sm:$0xff] %vm21_vm1, %v561_v1  ;;  %33 = vst.msk [vmem:[#allocation2 + $0x58] sm:$0xff] %vm21_vm1, %v561_v1  ;;  %v559_v12 = vld [vmem:[%s828_s0 + $0x30] sm:$0xff]   ;;  %v556_v13 = vld [vmem:[%s828_s0 + $0x18] sm:$0xff]  }
   0x7   :  { %34 = vst.msk [vmem:[#allocation2 + $0x60] sm:$0xff] %vm21_vm1, %v561_v1  ;;  %35 = vst.msk [vmem:[#allocation2 + $0x68] sm:$0xff] %vm21_vm1, %v561_v1  ;;  %512 = vmatpush3.bf16.msra.mxu0 %v549_v2  ;;  %541 = vmatpush3.bf16.msra.mxu1 %v549_v2  ;;  %v560_v14 = vld [vmem:[%s828_s0 + $0x38] sm:$0xff]   ;;  %v666_v41 = vld [vmem:[%s830_s2] ss:$0 sm:$0xff] }
   0x8   :  { %36 = vst.msk [vmem:[#allocation2 + $0x70] sm:$0xff] %vm21_vm1, %v561_v1  ;;  %37 = vst.msk [vmem:[#allocation2 + $0x78] sm:$0xff] %vm21_vm1, %v561_v1  ;;  %513 = vmatprep.subr.bf16.mxu0 %v550_v4  ;;  %537 = vmatprep.subr.bf16.mxu1 %v550_v4  ;;  %v47_v15 = vld [vmem:[#allocation2 + $0x10] sm:$0xff]  ;;  %v45_v18 = vld [vmem:[#allocation2] sm:$0xff] }
   0x9   :  { %44 = vst.msk [vmem:[%s829_s4] sm:$0x3] %vm43_vm3, %v561_v1  ;;  %v48_v24 = vld [vmem:[#allocation2 + $0x18] sm:$0xff]  ;;  %v46_v30 = vld [vmem:[#allocation2 + $0x8] sm:$0xff] }
   0xa   :  { %v49_v43 = vld [vmem:[#allocation2 + $0x20] sm:$0xff]  ;;  %v50_v63 = vld [vmem:[#allocation2 + $0x28] sm:$0xff] }
   0xb   :  { %514 = vmatpush3.bf16.msra.mxu0 %v550_v4  ;;  %542 = vmatpush3.bf16.msra.mxu1 %v550_v4  ;;  %v51_v36 = vld [vmem:[#allocation2 + $0x30] sm:$0xff]  ;;  %v52_v55 = vld [vmem:[#allocation2 + $0x38] sm:$0xff] }
   0xc   :  { %515 = vmatprep.subr.bf16.mxu0 %v551_v6  ;;  %538 = vmatprep.subr.bf16.mxu1 %v551_v6  ;;  %v53_v20 = vld [vmem:[#allocation2 + $0x40] sm:$0xff]  ;;  %v54_v32 = vld [vmem:[#allocation2 + $0x48] sm:$0xff] }
   0xd   :  { %v55_v16 = vld [vmem:[#allocation2 + $0x50] sm:$0xff]  ;;  %v56_v26 = vld [vmem:[#allocation2 + $0x58] sm:$0xff] }
   0xe   :  { %v57_v45 = vld [vmem:[#allocation2 + $0x60] sm:$0xff]  ;;  %v58_v7 = vld [vmem:[#allocation2 + $0x68] sm:$0xff] }
   0xf   :  { %516 = vmatpush3.bf16.msra.mxu0 %v551_v6  ;;  %543 = vmatpush3.bf16.msra.mxu1 %v551_v6  ;;  %v59_v38 = vld [vmem:[#allocation2 + $0x70] sm:$0xff]  ;;  %v60_v57 = vld [vmem:[#allocation2 + $0x78] sm:$0xff] }
  0x10   :  { %517 = vmatprep.subr.bf16.mxu0 %v552_v8  ;;  %539 = vmatprep.subr.bf16.mxu1 %v552_v8 }
  0x13   :  { %518 = vmatpush3.bf16.msra.mxu0 %v552_v8  ;;  %544 = vmatpush3.bf16.msra.mxu1 %v552_v8 }
  0x16   :  { %520 = vmatmul.mubr.msk.bf16.vlgmr.msra.gmra.mxu0 %vm153_vm2, %v554_v9  ;;  %528 = vmatmul.mubr.msk.bf16.vlgmr.msra.gmra.mxu1 %vm153_vm2, %v558_v10 }
  0x17   :  { %523 = vmatprep.mubr.msk.bf16.mxu0 %vm153_vm2, %v555_v11  ;;  %531 = vmatprep.mubr.msk.bf16.mxu1 %vm153_vm2, %v559_v12 }
  0x1e   :  { %524 = vmatmul.mubr.msk.bf16.gmra.mxu0 %vm153_vm2, %v556_v13  ;;  %532 = vmatmul.mubr.msk.bf16.gmra.mxu1 %vm153_vm2, %v560_v14 }
  0xd6   :  { %v521_v17 = vpop.f32.mrf.mxu0  ;;  %v529_v19 = vpop.f32.mrf.mxu1 }
  0xd7   :  { %v281_v21 = vadd.f32 %v521_v17, %v47_v15  ;;  %v289_v22 = vadd.f32 %v529_v19, %v55_v16 }
  0xd8   :  { %v216_v23 = vpop.f32.mrf.mxu0  ;;  %v248_v25 = vpop.f32.mrf.mxu1 }
  0xd9   :  { %298 = vst.msk [vmem:[#allocation2 + $0x10] sm:$0xff] %vm21_vm1, %v281_v21  ;;  %v279_v27 = vadd.f32 %v216_v23, %v45_v18  ;;  %306 = vst.msk [vmem:[#allocation2 + $0x50] sm:$0xff] %vm21_vm1, %v289_v22  ;;  %v287_v28 = vadd.f32 %v248_v25, %v53_v20 }
  0xda   :  { %v522_v29 = vpop.f32.mrf.mxu0  ;;  %v530_v31 = vpop.f32.mrf.mxu1 }
  0xdb   :  { %296 = vst.msk [vmem:[#allocation2] sm:$0xff] %vm21_vm1, %v279_v27  ;;  %v282_v33 = vadd.f32 %v522_v29, %v48_v24  ;;  %304 = vst.msk [vmem:[#allocation2 + $0x40] sm:$0xff] %vm21_vm1, %v287_v28  ;;  %v290_v34 = vadd.f32 %v530_v31, %v56_v26 }
  0xdc   :  { %v219_v35 = vpop.f32.mrf.mxu0  ;;  %v251_v37 = vpop.f32.mrf.mxu1 }
  0xdd   :  { %299 = vst.msk [vmem:[#allocation2 + $0x18] sm:$0xff] %vm21_vm1, %v282_v33  ;;  %v280_v39 = vadd.f32 %v219_v35, %v46_v30  ;;  %307 = vst.msk [vmem:[#allocation2 + $0x58] sm:$0xff] %vm21_vm1, %v290_v34  ;;  %v288_v40 = vadd.f32 %v251_v37, %v54_v32 }
  0xde   :  { %v525_v42 = vpop.f32.mrf.mxu0  ;;  %v533_v44 = vpop.f32.mrf.mxu1 }
  0xdf   :  { %297 = vst.msk [vmem:[#allocation2 + $0x8] sm:$0xff] %vm21_vm1, %v280_v39  ;;  %v285_v46 = vadd.f32 %v525_v42, %v51_v36  ;;  %305 = vst.msk [vmem:[#allocation2 + $0x48] sm:$0xff] %vm21_vm1, %v288_v40  ;;  %v293_v47 = vadd.f32 %v533_v44, %v59_v38 }
  0xe0   :  { %v317_v48 = vld [vmem:[#allocation2 + $0x10] sm:$0xff]  ;;  %v232_v49 = vpop.f32.mrf.mxu0  ;;  %v264_v51 = vpop.f32.mrf.mxu1 }
  0xe1   :  { %v325_v50 = vld [vmem:[#allocation2 + $0x50] sm:$0xff]  ;;  %v340_v52 = vadd.f32 %v666_v41, %v317_v48  ;;  %302 = vst.msk [vmem:[#allocation2 + $0x30] sm:$0xff] %vm21_vm1, %v285_v46  ;;  %v283_v53 = vadd.f32 %v232_v49, %v49_v43  ;;  %310 = vst.msk [vmem:[#allocation2 + $0x70] sm:$0xff] %vm21_vm1, %v293_v47  ;;  %v291_v56 = vadd.f32 %v264_v51, %v57_v45 }
  0xe2   :  { %v673_v54 = vadd.f32 %v666_v41, %v325_v50  ;;  %v315_v58 = vld [vmem:[#allocation2] sm:$0xff]  ;;  %v526_v59 = vpop.f32.mrf.mxu0  ;;  %v534_v61 = vpop.f32.mrf.mxu1 }
  0xe3   :  { %v323_v60 = vld [vmem:[#allocation2 + $0x40] sm:$0xff]  ;;  %356 = vst.msk [vmem:[%s831_s3 + $0x10] sm:$0xff] %vm21_vm1, %v340_v52  ;;  %v338_v62 = vadd.f32 %v666_v41, %v315_v58  ;;  %300 = vst.msk [vmem:[#allocation2 + $0x20] sm:$0xff] %vm21_vm1, %v283_v53  ;;  %v286_v1 = vadd.f32 %v526_v59, %v52_v55  ;;  %v294_v4 = vadd.f32 %v534_v61, %v60_v57  ;;  %v374_v23 = vsel %vm21_vm1, %v340_v52, 0.0 }
  0xe4   :  { %364 = vst.msk [vmem:[%s831_s3 + $0x50] sm:$0xff] %vm21_vm1, %v673_v54  ;;  %308 = vst.msk [vmem:[#allocation2 + $0x60] sm:$0xff] %vm21_vm1, %v291_v56  ;;  %v318_v0 = vld [vmem:[#allocation2 + $0x18] sm:$0xff]  ;;  %v689_v2 = vadd.f32 %v666_v41, %v323_v60  ;;  %v235_v3 = vpop.f32.mrf.mxu0  ;;  %v267_v8 = vpop.f32.mrf.mxu1  ;;  %v410_v14 = vmul.f32 %v340_v52, %v340_v52 }
  0xe5   :  { %354 = vst.msk [vmem:[%s831_s3] sm:$0xff] %vm21_vm1, %v338_v62  ;;  %v341_v5 = vadd.f32 %v666_v41, %v318_v0  ;;  %v326_v6 = vld [vmem:[#allocation2 + $0x58] sm:$0xff]  ;;  %303 = vst.msk [vmem:[#allocation2 + $0x38] sm:$0xff] %vm21_vm1, %v286_v1  ;;  %v284_v10 = vadd.f32 %v235_v3, %v50_v63  ;;  %v408_v12 = vmul.f32 %v338_v62, %v338_v62  ;;  %v371_v19 = vsel %vm21_vm1, %v338_v62, 0.0 }
  0xe6   :  { %v316_v9 = vld [vmem:[#allocation2 + $0x8] sm:$0xff]  ;;  %362 = vst.msk [vmem:[%s831_s3 + $0x40] sm:$0xff] %vm21_vm1, %v689_v2  ;;  %311 = vst.msk [vmem:[#allocation2 + $0x78] sm:$0xff] %vm21_vm1, %v294_v4  ;;  %v710_v16 = vadd.f32 %v666_v41, %v326_v6  ;;  %v292_v18 = vadd.f32 %v267_v8, %v58_v7  ;;  %v427_v34 = vsel %vm21_vm1, %v410_v14, 0.0  ;;  %v416_v4 = vmul.f32 %v689_v2, %v689_v2 }
  0xe7   :  { %v324_v11 = vld [vmem:[#allocation2 + $0x48] sm:$0xff]  ;;  %357 = vst.msk [vmem:[%s831_s3 + $0x18] sm:$0xff] %vm21_vm1, %v341_v5  ;;  %v339_v13 = vadd.f32 %v666_v41, %v316_v9  ;;  %301 = vst.msk [vmem:[#allocation2 + $0x28] sm:$0xff] %vm21_vm1, %v284_v10  ;;  %v424_v27 = vsel %vm21_vm1, %v408_v12, 0.0  ;;  %v411_v28 = vmul.f32 %v341_v5, %v341_v5  ;;  %v376_v35 = vsel %vm21_vm1, %v341_v5, 0.0 }
  0xe8   :  { %v321_v15 = vld [vmem:[#allocation2 + $0x30] sm:$0xff]  ;;  %v713_v17 = vadd.f32 %v666_v41, %v324_v11  ;;  %365 = vst.msk [vmem:[%s831_s3 + $0x58] sm:$0xff] %vm21_vm1, %v710_v16  ;;  %309 = vst.msk [vmem:[#allocation2 + $0x68] sm:$0xff] %vm21_vm1, %v292_v18  ;;  %v386_v8 = vsel %vm21_vm1, %v689_v2, 0.0  ;;  %v418_v12 = vmul.f32 %v673_v54, %v673_v54  ;;  %v419_v2 = vmul.f32 %v710_v16, %v710_v16 }
  0xe9   :  { %355 = vst.msk [vmem:[%s831_s3 + $0x8] sm:$0xff] %vm21_vm1, %v339_v13  ;;  %v372_v20 = vsel %vm21_vm1, %v339_v13, 0.0  ;;  %v409_v21 = vmul.f32 %v339_v13, %v339_v13  ;;  %v344_v22 = vadd.f32 %v666_v41, %v321_v15  ;;  %v329_v26 = vld [vmem:[#allocation2 + $0x70] sm:$0xff]  ;;  %v429_v43 = vsel %vm21_vm1, %v411_v28, 0.0 }
  0xea   :  { %v373_v24 = vadd.f32 %v372_v20, %v371_v19  ;;  %v319_v25 = vld [vmem:[#allocation2 + $0x20] sm:$0xff]  ;;  %363 = vst.msk [vmem:[%s831_s3 + $0x48] sm:$0xff] %vm21_vm1, %v713_v17  ;;  %v748_v38 = vadd.f32 %v666_v41, %v329_v26  ;;  %v417_v9 = vmul.f32 %v713_v17, %v713_v17  ;;  %v439_v13 = vsel %vm21_vm1, %v416_v4, 0.0 }
  0xeb   :  { %v425_v29 = vsel %vm21_vm1, %v409_v21, 0.0  ;;  %360 = vst.msk [vmem:[%s831_s3 + $0x30] sm:$0xff] %vm21_vm1, %v344_v22  ;;  %v342_v30 = vadd.f32 %v666_v41, %v319_v25  ;;  %v327_v33 = vld [vmem:[#allocation2 + $0x60] sm:$0xff]  ;;  %v414_v57 = vmul.f32 %v344_v22, %v344_v22  ;;  %v388_v14 = vsel %vm21_vm1, %v713_v17, 0.0 }
  0xec   :  { %v375_v31 = vadd.f32 %v374_v23, %v373_v24  ;;  %v426_v32 = vadd.f32 %v425_v29, %v424_v27  ;;  %v322_v37 = vld [vmem:[#allocation2 + $0x38] sm:$0xff]  ;;  %368 = vst.msk [vmem:[%s831_s3 + $0x70] sm:$0xff] %vm21_vm1, %v748_v38  ;;  %v350_v46 = vadd.f32 %v666_v41, %v327_v33  ;;  %v390_v19 = vsel %vm21_vm1, %v673_v54, 0.0 }
  0xed   :  { %358 = vst.msk [vmem:[%s831_s3 + $0x20] sm:$0xff] %vm21_vm1, %v342_v30  ;;  %v412_v36 = vmul.f32 %v342_v30, %v342_v30  ;;  %v345_v42 = vadd.f32 %v666_v41, %v322_v37  ;;  %v378_v44 = vsel %vm21_vm1, %v342_v30, 0.0  ;;  %v330_v47 = vld [vmem:[#allocation2 + $0x78] sm:$0xff]  ;;  %v435_v1 = vsel %vm21_vm1, %v414_v57, 0.0 }
  0xee   :  { %v428_v39 = vadd.f32 %v427_v34, %v426_v32  ;;  %v377_v40 = vadd.f32 %v376_v35, %v375_v31  ;;  %v320_v45 = vld [vmem:[#allocation2 + $0x28] sm:$0xff]  ;;  %366 = vst.msk [vmem:[%s831_s3 + $0x60] sm:$0xff] %vm21_vm1, %v350_v46  ;;  %v353_v55 = vadd.f32 %v666_v41, %v330_v47  ;;  %v441_v20 = vsel %vm21_vm1, %v417_v9, 0.0 }
  0xef   :  { %361 = vst.msk [vmem:[%s831_s3 + $0x38] sm:$0xff] %vm21_vm1, %v345_v42  ;;  %v431_v50 = vsel %vm21_vm1, %v412_v36, 0.0  ;;  %v343_v51 = vadd.f32 %v666_v41, %v320_v45  ;;  %v328_v52 = vld [vmem:[#allocation2 + $0x68] sm:$0xff]  ;;  %v415_v61 = vmul.f32 %v345_v42, %v345_v42  ;;  %v384_v3 = vsel %vm21_vm1, %v345_v42, 0.0 }
  0xf0   :  { %v379_v48 = vadd.f32 %v378_v44, %v377_v40  ;;  %v430_v49 = vadd.f32 %v429_v43, %v428_v39  ;;  %v351_v56 = vadd.f32 %v666_v41, %v328_v52  ;;  %369 = vst.msk [vmem:[%s831_s3 + $0x78] sm:$0xff] %vm21_vm1, %v353_v55  ;;  %v382_v41 = vsel %vm21_vm1, %v344_v22, 0.0 }
  0xf1   :  { %359 = vst.msk [vmem:[%s831_s3 + $0x28] sm:$0xff] %vm21_vm1, %v343_v51  ;;  %v380_v58 = vsel %vm21_vm1, %v343_v51, 0.0  ;;  %v413_v59 = vmul.f32 %v343_v51, %v343_v51  ;;  %v437_v7 = vsel %vm21_vm1, %v415_v61, 0.0  ;;  %v443_v23 = vsel %vm21_vm1, %v418_v12, 0.0 }
  0xf2   :  { %v432_v53 = vadd.f32 %v431_v50, %v430_v49  ;;  %v381_v60 = vadd.f32 %v380_v58, %v379_v48  ;;  %367 = vst.msk [vmem:[%s831_s3 + $0x68] sm:$0xff] %vm21_vm1, %v351_v56  ;;  %v392_v24 = vsel %vm21_vm1, %v710_v16, 0.0  ;;  %v420_v25 = vmul.f32 %v350_v46, %v350_v46 }
  0xf3   :  { %v433_v62 = vsel %vm21_vm1, %v413_v59, 0.0  ;;  %v445_v27 = vsel %vm21_vm1, %v419_v2, 0.0  ;;  %v394_v28 = vsel %vm21_vm1, %v350_v46, 0.0  ;;  %v421_v54 = vmul.f32 %v351_v56, %v351_v56 }
  0xf4   :  { %v383_v63 = vadd.f32 %v382_v41, %v381_v60  ;;  %v434_v0 = vadd.f32 %v433_v62, %v432_v53  ;;  %v422_v31 = vmul.f32 %v748_v38, %v748_v38  ;;  %v447_v32 = vsel %vm21_vm1, %v420_v25, 0.0 }
  0xf5   :  { %v396_v33 = vsel %vm21_vm1, %v351_v56, 0.0  ;;  %v398_v16 = vsel %vm21_vm1, %v748_v38, 0.0  ;;  %v423_v36 = vmul.f32 %v353_v55, %v353_v55  ;;  %v449_v37 = vsel %vm21_vm1, %v421_v54, 0.0 }
  0xf6   :  { %v436_v5 = vadd.f32 %v435_v1, %v434_v0  ;;  %v385_v6 = vadd.f32 %v384_v3, %v383_v63  ;;  %v451_v42 = vsel %vm21_vm1, %v422_v31, 0.0  ;;  %v400_v43 = vsel %vm21_vm1, %v353_v55, 0.0  ;;  %v370_v55 = vld [vmem:[%s829_s4] sm:$0x3] }
  0xf7   :  { %v453_v46 = vsel %vm21_vm1, %v423_v36, 0.0 }
  0xf8   :  { %v387_v10 = vadd.f32 %v386_v8, %v385_v6  ;;  %v438_v11 = vadd.f32 %v437_v7, %v436_v5 }
  0xfa   :  { %v389_v15 = vadd.f32 %v388_v14, %v387_v10  ;;  %v440_v18 = vadd.f32 %v439_v13, %v438_v11 }
  0xfc   :  { %v391_v21 = vadd.f32 %v390_v19, %v389_v15  ;;  %v442_v22 = vadd.f32 %v441_v20, %v440_v18 }
  0xfe   :  { %v444_v26 = vadd.f32 %v443_v23, %v442_v22  ;;  %v393_v17 = vadd.f32 %v392_v24, %v391_v21 }
 0x100   :  { %v395_v29 = vadd.f32 %v394_v28, %v393_v17  ;;  %v446_v30 = vadd.f32 %v445_v27, %v444_v26 }
 0x102   :  { %v448_v34 = vadd.f32 %v447_v32, %v446_v30  ;;  %v397_v35 = vadd.f32 %v396_v33, %v395_v29 }
 0x104   :  { %v399_v39 = vadd.f32 %v398_v16, %v397_v35  ;;  %v450_v40 = vadd.f32 %v449_v37, %v448_v34 }
 0x106   :  { %v401_v44 = vadd.f32 %v400_v43, %v399_v39  ;;  %v452_v45 = vadd.f32 %v451_v42, %v450_v40 }
 0x108   :  { %v402_v47 = vrot.slane %v401_v44, 4  ;;  %v454_v48 = vadd.f32 %v453_v46, %v452_v45 }
 0x10a   :  { %v403_v49 = vadd.f32 %v402_v47, %v401_v44  ;;  %v455_v50 = vrot.slane %v454_v48, 4 }
 0x10c   :  { %v404_v51 = vrot.slane %v403_v49, 2  ;;  %v456_v52 = vadd.f32 %v455_v50, %v454_v48 }
 0x10e   :  { %v405_v38 = vadd.f32 %v404_v51, %v403_v49  ;;  %v457_v53 = vrot.slane %v456_v52, 2 }
 0x110   :  { %v406_v56 = vrot.slane %v405_v38, 1  ;;  %v458_v57 = vadd.f32 %v457_v53, %v456_v52 }
 0x112   :  { %v459_v58 = vrot.slane %v458_v57, 1  ;;  %v407_v59 = vadd.f32 %v406_v56, %v405_v38 }
 0x114   :  { %v460_v60 = vadd.f32 %v459_v58, %v458_v57 }
 0x116   :  { %v462_v41 = vsel %vm461_vm4, %v407_v59, %v460_v60 }
 0x117   :  { %v463_v61 = vadd.f32 %v462_v41, %v370_v55 }
 0x119   :  { %465 = vst.msk [vmem:[%s829_s4] sm:$0x3] %vm43_vm3, %v463_v61 }

// kernel: local_enhancer_forward.40
= control target key start
LH: loop header
LB: loop body
LE: loop exit
PB: predicated region body
PF: predicated region fallthrough
CT: control target
= control target key end

     0   :  { %vm111_vm0 = vcmask 64512   ;;  %s361_s0 = inlined_call_operand.vmem [shape: f32[128,8], index: 0, kind: input, shape index: {}]   ;;  %s362_s1 = inlined_call_operand.vmem [shape: f32[1,8], index: 1, kind: input, shape index: {}]   ;;  %s363_s2 = inlined_call_operand.vmem [shape: f32[1,8], index: 2, kind: input, shape index: {}]   ;;  %s364_s3 = inlined_call_operand.vmem [shape: f32[128,8], index: 3, kind: input, shape index: {}]   ;;  %s365_s4 = inlined_call_operand.vmem [shape: f32[128,8], index: 4, kind: output, shape index: {}]  }
   0x1   :  { %v17_v0 = vld [vmem:[%s361_s0] sm:$0xff]  ;;  %v18_v4 = vld [vmem:[%s361_s0 + $0x8] sm:$0xff]  ;;  %v19_v7 = vld [vmem:[%s361_s0 + $0x10] sm:$0xff] }
   0x2   :  { %v165_v1 = vld [vmem:[%s362_s1] ss:$0 sm:$0xff]  ;;  %v20_v8 = vld [vmem:[%s361_s0 + $0x18] sm:$0xff]  ;;  %v80_v10 = vld [vmem:[%s364_s3 + $0x8] sm:$0xff] }
   0x3   :  { %v170_v2 = vld [vmem:[%s363_s2] ss:$0 sm:$0xff]  ;;  %v40_v3 = vmul.f32 %v165_v1, %v17_v0  ;;  %v41_v6 = vmul.f32 %v165_v1, %v18_v4  ;;  %v42_v11 = vmul.f32 %v165_v1, %v19_v7  ;;  %v81_v12 = vld [vmem:[%s364_s3 + $0x10] sm:$0xff]  ;;  %v43_v13 = vmul.f32 %v165_v1, %v20_v8  ;;  %v82_v16 = vld [vmem:[%s364_s3 + $0x18] sm:$0xff] }
   0x4   :  { %v79_v5 = vld [vmem:[%s364_s3] sm:$0xff]  ;;  %v22_v18 = vld [vmem:[%s361_s0 + $0x28] sm:$0xff]  ;;  %v23_v19 = vld [vmem:[%s361_s0 + $0x30] sm:$0xff] }
   0x5   :  { %v63_v9 = vadd.f32 %v170_v2, %v40_v3  ;;  %v21_v14 = vld [vmem:[%s361_s0 + $0x20] sm:$0xff]  ;;  %v64_v15 = vadd.f32 %v170_v2, %v41_v6  ;;  %v65_v21 = vadd.f32 %v170_v2, %v42_v11  ;;  %v66_v22 = vadd.f32 %v170_v2, %v43_v13  ;;  %v24_v25 = vld [vmem:[%s361_s0 + $0x38] sm:$0xff]  ;;  %v84_v28 = vld [vmem:[%s364_s3 + $0x28] sm:$0xff] }
   0x6   :  { %v44_v17 = vmul.f32 %v165_v1, %v21_v14  ;;  %v83_v23 = vld [vmem:[%s364_s3 + $0x20] sm:$0xff]  ;;  %v45_v24 = vmul.f32 %v165_v1, %v22_v18  ;;  %v46_v29 = vmul.f32 %v165_v1, %v23_v19  ;;  %v47_v30 = vmul.f32 %v165_v1, %v24_v25  ;;  %v26_v32 = vld [vmem:[%s361_s0 + $0x48] sm:$0xff]  ;;  %v85_v36 = vld [vmem:[%s364_s3 + $0x30] sm:$0xff] }
   0x7   :  { %v95_v20 = vadd.f32 %v79_v5, %v63_v9  ;;  %v96_v26 = vadd.f32 %v80_v10, %v64_v15  ;;  %v25_v31 = vld [vmem:[%s361_s0 + $0x40] sm:$0xff]  ;;  %v97_v33 = vadd.f32 %v81_v12, %v65_v21  ;;  %v98_v34 = vadd.f32 %v82_v16, %v66_v22  ;;  %v86_v37 = vld [vmem:[%s364_s3 + $0x38] sm:$0xff]  ;;  %v27_v39 = vld [vmem:[%s361_s0 + $0x50] sm:$0xff] }
   0x8   :  { %v67_v27 = vadd.f32 %v170_v2, %v44_v17  ;;  %v68_v35 = vadd.f32 %v170_v2, %v45_v24  ;;  %v48_v38 = vmul.f32 %v165_v1, %v25_v31  ;;  %v69_v41 = vadd.f32 %v170_v2, %v46_v29  ;;  %v87_v43 = vld [vmem:[%s364_s3 + $0x40] sm:$0xff]  ;;  %v28_v45 = vld [vmem:[%s361_s0 + $0x58] sm:$0xff]  ;;  %v88_v49 = vld [vmem:[%s364_s3 + $0x48] sm:$0xff] }
   0x9   :  { %112 = vst.msk [vmem:[%s365_s4] sm:$0xff] %vm111_vm0, %v95_v20  ;;  %113 = vst.msk [vmem:[%s365_s4 + $0x8] sm:$0xff] %vm111_vm0, %v96_v26  ;;  %v70_v42 = vadd.f32 %v170_v2, %v47_v30  ;;  %v49_v44 = vmul.f32 %v165_v1, %v26_v32  ;;  %v29_v46 = vld [vmem:[%s361_s0 + $0x60] sm:$0xff]  ;;  %v50_v50 = vmul.f32 %v165_v1, %v27_v39  ;;  %v89_v51 = vld [vmem:[%s364_s3 + $0x50] sm:$0xff] }
   0xa   :  { %v99_v40 = vadd.f32 %v83_v23, %v67_v27  ;;  %114 = vst.msk [vmem:[%s365_s4 + $0x10] sm:$0xff] %vm111_vm0, %v97_v33  ;;  %115 = vst.msk [vmem:[%s365_s4 + $0x18] sm:$0xff] %vm111_vm0, %v98_v34  ;;  %v100_v47 = vadd.f32 %v84_v28, %v68_v35  ;;  %v71_v48 = vadd.f32 %v170_v2, %v48_v38  ;;  %v30_v53 = vld [vmem:[%s361_s0 + $0x68] sm:$0xff]  ;;  %v90_v57 = vld [vmem:[%s364_s3 + $0x58] sm:$0xff] }
   0xb   :  { %v51_v52 = vmul.f32 %v165_v1, %v28_v45  ;;  %v101_v54 = vadd.f32 %v85_v36, %v69_v41  ;;  %v102_v55 = vadd.f32 %v86_v37, %v70_v42  ;;  %v72_v56 = vadd.f32 %v170_v2, %v49_v44  ;;  %v31_v59 = vld [vmem:[%s361_s0 + $0x70] sm:$0xff]  ;;  %v32_v60 = vld [vmem:[%s361_s0 + $0x78] sm:$0xff]  ;;  %v91_v0 = vld [vmem:[%s364_s3 + $0x60] sm:$0xff] }
   0xc   :  { %116 = vst.msk [vmem:[%s365_s4 + $0x20] sm:$0xff] %vm111_vm0, %v99_v40  ;;  %v52_v58 = vmul.f32 %v165_v1, %v29_v46  ;;  %117 = vst.msk [vmem:[%s365_s4 + $0x28] sm:$0xff] %vm111_vm0, %v100_v47  ;;  %v103_v61 = vadd.f32 %v87_v43, %v71_v48  ;;  %v73_v62 = vadd.f32 %v170_v2, %v50_v50  ;;  %v92_v6 = vld [vmem:[%s364_s3 + $0x68] sm:$0xff]  ;;  %v93_v12 = vld [vmem:[%s364_s3 + $0x70] sm:$0xff] }
   0xd   :  { %v74_v63 = vadd.f32 %v170_v2, %v51_v52  ;;  %v53_v3 = vmul.f32 %v165_v1, %v30_v53  ;;  %118 = vst.msk [vmem:[%s365_s4 + $0x30] sm:$0xff] %vm111_vm0, %v101_v54  ;;  %119 = vst.msk [vmem:[%s365_s4 + $0x38] sm:$0xff] %vm111_vm0, %v102_v55  ;;  %v104_v4 = vadd.f32 %v88_v49, %v72_v56  ;;  %v94_v13 = vld [vmem:[%s364_s3 + $0x78] sm:$0xff] }
   0xe   :  { %v75_v5 = vadd.f32 %v170_v2, %v52_v58  ;;  %v54_v7 = vmul.f32 %v165_v1, %v31_v59  ;;  %v55_v8 = vmul.f32 %v165_v1, %v32_v60  ;;  %120 = vst.msk [vmem:[%s365_s4 + $0x40] sm:$0xff] %vm111_vm0, %v103_v61  ;;  %v105_v9 = vadd.f32 %v89_v51, %v73_v62 }
   0xf   :  { %v106_v10 = vadd.f32 %v90_v57, %v74_v63  ;;  %v76_v11 = vadd.f32 %v170_v2, %v53_v3  ;;  %121 = vst.msk [vmem:[%s365_s4 + $0x48] sm:$0xff] %vm111_vm0, %v104_v4 }
  0x10   :  { %v107_v1 = vadd.f32 %v91_v0, %v75_v5  ;;  %v77_v14 = vadd.f32 %v170_v2, %v54_v7  ;;  %v78_v15 = vadd.f32 %v170_v2, %v55_v8  ;;  %122 = vst.msk [vmem:[%s365_s4 + $0x50] sm:$0xff] %vm111_vm0, %v105_v9 }
  0x11   :  { %123 = vst.msk [vmem:[%s365_s4 + $0x58] sm:$0xff] %vm111_vm0, %v106_v10  ;;  %v108_v16 = vadd.f32 %v92_v6, %v76_v11 }
  0x12   :  { %124 = vst.msk [vmem:[%s365_s4 + $0x60] sm:$0xff] %vm111_vm0, %v107_v1  ;;  %v109_v17 = vadd.f32 %v93_v12, %v77_v14  ;;  %v110_v18 = vadd.f32 %v94_v13, %v78_v15 }
  0x13   :  { %125 = vst.msk [vmem:[%s365_s4 + $0x68] sm:$0xff] %vm111_vm0, %v108_v16 }
  0x14   :  { %126 = vst.msk [vmem:[%s365_s4 + $0x70] sm:$0xff] %vm111_vm0, %v109_v17  ;;  %127 = vst.msk [vmem:[%s365_s4 + $0x78] sm:$0xff] %vm111_vm0, %v110_v18 }

// kernel: tile.51
= control target key start
LH: loop header
LB: loop body
LE: loop exit
PB: predicated region body
PF: predicated region fallthrough
CT: control target
= control target key end

     0   :  { %s22_s0 = inlined_call_operand.vmem [shape: f32[4], index: 0, kind: input, shape index: {}]   ;;  %s23_s1 = inlined_call_operand.vmem [shape: f32[4,4], index: 1, kind: output, shape index: {}]  }
   0x1   :  { %v4_v0 = vld [vmem:[%s22_s0] ss:$0 sm:$0xff] }
   0x2   :  { %5 = vst [vmem:[%s23_s1] sm:$0xf] %v4_v0 }

// kernel: tile.53
= control target key start
LH: loop header
LB: loop body
LE: loop exit
PB: predicated region body
PF: predicated region fallthrough
CT: control target
= control target key end

     0   :  { %vm8_vm0 = vcmask 31744   ;;  %s40_s8 = smov 4   ;;  %s41_s9 = smov 8   ;;  %vm14_vm1 = vcmask 130144   ;;  %vm20_vm2 = vcmask 97344   ;;  %vm26_vm3 = vcmask 64544   ;;  %s58_s0 = inlined_call_operand.vmem [shape: f32[4,4], index: 0, kind: input, shape index: {}]   ;;  %s59_s1 = inlined_call_operand.vmem [shape: f32[1,16], index: 1, kind: output, shape index: {}]  }
   0x1   :  { %v5_v0 = vld [vmem:[%s58_s0] sm:$0xf]  ;;  %s39_s0 = smov 12  }
   0x2   :  { %6 = vst [vmem:[#allocation1] sm:$0xf] %v5_v0 }
   0x9   :  { %v11_v1 = vld [vmem:[#allocation1 + $0x3] sm:$0x1]   ;;  %v23_v2 = vld [vmem:[#allocation1 + $0x1] sm:$0x1]   ;;  %v7_v3 = vld [vmem:[#allocation1] sm:$0x1]  }
   0xa   :  { %12 = vrot.lane.b32.xlu0 %v11_v1, %s39_s0  ;;  %24 = vrot.lane.b32.xlu1 %v23_v2, %s40_s8  ;;  %v17_v4 = vld [vmem:[#allocation1 + $0x2] sm:$0x1]   ;;  %9 = vst.msk [vmem:[#allocation0] sm:$0x1] %vm8_vm0, %v7_v3  }
   0xe   :  { %18 = vrot.lane.b32.xlu0 %v17_v4, %s41_s9 }
  0x7c   :  { %v13_v5 = vpop.permute.xlu0 %12   ;;  %v25_v6 = vpop.permute.xlu1 %24  }
  0x7d   :  { %15 = vst.msk [vmem:[#allocation0] sm:$0x1] %vm14_vm1, %v13_v5  }
  0x80   :  { %v19_v7 = vpop.permute.xlu0 %18  }
  0x81   :  { %21 = vst.msk [vmem:[#allocation0] sm:$0x1] %vm20_vm2, %v19_v7  }
  0x82   :  { %27 = vst.msk [vmem:[#allocation0] sm:$0x1] %vm26_vm3, %v25_v6  }
  0x89   :  { %v32_v8 = vld [vmem:[#allocation0] sm:$0x1] }
  0x8a   :  { %35 = vst [vmem:[%s59_s1] sm:$0x1] %v32_v8 }

// kernel: local_enhancer_forward.41
= control target key start
LH: loop header
LB: loop body
LE: loop exit
PB: predicated region body
PF: predicated region fallthrough
CT: control target
= control target key end

     0   :  { %vm21_vm0 = vcmask 130048   ;;  %v514_v1 = vmov 0.0   ;;  %vm133_vm1 = vcmask 261120   ;;  %vm43_vm2 = vcmask 123904   ;;  %s768_s1 = inlined_call_operand.vmem [shape: bf16[32,16], index: 1, kind: input, shape index: {}]   ;;  %s769_s0 = inlined_call_operand.vmem [shape: bf16[128,32], index: 0, kind: input, shape index: {}]   ;;  %s770_s4 = inlined_call_operand.vmem [shape: f32[2,16], index: 4, kind: output, shape index: {1}]   ;;  %s771_s2 = inlined_call_operand.vmem [shape: f32[1,16], index: 2, kind: input, shape index: {}]   ;;  %s772_s3 = inlined_call_operand.vmem [shape: f32[128,16], index: 3, kind: output, shape index: {0}]  }
   0x1   :  { %v504_v0 = vld [vmem:[%s768_s1 + $0x8] sm:$0xff]   ;;  %24 = vst.msk [vmem:[#allocation2 + $0x10] sm:$0xff] %vm21_vm0, %v514_v1  ;;  %22 = vst.msk [vmem:[#allocation2] sm:$0xff] %vm21_vm0, %v514_v1  ;;  %v505_v2 = vld [vmem:[%s768_s1] sm:$0xff]   ;;  %vm437_vm3 = vcmask 1040384  }
   0x2   :  { %23 = vst.msk [vmem:[#allocation2 + $0x8] sm:$0xff] %vm21_vm0, %v514_v1  ;;  %25 = vst.msk [vmem:[#allocation2 + $0x18] sm:$0xff] %vm21_vm0, %v514_v1  ;;  %479 = vmatprep.subr.bf16.mxu0 %v504_v0  ;;  %v506_v3 = vld [vmem:[%s769_s0] sm:$0xff]   ;;  %499 = vmatprep.subr.bf16.mxu1 %v504_v0  ;;  %v507_v4 = vld [vmem:[%s769_s0 + $0x8] sm:$0xff]  }
   0x3   :  { %26 = vst.msk [vmem:[#allocation2 + $0x20] sm:$0xff] %vm21_vm0, %v514_v1  ;;  %27 = vst.msk [vmem:[#allocation2 + $0x28] sm:$0xff] %vm21_vm0, %v514_v1  ;;  %480 = vmatpush3.bf16.msra.mxu0 %v504_v0  ;;  %501 = vmatpush3.bf16.msra.mxu1 %v504_v0  ;;  %v508_v5 = vld [vmem:[%s769_s0 + $0x10] sm:$0xff]   ;;  %v510_v6 = vld [vmem:[%s769_s0 + $0x20] sm:$0xff]  }
   0x4   :  { %28 = vst.msk [vmem:[#allocation2 + $0x30] sm:$0xff] %vm21_vm0, %v514_v1  ;;  %29 = vst.msk [vmem:[#allocation2 + $0x38] sm:$0xff] %vm21_vm0, %v514_v1  ;;  %481 = vmatprep.subr.bf16.mxu0 %v505_v2  ;;  %483 = vmatprep.mubr.msk.bf16.mxu0 %vm133_vm1, %v506_v3  ;;  %v511_v7 = vld [vmem:[%s769_s0 + $0x28] sm:$0xff]   ;;  %v512_v8 = vld [vmem:[%s769_s0 + $0x30] sm:$0xff]  }
   0x5   :  { %30 = vst.msk [vmem:[#allocation2 + $0x40] sm:$0xff] %vm21_vm0, %v514_v1  ;;  %31 = vst.msk [vmem:[#allocation2 + $0x48] sm:$0xff] %vm21_vm0, %v514_v1  ;;  %500 = vmatprep.subr.bf16.mxu1 %v505_v2  ;;  %491 = vmatprep.mubr.msk.bf16.mxu1 %vm133_vm1, %v510_v6  ;;  %v509_v9 = vld [vmem:[%s769_s0 + $0x18] sm:$0xff]   ;;  %v607_v37 = vld [vmem:[%s771_s2] ss:$0 sm:$0xff] }
   0x6   :  { %32 = vst.msk [vmem:[#allocation2 + $0x50] sm:$0xff] %vm21_vm0, %v514_v1  ;;  %33 = vst.msk [vmem:[#allocation2 + $0x58] sm:$0xff] %vm21_vm0, %v514_v1  ;;  %v513_v10 = vld [vmem:[%s769_s0 + $0x38] sm:$0xff]  }
   0x7   :  { %34 = vst.msk [vmem:[#allocation2 + $0x60] sm:$0xff] %vm21_vm0, %v514_v1  ;;  %35 = vst.msk [vmem:[#allocation2 + $0x68] sm:$0xff] %vm21_vm0, %v514_v1  ;;  %482 = vmatpush3.bf16.msra.mxu0 %v505_v2  ;;  %502 = vmatpush3.bf16.msra.mxu1 %v505_v2 }
   0x8   :  { %36 = vst.msk [vmem:[#allocation2 + $0x70] sm:$0xff] %vm21_vm0, %v514_v1  ;;  %37 = vst.msk [vmem:[#allocation2 + $0x78] sm:$0xff] %vm21_vm0, %v514_v1  ;;  %v47_v11 = vld [vmem:[#allocation2 + $0x10] sm:$0xff]  ;;  %v45_v14 = vld [vmem:[#allocation2] sm:$0xff] }
   0x9   :  { %44 = vst.msk [vmem:[%s770_s4] sm:$0x3] %vm43_vm2, %v514_v1  ;;  %v48_v20 = vld [vmem:[#allocation2 + $0x18] sm:$0xff]  ;;  %v46_v26 = vld [vmem:[#allocation2 + $0x8] sm:$0xff] }
   0xa   :  { %484 = vmatmul.mubr.msk.bf16.vlgmr.msra.gmra.mxu0 %vm133_vm1, %v507_v4  ;;  %492 = vmatmul.mubr.msk.bf16.vlgmr.msra.gmra.mxu1 %vm133_vm1, %v511_v7  ;;  %v49_v39 = vld [vmem:[#allocation2 + $0x20] sm:$0xff]  ;;  %v50_v59 = vld [vmem:[#allocation2 + $0x28] sm:$0xff] }
   0xb   :  { %487 = vmatprep.mubr.msk.bf16.mxu0 %vm133_vm1, %v508_v5  ;;  %495 = vmatprep.mubr.msk.bf16.mxu1 %vm133_vm1, %v512_v8  ;;  %v51_v32 = vld [vmem:[#allocation2 + $0x30] sm:$0xff]  ;;  %v52_v51 = vld [vmem:[#allocation2 + $0x38] sm:$0xff] }
   0xc   :  { %v53_v16 = vld [vmem:[#allocation2 + $0x40] sm:$0xff]  ;;  %v54_v28 = vld [vmem:[#allocation2 + $0x48] sm:$0xff] }
   0xd   :  { %v55_v12 = vld [vmem:[#allocation2 + $0x50] sm:$0xff]  ;;  %v56_v22 = vld [vmem:[#allocation2 + $0x58] sm:$0xff] }
   0xe   :  { %v57_v41 = vld [vmem:[#allocation2 + $0x60] sm:$0xff]  ;;  %v58_v3 = vld [vmem:[#allocation2 + $0x68] sm:$0xff] }
   0xf   :  { %v59_v34 = vld [vmem:[#allocation2 + $0x70] sm:$0xff]  ;;  %v60_v53 = vld [vmem:[#allocation2 + $0x78] sm:$0xff] }
  0x12   :  { %488 = vmatmul.mubr.msk.bf16.gmra.mxu0 %vm133_vm1, %v509_v9  ;;  %496 = vmatmul.mubr.msk.bf16.gmra.mxu1 %vm133_vm1, %v513_v10 }
  0xca   :  { %v485_v13 = vpop.f32.mrf.mxu0  ;;  %v493_v15 = vpop.f32.mrf.mxu1 }
  0xcb   :  { %v257_v17 = vadd.f32 %v485_v13, %v47_v11  ;;  %v265_v18 = vadd.f32 %v493_v15, %v55_v12 }
  0xcc   :  { %v192_v19 = vpop.f32.mrf.mxu0  ;;  %v224_v21 = vpop.f32.mrf.mxu1 }
  0xcd   :  { %274 = vst.msk [vmem:[#allocation2 + $0x10] sm:$0xff] %vm21_vm0, %v257_v17  ;;  %v255_v23 = vadd.f32 %v192_v19, %v45_v14  ;;  %282 = vst.msk [vmem:[#allocation2 + $0x50] sm:$0xff] %vm21_vm0, %v265_v18  ;;  %v263_v24 = vadd.f32 %v224_v21, %v53_v16 }
  0xce   :  { %v486_v25 = vpop.f32.mrf.mxu0  ;;  %v494_v27 = vpop.f32.mrf.mxu1 }
  0xcf   :  { %272 = vst.msk [vmem:[#allocation2] sm:$0xff] %vm21_vm0, %v255_v23  ;;  %v258_v29 = vadd.f32 %v486_v25, %v48_v20  ;;  %280 = vst.msk [vmem:[#allocation2 + $0x40] sm:$0xff] %vm21_vm0, %v263_v24  ;;  %v266_v30 = vadd.f32 %v494_v27, %v56_v22 }
  0xd0   :  { %v195_v31 = vpop.f32.mrf.mxu0  ;;  %v227_v33 = vpop.f32.mrf.mxu1 }
  0xd1   :  { %275 = vst.msk [vmem:[#allocation2 + $0x18] sm:$0xff] %vm21_vm0, %v258_v29  ;;  %v256_v35 = vadd.f32 %v195_v31, %v46_v26  ;;  %283 = vst.msk [vmem:[#allocation2 + $0x58] sm:$0xff] %vm21_vm0, %v266_v30  ;;  %v264_v36 = vadd.f32 %v227_v33, %v54_v28 }
  0xd2   :  { %v489_v38 = vpop.f32.mrf.mxu0  ;;  %v497_v40 = vpop.f32.mrf.mxu1 }
  0xd3   :  { %273 = vst.msk [vmem:[#allocation2 + $0x8] sm:$0xff] %vm21_vm0, %v256_v35  ;;  %v261_v42 = vadd.f32 %v489_v38, %v51_v32  ;;  %281 = vst.msk [vmem:[#allocation2 + $0x48] sm:$0xff] %vm21_vm0, %v264_v36  ;;  %v269_v43 = vadd.f32 %v497_v40, %v59_v34 }
  0xd4   :  { %v293_v44 = vld [vmem:[#allocation2 + $0x10] sm:$0xff]  ;;  %v208_v45 = vpop.f32.mrf.mxu0  ;;  %v240_v47 = vpop.f32.mrf.mxu1 }
  0xd5   :  { %v301_v46 = vld [vmem:[#allocation2 + $0x50] sm:$0xff]  ;;  %v316_v48 = vadd.f32 %v607_v37, %v293_v44  ;;  %278 = vst.msk [vmem:[#allocation2 + $0x30] sm:$0xff] %vm21_vm0, %v261_v42  ;;  %v259_v49 = vadd.f32 %v208_v45, %v49_v39  ;;  %286 = vst.msk [vmem:[#allocation2 + $0x70] sm:$0xff] %vm21_vm0, %v269_v43  ;;  %v267_v52 = vadd.f32 %v240_v47, %v57_v41 }
  0xd6   :  { %v614_v50 = vadd.f32 %v607_v37, %v301_v46  ;;  %v291_v54 = vld [vmem:[#allocation2] sm:$0xff]  ;;  %v490_v55 = vpop.f32.mrf.mxu0  ;;  %v498_v57 = vpop.f32.mrf.mxu1 }
  0xd7   :  { %v299_v56 = vld [vmem:[#allocation2 + $0x40] sm:$0xff]  ;;  %332 = vst.msk [vmem:[%s772_s3 + $0x10] sm:$0xff] %vm21_vm0, %v316_v48  ;;  %v314_v58 = vadd.f32 %v607_v37, %v291_v54  ;;  %276 = vst.msk [vmem:[#allocation2 + $0x20] sm:$0xff] %vm21_vm0, %v259_v49  ;;  %v262_v61 = vadd.f32 %v490_v55, %v52_v51  ;;  %v270_v0 = vadd.f32 %v498_v57, %v60_v53  ;;  %v350_v19 = vsel %vm21_vm0, %v316_v48, 0.0 }
  0xd8   :  { %340 = vst.msk [vmem:[%s772_s3 + $0x50] sm:$0xff] %vm21_vm0, %v614_v50  ;;  %284 = vst.msk [vmem:[#allocation2 + $0x60] sm:$0xff] %vm21_vm0, %v267_v52  ;;  %v294_v60 = vld [vmem:[#allocation2 + $0x18] sm:$0xff]  ;;  %v630_v62 = vadd.f32 %v607_v37, %v299_v56  ;;  %v211_v63 = vpop.f32.mrf.mxu0  ;;  %v243_v4 = vpop.f32.mrf.mxu1  ;;  %v386_v10 = vmul.f32 %v316_v48, %v316_v48 }
  0xd9   :  { %330 = vst.msk [vmem:[%s772_s3] sm:$0xff] %vm21_vm0, %v314_v58  ;;  %v317_v1 = vadd.f32 %v607_v37, %v294_v60  ;;  %v302_v2 = vld [vmem:[#allocation2 + $0x58] sm:$0xff]  ;;  %279 = vst.msk [vmem:[#allocation2 + $0x38] sm:$0xff] %vm21_vm0, %v262_v61  ;;  %v260_v6 = vadd.f32 %v211_v63, %v50_v59  ;;  %v384_v8 = vmul.f32 %v314_v58, %v314_v58  ;;  %v347_v15 = vsel %vm21_vm0, %v314_v58, 0.0 }
  0xda   :  { %v292_v5 = vld [vmem:[#allocation2 + $0x8] sm:$0xff]  ;;  %338 = vst.msk [vmem:[%s772_s3 + $0x40] sm:$0xff] %vm21_vm0, %v630_v62  ;;  %287 = vst.msk [vmem:[#allocation2 + $0x78] sm:$0xff] %vm21_vm0, %v270_v0  ;;  %v651_v12 = vadd.f32 %v607_v37, %v302_v2  ;;  %v268_v14 = vadd.f32 %v243_v4, %v58_v3  ;;  %v403_v30 = vsel %vm21_vm0, %v386_v10, 0.0  ;;  %v392_v0 = vmul.f32 %v630_v62, %v630_v62 }
  0xdb   :  { %v300_v7 = vld [vmem:[#allocation2 + $0x48] sm:$0xff]  ;;  %333 = vst.msk [vmem:[%s772_s3 + $0x18] sm:$0xff] %vm21_vm0, %v317_v1  ;;  %v315_v9 = vadd.f32 %v607_v37, %v292_v5  ;;  %277 = vst.msk [vmem:[#allocation2 + $0x28] sm:$0xff] %vm21_vm0, %v260_v6  ;;  %v400_v23 = vsel %vm21_vm0, %v384_v8, 0.0  ;;  %v387_v24 = vmul.f32 %v317_v1, %v317_v1  ;;  %v352_v31 = vsel %vm21_vm0, %v317_v1, 0.0 }
  0xdc   :  { %v297_v11 = vld [vmem:[#allocation2 + $0x30] sm:$0xff]  ;;  %v654_v13 = vadd.f32 %v607_v37, %v300_v7  ;;  %341 = vst.msk [vmem:[%s772_s3 + $0x58] sm:$0xff] %vm21_vm0, %v651_v12  ;;  %285 = vst.msk [vmem:[#allocation2 + $0x68] sm:$0xff] %vm21_vm0, %v268_v14  ;;  %v362_v4 = vsel %vm21_vm0, %v630_v62, 0.0  ;;  %v394_v8 = vmul.f32 %v614_v50, %v614_v50  ;;  %v395_v62 = vmul.f32 %v651_v12, %v651_v12 }
  0xdd   :  { %331 = vst.msk [vmem:[%s772_s3 + $0x8] sm:$0xff] %vm21_vm0, %v315_v9  ;;  %v348_v16 = vsel %vm21_vm0, %v315_v9, 0.0  ;;  %v385_v17 = vmul.f32 %v315_v9, %v315_v9  ;;  %v320_v18 = vadd.f32 %v607_v37, %v297_v11  ;;  %v305_v22 = vld [vmem:[#allocation2 + $0x70] sm:$0xff]  ;;  %v405_v39 = vsel %vm21_vm0, %v387_v24, 0.0 }
  0xde   :  { %v349_v20 = vadd.f32 %v348_v16, %v347_v15  ;;  %v295_v21 = vld [vmem:[#allocation2 + $0x20] sm:$0xff]  ;;  %339 = vst.msk [vmem:[%s772_s3 + $0x48] sm:$0xff] %vm21_vm0, %v654_v13  ;;  %v689_v34 = vadd.f32 %v607_v37, %v305_v22  ;;  %v393_v5 = vmul.f32 %v654_v13, %v654_v13  ;;  %v415_v9 = vsel %vm21_vm0, %v392_v0, 0.0 }
  0xdf   :  { %v401_v25 = vsel %vm21_vm0, %v385_v17, 0.0  ;;  %336 = vst.msk [vmem:[%s772_s3 + $0x30] sm:$0xff] %vm21_vm0, %v320_v18  ;;  %v318_v26 = vadd.f32 %v607_v37, %v295_v21  ;;  %v303_v29 = vld [vmem:[#allocation2 + $0x60] sm:$0xff]  ;;  %v390_v53 = vmul.f32 %v320_v18, %v320_v18  ;;  %v364_v10 = vsel %vm21_vm0, %v654_v13, 0.0 }
  0xe0   :  { %v351_v27 = vadd.f32 %v350_v19, %v349_v20  ;;  %v402_v28 = vadd.f32 %v401_v25, %v400_v23  ;;  %v298_v33 = vld [vmem:[#allocation2 + $0x38] sm:$0xff]  ;;  %344 = vst.msk [vmem:[%s772_s3 + $0x70] sm:$0xff] %vm21_vm0, %v689_v34  ;;  %v326_v42 = vadd.f32 %v607_v37, %v303_v29  ;;  %v366_v15 = vsel %vm21_vm0, %v614_v50, 0.0 }
  0xe1   :  { %334 = vst.msk [vmem:[%s772_s3 + $0x20] sm:$0xff] %vm21_vm0, %v318_v26  ;;  %v388_v32 = vmul.f32 %v318_v26, %v318_v26  ;;  %v321_v38 = vadd.f32 %v607_v37, %v298_v33  ;;  %v354_v40 = vsel %vm21_vm0, %v318_v26, 0.0  ;;  %v306_v43 = vld [vmem:[#allocation2 + $0x78] sm:$0xff]  ;;  %v411_v61 = vsel %vm21_vm0, %v390_v53, 0.0 }
  0xe2   :  { %v404_v35 = vadd.f32 %v403_v30, %v402_v28  ;;  %v353_v36 = vadd.f32 %v352_v31, %v351_v27  ;;  %v296_v41 = vld [vmem:[#allocation2 + $0x28] sm:$0xff]  ;;  %342 = vst.msk [vmem:[%s772_s3 + $0x60] sm:$0xff] %vm21_vm0, %v326_v42  ;;  %v329_v51 = vadd.f32 %v607_v37, %v306_v43  ;;  %v417_v16 = vsel %vm21_vm0, %v393_v5, 0.0 }
  0xe3   :  { %337 = vst.msk [vmem:[%s772_s3 + $0x38] sm:$0xff] %vm21_vm0, %v321_v38  ;;  %v407_v46 = vsel %vm21_vm0, %v388_v32, 0.0  ;;  %v319_v47 = vadd.f32 %v607_v37, %v296_v41  ;;  %v304_v48 = vld [vmem:[#allocation2 + $0x68] sm:$0xff]  ;;  %v391_v57 = vmul.f32 %v321_v38, %v321_v38  ;;  %v360_v63 = vsel %vm21_vm0, %v321_v38, 0.0 }
  0xe4   :  { %v355_v44 = vadd.f32 %v354_v40, %v353_v36  ;;  %v406_v45 = vadd.f32 %v405_v39, %v404_v35  ;;  %v327_v52 = vadd.f32 %v607_v37, %v304_v48  ;;  %345 = vst.msk [vmem:[%s772_s3 + $0x78] sm:$0xff] %vm21_vm0, %v329_v51  ;;  %v358_v37 = vsel %vm21_vm0, %v320_v18, 0.0 }
  0xe5   :  { %335 = vst.msk [vmem:[%s772_s3 + $0x28] sm:$0xff] %vm21_vm0, %v319_v47  ;;  %v356_v54 = vsel %vm21_vm0, %v319_v47, 0.0  ;;  %v389_v55 = vmul.f32 %v319_v47, %v319_v47  ;;  %v413_v3 = vsel %vm21_vm0, %v391_v57, 0.0  ;;  %v419_v19 = vsel %vm21_vm0, %v394_v8, 0.0 }
  0xe6   :  { %v408_v49 = vadd.f32 %v407_v46, %v406_v45  ;;  %v357_v56 = vadd.f32 %v356_v54, %v355_v44  ;;  %343 = vst.msk [vmem:[%s772_s3 + $0x68] sm:$0xff] %vm21_vm0, %v327_v52  ;;  %v368_v20 = vsel %vm21_vm0, %v651_v12, 0.0  ;;  %v396_v21 = vmul.f32 %v326_v42, %v326_v42 }
  0xe7   :  { %v409_v58 = vsel %vm21_vm0, %v389_v55, 0.0  ;;  %v421_v23 = vsel %vm21_vm0, %v395_v62, 0.0  ;;  %v370_v24 = vsel %vm21_vm0, %v326_v42, 0.0  ;;  %v397_v50 = vmul.f32 %v327_v52, %v327_v52 }
  0xe8   :  { %v359_v59 = vadd.f32 %v358_v37, %v357_v56  ;;  %v410_v60 = vadd.f32 %v409_v58, %v408_v49  ;;  %v398_v27 = vmul.f32 %v689_v34, %v689_v34  ;;  %v423_v28 = vsel %vm21_vm0, %v396_v21, 0.0 }
  0xe9   :  { %v372_v29 = vsel %vm21_vm0, %v327_v52, 0.0  ;;  %v374_v12 = vsel %vm21_vm0, %v689_v34, 0.0  ;;  %v399_v32 = vmul.f32 %v329_v51, %v329_v51  ;;  %v425_v33 = vsel %vm21_vm0, %v397_v50, 0.0 }
  0xea   :  { %v412_v1 = vadd.f32 %v411_v61, %v410_v60  ;;  %v361_v2 = vadd.f32 %v360_v63, %v359_v59  ;;  %v427_v38 = vsel %vm21_vm0, %v398_v27, 0.0  ;;  %v376_v39 = vsel %vm21_vm0, %v329_v51, 0.0  ;;  %v346_v51 = vld [vmem:[%s770_s4] sm:$0x3] }
  0xeb   :  { %v429_v42 = vsel %vm21_vm0, %v399_v32, 0.0 }
  0xec   :  { %v363_v6 = vadd.f32 %v362_v4, %v361_v2  ;;  %v414_v7 = vadd.f32 %v413_v3, %v412_v1 }
  0xee   :  { %v365_v11 = vadd.f32 %v364_v10, %v363_v6  ;;  %v416_v14 = vadd.f32 %v415_v9, %v414_v7 }
  0xf0   :  { %v367_v17 = vadd.f32 %v366_v15, %v365_v11  ;;  %v418_v18 = vadd.f32 %v417_v16, %v416_v14 }
  0xf2   :  { %v420_v22 = vadd.f32 %v419_v19, %v418_v18  ;;  %v369_v13 = vadd.f32 %v368_v20, %v367_v17 }
  0xf4   :  { %v371_v25 = vadd.f32 %v370_v24, %v369_v13  ;;  %v422_v26 = vadd.f32 %v421_v23, %v420_v22 }
  0xf6   :  { %v424_v30 = vadd.f32 %v423_v28, %v422_v26  ;;  %v373_v31 = vadd.f32 %v372_v29, %v371_v25 }
  0xf8   :  { %v375_v35 = vadd.f32 %v374_v12, %v373_v31  ;;  %v426_v36 = vadd.f32 %v425_v33, %v424_v30 }
  0xfa   :  { %v377_v40 = vadd.f32 %v376_v39, %v375_v35  ;;  %v428_v41 = vadd.f32 %v427_v38, %v426_v36 }
  0xfc   :  { %v378_v43 = vrot.slane %v377_v40, 4  ;;  %v430_v44 = vadd.f32 %v429_v42, %v428_v41 }
  0xfe   :  { %v379_v45 = vadd.f32 %v378_v43, %v377_v40  ;;  %v431_v46 = vrot.slane %v430_v44, 4 }
 0x100   :  { %v380_v47 = vrot.slane %v379_v45, 2  ;;  %v432_v48 = vadd.f32 %v431_v46, %v430_v44 }
 0x102   :  { %v381_v34 = vadd.f32 %v380_v47, %v379_v45  ;;  %v433_v49 = vrot.slane %v432_v48, 2 }
 0x104   :  { %v382_v52 = vrot.slane %v381_v34, 1  ;;  %v434_v53 = vadd.f32 %v433_v49, %v432_v48 }
 0x106   :  { %v435_v54 = vrot.slane %v434_v53, 1  ;;  %v383_v55 = vadd.f32 %v382_v52, %v381_v34 }
 0x108   :  { %v436_v56 = vadd.f32 %v435_v54, %v434_v53 }
 0x10a   :  { %v438_v37 = vsel %vm437_vm3, %v383_v55, %v436_v56 }
 0x10b   :  { %v439_v57 = vadd.f32 %v438_v37, %v346_v51 }
 0x10d   :  { %441 = vst.msk [vmem:[%s770_s4] sm:$0x3] %vm43_vm2, %v439_v57 }

// kernel: local_enhancer_forward.42
= control target key start
LH: loop header
LB: loop body
LE: loop exit
PB: predicated region body
PF: predicated region fallthrough
CT: control target
= control target key end

     0   :  { %vm92_vm0 = vcmask 130048   ;;  %s271_s0 = inlined_call_operand.vmem [shape: f32[128,16], index: 0, kind: input, shape index: {}]   ;;  %s272_s1 = inlined_call_operand.vmem [shape: f32[1,16], index: 1, kind: input, shape index: {}]   ;;  %s273_s2 = inlined_call_operand.vmem [shape: f32[1,16], index: 2, kind: input, shape index: {}]   ;;  %s274_s3 = inlined_call_operand.vmem [shape: f32[128,16], index: 3, kind: output, shape index: {}]  }
   0x1   :  { %v14_v0 = vld [vmem:[%s271_s0] sm:$0xff]  ;;  %v15_v4 = vld [vmem:[%s271_s0 + $0x8] sm:$0xff]  ;;  %v16_v5 = vld [vmem:[%s271_s0 + $0x10] sm:$0xff] }
   0x2   :  { %v113_v1 = vld [vmem:[%s272_s1] ss:$0 sm:$0xff]  ;;  %v17_v6 = vld [vmem:[%s271_s0 + $0x18] sm:$0xff]  ;;  %v19_v11 = vld [vmem:[%s271_s0 + $0x28] sm:$0xff] }
   0x3   :  { %v144_v2 = vld [vmem:[%s273_s2] ss:$0 sm:$0xff]  ;;  %v37_v3 = vmul.f32 %v113_v1, %v14_v0  ;;  %v38_v7 = vmul.f32 %v113_v1, %v15_v4  ;;  %v39_v8 = vmul.f32 %v113_v1, %v16_v5  ;;  %v40_v9 = vmul.f32 %v113_v1, %v17_v6  ;;  %v20_v12 = vld [vmem:[%s271_s0 + $0x30] sm:$0xff]  ;;  %v21_v17 = vld [vmem:[%s271_s0 + $0x38] sm:$0xff] }
   0x4   :  { %v18_v10 = vld [vmem:[%s271_s0 + $0x20] sm:$0xff]  ;;  %v42_v15 = vmul.f32 %v113_v1, %v19_v11  ;;  %v43_v16 = vmul.f32 %v113_v1, %v20_v12  ;;  %v44_v21 = vmul.f32 %v113_v1, %v21_v17  ;;  %v23_v27 = vld [vmem:[%s271_s0 + $0x48] sm:$0xff]  ;;  %v24_v28 = vld [vmem:[%s271_s0 + $0x50] sm:$0xff] }
   0x5   :  { %v60_v13 = vadd.f32 %v144_v2, %v37_v3  ;;  %v41_v14 = vmul.f32 %v113_v1, %v18_v10  ;;  %v61_v18 = vadd.f32 %v144_v2, %v38_v7  ;;  %v62_v19 = vadd.f32 %v144_v2, %v39_v8  ;;  %v22_v22 = vld [vmem:[%s271_s0 + $0x40] sm:$0xff]  ;;  %v25_v29 = vld [vmem:[%s271_s0 + $0x58] sm:$0xff]  ;;  %v27_v35 = vld [vmem:[%s271_s0 + $0x68] sm:$0xff] }
   0x6   :  { %v63_v20 = vadd.f32 %v144_v2, %v40_v9  ;;  %v65_v25 = vadd.f32 %v144_v2, %v42_v15  ;;  %v66_v26 = vadd.f32 %v144_v2, %v43_v16  ;;  %v67_v33 = vadd.f32 %v144_v2, %v44_v21  ;;  %v26_v34 = vld [vmem:[%s271_s0 + $0x60] sm:$0xff]  ;;  %v28_v36 = vld [vmem:[%s271_s0 + $0x70] sm:$0xff]  ;;  %v29_v41 = vld [vmem:[%s271_s0 + $0x78] sm:$0xff] }
   0x7   :  { %v76_v23 = vmax.f32 %v60_v13, 0.0  ;;  %v64_v24 = vadd.f32 %v144_v2, %v41_v14  ;;  %v77_v30 = vmax.f32 %v61_v18, 0.0  ;;  %v78_v31 = vmax.f32 %v62_v19, 0.0 }
   0x8   :  { %v79_v32 = vmax.f32 %v63_v20, 0.0  ;;  %v81_v38 = vmax.f32 %v65_v25, 0.0  ;;  %v82_v39 = vmax.f32 %v66_v26, 0.0  ;;  %v45_v40 = vmul.f32 %v113_v1, %v22_v22 }
   0x9   :  { %93 = vst.msk [vmem:[%s274_s3] sm:$0xff] %vm92_vm0, %v76_v23  ;;  %v80_v37 = vmax.f32 %v64_v24, 0.0  ;;  %94 = vst.msk [vmem:[%s274_s3 + $0x8] sm:$0xff] %vm92_vm0, %v77_v30  ;;  %v83_v42 = vmax.f32 %v67_v33, 0.0  ;;  %v46_v43 = vmul.f32 %v113_v1, %v23_v27  ;;  %v47_v44 = vmul.f32 %v113_v1, %v24_v28 }
   0xa   :  { %95 = vst.msk [vmem:[%s274_s3 + $0x10] sm:$0xff] %vm92_vm0, %v78_v31  ;;  %96 = vst.msk [vmem:[%s274_s3 + $0x18] sm:$0xff] %vm92_vm0, %v79_v32  ;;  %v48_v45 = vmul.f32 %v113_v1, %v25_v29  ;;  %v68_v46 = vadd.f32 %v144_v2, %v45_v40  ;;  %v49_v47 = vmul.f32 %v113_v1, %v26_v34 }
   0xb   :  { %97 = vst.msk [vmem:[%s274_s3 + $0x20] sm:$0xff] %vm92_vm0, %v80_v37  ;;  %98 = vst.msk [vmem:[%s274_s3 + $0x28] sm:$0xff] %vm92_vm0, %v81_v38  ;;  %v50_v48 = vmul.f32 %v113_v1, %v27_v35  ;;  %v51_v49 = vmul.f32 %v113_v1, %v28_v36  ;;  %v69_v50 = vadd.f32 %v144_v2, %v46_v43 }
   0xc   :  { %99 = vst.msk [vmem:[%s274_s3 + $0x30] sm:$0xff] %vm92_vm0, %v82_v39  ;;  %100 = vst.msk [vmem:[%s274_s3 + $0x38] sm:$0xff] %vm92_vm0, %v83_v42  ;;  %v70_v51 = vadd.f32 %v144_v2, %v47_v44  ;;  %v71_v52 = vadd.f32 %v144_v2, %v48_v45  ;;  %v52_v53 = vmul.f32 %v113_v1, %v29_v41  ;;  %v84_v54 = vmax.f32 %v68_v46, 0.0 }
   0xd   :  { %v72_v55 = vadd.f32 %v144_v2, %v49_v47  ;;  %v73_v56 = vadd.f32 %v144_v2, %v50_v48  ;;  %v74_v57 = vadd.f32 %v144_v2, %v51_v49  ;;  %v85_v58 = vmax.f32 %v69_v50, 0.0 }
   0xe   :  { %v86_v59 = vmax.f32 %v70_v51, 0.0  ;;  %v87_v60 = vmax.f32 %v71_v52, 0.0  ;;  %v75_v61 = vadd.f32 %v144_v2, %v52_v53  ;;  %101 = vst.msk [vmem:[%s274_s3 + $0x40] sm:$0xff] %vm92_vm0, %v84_v54 }
   0xf   :  { %v88_v62 = vmax.f32 %v72_v55, 0.0  ;;  %v89_v63 = vmax.f32 %v73_v56, 0.0  ;;  %v90_v0 = vmax.f32 %v74_v57, 0.0  ;;  %102 = vst.msk [vmem:[%s274_s3 + $0x48] sm:$0xff] %vm92_vm0, %v85_v58 }
  0x10   :  { %103 = vst.msk [vmem:[%s274_s3 + $0x50] sm:$0xff] %vm92_vm0, %v86_v59  ;;  %104 = vst.msk [vmem:[%s274_s3 + $0x58] sm:$0xff] %vm92_vm0, %v87_v60  ;;  %v91_v1 = vmax.f32 %v75_v61, 0.0 }
  0x11   :  { %105 = vst.msk [vmem:[%s274_s3 + $0x60] sm:$0xff] %vm92_vm0, %v88_v62  ;;  %106 = vst.msk [vmem:[%s274_s3 + $0x68] sm:$0xff] %vm92_vm0, %v89_v63 }
  0x12   :  { %107 = vst.msk [vmem:[%s274_s3 + $0x70] sm:$0xff] %vm92_vm0, %v90_v0  ;;  %108 = vst.msk [vmem:[%s274_s3 + $0x78] sm:$0xff] %vm92_vm0, %v91_v1 }

// kernel: local_enhancer_forward.43
= control target key start
LH: loop header
LB: loop body
LE: loop exit
PB: predicated region body
PF: predicated region fallthrough
CT: control target
= control target key end

     0   :  { %v1765_v0 = vmov 0   ;;  %vm600_vm0 = vcmask 556032   ;;  %vm697_vm1 = vcmask 1041408   ;;  %vm19_vm2 = vcmask 23552   ;;  %s2602_s1 = inlined_call_operand.vmem [shape: bf16[196,3], index: 1, kind: input, shape index: {}]   ;;  %s2603_s0 = inlined_call_operand.vmem [shape: bf16[512,196], index: 0, kind: input, shape index: {}]   ;;  %s2604_s2 = inlined_call_operand.vmem [shape: f32[1,3], index: 2, kind: input, shape index: {}]   ;;  %s2605_s3 = inlined_call_operand.vmem [shape: f32[512,3], index: 3, kind: output, shape index: {}]  }
   0x1   :  { %701 = vmatprep.subr.bf16.mxu0 %v1765_v0  ;;  %1499 = vmatprep.subr.bf16.mxu1 %v1765_v0  ;;  %v1527_v1 = vld [vmem:[%s2602_s1 + $0x38] sm:$0xff]   ;;  %v1528_v2 = vld [vmem:[%s2602_s1 + $0x30] sm:$0xff]   ;;  %v1529_v3 = vld [vmem:[%s2602_s1 + $0x28] sm:$0xff]   ;;  %v1766_v17 = vmov 0.0  }
   0x2   :  { %702 = vmatpush1.bf16.msra.mxu0 %v1527_v1  ;;  %1512 = vmatpush1.bf16.msra.mxu1 %v1527_v1  ;;  %v1530_v4 = vld [vmem:[%s2602_s1 + $0x20] sm:$0xff]   ;;  %v1531_v6 = vld [vmem:[%s2602_s1 + $0x18] sm:$0xff]   ;;  %v1532_v8 = vld [vmem:[%s2602_s1 + $0x10] sm:$0xff]   ;;  %20 = vst.msk [vmem:[#allocation2] sm:$0xff] %vm19_vm2, %v1766_v17 }
   0x3   :  { %703 = vmatprep.subr.bf16.mxu0 %v1765_v0  ;;  %1500 = vmatprep.subr.bf16.mxu1 %v1765_v0  ;;  %v1542_v5 = vld [vmem:[%s2603_s0 + $0x4] ss:$8 sps:$4 sm:$0xff]   ;;  %v1535_v11 = vld [vmem:[%s2602_s1 + $0x60] ss:$0 sps:$4 sm:$0x33]   ;;  %v1536_v13 = vld [vmem:[%s2602_s1 + $0x58] sm:$0xff]  }
   0x4   :  { %v1545_v7 = vld [vmem:[%s2603_s0 + $0x104] ss:$8 sps:$4 sm:$0xff]   ;;  %1466 = vmatprep.mubr.msk.bf16.mxu0 %vm600_vm0, %v1542_v5  ;;  %v699_v12 = vsel %vm697_vm1, %v1535_v11, 0  ;;  %v1537_v14 = vld [vmem:[%s2602_s1 + $0x50] sm:$0xff]   ;;  %21 = vst.msk [vmem:[#allocation2 + $0x8] sm:$0xff] %vm19_vm2, %v1766_v17  ;;  %22 = vst.msk [vmem:[#allocation2 + $0x10] sm:$0xff] %vm19_vm2, %v1766_v17 }
   0x5   :  { %1482 = vmatprep.mubr.msk.bf16.mxu1 %vm600_vm0, %v1545_v7  ;;  %v1533_v9 = vld [vmem:[%s2602_s1 + $0x8] sm:$0xff]   ;;  %v1534_v10 = vld [vmem:[%s2602_s1] sm:$0xff]   ;;  %23 = vst.msk [vmem:[#allocation2 + $0x18] sm:$0xff] %vm19_vm2, %v1766_v17  ;;  %24 = vst.msk [vmem:[#allocation2 + $0x20] sm:$0xff] %vm19_vm2, %v1766_v17 }
   0x6   :  { %704 = vmatpush1.bf16.msra.mxu0 %v1528_v2  ;;  %1513 = vmatpush1.bf16.msra.mxu1 %v1528_v2  ;;  %v1538_v15 = vld [vmem:[%s2602_s1 + $0x48] sm:$0xff]   ;;  %v1858_v16 = vld [vmem:[%s2602_s1 + $0x40] sm:$0xff]   ;;  %25 = vst.msk [vmem:[#allocation2 + $0x28] sm:$0xff] %vm19_vm2, %v1766_v17  ;;  %26 = vst.msk [vmem:[#allocation2 + $0x30] sm:$0xff] %vm19_vm2, %v1766_v17 }
   0x7   :  { %705 = vmatprep.subr.bf16.mxu0 %v1765_v0  ;;  %1501 = vmatprep.subr.bf16.mxu1 %v1765_v0  ;;  %27 = vst.msk [vmem:[#allocation2 + $0x38] sm:$0xff] %vm19_vm2, %v1766_v17  ;;  %28 = vst.msk [vmem:[#allocation2 + $0x40] sm:$0xff] %vm19_vm2, %v1766_v17  ;;  %v1540_v18 = vld [vmem:[%s2603_s0] ss:$8 sps:$4 sm:$0xff]   ;;  %v1546_v20 = vld [vmem:[%s2603_s0 + $0x14] ss:$8 sps:$4 sm:$0xff]  }
   0x8   :  { %29 = vst.msk [vmem:[#allocation2 + $0x48] sm:$0xff] %vm19_vm2, %v1766_v17  ;;  %30 = vst.msk [vmem:[#allocation2 + $0x50] sm:$0xff] %vm19_vm2, %v1766_v17  ;;  %v1543_v19 = vld [vmem:[%s2603_s0 + $0x100] ss:$8 sps:$4 sm:$0xff]   ;;  %v1548_v21 = vld [vmem:[%s2603_s0 + $0x114] ss:$8 sps:$4 sm:$0xff]  }
   0x9   :  { %31 = vst.msk [vmem:[#allocation2 + $0x58] sm:$0xff] %vm19_vm2, %v1766_v17  ;;  %32 = vst.msk [vmem:[#allocation2 + $0x60] sm:$0xff] %vm19_vm2, %v1766_v17  ;;  %v1550_v22 = vld [vmem:[%s2603_s0 + $0x10] ss:$8 sps:$4 sm:$0xff]   ;;  %v1552_v24 = vld [vmem:[%s2603_s0 + $0x24] ss:$8 sps:$4 sm:$0xff]  }
   0xa   :  { %706 = vmatpush1.bf16.msra.mxu0 %v1529_v3  ;;  %1514 = vmatpush1.bf16.msra.mxu1 %v1529_v3  ;;  %33 = vst.msk [vmem:[#allocation2 + $0x68] sm:$0xff] %vm19_vm2, %v1766_v17  ;;  %34 = vst.msk [vmem:[#allocation2 + $0x70] sm:$0xff] %vm19_vm2, %v1766_v17  ;;  %v1551_v23 = vld [vmem:[%s2603_s0 + $0x110] ss:$8 sps:$4 sm:$0xff]   ;;  %v1554_v25 = vld [vmem:[%s2603_s0 + $0x124] ss:$8 sps:$4 sm:$0xff]  }
   0xb   :  { %707 = vmatprep.subr.bf16.mxu0 %v1765_v0  ;;  %1502 = vmatprep.subr.bf16.mxu1 %v1765_v0  ;;  %35 = vst.msk [vmem:[#allocation2 + $0x78] sm:$0xff] %vm19_vm2, %v1766_v17  ;;  %36 = vst.msk [vmem:[#allocation2 + $0x80] sm:$0xff] %vm19_vm2, %v1766_v17  ;;  %v1556_v26 = vld [vmem:[%s2603_s0 + $0x20] ss:$8 sps:$4 sm:$0xff]   ;;  %v1558_v28 = vld [vmem:[%s2603_s0 + $0x34] ss:$8 sps:$4 sm:$0xff]  }
   0xc   :  { %37 = vst.msk [vmem:[#allocation2 + $0x88] sm:$0xff] %vm19_vm2, %v1766_v17  ;;  %38 = vst.msk [vmem:[#allocation2 + $0x90] sm:$0xff] %vm19_vm2, %v1766_v17  ;;  %v1557_v27 = vld [vmem:[%s2603_s0 + $0x120] ss:$8 sps:$4 sm:$0xff]   ;;  %v1560_v29 = vld [vmem:[%s2603_s0 + $0x134] ss:$8 sps:$4 sm:$0xff]  }
   0xd   :  { %39 = vst.msk [vmem:[#allocation2 + $0x98] sm:$0xff] %vm19_vm2, %v1766_v17  ;;  %40 = vst.msk [vmem:[#allocation2 + $0xa0] sm:$0xff] %vm19_vm2, %v1766_v17  ;;  %v1562_v30 = vld [vmem:[%s2603_s0 + $0x30] ss:$8 sps:$4 sm:$0xff]   ;;  %v1564_v32 = vld [vmem:[%s2603_s0 + $0x44] ss:$8 sps:$4 sm:$0xff]  }
   0xe   :  { %708 = vmatpush1.bf16.msra.mxu0 %v1530_v4  ;;  %1515 = vmatpush1.bf16.msra.mxu1 %v1530_v4  ;;  %41 = vst.msk [vmem:[#allocation2 + $0xa8] sm:$0xff] %vm19_vm2, %v1766_v17  ;;  %42 = vst.msk [vmem:[#allocation2 + $0xb0] sm:$0xff] %vm19_vm2, %v1766_v17  ;;  %v1563_v31 = vld [vmem:[%s2603_s0 + $0x130] ss:$8 sps:$4 sm:$0xff]   ;;  %v1566_v33 = vld [vmem:[%s2603_s0 + $0x144] ss:$8 sps:$4 sm:$0xff]  }
   0xf   :  { %709 = vmatprep.subr.bf16.mxu0 %v1765_v0  ;;  %1503 = vmatprep.subr.bf16.mxu1 %v1765_v0  ;;  %43 = vst.msk [vmem:[#allocation2 + $0xb8] sm:$0xff] %vm19_vm2, %v1766_v17  ;;  %44 = vst.msk [vmem:[#allocation2 + $0xc0] sm:$0xff] %vm19_vm2, %v1766_v17  ;;  %v1568_v34 = vld [vmem:[%s2603_s0 + $0x40] ss:$8 sps:$4 sm:$0xff]   ;;  %v1570_v36 = vld [vmem:[%s2603_s0 + $0x54] ss:$8 sps:$4 sm:$0xff]  }
  0x10   :  { %45 = vst.msk [vmem:[#allocation2 + $0xc8] sm:$0xff] %vm19_vm2, %v1766_v17  ;;  %46 = vst.msk [vmem:[#allocation2 + $0xd0] sm:$0xff] %vm19_vm2, %v1766_v17  ;;  %v1569_v35 = vld [vmem:[%s2603_s0 + $0x140] ss:$8 sps:$4 sm:$0xff]   ;;  %v1572_v37 = vld [vmem:[%s2603_s0 + $0x154] ss:$8 sps:$4 sm:$0xff]  }
  0x11   :  { %47 = vst.msk [vmem:[#allocation2 + $0xd8] sm:$0xff] %vm19_vm2, %v1766_v17  ;;  %48 = vst.msk [vmem:[#allocation2 + $0xe0] sm:$0xff] %vm19_vm2, %v1766_v17  ;;  %v1574_v38 = vld [vmem:[%s2603_s0 + $0x50] ss:$8 sps:$4 sm:$0xff]   ;;  %v1576_v40 = vld [vmem:[%s2603_s0 + $0x64] ss:$8 sps:$4 sm:$0xff]  }
  0x12   :  { %710 = vmatpush1.bf16.msra.mxu0 %v1531_v6  ;;  %1516 = vmatpush1.bf16.msra.mxu1 %v1531_v6  ;;  %49 = vst.msk [vmem:[#allocation2 + $0xe8] sm:$0xff] %vm19_vm2, %v1766_v17  ;;  %50 = vst.msk [vmem:[#allocation2 + $0xf0] sm:$0xff] %vm19_vm2, %v1766_v17  ;;  %v1575_v39 = vld [vmem:[%s2603_s0 + $0x150] ss:$8 sps:$4 sm:$0xff]   ;;  %v1578_v41 = vld [vmem:[%s2603_s0 + $0x164] ss:$8 sps:$4 sm:$0xff]  }
  0x13   :  { %711 = vmatprep.subr.bf16.mxu0 %v1765_v0  ;;  %1504 = vmatprep.subr.bf16.mxu1 %v1765_v0  ;;  %51 = vst.msk [vmem:[#allocation2 + $0xf8] sm:$0xff] %vm19_vm2, %v1766_v17  ;;  %52 = vst.msk [vmem:[#allocation2 + $0x100] sm:$0xff] %vm19_vm2, %v1766_v17  ;;  %v1580_v42 = vld [vmem:[%s2603_s0 + $0x60] ss:$8 sps:$4 sm:$0xff]   ;;  %v1582_v44 = vld [vmem:[%s2603_s0 + $0x74] ss:$8 sps:$4 sm:$0xff]  }
  0x14   :  { %53 = vst.msk [vmem:[#allocation2 + $0x108] sm:$0xff] %vm19_vm2, %v1766_v17  ;;  %54 = vst.msk [vmem:[#allocation2 + $0x110] sm:$0xff] %vm19_vm2, %v1766_v17  ;;  %v1581_v43 = vld [vmem:[%s2603_s0 + $0x160] ss:$8 sps:$4 sm:$0xff]   ;;  %v1584_v45 = vld [vmem:[%s2603_s0 + $0x174] ss:$8 sps:$4 sm:$0xff]  }
  0x15   :  { %55 = vst.msk [vmem:[#allocation2 + $0x118] sm:$0xff] %vm19_vm2, %v1766_v17  ;;  %56 = vst.msk [vmem:[#allocation2 + $0x120] sm:$0xff] %vm19_vm2, %v1766_v17  ;;  %v1586_v46 = vld [vmem:[%s2603_s0 + $0x70] ss:$8 sps:$4 sm:$0xff]   ;;  %v1588_v48 = vld [vmem:[%s2603_s0 + $0x84] ss:$8 sps:$4 sm:$0xff]  }
  0x16   :  { %712 = vmatpush1.bf16.msra.mxu0 %v1532_v8  ;;  %1517 = vmatpush1.bf16.msra.mxu1 %v1532_v8  ;;  %57 = vst.msk [vmem:[#allocation2 + $0x128] sm:$0xff] %vm19_vm2, %v1766_v17  ;;  %58 = vst.msk [vmem:[#allocation2 + $0x130] sm:$0xff] %vm19_vm2, %v1766_v17  ;;  %v1587_v47 = vld [vmem:[%s2603_s0 + $0x170] ss:$8 sps:$4 sm:$0xff]   ;;  %v1590_v49 = vld [vmem:[%s2603_s0 + $0x184] ss:$8 sps:$4 sm:$0xff]  }
  0x17   :  { %713 = vmatprep.subr.bf16.mxu0 %v1765_v0  ;;  %1505 = vmatprep.subr.bf16.mxu1 %v1765_v0  ;;  %59 = vst.msk [vmem:[#allocation2 + $0x138] sm:$0xff] %vm19_vm2, %v1766_v17  ;;  %60 = vst.msk [vmem:[#allocation2 + $0x140] sm:$0xff] %vm19_vm2, %v1766_v17  ;;  %v1592_v50 = vld [vmem:[%s2603_s0 + $0x80] ss:$8 sps:$4 sm:$0xff]   ;;  %v1594_v52 = vld [vmem:[%s2603_s0 + $0x94] ss:$8 sps:$4 sm:$0xff]  }
  0x18   :  { %61 = vst.msk [vmem:[#allocation2 + $0x148] sm:$0xff] %vm19_vm2, %v1766_v17  ;;  %62 = vst.msk [vmem:[#allocation2 + $0x150] sm:$0xff] %vm19_vm2, %v1766_v17  ;;  %v1593_v51 = vld [vmem:[%s2603_s0 + $0x180] ss:$8 sps:$4 sm:$0xff]   ;;  %v1596_v53 = vld [vmem:[%s2603_s0 + $0x194] ss:$8 sps:$4 sm:$0xff]  }
  0x19   :  { %63 = vst.msk [vmem:[#allocation2 + $0x158] sm:$0xff] %vm19_vm2, %v1766_v17  ;;  %64 = vst.msk [vmem:[#allocation2 + $0x160] sm:$0xff] %vm19_vm2, %v1766_v17  ;;  %v1598_v54 = vld [vmem:[%s2603_s0 + $0x90] ss:$8 sps:$4 sm:$0xff]   ;;  %v1600_v56 = vld [vmem:[%s2603_s0 + $0xa4] ss:$8 sps:$4 sm:$0xff]  }
  0x1a   :  { %714 = vmatpush1.bf16.msra.mxu0 %v1533_v9  ;;  %1518 = vmatpush1.bf16.msra.mxu1 %v1533_v9  ;;  %65 = vst.msk [vmem:[#allocation2 + $0x168] sm:$0xff] %vm19_vm2, %v1766_v17  ;;  %66 = vst.msk [vmem:[#allocation2 + $0x170] sm:$0xff] %vm19_vm2, %v1766_v17  ;;  %v1599_v55 = vld [vmem:[%s2603_s0 + $0x190] ss:$8 sps:$4 sm:$0xff]   ;;  %v1602_v57 = vld [vmem:[%s2603_s0 + $0x1a4] ss:$8 sps:$4 sm:$0xff]  }
  0x1b   :  { %715 = vmatprep.subr.bf16.mxu0 %v1765_v0  ;;  %1506 = vmatprep.subr.bf16.mxu1 %v1765_v0  ;;  %67 = vst.msk [vmem:[#allocation2 + $0x178] sm:$0xff] %vm19_vm2, %v1766_v17  ;;  %68 = vst.msk [vmem:[#allocation2 + $0x180] sm:$0xff] %vm19_vm2, %v1766_v17  ;;  %v1604_v58 = vld [vmem:[%s2603_s0 + $0xa0] ss:$8 sps:$4 sm:$0xff]   ;;  %v1606_v60 = vld [vmem:[%s2603_s0 + $0xb4] ss:$8 sps:$4 sm:$0xff]  }
  0x1c   :  { %69 = vst.msk [vmem:[#allocation2 + $0x188] sm:$0xff] %vm19_vm2, %v1766_v17  ;;  %70 = vst.msk [vmem:[#allocation2 + $0x190] sm:$0xff] %vm19_vm2, %v1766_v17  ;;  %v1605_v59 = vld [vmem:[%s2603_s0 + $0x1a0] ss:$8 sps:$4 sm:$0xff]   ;;  %v1608_v61 = vld [vmem:[%s2603_s0 + $0x1b4] ss:$8 sps:$4 sm:$0xff]  }
  0x1d   :  { %71 = vst.msk [vmem:[#allocation2 + $0x198] sm:$0xff] %vm19_vm2, %v1766_v17  ;;  %72 = vst.msk [vmem:[#allocation2 + $0x1a0] sm:$0xff] %vm19_vm2, %v1766_v17  ;;  %v1610_v62 = vld [vmem:[%s2603_s0 + $0xb0] ss:$8 sps:$4 sm:$0xff]   ;;  %v1614_v1 = vld [vmem:[%s2603_s0 + $0x1c4] ss:$8 sps:$4 sm:$0xff]  }
  0x1e   :  { %716 = vmatpush1.bf16.msra.mxu0 %v1534_v10  ;;  %1519 = vmatpush1.bf16.msra.mxu1 %v1534_v10  ;;  %73 = vst.msk [vmem:[#allocation2 + $0x1a8] sm:$0xff] %vm19_vm2, %v1766_v17  ;;  %74 = vst.msk [vmem:[#allocation2 + $0x1b0] sm:$0xff] %vm19_vm2, %v1766_v17  ;;  %v1611_v63 = vld [vmem:[%s2603_s0 + $0x1b0] ss:$8 sps:$4 sm:$0xff]   ;;  %v1616_v2 = vld [vmem:[%s2603_s0 + $0xc0] ss:$8 sps:$4 sm:$0xff]  }
  0x1f   :  { %723 = vmatprep.subr.bf16.mxu0 %v1765_v0  ;;  %1507 = vmatprep.subr.bf16.mxu1 %v1765_v0  ;;  %75 = vst.msk [vmem:[#allocation2 + $0x1b8] sm:$0xff] %vm19_vm2, %v1766_v17  ;;  %76 = vst.msk [vmem:[#allocation2 + $0x1c0] sm:$0xff] %vm19_vm2, %v1766_v17  ;;  %v1617_v3 = vld [vmem:[%s2603_s0 + $0x1c0] ss:$8 sps:$4 sm:$0xff]   ;;  %v1618_v4 = vld [vmem:[%s2603_s0 + $0xd4] ss:$8 sps:$4 sm:$0xff]  }
  0x20   :  { %77 = vst.msk [vmem:[#allocation2 + $0x1c8] sm:$0xff] %vm19_vm2, %v1766_v17  ;;  %78 = vst.msk [vmem:[#allocation2 + $0x1d0] sm:$0xff] %vm19_vm2, %v1766_v17  ;;  %v1620_v5 = vld [vmem:[%s2603_s0 + $0x1d4] ss:$8 sps:$4 sm:$0xff]   ;;  %v1622_v6 = vld [vmem:[%s2603_s0 + $0xd0] ss:$8 sps:$4 sm:$0xff]  }
  0x21   :  { %79 = vst.msk [vmem:[#allocation2 + $0x1d8] sm:$0xff] %vm19_vm2, %v1766_v17  ;;  %80 = vst.msk [vmem:[#allocation2 + $0x1e0] sm:$0xff] %vm19_vm2, %v1766_v17  ;;  %v1623_v7 = vld [vmem:[%s2603_s0 + $0x1d0] ss:$8 sps:$4 sm:$0xff]   ;;  %v1624_v8 = vld [vmem:[%s2603_s0 + $0xe4] ss:$8 sps:$4 sm:$0xff]  }
  0x22   :  { %724 = vmatpush2.bf16.msra.mxu0 %v699_v12  ;;  %1520 = vmatpush2.bf16.msra.mxu1 %v699_v12  ;;  %81 = vst.msk [vmem:[#allocation2 + $0x1e8] sm:$0xff] %vm19_vm2, %v1766_v17  ;;  %82 = vst.msk [vmem:[#allocation2 + $0x1f0] sm:$0xff] %vm19_vm2, %v1766_v17  ;;  %v1626_v9 = vld [vmem:[%s2603_s0 + $0x1e4] ss:$8 sps:$4 sm:$0xff]   ;;  %v1628_v10 = vld [vmem:[%s2603_s0 + $0xe0] ss:$8 sps:$4 sm:$0xff]  }
  0x23   :  { %725 = vmatprep.subr.bf16.mxu0 %v1765_v0  ;;  %1508 = vmatprep.subr.bf16.mxu1 %v1765_v0  ;;  %83 = vst.msk [vmem:[#allocation2 + $0x1f8] sm:$0xff] %vm19_vm2, %v1766_v17  ;;  %v1629_v11 = vld [vmem:[%s2603_s0 + $0x1e0] ss:$8 sps:$4 sm:$0xff]   ;;  %v1630_v12 = vld [vmem:[%s2603_s0 + $0xf4] ss:$8 sps:$4 sm:$0xff]  }
  0x24   :  { %v116_v17 = vld [vmem:[#allocation2 + $0x100] sm:$0xff] }
  0x26   :  { %726 = vmatpush2.bf16.msra.mxu0 %v1536_v13  ;;  %1521 = vmatpush2.bf16.msra.mxu1 %v1536_v13  ;;  %v1632_v13 = vld [vmem:[%s2603_s0 + $0x1f4] ss:$8 sps:$4 sm:$0xff]  }
  0x27   :  { %727 = vmatprep.subr.bf16.mxu0 %v1765_v0  ;;  %1509 = vmatprep.subr.bf16.mxu1 %v1765_v0 }
  0x2a   :  { %728 = vmatpush2.bf16.msra.mxu0 %v1537_v14  ;;  %1522 = vmatpush2.bf16.msra.mxu1 %v1537_v14  ;;  %v1634_v14 = vld [vmem:[%s2603_s0 + $0xf0] ss:$8 sps:$4 sm:$0xff]  }
  0x2b   :  { %729 = vmatprep.subr.bf16.mxu0 %v1765_v0  ;;  %1510 = vmatprep.subr.bf16.mxu1 %v1765_v0 }
  0x2e   :  { %730 = vmatpush2.bf16.msra.mxu0 %v1538_v15  ;;  %1523 = vmatpush2.bf16.msra.mxu1 %v1538_v15  ;;  %v1635_v15 = vld [vmem:[%s2603_s0 + $0x1f0] ss:$8 sps:$4 sm:$0xff]  }
  0x2f   :  { %731 = vmatprep.subr.bf16.mxu0 %v1765_v0  ;;  %1511 = vmatprep.subr.bf16.mxu1 %v1765_v0  ;;  %v1612_v0 = vld [vmem:[%s2603_s0 + $0xc4] ss:$8 sps:$4 sm:$0xff]  }
  0x32   :  { %732 = vmatpush2.bf16.msra.mxu0 %v1858_v16  ;;  %1524 = vmatpush2.bf16.msra.mxu1 %v1858_v16  ;;  %v84_v16 = vld [vmem:[#allocation2] sm:$0xff] }
  0x35   :  { %734 = vmatmul.mubr.bf16.vlgmr.msra.gmra.mxu0 %v1540_v18  ;;  %862 = vmatmul.mubr.bf16.vlgmr.msra.gmra.mxu1 %v1543_v19 }
  0x36   :  { %1467 = vmatprep.mubr.msk.bf16.mxu0 %vm600_vm0, %v1546_v20  ;;  %1483 = vmatprep.mubr.msk.bf16.mxu1 %vm600_vm0, %v1548_v21 }
  0x3d   :  { %742 = vmatmul.mubr.bf16.gmra.mxu0 %v1550_v22  ;;  %870 = vmatmul.mubr.bf16.gmra.mxu1 %v1551_v23 }
  0x3e   :  { %1468 = vmatprep.mubr.msk.bf16.mxu0 %vm600_vm0, %v1552_v24  ;;  %1484 = vmatprep.mubr.msk.bf16.mxu1 %vm600_vm0, %v1554_v25  ;;  %v85_v24 = vld [vmem:[#allocation2 + $0x8] sm:$0xff] }
  0x3f   :  { %v117_v25 = vld [vmem:[#allocation2 + $0x108] sm:$0xff] }
  0x45   :  { %750 = vmatmul.mubr.bf16.gmra.mxu0 %v1556_v26  ;;  %878 = vmatmul.mubr.bf16.gmra.mxu1 %v1557_v27 }
  0x46   :  { %1469 = vmatprep.mubr.msk.bf16.mxu0 %vm600_vm0, %v1558_v28  ;;  %1485 = vmatprep.mubr.msk.bf16.mxu1 %vm600_vm0, %v1560_v29 }
  0x4d   :  { %758 = vmatmul.mubr.bf16.gmra.mxu0 %v1562_v30  ;;  %886 = vmatmul.mubr.bf16.gmra.mxu1 %v1563_v31 }
  0x4e   :  { %1470 = vmatprep.mubr.msk.bf16.mxu0 %vm600_vm0, %v1564_v32  ;;  %1486 = vmatprep.mubr.msk.bf16.mxu1 %vm600_vm0, %v1566_v33  ;;  %v86_v32 = vld [vmem:[#allocation2 + $0x10] sm:$0xff] }
  0x4f   :  { %v118_v33 = vld [vmem:[#allocation2 + $0x110] sm:$0xff] }
  0x55   :  { %766 = vmatmul.mubr.bf16.gmra.mxu0 %v1568_v34  ;;  %894 = vmatmul.mubr.bf16.gmra.mxu1 %v1569_v35  ;;  %v2215_v34 = vld [vmem:[%s2604_s2] ss:$0 sm:$0xff] }
  0x56   :  { %1471 = vmatprep.mubr.msk.bf16.mxu0 %vm600_vm0, %v1570_v36  ;;  %1487 = vmatprep.mubr.msk.bf16.mxu1 %vm600_vm0, %v1572_v37 }
  0x5d   :  { %774 = vmatmul.mubr.bf16.gmra.mxu0 %v1574_v38  ;;  %902 = vmatmul.mubr.bf16.gmra.mxu1 %v1575_v39  ;;  %v87_v39 = vld [vmem:[#allocation2 + $0x18] sm:$0xff] }
  0x5e   :  { %1472 = vmatprep.mubr.msk.bf16.mxu0 %vm600_vm0, %v1576_v40  ;;  %1488 = vmatprep.mubr.msk.bf16.mxu1 %vm600_vm0, %v1578_v41 }
  0x65   :  { %782 = vmatmul.mubr.bf16.gmra.mxu0 %v1580_v42  ;;  %910 = vmatmul.mubr.bf16.gmra.mxu1 %v1581_v43 }
  0x66   :  { %1473 = vmatprep.mubr.msk.bf16.mxu0 %vm600_vm0, %v1582_v44  ;;  %1489 = vmatprep.mubr.msk.bf16.mxu1 %vm600_vm0, %v1584_v45  ;;  %v119_v44 = vld [vmem:[#allocation2 + $0x118] sm:$0xff] }
  0x6d   :  { %790 = vmatmul.mubr.bf16.gmra.mxu0 %v1586_v46  ;;  %918 = vmatmul.mubr.bf16.gmra.mxu1 %v1587_v47 }
  0x6e   :  { %1474 = vmatprep.mubr.msk.bf16.mxu0 %vm600_vm0, %v1588_v48  ;;  %1490 = vmatprep.mubr.msk.bf16.mxu1 %vm600_vm0, %v1590_v49 }
  0x75   :  { %798 = vmatmul.mubr.bf16.gmra.mxu0 %v1592_v50  ;;  %926 = vmatmul.mubr.bf16.gmra.mxu1 %v1593_v51  ;;  %v88_v51 = vld [vmem:[#allocation2 + $0x20] sm:$0xff] }
  0x76   :  { %1475 = vmatprep.mubr.msk.bf16.mxu0 %vm600_vm0, %v1594_v52  ;;  %1491 = vmatprep.mubr.msk.bf16.mxu1 %vm600_vm0, %v1596_v53 }
  0x7d   :  { %806 = vmatmul.mubr.bf16.gmra.mxu0 %v1598_v54  ;;  %934 = vmatmul.mubr.bf16.gmra.mxu1 %v1599_v55 }
  0x7e   :  { %1476 = vmatprep.mubr.msk.bf16.mxu0 %vm600_vm0, %v1600_v56  ;;  %1492 = vmatprep.mubr.msk.bf16.mxu1 %vm600_vm0, %v1602_v57  ;;  %v120_v56 = vld [vmem:[#allocation2 + $0x120] sm:$0xff] }
  0x85   :  { %814 = vmatmul.mubr.bf16.gmra.mxu0 %v1604_v58  ;;  %942 = vmatmul.mubr.bf16.gmra.mxu1 %v1605_v59 }
  0x86   :  { %1477 = vmatprep.mubr.msk.bf16.mxu0 %vm600_vm0, %v1606_v60  ;;  %1493 = vmatprep.mubr.msk.bf16.mxu1 %vm600_vm0, %v1608_v61 }
  0x8d   :  { %822 = vmatmul.mubr.bf16.gmra.mxu0 %v1610_v62  ;;  %950 = vmatmul.mubr.bf16.gmra.mxu1 %v1611_v63  ;;  %v89_v63 = vld [vmem:[#allocation2 + $0x28] sm:$0xff] }
  0x8e   :  { %1478 = vmatprep.mubr.msk.bf16.mxu0 %vm600_vm0, %v1612_v0  ;;  %1494 = vmatprep.mubr.msk.bf16.mxu1 %vm600_vm0, %v1614_v1 }
  0x95   :  { %830 = vmatmul.mubr.bf16.gmra.mxu0 %v1616_v2  ;;  %958 = vmatmul.mubr.bf16.gmra.mxu1 %v1617_v3 }
  0x96   :  { %1479 = vmatprep.mubr.msk.bf16.mxu0 %vm600_vm0, %v1618_v4  ;;  %1495 = vmatprep.mubr.msk.bf16.mxu1 %vm600_vm0, %v1620_v5  ;;  %v121_v4 = vld [vmem:[#allocation2 + $0x128] sm:$0xff] }
  0x9d   :  { %838 = vmatmul.mubr.bf16.gmra.mxu0 %v1622_v6  ;;  %966 = vmatmul.mubr.bf16.gmra.mxu1 %v1623_v7 }
  0x9e   :  { %1480 = vmatprep.mubr.msk.bf16.mxu0 %vm600_vm0, %v1624_v8  ;;  %1496 = vmatprep.mubr.msk.bf16.mxu1 %vm600_vm0, %v1626_v9 }
  0xa5   :  { %846 = vmatmul.mubr.bf16.gmra.mxu0 %v1628_v10  ;;  %974 = vmatmul.mubr.bf16.gmra.mxu1 %v1629_v11  ;;  %v90_v11 = vld [vmem:[#allocation2 + $0x30] sm:$0xff] }
  0xa6   :  { %1481 = vmatprep.mubr.msk.bf16.mxu0 %vm600_vm0, %v1630_v12  ;;  %1497 = vmatprep.mubr.msk.bf16.mxu1 %vm600_vm0, %v1632_v13 }
  0xad   :  { %854 = vmatmul.mubr.bf16.gmra.mxu0 %v1634_v14  ;;  %982 = vmatmul.mubr.bf16.gmra.mxu1 %v1635_v15 }
  0xf5   :  { %v735_v18 = vpop.f32.mrf.mxu0  ;;  %v863_v19 = vpop.f32.mrf.mxu1 }
  0xf6   :  { %v990_v20 = vadd.f32 %v735_v18, %v84_v16  ;;  %v1022_v21 = vadd.f32 %v863_v19, %v116_v17  ;;  %v122_v16 = vld [vmem:[#allocation2 + $0x130] sm:$0xff] }
  0xf7   :  { %v737_v22 = vpop.f32.mrf.mxu0  ;;  %v865_v23 = vpop.f32.mrf.mxu1 }
  0xf8   :  { %1055 = vst.msk [vmem:[#allocation2] sm:$0xff] %vm19_vm2, %v990_v20  ;;  %1087 = vst.msk [vmem:[#allocation2 + $0x100] sm:$0xff] %vm19_vm2, %v1022_v21  ;;  %v91_v23 = vld [vmem:[#allocation2 + $0x38] sm:$0xff] }
  0xf9   :  { %v738_v26 = vpop.f32.mrf.mxu0  ;;  %v866_v27 = vpop.f32.mrf.mxu1 }
  0xfa   :  { %v991_v28 = vadd.f32 %v738_v26, %v85_v24  ;;  %v1023_v29 = vadd.f32 %v866_v27, %v117_v25 }
  0xfb   :  { %v740_v30 = vpop.f32.mrf.mxu0  ;;  %v868_v31 = vpop.f32.mrf.mxu1 }
  0xfc   :  { %1056 = vst.msk [vmem:[#allocation2 + $0x8] sm:$0xff] %vm19_vm2, %v991_v28  ;;  %1088 = vst.msk [vmem:[#allocation2 + $0x108] sm:$0xff] %vm19_vm2, %v1023_v29  ;;  %v123_v29 = vld [vmem:[#allocation2 + $0x138] sm:$0xff] }
  0xfd   :  { %v743_v35 = vpop.f32.mrf.mxu0  ;;  %v871_v36 = vpop.f32.mrf.mxu1 }
  0xfe   :  { %v992_v37 = vadd.f32 %v743_v35, %v86_v32  ;;  %v1024_v38 = vadd.f32 %v871_v36, %v118_v33 }
  0xff   :  { %v1122_v40 = vld [vmem:[#allocation2] sm:$0xff]  ;;  %v745_v42 = vpop.f32.mrf.mxu0  ;;  %v873_v43 = vpop.f32.mrf.mxu1 }
 0x100   :  { %v1154_v41 = vld [vmem:[#allocation2 + $0x100] sm:$0xff]  ;;  %v1193_v45 = vadd.f32 %v2215_v34, %v1122_v40  ;;  %1057 = vst.msk [vmem:[#allocation2 + $0x10] sm:$0xff] %vm19_vm2, %v992_v37  ;;  %1089 = vst.msk [vmem:[#allocation2 + $0x110] sm:$0xff] %vm19_vm2, %v1024_v38 }
 0x101   :  { %v1225_v46 = vadd.f32 %v2215_v34, %v1154_v41  ;;  %v746_v47 = vpop.f32.mrf.mxu0  ;;  %v874_v48 = vpop.f32.mrf.mxu1  ;;  %v92_v38 = vld [vmem:[#allocation2 + $0x40] sm:$0xff] }
 0x102   :  { %1636 = vtanh.f32 %v1193_v45  ;;  %v993_v49 = vadd.f32 %v746_v47, %v87_v39  ;;  %v1025_v50 = vadd.f32 %v874_v48, %v119_v44  ;;  %v124_v44 = vld [vmem:[#allocation2 + $0x140] sm:$0xff] }
 0x103   :  { %1638 = vtanh.f32 %v1225_v46  ;;  %v1123_v52 = vld [vmem:[#allocation2 + $0x8] sm:$0xff]  ;;  %v748_v54 = vpop.f32.mrf.mxu0  ;;  %v876_v55 = vpop.f32.mrf.mxu1 }
 0x104   :  { %v1155_v53 = vld [vmem:[#allocation2 + $0x108] sm:$0xff]  ;;  %v1194_v57 = vadd.f32 %v2215_v34, %v1123_v52  ;;  %1058 = vst.msk [vmem:[#allocation2 + $0x18] sm:$0xff] %vm19_vm2, %v993_v49  ;;  %1090 = vst.msk [vmem:[#allocation2 + $0x118] sm:$0xff] %vm19_vm2, %v1025_v50 }
 0x105   :  { %v1226_v58 = vadd.f32 %v2215_v34, %v1155_v53  ;;  %v751_v59 = vpop.f32.mrf.mxu0  ;;  %v879_v60 = vpop.f32.mrf.mxu1  ;;  %v93_v52 = vld [vmem:[#allocation2 + $0x48] sm:$0xff] }
 0x106   :  { %1640 = vtanh.f32 %v1194_v57  ;;  %v994_v61 = vadd.f32 %v751_v59, %v88_v51  ;;  %v1026_v62 = vadd.f32 %v879_v60, %v120_v56 }
 0x107   :  { %1642 = vtanh.f32 %v1226_v58  ;;  %v1124_v0 = vld [vmem:[#allocation2 + $0x10] sm:$0xff]  ;;  %v753_v2 = vpop.f32.mrf.mxu0  ;;  %v881_v3 = vpop.f32.mrf.mxu1  ;;  %v125_v58 = vld [vmem:[#allocation2 + $0x148] sm:$0xff] }
 0x108   :  { %v1156_v1 = vld [vmem:[#allocation2 + $0x110] sm:$0xff]  ;;  %v1195_v5 = vadd.f32 %v2215_v34, %v1124_v0  ;;  %1059 = vst.msk [vmem:[#allocation2 + $0x20] sm:$0xff] %vm19_vm2, %v994_v61  ;;  %1091 = vst.msk [vmem:[#allocation2 + $0x120] sm:$0xff] %vm19_vm2, %v1026_v62 }
 0x109   :  { %v1227_v6 = vadd.f32 %v2215_v34, %v1156_v1  ;;  %v754_v7 = vpop.f32.mrf.mxu0  ;;  %v882_v8 = vpop.f32.mrf.mxu1  ;;  %v94_v2 = vld [vmem:[#allocation2 + $0x50] sm:$0xff] }
 0x10a   :  { %1644 = vtanh.f32 %v1195_v5  ;;  %v995_v9 = vadd.f32 %v754_v7, %v89_v63  ;;  %v1027_v10 = vadd.f32 %v882_v8, %v121_v4  ;;  %v126_v8 = vld [vmem:[#allocation2 + $0x150] sm:$0xff] }
 0x10b   :  { %1646 = vtanh.f32 %v1227_v6  ;;  %v1125_v12 = vld [vmem:[#allocation2 + $0x18] sm:$0xff]  ;;  %v756_v14 = vpop.f32.mrf.mxu0  ;;  %v884_v15 = vpop.f32.mrf.mxu1 }
 0x10c   :  { %v1157_v13 = vld [vmem:[#allocation2 + $0x118] sm:$0xff]  ;;  %v1196_v17 = vadd.f32 %v2215_v34, %v1125_v12  ;;  %1060 = vst.msk [vmem:[#allocation2 + $0x28] sm:$0xff] %vm19_vm2, %v995_v9  ;;  %1092 = vst.msk [vmem:[#allocation2 + $0x128] sm:$0xff] %vm19_vm2, %v1027_v10 }
 0x10d   :  { %v1228_v18 = vadd.f32 %v2215_v34, %v1157_v13  ;;  %v759_v19 = vpop.f32.mrf.mxu0  ;;  %v887_v20 = vpop.f32.mrf.mxu1 }
 0x10e   :  { %1648 = vtanh.f32 %v1196_v17  ;;  %v996_v21 = vadd.f32 %v759_v19, %v90_v11  ;;  %v1028_v22 = vadd.f32 %v887_v20, %v122_v16  ;;  %v95_v16 = vld [vmem:[#allocation2 + $0x58] sm:$0xff] }
 0x10f   :  { %v1637_v24 = vpop.eup %1636  ;;  %1650 = vtanh.f32 %v1228_v18  ;;  %v1126_v25 = vld [vmem:[#allocation2 + $0x20] sm:$0xff]  ;;  %v761_v27 = vpop.f32.mrf.mxu0 }
 0x110   :  { %v1158_v26 = vld [vmem:[#allocation2 + $0x120] sm:$0xff]  ;;  %v889_v28 = vpop.f32.mrf.mxu1  ;;  %v1639_v30 = vpop.eup %1638  ;;  %1321 = vst.msk [vmem:[%s2605_s3] sm:$0xff] %vm19_vm2, %v1637_v24  ;;  %v1197_v31 = vadd.f32 %v2215_v34, %v1126_v25  ;;  %1061 = vst.msk [vmem:[#allocation2 + $0x30] sm:$0xff] %vm19_vm2, %v996_v21 }
 0x111   :  { %v1229_v32 = vadd.f32 %v2215_v34, %v1158_v26  ;;  %1093 = vst.msk [vmem:[#allocation2 + $0x130] sm:$0xff] %vm19_vm2, %v1028_v22  ;;  %1353 = vst.msk [vmem:[%s2605_s3 + $0x100] sm:$0xff] %vm19_vm2, %v1639_v30  ;;  %v762_v33 = vpop.f32.mrf.mxu0  ;;  %v127_v22 = vld [vmem:[#allocation2 + $0x158] sm:$0xff]  ;;  %v96_v30 = vld [vmem:[#allocation2 + $0x60] sm:$0xff] }
 0x112   :  { %v890_v35 = vpop.f32.mrf.mxu1  ;;  %1652 = vtanh.f32 %v1197_v31  ;;  %v997_v36 = vadd.f32 %v762_v33, %v91_v23 }
 0x113   :  { %v1029_v37 = vadd.f32 %v890_v35, %v123_v29  ;;  %v1641_v39 = vpop.eup %1640  ;;  %1654 = vtanh.f32 %v1229_v32  ;;  %v1127_v40 = vld [vmem:[#allocation2 + $0x28] sm:$0xff]  ;;  %v764_v42 = vpop.f32.mrf.mxu0 }
 0x114   :  { %v1159_v41 = vld [vmem:[#allocation2 + $0x128] sm:$0xff]  ;;  %v892_v43 = vpop.f32.mrf.mxu1  ;;  %v1643_v45 = vpop.eup %1642  ;;  %1322 = vst.msk [vmem:[%s2605_s3 + $0x8] sm:$0xff] %vm19_vm2, %v1641_v39  ;;  %v1198_v46 = vadd.f32 %v2215_v34, %v1127_v40  ;;  %1062 = vst.msk [vmem:[#allocation2 + $0x38] sm:$0xff] %vm19_vm2, %v997_v36 }
 0x115   :  { %v1230_v47 = vadd.f32 %v2215_v34, %v1159_v41  ;;  %1094 = vst.msk [vmem:[#allocation2 + $0x138] sm:$0xff] %vm19_vm2, %v1029_v37  ;;  %1354 = vst.msk [vmem:[%s2605_s3 + $0x108] sm:$0xff] %vm19_vm2, %v1643_v45  ;;  %v767_v48 = vpop.f32.mrf.mxu0  ;;  %v128_v37 = vld [vmem:[#allocation2 + $0x160] sm:$0xff]  ;;  %v97_v45 = vld [vmem:[#allocation2 + $0x68] sm:$0xff] }
 0x116   :  { %v895_v49 = vpop.f32.mrf.mxu1  ;;  %1656 = vtanh.f32 %v1198_v46  ;;  %v998_v50 = vadd.f32 %v767_v48, %v92_v38 }
 0x117   :  { %v1030_v51 = vadd.f32 %v895_v49, %v124_v44  ;;  %v1645_v53 = vpop.eup %1644  ;;  %1658 = vtanh.f32 %v1230_v47  ;;  %v1128_v54 = vld [vmem:[#allocation2 + $0x30] sm:$0xff]  ;;  %v769_v56 = vpop.f32.mrf.mxu0 }
 0x118   :  { %v1160_v55 = vld [vmem:[#allocation2 + $0x130] sm:$0xff]  ;;  %v897_v57 = vpop.f32.mrf.mxu1  ;;  %v1647_v59 = vpop.eup %1646  ;;  %1323 = vst.msk [vmem:[%s2605_s3 + $0x10] sm:$0xff] %vm19_vm2, %v1645_v53  ;;  %v1199_v60 = vadd.f32 %v2215_v34, %v1128_v54  ;;  %1063 = vst.msk [vmem:[#allocation2 + $0x40] sm:$0xff] %vm19_vm2, %v998_v50 }
 0x119   :  { %v1231_v61 = vadd.f32 %v2215_v34, %v1160_v55  ;;  %1095 = vst.msk [vmem:[#allocation2 + $0x140] sm:$0xff] %vm19_vm2, %v1030_v51  ;;  %1355 = vst.msk [vmem:[%s2605_s3 + $0x110] sm:$0xff] %vm19_vm2, %v1647_v59  ;;  %v770_v62 = vpop.f32.mrf.mxu0  ;;  %v129_v51 = vld [vmem:[#allocation2 + $0x168] sm:$0xff]  ;;  %v98_v59 = vld [vmem:[#allocation2 + $0x70] sm:$0xff] }
 0x11a   :  { %v898_v63 = vpop.f32.mrf.mxu1  ;;  %1660 = vtanh.f32 %v1199_v60  ;;  %v999_v0 = vadd.f32 %v770_v62, %v93_v52 }
 0x11b   :  { %v1031_v1 = vadd.f32 %v898_v63, %v125_v58  ;;  %v1649_v3 = vpop.eup %1648  ;;  %1662 = vtanh.f32 %v1231_v61  ;;  %v1129_v4 = vld [vmem:[#allocation2 + $0x38] sm:$0xff]  ;;  %v772_v6 = vpop.f32.mrf.mxu0 }
 0x11c   :  { %v1161_v5 = vld [vmem:[#allocation2 + $0x138] sm:$0xff]  ;;  %v900_v7 = vpop.f32.mrf.mxu1  ;;  %v1651_v9 = vpop.eup %1650  ;;  %1324 = vst.msk [vmem:[%s2605_s3 + $0x18] sm:$0xff] %vm19_vm2, %v1649_v3  ;;  %v1200_v10 = vadd.f32 %v2215_v34, %v1129_v4  ;;  %1064 = vst.msk [vmem:[#allocation2 + $0x48] sm:$0xff] %vm19_vm2, %v999_v0 }
 0x11d   :  { %v1232_v11 = vadd.f32 %v2215_v34, %v1161_v5  ;;  %1096 = vst.msk [vmem:[#allocation2 + $0x148] sm:$0xff] %vm19_vm2, %v1031_v1  ;;  %1356 = vst.msk [vmem:[%s2605_s3 + $0x118] sm:$0xff] %vm19_vm2, %v1651_v9  ;;  %v775_v12 = vpop.f32.mrf.mxu0  ;;  %v130_v1 = vld [vmem:[#allocation2 + $0x170] sm:$0xff]  ;;  %v99_v9 = vld [vmem:[#allocation2 + $0x78] sm:$0xff] }
 0x11e   :  { %v903_v13 = vpop.f32.mrf.mxu1  ;;  %1664 = vtanh.f32 %v1200_v10  ;;  %v1000_v14 = vadd.f32 %v775_v12, %v94_v2 }
 0x11f   :  { %v1032_v15 = vadd.f32 %v903_v13, %v126_v8  ;;  %v1653_v17 = vpop.eup %1652  ;;  %1666 = vtanh.f32 %v1232_v11  ;;  %v1130_v18 = vld [vmem:[#allocation2 + $0x40] sm:$0xff]  ;;  %v777_v20 = vpop.f32.mrf.mxu0 }
 0x120   :  { %v1162_v19 = vld [vmem:[#allocation2 + $0x140] sm:$0xff]  ;;  %v905_v21 = vpop.f32.mrf.mxu1  ;;  %v1655_v23 = vpop.eup %1654  ;;  %1325 = vst.msk [vmem:[%s2605_s3 + $0x20] sm:$0xff] %vm19_vm2, %v1653_v17  ;;  %v1201_v24 = vadd.f32 %v2215_v34, %v1130_v18  ;;  %1065 = vst.msk [vmem:[#allocation2 + $0x50] sm:$0xff] %vm19_vm2, %v1000_v14 }
 0x121   :  { %v1233_v25 = vadd.f32 %v2215_v34, %v1162_v19  ;;  %1097 = vst.msk [vmem:[#allocation2 + $0x150] sm:$0xff] %vm19_vm2, %v1032_v15  ;;  %1357 = vst.msk [vmem:[%s2605_s3 + $0x120] sm:$0xff] %vm19_vm2, %v1655_v23  ;;  %v778_v26 = vpop.f32.mrf.mxu0  ;;  %v131_v15 = vld [vmem:[#allocation2 + $0x178] sm:$0xff]  ;;  %v100_v23 = vld [vmem:[#allocation2 + $0x80] sm:$0xff] }
 0x122   :  { %v906_v27 = vpop.f32.mrf.mxu1  ;;  %1668 = vtanh.f32 %v1201_v24  ;;  %v1001_v28 = vadd.f32 %v778_v26, %v95_v16 }
 0x123   :  { %v1033_v29 = vadd.f32 %v906_v27, %v127_v22  ;;  %v1657_v31 = vpop.eup %1656  ;;  %1670 = vtanh.f32 %v1233_v25  ;;  %v1131_v32 = vld [vmem:[#allocation2 + $0x48] sm:$0xff]  ;;  %v780_v35 = vpop.f32.mrf.mxu0 }
 0x124   :  { %v1163_v33 = vld [vmem:[#allocation2 + $0x148] sm:$0xff]  ;;  %v908_v36 = vpop.f32.mrf.mxu1  ;;  %v1659_v38 = vpop.eup %1658  ;;  %1326 = vst.msk [vmem:[%s2605_s3 + $0x28] sm:$0xff] %vm19_vm2, %v1657_v31  ;;  %v1202_v39 = vadd.f32 %v2215_v34, %v1131_v32  ;;  %1066 = vst.msk [vmem:[#allocation2 + $0x58] sm:$0xff] %vm19_vm2, %v1001_v28 }
 0x125   :  { %v1234_v40 = vadd.f32 %v2215_v34, %v1163_v33  ;;  %1098 = vst.msk [vmem:[#allocation2 + $0x158] sm:$0xff] %vm19_vm2, %v1033_v29  ;;  %1358 = vst.msk [vmem:[%s2605_s3 + $0x128] sm:$0xff] %vm19_vm2, %v1659_v38  ;;  %v783_v41 = vpop.f32.mrf.mxu0  ;;  %v132_v29 = vld [vmem:[#allocation2 + $0x180] sm:$0xff]  ;;  %v101_v38 = vld [vmem:[#allocation2 + $0x88] sm:$0xff] }
 0x126   :  { %v911_v42 = vpop.f32.mrf.mxu1  ;;  %1672 = vtanh.f32 %v1202_v39  ;;  %v1002_v43 = vadd.f32 %v783_v41, %v96_v30 }
 0x127   :  { %v1034_v44 = vadd.f32 %v911_v42, %v128_v37  ;;  %v1661_v46 = vpop.eup %1660  ;;  %1674 = vtanh.f32 %v1234_v40  ;;  %v1132_v47 = vld [vmem:[#allocation2 + $0x50] sm:$0xff]  ;;  %v785_v49 = vpop.f32.mrf.mxu0 }
 0x128   :  { %v1164_v48 = vld [vmem:[#allocation2 + $0x150] sm:$0xff]  ;;  %v913_v50 = vpop.f32.mrf.mxu1  ;;  %v1663_v52 = vpop.eup %1662  ;;  %1327 = vst.msk [vmem:[%s2605_s3 + $0x30] sm:$0xff] %vm19_vm2, %v1661_v46  ;;  %v1203_v53 = vadd.f32 %v2215_v34, %v1132_v47  ;;  %1067 = vst.msk [vmem:[#allocation2 + $0x60] sm:$0xff] %vm19_vm2, %v1002_v43 }
 0x129   :  { %v1235_v54 = vadd.f32 %v2215_v34, %v1164_v48  ;;  %1099 = vst.msk [vmem:[#allocation2 + $0x160] sm:$0xff] %vm19_vm2, %v1034_v44  ;;  %1359 = vst.msk [vmem:[%s2605_s3 + $0x130] sm:$0xff] %vm19_vm2, %v1663_v52  ;;  %v786_v55 = vpop.f32.mrf.mxu0  ;;  %v133_v44 = vld [vmem:[#allocation2 + $0x188] sm:$0xff]  ;;  %v102_v52 = vld [vmem:[#allocation2 + $0x90] sm:$0xff] }
 0x12a   :  { %v914_v56 = vpop.f32.mrf.mxu1  ;;  %1676 = vtanh.f32 %v1203_v53  ;;  %v1003_v57 = vadd.f32 %v786_v55, %v97_v45 }
 0x12b   :  { %v1035_v58 = vadd.f32 %v914_v56, %v129_v51  ;;  %v1665_v60 = vpop.eup %1664  ;;  %1678 = vtanh.f32 %v1235_v54  ;;  %v1133_v61 = vld [vmem:[#allocation2 + $0x58] sm:$0xff]  ;;  %v788_v63 = vpop.f32.mrf.mxu0 }
 0x12c   :  { %v1165_v62 = vld [vmem:[#allocation2 + $0x158] sm:$0xff]  ;;  %v916_v0 = vpop.f32.mrf.mxu1  ;;  %v1667_v2 = vpop.eup %1666  ;;  %1328 = vst.msk [vmem:[%s2605_s3 + $0x38] sm:$0xff] %vm19_vm2, %v1665_v60  ;;  %v1204_v3 = vadd.f32 %v2215_v34, %v1133_v61  ;;  %1068 = vst.msk [vmem:[#allocation2 + $0x68] sm:$0xff] %vm19_vm2, %v1003_v57 }
 0x12d   :  { %v1236_v4 = vadd.f32 %v2215_v34, %v1165_v62  ;;  %1100 = vst.msk [vmem:[#allocation2 + $0x168] sm:$0xff] %vm19_vm2, %v1035_v58  ;;  %1360 = vst.msk [vmem:[%s2605_s3 + $0x138] sm:$0xff] %vm19_vm2, %v1667_v2  ;;  %v791_v5 = vpop.f32.mrf.mxu0  ;;  %v134_v58 = vld [vmem:[#allocation2 + $0x190] sm:$0xff]  ;;  %v103_v2 = vld [vmem:[#allocation2 + $0x98] sm:$0xff] }
 0x12e   :  { %v919_v6 = vpop.f32.mrf.mxu1  ;;  %1680 = vtanh.f32 %v1204_v3  ;;  %v1004_v7 = vadd.f32 %v791_v5, %v98_v59 }
 0x12f   :  { %v1036_v8 = vadd.f32 %v919_v6, %v130_v1  ;;  %v1669_v10 = vpop.eup %1668  ;;  %1682 = vtanh.f32 %v1236_v4  ;;  %v1134_v11 = vld [vmem:[#allocation2 + $0x60] sm:$0xff]  ;;  %v793_v13 = vpop.f32.mrf.mxu0 }
 0x130   :  { %v1166_v12 = vld [vmem:[#allocation2 + $0x160] sm:$0xff]  ;;  %v921_v14 = vpop.f32.mrf.mxu1  ;;  %v1671_v16 = vpop.eup %1670  ;;  %1329 = vst.msk [vmem:[%s2605_s3 + $0x40] sm:$0xff] %vm19_vm2, %v1669_v10  ;;  %v1205_v17 = vadd.f32 %v2215_v34, %v1134_v11  ;;  %1069 = vst.msk [vmem:[#allocation2 + $0x70] sm:$0xff] %vm19_vm2, %v1004_v7 }
 0x131   :  { %v1237_v18 = vadd.f32 %v2215_v34, %v1166_v12  ;;  %1101 = vst.msk [vmem:[#allocation2 + $0x170] sm:$0xff] %vm19_vm2, %v1036_v8  ;;  %1361 = vst.msk [vmem:[%s2605_s3 + $0x140] sm:$0xff] %vm19_vm2, %v1671_v16  ;;  %v794_v19 = vpop.f32.mrf.mxu0  ;;  %v135_v8 = vld [vmem:[#allocation2 + $0x198] sm:$0xff]  ;;  %v104_v16 = vld [vmem:[#allocation2 + $0xa0] sm:$0xff] }
 0x132   :  { %v922_v20 = vpop.f32.mrf.mxu1  ;;  %1684 = vtanh.f32 %v1205_v17  ;;  %v1005_v21 = vadd.f32 %v794_v19, %v99_v9 }
 0x133   :  { %v1037_v22 = vadd.f32 %v922_v20, %v131_v15  ;;  %v1673_v24 = vpop.eup %1672  ;;  %1686 = vtanh.f32 %v1237_v18  ;;  %v1135_v25 = vld [vmem:[#allocation2 + $0x68] sm:$0xff]  ;;  %v796_v27 = vpop.f32.mrf.mxu0 }
 0x134   :  { %v1167_v26 = vld [vmem:[#allocation2 + $0x168] sm:$0xff]  ;;  %v924_v28 = vpop.f32.mrf.mxu1  ;;  %v1675_v30 = vpop.eup %1674  ;;  %1330 = vst.msk [vmem:[%s2605_s3 + $0x48] sm:$0xff] %vm19_vm2, %v1673_v24  ;;  %v1206_v31 = vadd.f32 %v2215_v34, %v1135_v25  ;;  %1070 = vst.msk [vmem:[#allocation2 + $0x78] sm:$0xff] %vm19_vm2, %v1005_v21 }
 0x135   :  { %v1238_v32 = vadd.f32 %v2215_v34, %v1167_v26  ;;  %1102 = vst.msk [vmem:[#allocation2 + $0x178] sm:$0xff] %vm19_vm2, %v1037_v22  ;;  %1362 = vst.msk [vmem:[%s2605_s3 + $0x148] sm:$0xff] %vm19_vm2, %v1675_v30  ;;  %v799_v33 = vpop.f32.mrf.mxu0  ;;  %v136_v22 = vld [vmem:[#allocation2 + $0x1a0] sm:$0xff]  ;;  %v105_v30 = vld [vmem:[#allocation2 + $0xa8] sm:$0xff] }
 0x136   :  { %v927_v35 = vpop.f32.mrf.mxu1  ;;  %1688 = vtanh.f32 %v1206_v31  ;;  %v1006_v36 = vadd.f32 %v799_v33, %v100_v23 }
 0x137   :  { %v1038_v37 = vadd.f32 %v927_v35, %v132_v29  ;;  %v1677_v39 = vpop.eup %1676  ;;  %1690 = vtanh.f32 %v1238_v32  ;;  %v1136_v40 = vld [vmem:[#allocation2 + $0x70] sm:$0xff]  ;;  %v801_v42 = vpop.f32.mrf.mxu0 }
 0x138   :  { %v1168_v41 = vld [vmem:[#allocation2 + $0x170] sm:$0xff]  ;;  %v929_v43 = vpop.f32.mrf.mxu1  ;;  %v1679_v45 = vpop.eup %1678  ;;  %1331 = vst.msk [vmem:[%s2605_s3 + $0x50] sm:$0xff] %vm19_vm2, %v1677_v39  ;;  %v1207_v46 = vadd.f32 %v2215_v34, %v1136_v40  ;;  %1071 = vst.msk [vmem:[#allocation2 + $0x80] sm:$0xff] %vm19_vm2, %v1006_v36 }
 0x139   :  { %v1239_v47 = vadd.f32 %v2215_v34, %v1168_v41  ;;  %1103 = vst.msk [vmem:[#allocation2 + $0x180] sm:$0xff] %vm19_vm2, %v1038_v37  ;;  %1363 = vst.msk [vmem:[%s2605_s3 + $0x150] sm:$0xff] %vm19_vm2, %v1679_v45  ;;  %v802_v48 = vpop.f32.mrf.mxu0  ;;  %v137_v37 = vld [vmem:[#allocation2 + $0x1a8] sm:$0xff]  ;;  %v106_v45 = vld [vmem:[#allocation2 + $0xb0] sm:$0xff] }
 0x13a   :  { %v930_v49 = vpop.f32.mrf.mxu1  ;;  %1692 = vtanh.f32 %v1207_v46  ;;  %v1007_v50 = vadd.f32 %v802_v48, %v101_v38 }
 0x13b   :  { %v1039_v51 = vadd.f32 %v930_v49, %v133_v44  ;;  %v1681_v53 = vpop.eup %1680  ;;  %1694 = vtanh.f32 %v1239_v47  ;;  %v1137_v54 = vld [vmem:[#allocation2 + $0x78] sm:$0xff]  ;;  %v804_v56 = vpop.f32.mrf.mxu0 }
 0x13c   :  { %v1169_v55 = vld [vmem:[#allocation2 + $0x178] sm:$0xff]  ;;  %v932_v57 = vpop.f32.mrf.mxu1  ;;  %v1683_v59 = vpop.eup %1682  ;;  %1332 = vst.msk [vmem:[%s2605_s3 + $0x58] sm:$0xff] %vm19_vm2, %v1681_v53  ;;  %v1208_v60 = vadd.f32 %v2215_v34, %v1137_v54  ;;  %1072 = vst.msk [vmem:[#allocation2 + $0x88] sm:$0xff] %vm19_vm2, %v1007_v50 }
 0x13d   :  { %v1240_v61 = vadd.f32 %v2215_v34, %v1169_v55  ;;  %1104 = vst.msk [vmem:[#allocation2 + $0x188] sm:$0xff] %vm19_vm2, %v1039_v51  ;;  %1364 = vst.msk [vmem:[%s2605_s3 + $0x158] sm:$0xff] %vm19_vm2, %v1683_v59  ;;  %v807_v62 = vpop.f32.mrf.mxu0  ;;  %v138_v51 = vld [vmem:[#allocation2 + $0x1b0] sm:$0xff]  ;;  %v107_v59 = vld [vmem:[#allocation2 + $0xb8] sm:$0xff] }
 0x13e   :  { %v935_v63 = vpop.f32.mrf.mxu1  ;;  %1696 = vtanh.f32 %v1208_v60  ;;  %v1008_v0 = vadd.f32 %v807_v62, %v102_v52 }
 0x13f   :  { %v1040_v1 = vadd.f32 %v935_v63, %v134_v58  ;;  %v1685_v3 = vpop.eup %1684  ;;  %1698 = vtanh.f32 %v1240_v61  ;;  %v1138_v4 = vld [vmem:[#allocation2 + $0x80] sm:$0xff]  ;;  %v809_v6 = vpop.f32.mrf.mxu0 }
 0x140   :  { %v1170_v5 = vld [vmem:[#allocation2 + $0x180] sm:$0xff]  ;;  %v937_v7 = vpop.f32.mrf.mxu1  ;;  %v1687_v9 = vpop.eup %1686  ;;  %1333 = vst.msk [vmem:[%s2605_s3 + $0x60] sm:$0xff] %vm19_vm2, %v1685_v3  ;;  %v1209_v10 = vadd.f32 %v2215_v34, %v1138_v4  ;;  %1073 = vst.msk [vmem:[#allocation2 + $0x90] sm:$0xff] %vm19_vm2, %v1008_v0 }
 0x141   :  { %v1241_v11 = vadd.f32 %v2215_v34, %v1170_v5  ;;  %1105 = vst.msk [vmem:[#allocation2 + $0x190] sm:$0xff] %vm19_vm2, %v1040_v1  ;;  %1365 = vst.msk [vmem:[%s2605_s3 + $0x160] sm:$0xff] %vm19_vm2, %v1687_v9  ;;  %v810_v12 = vpop.f32.mrf.mxu0  ;;  %v139_v1 = vld [vmem:[#allocation2 + $0x1b8] sm:$0xff]  ;;  %v108_v9 = vld [vmem:[#allocation2 + $0xc0] sm:$0xff] }
 0x142   :  { %v938_v13 = vpop.f32.mrf.mxu1  ;;  %1700 = vtanh.f32 %v1209_v10  ;;  %v1009_v14 = vadd.f32 %v810_v12, %v103_v2 }
 0x143   :  { %v1041_v15 = vadd.f32 %v938_v13, %v135_v8  ;;  %v1689_v17 = vpop.eup %1688  ;;  %1702 = vtanh.f32 %v1241_v11  ;;  %v1139_v18 = vld [vmem:[#allocation2 + $0x88] sm:$0xff]  ;;  %v812_v20 = vpop.f32.mrf.mxu0 }
 0x144   :  { %v1171_v19 = vld [vmem:[#allocation2 + $0x188] sm:$0xff]  ;;  %v940_v21 = vpop.f32.mrf.mxu1  ;;  %v1691_v23 = vpop.eup %1690  ;;  %1334 = vst.msk [vmem:[%s2605_s3 + $0x68] sm:$0xff] %vm19_vm2, %v1689_v17  ;;  %v1210_v24 = vadd.f32 %v2215_v34, %v1139_v18  ;;  %1074 = vst.msk [vmem:[#allocation2 + $0x98] sm:$0xff] %vm19_vm2, %v1009_v14 }
 0x145   :  { %v1242_v25 = vadd.f32 %v2215_v34, %v1171_v19  ;;  %1106 = vst.msk [vmem:[#allocation2 + $0x198] sm:$0xff] %vm19_vm2, %v1041_v15  ;;  %1366 = vst.msk [vmem:[%s2605_s3 + $0x168] sm:$0xff] %vm19_vm2, %v1691_v23  ;;  %v815_v26 = vpop.f32.mrf.mxu0  ;;  %v140_v15 = vld [vmem:[#allocation2 + $0x1c0] sm:$0xff]  ;;  %v109_v23 = vld [vmem:[#allocation2 + $0xc8] sm:$0xff] }
 0x146   :  { %v943_v27 = vpop.f32.mrf.mxu1  ;;  %1704 = vtanh.f32 %v1210_v24  ;;  %v1010_v28 = vadd.f32 %v815_v26, %v104_v16 }
 0x147   :  { %v1042_v29 = vadd.f32 %v943_v27, %v136_v22  ;;  %v1693_v31 = vpop.eup %1692  ;;  %1706 = vtanh.f32 %v1242_v25  ;;  %v1140_v32 = vld [vmem:[#allocation2 + $0x90] sm:$0xff]  ;;  %v817_v35 = vpop.f32.mrf.mxu0 }
 0x148   :  { %v1172_v33 = vld [vmem:[#allocation2 + $0x190] sm:$0xff]  ;;  %v945_v36 = vpop.f32.mrf.mxu1  ;;  %v1695_v38 = vpop.eup %1694  ;;  %1335 = vst.msk [vmem:[%s2605_s3 + $0x70] sm:$0xff] %vm19_vm2, %v1693_v31  ;;  %v1211_v39 = vadd.f32 %v2215_v34, %v1140_v32  ;;  %1075 = vst.msk [vmem:[#allocation2 + $0xa0] sm:$0xff] %vm19_vm2, %v1010_v28 }
 0x149   :  { %v1243_v40 = vadd.f32 %v2215_v34, %v1172_v33  ;;  %1107 = vst.msk [vmem:[#allocation2 + $0x1a0] sm:$0xff] %vm19_vm2, %v1042_v29  ;;  %1367 = vst.msk [vmem:[%s2605_s3 + $0x170] sm:$0xff] %vm19_vm2, %v1695_v38  ;;  %v818_v41 = vpop.f32.mrf.mxu0  ;;  %v141_v29 = vld [vmem:[#allocation2 + $0x1c8] sm:$0xff]  ;;  %v110_v38 = vld [vmem:[#allocation2 + $0xd0] sm:$0xff] }
 0x14a   :  { %v946_v42 = vpop.f32.mrf.mxu1  ;;  %1708 = vtanh.f32 %v1211_v39  ;;  %v1011_v43 = vadd.f32 %v818_v41, %v105_v30 }
 0x14b   :  { %v1043_v44 = vadd.f32 %v946_v42, %v137_v37  ;;  %v1697_v46 = vpop.eup %1696  ;;  %1710 = vtanh.f32 %v1243_v40  ;;  %v1141_v47 = vld [vmem:[#allocation2 + $0x98] sm:$0xff]  ;;  %v820_v49 = vpop.f32.mrf.mxu0 }
 0x14c   :  { %v1173_v48 = vld [vmem:[#allocation2 + $0x198] sm:$0xff]  ;;  %v948_v50 = vpop.f32.mrf.mxu1  ;;  %v1699_v52 = vpop.eup %1698  ;;  %1336 = vst.msk [vmem:[%s2605_s3 + $0x78] sm:$0xff] %vm19_vm2, %v1697_v46  ;;  %v1212_v53 = vadd.f32 %v2215_v34, %v1141_v47  ;;  %1076 = vst.msk [vmem:[#allocation2 + $0xa8] sm:$0xff] %vm19_vm2, %v1011_v43 }
 0x14d   :  { %v1244_v54 = vadd.f32 %v2215_v34, %v1173_v48  ;;  %1108 = vst.msk [vmem:[#allocation2 + $0x1a8] sm:$0xff] %vm19_vm2, %v1043_v44  ;;  %1368 = vst.msk [vmem:[%s2605_s3 + $0x178] sm:$0xff] %vm19_vm2, %v1699_v52  ;;  %v823_v55 = vpop.f32.mrf.mxu0  ;;  %v142_v44 = vld [vmem:[#allocation2 + $0x1d0] sm:$0xff]  ;;  %v111_v52 = vld [vmem:[#allocation2 + $0xd8] sm:$0xff] }
 0x14e   :  { %v951_v56 = vpop.f32.mrf.mxu1  ;;  %1712 = vtanh.f32 %v1212_v53  ;;  %v1012_v57 = vadd.f32 %v823_v55, %v106_v45 }
 0x14f   :  { %v1044_v58 = vadd.f32 %v951_v56, %v138_v51  ;;  %v1701_v60 = vpop.eup %1700  ;;  %1714 = vtanh.f32 %v1244_v54  ;;  %v1142_v61 = vld [vmem:[#allocation2 + $0xa0] sm:$0xff]  ;;  %v825_v63 = vpop.f32.mrf.mxu0 }
 0x150   :  { %v1174_v62 = vld [vmem:[#allocation2 + $0x1a0] sm:$0xff]  ;;  %v953_v0 = vpop.f32.mrf.mxu1  ;;  %v1703_v2 = vpop.eup %1702  ;;  %1337 = vst.msk [vmem:[%s2605_s3 + $0x80] sm:$0xff] %vm19_vm2, %v1701_v60  ;;  %v1213_v3 = vadd.f32 %v2215_v34, %v1142_v61  ;;  %1077 = vst.msk [vmem:[#allocation2 + $0xb0] sm:$0xff] %vm19_vm2, %v1012_v57 }
 0x151   :  { %v1245_v4 = vadd.f32 %v2215_v34, %v1174_v62  ;;  %1109 = vst.msk [vmem:[#allocation2 + $0x1b0] sm:$0xff] %vm19_vm2, %v1044_v58  ;;  %1369 = vst.msk [vmem:[%s2605_s3 + $0x180] sm:$0xff] %vm19_vm2, %v1703_v2  ;;  %v826_v5 = vpop.f32.mrf.mxu0  ;;  %v143_v58 = vld [vmem:[#allocation2 + $0x1d8] sm:$0xff]  ;;  %v112_v2 = vld [vmem:[#allocation2 + $0xe0] sm:$0xff] }
 0x152   :  { %v954_v6 = vpop.f32.mrf.mxu1  ;;  %1716 = vtanh.f32 %v1213_v3  ;;  %v1013_v7 = vadd.f32 %v826_v5, %v107_v59 }
 0x153   :  { %v1045_v8 = vadd.f32 %v954_v6, %v139_v1  ;;  %v1705_v10 = vpop.eup %1704  ;;  %1718 = vtanh.f32 %v1245_v4  ;;  %v1143_v11 = vld [vmem:[#allocation2 + $0xa8] sm:$0xff]  ;;  %v828_v13 = vpop.f32.mrf.mxu0 }
 0x154   :  { %v1175_v12 = vld [vmem:[#allocation2 + $0x1a8] sm:$0xff]  ;;  %v956_v14 = vpop.f32.mrf.mxu1  ;;  %v1707_v16 = vpop.eup %1706  ;;  %1338 = vst.msk [vmem:[%s2605_s3 + $0x88] sm:$0xff] %vm19_vm2, %v1705_v10  ;;  %v1214_v17 = vadd.f32 %v2215_v34, %v1143_v11  ;;  %1078 = vst.msk [vmem:[#allocation2 + $0xb8] sm:$0xff] %vm19_vm2, %v1013_v7 }
 0x155   :  { %v1246_v18 = vadd.f32 %v2215_v34, %v1175_v12  ;;  %1110 = vst.msk [vmem:[#allocation2 + $0x1b8] sm:$0xff] %vm19_vm2, %v1045_v8  ;;  %1370 = vst.msk [vmem:[%s2605_s3 + $0x188] sm:$0xff] %vm19_vm2, %v1707_v16  ;;  %v831_v19 = vpop.f32.mrf.mxu0  ;;  %v144_v8 = vld [vmem:[#allocation2 + $0x1e0] sm:$0xff]  ;;  %v113_v16 = vld [vmem:[#allocation2 + $0xe8] sm:$0xff] }
 0x156   :  { %v959_v20 = vpop.f32.mrf.mxu1  ;;  %1720 = vtanh.f32 %v1214_v17  ;;  %v1014_v21 = vadd.f32 %v831_v19, %v108_v9 }
 0x157   :  { %v1046_v22 = vadd.f32 %v959_v20, %v140_v15  ;;  %v1709_v24 = vpop.eup %1708  ;;  %1722 = vtanh.f32 %v1246_v18  ;;  %v1144_v25 = vld [vmem:[#allocation2 + $0xb0] sm:$0xff]  ;;  %v833_v27 = vpop.f32.mrf.mxu0 }
 0x158   :  { %v1176_v26 = vld [vmem:[#allocation2 + $0x1b0] sm:$0xff]  ;;  %v961_v28 = vpop.f32.mrf.mxu1  ;;  %v1711_v30 = vpop.eup %1710  ;;  %1339 = vst.msk [vmem:[%s2605_s3 + $0x90] sm:$0xff] %vm19_vm2, %v1709_v24  ;;  %v1215_v31 = vadd.f32 %v2215_v34, %v1144_v25  ;;  %1079 = vst.msk [vmem:[#allocation2 + $0xc0] sm:$0xff] %vm19_vm2, %v1014_v21  ;;  %v145_v21 = vld [vmem:[#allocation2 + $0x1e8] sm:$0xff] }
 0x159   :  { %v1247_v32 = vadd.f32 %v2215_v34, %v1176_v26  ;;  %1111 = vst.msk [vmem:[#allocation2 + $0x1c0] sm:$0xff] %vm19_vm2, %v1046_v22  ;;  %1371 = vst.msk [vmem:[%s2605_s3 + $0x190] sm:$0xff] %vm19_vm2, %v1711_v30  ;;  %v834_v33 = vpop.f32.mrf.mxu0  ;;  %v114_v30 = vld [vmem:[#allocation2 + $0xf0] sm:$0xff] }
 0x15a   :  { %v962_v35 = vpop.f32.mrf.mxu1  ;;  %1724 = vtanh.f32 %v1215_v31  ;;  %v1015_v36 = vadd.f32 %v834_v33, %v109_v23  ;;  %v2504_v23 = vld [vmem:[%s2604_s2] ss:$0 sm:$0xff] }
 0x15b   :  { %v1047_v37 = vadd.f32 %v962_v35, %v141_v29  ;;  %v1713_v39 = vpop.eup %1712  ;;  %1726 = vtanh.f32 %v1247_v32  ;;  %v1145_v40 = vld [vmem:[#allocation2 + $0xb8] sm:$0xff]  ;;  %v836_v42 = vpop.f32.mrf.mxu0 }
 0x15c   :  { %v1177_v41 = vld [vmem:[#allocation2 + $0x1b8] sm:$0xff]  ;;  %v964_v43 = vpop.f32.mrf.mxu1  ;;  %v1715_v45 = vpop.eup %1714  ;;  %1340 = vst.msk [vmem:[%s2605_s3 + $0x98] sm:$0xff] %vm19_vm2, %v1713_v39  ;;  %v1216_v46 = vadd.f32 %v2215_v34, %v1145_v40  ;;  %1080 = vst.msk [vmem:[#allocation2 + $0xc8] sm:$0xff] %vm19_vm2, %v1015_v36 }
 0x15d   :  { %v1248_v47 = vadd.f32 %v2215_v34, %v1177_v41  ;;  %1112 = vst.msk [vmem:[#allocation2 + $0x1c8] sm:$0xff] %vm19_vm2, %v1047_v37  ;;  %1372 = vst.msk [vmem:[%s2605_s3 + $0x198] sm:$0xff] %vm19_vm2, %v1715_v45  ;;  %v839_v48 = vpop.f32.mrf.mxu0  ;;  %v146_v37 = vld [vmem:[#allocation2 + $0x1f0] sm:$0xff]  ;;  %v115_v45 = vld [vmem:[#allocation2 + $0xf8] sm:$0xff] }
 0x15e   :  { %v967_v49 = vpop.f32.mrf.mxu1  ;;  %1728 = vtanh.f32 %v1216_v46  ;;  %v1016_v50 = vadd.f32 %v839_v48, %v110_v38 }
 0x15f   :  { %v1048_v51 = vadd.f32 %v967_v49, %v142_v44  ;;  %v1717_v53 = vpop.eup %1716  ;;  %1730 = vtanh.f32 %v1248_v47  ;;  %v1146_v54 = vld [vmem:[#allocation2 + $0xc0] sm:$0xff]  ;;  %v841_v56 = vpop.f32.mrf.mxu0 }
 0x160   :  { %v1178_v55 = vld [vmem:[#allocation2 + $0x1c0] sm:$0xff]  ;;  %v969_v57 = vpop.f32.mrf.mxu1  ;;  %v1719_v59 = vpop.eup %1718  ;;  %1341 = vst.msk [vmem:[%s2605_s3 + $0xa0] sm:$0xff] %vm19_vm2, %v1717_v53  ;;  %v1217_v60 = vadd.f32 %v2215_v34, %v1146_v54  ;;  %1081 = vst.msk [vmem:[#allocation2 + $0xd0] sm:$0xff] %vm19_vm2, %v1016_v50 }
 0x161   :  { %v1249_v61 = vadd.f32 %v2215_v34, %v1178_v55  ;;  %1113 = vst.msk [vmem:[#allocation2 + $0x1d0] sm:$0xff] %vm19_vm2, %v1048_v51  ;;  %1373 = vst.msk [vmem:[%s2605_s3 + $0x1a0] sm:$0xff] %vm19_vm2, %v1719_v59  ;;  %v842_v62 = vpop.f32.mrf.mxu0  ;;  %v147_v51 = vld [vmem:[#allocation2 + $0x1f8] sm:$0xff] }
 0x162   :  { %v970_v63 = vpop.f32.mrf.mxu1  ;;  %1732 = vtanh.f32 %v1217_v60  ;;  %v1017_v0 = vadd.f32 %v842_v62, %v111_v52 }
 0x163   :  { %v1049_v1 = vadd.f32 %v970_v63, %v143_v58  ;;  %v1721_v3 = vpop.eup %1720  ;;  %1734 = vtanh.f32 %v1249_v61  ;;  %v1147_v4 = vld [vmem:[#allocation2 + $0xc8] sm:$0xff]  ;;  %v844_v6 = vpop.f32.mrf.mxu0 }
 0x164   :  { %v1179_v5 = vld [vmem:[#allocation2 + $0x1c8] sm:$0xff]  ;;  %v972_v7 = vpop.f32.mrf.mxu1  ;;  %v1723_v9 = vpop.eup %1722  ;;  %1342 = vst.msk [vmem:[%s2605_s3 + $0xa8] sm:$0xff] %vm19_vm2, %v1721_v3  ;;  %v1218_v10 = vadd.f32 %v2215_v34, %v1147_v4  ;;  %1082 = vst.msk [vmem:[#allocation2 + $0xd8] sm:$0xff] %vm19_vm2, %v1017_v0 }
 0x165   :  { %v1250_v11 = vadd.f32 %v2215_v34, %v1179_v5  ;;  %1114 = vst.msk [vmem:[#allocation2 + $0x1d8] sm:$0xff] %vm19_vm2, %v1049_v1  ;;  %1374 = vst.msk [vmem:[%s2605_s3 + $0x1a8] sm:$0xff] %vm19_vm2, %v1723_v9  ;;  %v847_v12 = vpop.f32.mrf.mxu0 }
 0x166   :  { %v975_v13 = vpop.f32.mrf.mxu1  ;;  %1736 = vtanh.f32 %v1218_v10  ;;  %v1018_v14 = vadd.f32 %v847_v12, %v112_v2 }
 0x167   :  { %v1050_v15 = vadd.f32 %v975_v13, %v144_v8  ;;  %v1725_v17 = vpop.eup %1724  ;;  %1738 = vtanh.f32 %v1250_v11  ;;  %v1148_v18 = vld [vmem:[#allocation2 + $0xd0] sm:$0xff]  ;;  %v849_v34 = vpop.f32.mrf.mxu0 }
 0x168   :  { %v1180_v19 = vld [vmem:[#allocation2 + $0x1d0] sm:$0xff]  ;;  %v977_v20 = vpop.f32.mrf.mxu1  ;;  %v1727_v22 = vpop.eup %1726  ;;  %1343 = vst.msk [vmem:[%s2605_s3 + $0xb0] sm:$0xff] %vm19_vm2, %v1725_v17  ;;  %v1219_v24 = vadd.f32 %v2504_v23, %v1148_v18  ;;  %1083 = vst.msk [vmem:[#allocation2 + $0xe0] sm:$0xff] %vm19_vm2, %v1018_v14 }
 0x169   :  { %v1251_v25 = vadd.f32 %v2504_v23, %v1180_v19  ;;  %1115 = vst.msk [vmem:[#allocation2 + $0x1e0] sm:$0xff] %vm19_vm2, %v1050_v15  ;;  %1375 = vst.msk [vmem:[%s2605_s3 + $0x1b0] sm:$0xff] %vm19_vm2, %v1727_v22  ;;  %v850_v26 = vpop.f32.mrf.mxu0 }
 0x16a   :  { %v978_v27 = vpop.f32.mrf.mxu1  ;;  %1740 = vtanh.f32 %v1219_v24  ;;  %v1019_v28 = vadd.f32 %v850_v26, %v113_v16 }
 0x16b   :  { %v1051_v29 = vadd.f32 %v978_v27, %v145_v21  ;;  %v1729_v31 = vpop.eup %1728  ;;  %1742 = vtanh.f32 %v1251_v25  ;;  %v1149_v32 = vld [vmem:[#allocation2 + $0xd8] sm:$0xff]  ;;  %v852_v35 = vpop.f32.mrf.mxu0 }
 0x16c   :  { %v1181_v33 = vld [vmem:[#allocation2 + $0x1d8] sm:$0xff]  ;;  %v980_v36 = vpop.f32.mrf.mxu1  ;;  %v1731_v38 = vpop.eup %1730  ;;  %1344 = vst.msk [vmem:[%s2605_s3 + $0xb8] sm:$0xff] %vm19_vm2, %v1729_v31  ;;  %v1220_v39 = vadd.f32 %v2504_v23, %v1149_v32  ;;  %1084 = vst.msk [vmem:[#allocation2 + $0xe8] sm:$0xff] %vm19_vm2, %v1019_v28 }
 0x16d   :  { %v1252_v40 = vadd.f32 %v2504_v23, %v1181_v33  ;;  %1116 = vst.msk [vmem:[#allocation2 + $0x1e8] sm:$0xff] %vm19_vm2, %v1051_v29  ;;  %1376 = vst.msk [vmem:[%s2605_s3 + $0x1b8] sm:$0xff] %vm19_vm2, %v1731_v38  ;;  %v855_v41 = vpop.f32.mrf.mxu0 }
 0x16e   :  { %v983_v42 = vpop.f32.mrf.mxu1  ;;  %1744 = vtanh.f32 %v1220_v39  ;;  %v1020_v43 = vadd.f32 %v855_v41, %v114_v30 }
 0x16f   :  { %v1052_v44 = vadd.f32 %v983_v42, %v146_v37  ;;  %v1733_v46 = vpop.eup %1732  ;;  %1746 = vtanh.f32 %v1252_v40  ;;  %v1150_v47 = vld [vmem:[#allocation2 + $0xe0] sm:$0xff]  ;;  %v857_v49 = vpop.f32.mrf.mxu0 }
 0x170   :  { %v1182_v48 = vld [vmem:[#allocation2 + $0x1e0] sm:$0xff]  ;;  %v985_v50 = vpop.f32.mrf.mxu1  ;;  %v1735_v52 = vpop.eup %1734  ;;  %1345 = vst.msk [vmem:[%s2605_s3 + $0xc0] sm:$0xff] %vm19_vm2, %v1733_v46  ;;  %v1221_v53 = vadd.f32 %v2504_v23, %v1150_v47  ;;  %1085 = vst.msk [vmem:[#allocation2 + $0xf0] sm:$0xff] %vm19_vm2, %v1020_v43 }
 0x171   :  { %v1253_v54 = vadd.f32 %v2504_v23, %v1182_v48  ;;  %1117 = vst.msk [vmem:[#allocation2 + $0x1f0] sm:$0xff] %vm19_vm2, %v1052_v44  ;;  %1377 = vst.msk [vmem:[%s2605_s3 + $0x1c0] sm:$0xff] %vm19_vm2, %v1735_v52  ;;  %v858_v55 = vpop.f32.mrf.mxu0 }
 0x172   :  { %v986_v56 = vpop.f32.mrf.mxu1  ;;  %1748 = vtanh.f32 %v1221_v53  ;;  %v1021_v57 = vadd.f32 %v858_v55, %v115_v45 }
 0x173   :  { %v1053_v58 = vadd.f32 %v986_v56, %v147_v51  ;;  %v1737_v59 = vpop.eup %1736  ;;  %1750 = vtanh.f32 %v1253_v54  ;;  %v1151_v60 = vld [vmem:[#allocation2 + $0xe8] sm:$0xff]  ;;  %v860_v62 = vpop.f32.mrf.mxu0 }
 0x174   :  { %v1183_v61 = vld [vmem:[#allocation2 + $0x1e8] sm:$0xff]  ;;  %v988_v63 = vpop.f32.mrf.mxu1  ;;  %v1739_v0 = vpop.eup %1738  ;;  %1346 = vst.msk [vmem:[%s2605_s3 + $0xc8] sm:$0xff] %vm19_vm2, %v1737_v59  ;;  %v1222_v1 = vadd.f32 %v2504_v23, %v1151_v60  ;;  %1086 = vst.msk [vmem:[#allocation2 + $0xf8] sm:$0xff] %vm19_vm2, %v1021_v57 }
 0x175   :  { %v1254_v2 = vadd.f32 %v2504_v23, %v1183_v61  ;;  %1118 = vst.msk [vmem:[#allocation2 + $0x1f8] sm:$0xff] %vm19_vm2, %v1053_v58  ;;  %1378 = vst.msk [vmem:[%s2605_s3 + $0x1c8] sm:$0xff] %vm19_vm2, %v1739_v0 }
 0x176   :  { %1752 = vtanh.f32 %v1222_v1 }
 0x177   :  { %v1741_v3 = vpop.eup %1740  ;;  %1754 = vtanh.f32 %v1254_v2  ;;  %v1152_v4 = vld [vmem:[#allocation2 + $0xf0] sm:$0xff] }
 0x178   :  { %v1184_v5 = vld [vmem:[#allocation2 + $0x1f0] sm:$0xff]  ;;  %v1743_v6 = vpop.eup %1742  ;;  %1347 = vst.msk [vmem:[%s2605_s3 + $0xd0] sm:$0xff] %vm19_vm2, %v1741_v3  ;;  %v1223_v7 = vadd.f32 %v2504_v23, %v1152_v4 }
 0x179   :  { %v1255_v8 = vadd.f32 %v2504_v23, %v1184_v5  ;;  %1379 = vst.msk [vmem:[%s2605_s3 + $0x1d0] sm:$0xff] %vm19_vm2, %v1743_v6 }
 0x17a   :  { %1756 = vtanh.f32 %v1223_v7 }
 0x17b   :  { %v1745_v9 = vpop.eup %1744  ;;  %1758 = vtanh.f32 %v1255_v8  ;;  %v1153_v10 = vld [vmem:[#allocation2 + $0xf8] sm:$0xff] }
 0x17c   :  { %v1185_v11 = vld [vmem:[#allocation2 + $0x1f8] sm:$0xff]  ;;  %v1747_v12 = vpop.eup %1746  ;;  %1348 = vst.msk [vmem:[%s2605_s3 + $0xd8] sm:$0xff] %vm19_vm2, %v1745_v9  ;;  %v1224_v13 = vadd.f32 %v2504_v23, %v1153_v10 }
 0x17d   :  { %v1256_v14 = vadd.f32 %v2504_v23, %v1185_v11  ;;  %1380 = vst.msk [vmem:[%s2605_s3 + $0x1d8] sm:$0xff] %vm19_vm2, %v1747_v12 }
 0x17e   :  { %1760 = vtanh.f32 %v1224_v13 }
 0x17f   :  { %v1749_v15 = vpop.eup %1748  ;;  %1762 = vtanh.f32 %v1256_v14 }
 0x180   :  { %v1751_v16 = vpop.eup %1750  ;;  %1349 = vst.msk [vmem:[%s2605_s3 + $0xe0] sm:$0xff] %vm19_vm2, %v1749_v15 }
 0x181   :  { %1381 = vst.msk [vmem:[%s2605_s3 + $0x1e0] sm:$0xff] %vm19_vm2, %v1751_v16 }
 0x183   :  { %v1753_v17 = vpop.eup %1752 }
 0x184   :  { %v1755_v18 = vpop.eup %1754  ;;  %1350 = vst.msk [vmem:[%s2605_s3 + $0xe8] sm:$0xff] %vm19_vm2, %v1753_v17 }
 0x185   :  { %1382 = vst.msk [vmem:[%s2605_s3 + $0x1e8] sm:$0xff] %vm19_vm2, %v1755_v18 }
 0x187   :  { %v1757_v19 = vpop.eup %1756 }
 0x188   :  { %v1759_v34 = vpop.eup %1758  ;;  %1351 = vst.msk [vmem:[%s2605_s3 + $0xf0] sm:$0xff] %vm19_vm2, %v1757_v19 }
 0x189   :  { %1383 = vst.msk [vmem:[%s2605_s3 + $0x1f0] sm:$0xff] %vm19_vm2, %v1759_v34 }
 0x18b   :  { %v1761_v20 = vpop.eup %1760 }
 0x18c   :  { %v1763_v21 = vpop.eup %1762  ;;  %1352 = vst.msk [vmem:[%s2605_s3 + $0xf8] sm:$0xff] %vm19_vm2, %v1761_v20 }
 0x18d   :  { %1384 = vst.msk [vmem:[%s2605_s3 + $0x1f8] sm:$0xff] %vm19_vm2, %v1763_v21 }

</bundles_post_ra>
